<compile_context>
chip_gen: v6e
topology: v6e:2x2x1
jax: 0.10.0
libtpu: 0.0.40
codegen_flags: <defaults>
</compile_context>

<pallas_src>
import functools

import numpy as np
import jax
import jax.numpy as jnp
from jax.experimental import pallas as pl
from jax.experimental.pallas import tpu as pltpu


# ----------------------------------------------------------------------------
# Deterministic parameter construction (librosa-style slaney mel filterbank,
# periodic hann window, real-DFT bases).  Pure numpy, no file / network access.
# ----------------------------------------------------------------------------
def _hz_to_mel(hz):
    hz = np.asarray(hz, dtype=np.float64)
    f_sp = 200.0 / 3.0
    min_log_hz = 1000.0
    min_log_mel = min_log_hz / f_sp
    logstep = np.log(6.4) / 27.0
    mel = hz / f_sp
    log_region = hz >= min_log_hz
    mel = np.where(log_region,
                   min_log_mel + np.log(np.maximum(hz, min_log_hz) / min_log_hz) / logstep,
                   mel)
    return mel


def _mel_to_hz(mel):
    mel = np.asarray(mel, dtype=np.float64)
    f_sp = 200.0 / 3.0
    min_log_hz = 1000.0
    min_log_mel = min_log_hz / f_sp
    logstep = np.log(6.4) / 27.0
    hz = f_sp * mel
    log_region = mel >= min_log_mel
    hz = np.where(log_region, min_log_hz * np.exp(logstep * (mel - min_log_mel)), hz)
    return hz


def librosa_mel_fn(sr, n_fft, n_mels, fmin, fmax):
    """Slaney-normalized triangular mel filterbank (librosa defaults)."""
    if fmax is None:
        fmax = sr / 2.0
    n_freq = n_fft // 2 + 1
    fftfreqs = np.linspace(0.0, sr / 2.0, n_freq)
    mel_pts = np.linspace(_hz_to_mel(fmin), _hz_to_mel(fmax), n_mels + 2)
    hz_pts = _mel_to_hz(mel_pts)

    fdiff = np.diff(hz_pts)
    ramps = hz_pts[:, None] - fftfreqs[None, :]

    weights = np.zeros((n_mels, n_freq), dtype=np.float64)
    for i in range(n_mels):
        lower = -ramps[i] / fdiff[i]
        upper = ramps[i + 2] / fdiff[i + 1]
        weights[i] = np.maximum(0.0, np.minimum(lower, upper))

    enorm = 2.0 / (hz_pts[2:n_mels + 2] - hz_pts[:n_mels])   # slaney norm
    weights *= enorm[:, None]
    return weights.astype(np.float32)


def hann_window(win_length):
    # torch.hann_window(periodic=True)
    n = np.arange(win_length, dtype=np.float64)
    return 0.5 - 0.5 * np.cos(2.0 * np.pi * n / win_length)


def dft_bases(n_fft):
    """real[k] = sum_n x[n] cos(2*pi*k*n/N);  imag[k] = -sum_n x[n] sin(...)."""
    n_freq = n_fft // 2 + 1
    n = np.arange(n_fft, dtype=np.float64)[:, None]
    k = np.arange(n_freq, dtype=np.float64)[None, :]
    ang = 2.0 * np.pi * n * k / n_fft
    return np.cos(ang), -np.sin(ang)          # each [n_fft, n_freq]


def _round_up(x, m):
    return ((x + m - 1) // m) * m


_HALO_ROWS = 8   # extra hop-rows fetched per frame tile (covers n_fft/hop - 1 <= 8)


# ----------------------------------------------------------------------------
# Pallas kernel: rebuild overlapping frames in VMEM -> one bf16 DFT matmul
# (window folded in, real|imag stacked on lanes) -> magnitude -> bf16 mel
# matmul -> log10(clamp) -> lane-dense store.
#   rows_ref  : [1, tt, hop]        bf16  hop-rows of the padded audio
#   halo_ref  : [1, 8, hop]         bf16  next 8 hop-rows (tile overlap)
#   basis_ref : [n_fft, 2*fk]       bf16  windowed cos | -sin DFT basis
#   mel_ref   : [fk, n_mel_lane]    bf16  transposed mel filterbank
#   out_ref   : [1, n_mel_sub, tt]  f32   log-mel tile (frames lane-dense)
# ----------------------------------------------------------------------------
def audio2mel_kernel(rows_ref, halo_ref, basis_ref, mel_ref, out_ref, *,
                     n_phases, fk, n_mel_sub, tt):
    main = rows_ref[0]                                   # [tt, hop]  bf16
    halo = halo_ref[0]                                   # [8,  hop]  bf16

    if n_phases > 1:
        # Frame u, sample (j*hop + m) == rows[u + j, m]  (requires hop | n_fft).
        # The j-row sublane shifts are done on an f32 copy (32-bit sublanes
        # shift natively); each shifted piece is cast back to bf16 for the MXU.
        rows32 = jnp.concatenate([main.astype(jnp.float32),
                                  halo.astype(jnp.float32)], axis=0)   # [tt+8, hop]
        pieces = [main] + [rows32[j:j + tt, :].astype(jnp.bfloat16)
                           for j in range(1, n_phases)]
        frames = jnp.concatenate(pieces, axis=1)         # [tt, n_fft] bf16
    else:
        frames = main                                    # hop == n_fft

    # One MXU matmul gives real (lanes [0, fk)) and imag (lanes [fk, 2fk)).
    ri = jnp.dot(frames, basis_ref[...],
                 preferred_element_type=jnp.float32)     # [tt, 2*fk]  f32
    real = ri[:, :fk]
    imag = ri[:, fk:]
    mag = jnp.sqrt(real * real + imag * imag)            # [tt, fk]    f32

    # Mel projection also on the MXU in bf16 (f32 accumulation).
    mel = jnp.dot(mag.astype(jnp.bfloat16), mel_ref[...],
                  preferred_element_type=jnp.float32)    # [tt, n_mel_lane] f32
    logmel = jnp.log10(jnp.maximum(mel, 1e-5))

    # Lane-dense store: transpose the aligned [tt, n_mel_lane] tile (XLU, hidden
    # under the MXU work) and keep the first n_mel_sub mel rows.
    out_ref[0] = logmel.T[:n_mel_sub, :]                 # [n_mel_sub, tt]


class Audio2Mel:
    def __init__(self, n_fft=1024, hop_length=256, win_length=1024,
                 sampling_rate=22050, n_mel_channels=80, mel_fmin=0.0, mel_fmax=None):
        assert win_length == n_fft, "kernel assumes win_length == n_fft (module default)"
        assert n_fft % hop_length == 0, "kernel uses hop-phase framing (hop must divide n_fft)"
        # TODO(synk): hop lengths that do not divide n_fft would need a gather-based
        # framing fallback; the module default (1024 / 256) is covered here.
        self.n_fft = n_fft
        self.hop_length = hop_length
        self.win_length = win_length
        self.sampling_rate = sampling_rate
        self.n_mel_channels = n_mel_channels
        self.n_phases = n_fft // hop_length
        assert self.n_phases - 1 <= _HALO_ROWS, "hop too small for the 8-row halo"

        n_freq = n_fft // 2 + 1
        self.n_freq = n_freq

        mel_basis = librosa_mel_fn(sampling_rate, n_fft, n_mel_channels, mel_fmin, mel_fmax)

        # Drop the Nyquist bin iff its mel weight is exactly zero (true for the
        # slaney filterbank whenever fmax <= sr/2, i.e. the module default) and
        # the remaining bin count is already lane aligned -> 1024x1024 basis.
        drop_nyquist = ((n_freq - 1) % 128 == 0
                        and bool(np.all(mel_basis[:, n_freq - 1] == 0.0)))
        keep = n_freq - 1 if drop_nyquist else n_freq
        fk = _round_up(keep, 128)
        self.keep = keep
        self.fk = fk

        win = hann_window(win_length)                    # [n_fft]
        cos_b, sin_b = dft_bases(n_fft)                  # [n_fft, n_freq] each
        wcos = cos_b * win[:, None]
        wsin = sin_b * win[:, None]

        basis_t = np.zeros((n_fft, 2 * fk), dtype=np.float32)
        basis_t[:, :keep] = wcos[:, :keep]
        basis_t[:, fk:fk + keep] = wsin[:, :keep]
        self.basis_t_bf16 = jnp.asarray(basis_t, dtype=jnp.bfloat16)   # [n_fft, 2*fk]

        self.n_mel_sub = _round_up(n_mel_channels, 8)     # stored rows (sublane aligned)
        self.n_mel_lane = _round_up(n_mel_channels, 128)  # matmul / transpose width
        mel_t = np.zeros((fk, self.n_mel_lane), dtype=np.float32)
        mel_t[:keep, :n_mel_channels] = mel_basis[:, :keep].T
        self.mel_t_bf16 = jnp.asarray(mel_t, dtype=jnp.bfloat16)       # [fk, n_mel_lane]

        # f32 copies for the pure-JAX reference.
        self.window_f32 = jnp.asarray(win.astype(np.float32))          # [n_fft]
        self.cos_basis = jnp.asarray(cos_b.astype(np.float32))         # [n_fft, n_freq]
        self.sin_basis = jnp.asarray(sin_b.astype(np.float32))         # [n_fft, n_freq]
        self.mel_basis_f32 = jnp.asarray(mel_basis)                    # [n_mel, n_freq]

    # ---------------- Pallas forward ----------------------------------------
    def __call__(self, audio, *, max_frame_tile=512):
        """audio [B, 1, L] float32 -> log-mel [B, n_mel, T] float32."""
        B = audio.shape[0]
        n_fft, hop = self.n_fft, self.hop_length
        max_frame_tile = _round_up(max(max_frame_tile, 128), 128)

        # Reflect pad, then cast to bf16 BEFORE any expansion: the kernel (and
        # all HBM traffic after this point) only ever sees bf16 audio rows.
        p = (n_fft - hop) // 2
        x = jnp.pad(audio, ((0, 0), (0, 0), (p, p)), mode="reflect")[:, 0, :]  # [B, Lp]
        x = x.astype(jnp.bfloat16)
        Lp = x.shape[1]
        T = 1 + (Lp - n_fft) // hop

        # Frame-axis tiling: lane-dense 128-multiples; 512-wide tiles for long
        # clips (keeps the MXU fed, ~11 MiB VMEM, and num_t >= 2 for typical
        # clips so v7x megacore still gets a parallel split on the t axis).
        if T >= max_frame_tile:
            tt = max_frame_tile
        else:
            tt = _round_up(max(T, 1), 128)
        num_t = -(-T // tt)
        T_pad = num_t * tt

        # Non-overlapping hop-rows + zero tail (padded rows only ever feed
        # frames >= T, which are cropped below).
        R_pad = T_pad + _HALO_ROWS
        total = R_pad * hop
        x = jnp.pad(x, ((0, 0), (0, max(total - Lp, 0))))[:, :total]
        rows = x.reshape(B, R_pad, hop)                   # [B, R_pad, hop] bf16

        fk = self.fk
        n_mel_sub = self.n_mel_sub
        n_mel_lane = self.n_mel_lane
        kernel = functools.partial(audio2mel_kernel, n_phases=self.n_phases,
                                   fk=fk, n_mel_sub=n_mel_sub, tt=tt)

        out = pl.pallas_call(
            kernel,
            out_shape=jax.ShapeDtypeStruct((B, n_mel_sub, T_pad), jnp.float32),
            grid_spec=pltpu.PrefetchScalarGridSpec(
                num_scalar_prefetch=0,
                grid=(B, num_t),
                in_specs=[
                    # tt hop-rows of this frame tile
                    pl.BlockSpec((1, tt, hop), lambda b, t: (b, t, 0)),
                    # the next 8 hop-rows (same array, shifted index) = tile halo
                    pl.BlockSpec((1, _HALO_ROWS, hop),
                                 lambda b, t: (b, (t + 1) * (tt // _HALO_ROWS), 0)),
                    # constant operands: block index never changes -> DMA'd once
                    pl.BlockSpec((n_fft, 2 * fk), lambda b, t: (0, 0)),
                    pl.BlockSpec((fk, n_mel_lane), lambda b, t: (0, 0)),
                ],
                out_specs=pl.BlockSpec((1, n_mel_sub, tt), lambda b, t: (b, 0, t)),
            ),
            compiler_params=pltpu.CompilerParams(
                dimension_semantics=("parallel", "parallel"),
                vmem_limit_bytes=32 * 1024 * 1024,   # also safe on v7x's 64 MiB VMEM
            ),
        )(rows, rows, self.basis_t_bf16, self.mel_t_bf16)

        # Strip mel/frame padding; kernel output is already [B, n_mel_pad, T_pad].
        return out[:, :self.n_mel_channels, :T]

    # ---------------- pure-JAX f32 reference --------------------------------
    def reference(self, audio):
        p = (self.n_fft - self.hop_length) // 2
        x = jnp.pad(audio, ((0, 0), (0, 0), (p, p)), mode="reflect")[:, 0, :]
        T = 1 + (x.shape[1] - self.n_fft) // self.hop_length
        idx = (jnp.arange(T)[:, None] * self.hop_length
               + jnp.arange(self.n_fft)[None, :])                      # [T, n_fft]
        frames = x[:, idx]                                             # [B, T, n_fft]
        xw = frames * self.window_f32[None, None, :]
        real = jnp.einsum("btn,nf->bft", xw, self.cos_basis)
        imag = jnp.einsum("btn,nf->bft", xw, self.sin_basis)
        mag = jnp.sqrt(real * real + imag * imag)                      # [B, F, T]
        mel = jnp.einsum("mf,bft->bmt", self.mel_basis_f32, mag)       # [B, n_mel, T]
        return jnp.log10(jnp.maximum(mel, 1e-5))


if __name__ == "__main__":
    a2m = Audio2Mel()        # module defaults: n_fft=1024, hop=256, n_mel=80

    key = jax.random.PRNGKey(0)
    k1, k2 = jax.random.split(key)

    # Case 1: small clip -> single frame tile (T=16, padded to one 128-wide tile).
    B, L = 2, 4096
    audio = jax.random.normal(k1, (B, 1, L), dtype=jnp.float32) * 0.1
    out = jax.block_until_ready(a2m(audio))
    ref = jax.block_until_ready(a2m.reference(audio))
    T = 1 + (L + 2 * ((a2m.n_fft - a2m.hop_length) // 2) - a2m.n_fft) // a2m.hop_length
    assert out.shape == ref.shape == (B, a2m.n_mel_channels, T), (out.shape, ref.shape)
    np.testing.assert_allclose(np.asarray(out), np.asarray(ref), rtol=5e-2, atol=5e-2)

    # Case 2: longer clip with a small tile so multiple grid tiles (and the
    # overlapping-row halo at the tile boundary) are exercised.
    B2, L2 = 2, 34000        # T = 132 -> two 128-frame tiles
    audio2 = jax.random.normal(k2, (B2, 1, L2), dtype=jnp.float32) * 0.1
    out2 = jax.block_until_ready(a2m(audio2, max_frame_tile=128))
    ref2 = jax.block_until_ready(a2m.reference(audio2))
    assert out2.shape == ref2.shape
    np.testing.assert_allclose(np.asarray(out2), np.asarray(ref2), rtol=5e-2, atol=5e-2)

    print("KERNEL_OK")
</pallas_src>

<mosaic_0001>
module attributes {stable_mosaic.version = 11 : i64} {
  func.func @audio2mel_kernel(%arg0: i32, %arg1: i32, %arg2: memref<1x128x256xbf16, #tpu.memory_space<vmem>>, %arg3: memref<1x8x256xbf16, #tpu.memory_space<vmem>>, %arg4: memref<1024x1024xbf16, #tpu.memory_space<vmem>>, %arg5: memref<512x128xbf16, #tpu.memory_space<vmem>>, %arg6: memref<1x80x128xf32, #tpu.memory_space<vmem>>) attributes {dimension_semantics = [#tpu.dimension_semantics<parallel>, #tpu.dimension_semantics<parallel>], iteration_bounds = array<i64: 2, 1>, scalar_prefetch = 0 : i64, scratch_operands = 0 : i64, tpu.core_type = #tpu.core_type<tc>, window_params = [{transform_indices = @transform_0, window_bounds = array<i64: 1, 128, 256>}, {transform_indices = @transform_1, window_bounds = array<i64: 1, 8, 256>}, {pipeline_mode = #tpu.pipeline_mode<synchronous>, transform_indices = @transform_2, window_bounds = array<i64: 1024, 1024>}, {pipeline_mode = #tpu.pipeline_mode<synchronous>, transform_indices = @transform_3, window_bounds = array<i64: 512, 128>}, {transform_indices = @transform_4, window_bounds = array<i64: 1, 80, 128>}]} {
    %c0 = arith.constant 0 : index
    %c0_0 = arith.constant 0 : index
    %c0_1 = arith.constant 0 : index
    %0 = vector.load %arg2[%c0, %c0_0, %c0_1] : memref<1x128x256xbf16, #tpu.memory_space<vmem>>, vector<1x128x256xbf16>
    %1 = vector.shape_cast %0 : vector<1x128x256xbf16> to vector<128x256xbf16>
    %c0_2 = arith.constant 0 : index
    %c0_3 = arith.constant 0 : index
    %c0_4 = arith.constant 0 : index
    %2 = vector.load %arg3[%c0_2, %c0_3, %c0_4] : memref<1x8x256xbf16, #tpu.memory_space<vmem>>, vector<1x8x256xbf16>
    %3 = vector.shape_cast %2 : vector<1x8x256xbf16> to vector<8x256xbf16>
    %4 = arith.extf %1 : vector<128x256xbf16> to vector<128x256xf32>
    %5 = arith.extf %3 : vector<8x256xbf16> to vector<8x256xf32>
    %6 = tpu.concatenate %4, %5 in 0 : vector<128x256xf32>, vector<8x256xf32> -> vector<136x256xf32>
    %7 = vector.extract_strided_slice %6 {offsets = [1, 0], sizes = [128, 256], strides = [1, 1]} : vector<136x256xf32> to vector<128x256xf32>
    %8 = arith.truncf %7 : vector<128x256xf32> to vector<128x256xbf16>
    %9 = vector.extract_strided_slice %6 {offsets = [2, 0], sizes = [128, 256], strides = [1, 1]} : vector<136x256xf32> to vector<128x256xf32>
    %10 = arith.truncf %9 : vector<128x256xf32> to vector<128x256xbf16>
    %11 = vector.extract_strided_slice %6 {offsets = [3, 0], sizes = [128, 256], strides = [1, 1]} : vector<136x256xf32> to vector<128x256xf32>
    %12 = arith.truncf %11 : vector<128x256xf32> to vector<128x256xbf16>
    %13 = tpu.concatenate %1, %8, %10, %12 in 1 : vector<128x256xbf16>, vector<128x256xbf16>, vector<128x256xbf16>, vector<128x256xbf16> -> vector<128x1024xbf16>
    %c0_5 = arith.constant 0 : index
    %c0_6 = arith.constant 0 : index
    %14 = vector.load %arg4[%c0_5, %c0_6] : memref<1024x1024xbf16, #tpu.memory_space<vmem>>, vector<1024x1024xbf16>
    %cst = arith.constant dense<0.000000e+00> : vector<128x1024xf32>
    %15 = tpu.matmul %13, %14, %cst {dimension_numbers = #tpu.dot_dimension_numbers<[1], [0], [0], [1], [0, 0, 1, 1], [], []>} : vector<128x1024xbf16>, vector<1024x1024xbf16>, vector<128x1024xf32> -> vector<128x1024xf32>
    %16 = vector.extract_strided_slice %15 {offsets = [0, 0], sizes = [128, 512], strides = [1, 1]} : vector<128x1024xf32> to vector<128x512xf32>
    %17 = vector.extract_strided_slice %15 {offsets = [0, 512], sizes = [128, 512], strides = [1, 1]} : vector<128x1024xf32> to vector<128x512xf32>
    %18 = arith.mulf %16, %16 : vector<128x512xf32>
    %19 = arith.mulf %17, %17 : vector<128x512xf32>
    %20 = arith.addf %18, %19 : vector<128x512xf32>
    %21 = math.sqrt %20 : vector<128x512xf32>
    %22 = arith.truncf %21 : vector<128x512xf32> to vector<128x512xbf16>
    %c0_7 = arith.constant 0 : index
    %c0_8 = arith.constant 0 : index
    %23 = vector.load %arg5[%c0_7, %c0_8] : memref<512x128xbf16, #tpu.memory_space<vmem>>, vector<512x128xbf16>
    %cst_9 = arith.constant dense<0.000000e+00> : vector<128x128xf32>
    %24 = tpu.matmul %22, %23, %cst_9 {dimension_numbers = #tpu.dot_dimension_numbers<[1], [0], [0], [1], [0, 0, 1, 1], [], []>} : vector<128x512xbf16>, vector<512x128xbf16>, vector<128x128xf32> -> vector<128x128xf32>
    %cst_10 = arith.constant 9.99999974E-6 : f32
    %25 = vector.broadcast %cst_10 : f32 to vector<128x128xf32>
    %26 = arith.maximumf %24, %25 : vector<128x128xf32>
    %27 = math.log %26 : vector<128x128xf32>
    %cst_11 = arith.constant 0.434294492 : f32
    %28 = vector.broadcast %cst_11 : f32 to vector<128x128xf32>
    %29 = arith.mulf %27, %28 : vector<128x128xf32>
    %30 = tpu.transpose %29, [1, 0] : vector<128x128xf32> -> vector<128x128xf32>
    %31 = vector.extract_strided_slice %30 {offsets = [0, 0], sizes = [80, 128], strides = [1, 1]} : vector<128x128xf32> to vector<80x128xf32>
    %c0_12 = arith.constant 0 : index
    %c0_13 = arith.constant 0 : index
    %c0_14 = arith.constant 0 : index
    %32 = vector.load %arg6[%c0_12, %c0_13, %c0_14] : memref<1x80x128xf32, #tpu.memory_space<vmem>>, vector<1x80x128xf32>
    %33 = vector.shape_cast %32 : vector<1x80x128xf32> to vector<80x128xf32>
    %34 = vector.shape_cast %31 : vector<80x128xf32> to vector<1x80x128xf32>
    tpu.vector_store %arg6[%c0_12, %c0_13, %c0_14], %34 {strides = array<i32>} : memref<1x80x128xf32, #tpu.memory_space<vmem>>, vector<1x80x128xf32>,
    return
  }
  func.func @transform_0(%arg0: i32, %arg1: i32) -> (i32, i32, i32) {
    %c0_i32 = arith.constant 0 : i32
    %c0_i32_0 = arith.constant 0 : i32
    return %arg0, %arg1, %c0_i32 : i32, i32, i32
  }
  func.func @transform_1(%arg0: i32, %arg1: i32) -> (i32, i32, i32) {
    %c1_i32 = arith.constant 1 : i32
    %0 = arith.addi %arg1, %c1_i32 : i32
    %c16_i32 = arith.constant 16 : i32
    %1 = arith.muli %0, %c16_i32 : i32
    %c0_i32 = arith.constant 0 : i32
    %c0_i32_0 = arith.constant 0 : i32
    return %arg0, %1, %c0_i32 : i32, i32, i32
  }
  func.func @transform_2(%arg0: i32, %arg1: i32) -> (i32, i32) {
    %c0_i32 = arith.constant 0 : i32
    %c0_i32_0 = arith.constant 0 : i32
    %c0_i32_1 = arith.constant 0 : i32
    return %c0_i32, %c0_i32_0 : i32, i32
  }
  func.func @transform_3(%arg0: i32, %arg1: i32) -> (i32, i32) {
    %c0_i32 = arith.constant 0 : i32
    %c0_i32_0 = arith.constant 0 : i32
    %c0_i32_1 = arith.constant 0 : i32
    return %c0_i32, %c0_i32_0 : i32, i32
  }
  func.func @transform_4(%arg0: i32, %arg1: i32) -> (i32, i32, i32) {
    %c0_i32 = arith.constant 0 : i32
    %c0_i32_0 = arith.constant 0 : i32
    return %arg0, %c0_i32, %arg1 : i32, i32, i32
  }
}

</mosaic_0001>

<bundles_post_ra>
// kernel: tpu_custom_call.1
= control target key start
LH: loop header
LB: loop body
LE: loop exit
PB: predicated region body
PF: predicated region fallthrough
CT: control target
= control target key end

     0   :  { %s10801_s0 = inlined_call_operand.hbm [shape: bf16[2,136,256], index: 0, kind: input, shape index: {}]   ;;  %s10802_s1 = inlined_call_operand.hbm [shape: bf16[2,136,256], index: 1, kind: input, shape index: {}]   ;;  %s10803_s2 = inlined_call_operand.hbm [shape: bf16[1024,1024], index: 2, kind: input, shape index: {}]   ;;  %s10804_s3 = inlined_call_operand.hbm [shape: bf16[512,128], index: 3, kind: input, shape index: {}]   ;;  %s10805_s4 = inlined_call_operand.hbm [shape: f32[2,80,128], index: 4, kind: output, shape index: {}]  }
   0x1   :  { %10912 = sst [smem:[#allocation115_spill]] %s10801_s0 }
   0x2   :  { %10913 = sst [smem:[#allocation116_spill]] %s10803_s2 }
   0x3   :  { %10914 = sst [smem:[#allocation117_spill]] %s10804_s3 }
   0x4   :  { %9 = vsyncpa [#allocation3], 0 }
   0x5   :  { %11 = vsyncpa [#allocation3 + $0x1], 0 }
   0x6   :  { %12 = vsyncpa [#allocation6], 0 }
   0x7   :  { %14 = vsyncpa [#allocation6 + $0x1], 0 }
   0x8   :  { %15 = vsyncpa [#allocation9], 0 }
   0x9   :  { %16 = vsyncpa [#allocation4], 0 }
   0xa   :  { %18 = vsyncpa [#allocation4 + $0x1], 0  ;;  %s8375_s15 = smov 0   ;;  %s8377_s16 = smov 0  }
   0xb   :  { %s8379_s17 = smov 0   ;;  %s8381_s18 = smov 0  }
   0xc   :  { %s8383_s19 = smov 0   ;;  %s8385_s20 = smov 0  }
   0xd LB: > { %10915 = sst [smem:[#allocation16_spill]] %s8323_s17  ;;  %s8406_s21 = sadd.s32 4294967295, %s8335_s20   ;;  %s8335_s20 = sphi %s8385_s20, %s24_s20   ;;  %s8331_s19 = sphi %s8383_s19, %s11274_s19   ;;  %s8327_s18 = sphi %s8381_s18, %s11273_s18   ;;  %s8323_s17 = sphi %s8379_s17, %s11269_s17   ;;  %s8319_s16 = sphi %s8377_s16, %s11272_s16   ;;  %s8315_s15 = sphi %s8375_s15, %s11271_s15  }
   0xe   : > { %s7046_s22 = sadd.s32 4294967294, %s8335_s20   ;;  %p58_p0 = scmp.ne.s32.totalorder %s8319_s16, %s8315_s15 }
   0xf   : > { %p10806_p1 = scmp.eq.s32.totalorder %s8406_s21, 0  ;;  %p164_p3 = scmp.eq.s32.totalorder %s7046_s22, 1 }
  0x10   : > { %p7047_p5 = scmp.ge.s32.totalorder %s8335_s20, 1  ;;  %p171_p7 = scmp.lt.s32.totalorder %s8335_s20, 3 }
  0x11   : > { %p8415_p4 = por %p10806_p1, %p58_p0  ;;  %p8420_p6 = por %p164_p3, %p58_p0 }
  0x12   : > { %p8425_p8 = pnand %p7047_p5, %p171_p7  ;;  %s8337_s26 = smov [#allocation7]  }
  0x13   : > { %s10917_s24 = scalar_select %p8420_p6, 1, 0 }
  0x14   : > { %s183_s27 = sshll.u32 %s8337_s26, 4  ;;  %p7786_p9 = pneg %p8425_p8  ;;  %s184_s27 = int_to_ptr.vmem [resolvable:$true] %s183_s27 }
  0x15   : > { %s8338_s29 = smov [#allocation8]   ;;  %s8145_s5 = scalar_lea.vmem %s184_s27, 65536 }
  0x16   : > { %p8434_p11 = pnand %p7786_p9, %p10806_p1  ;;  %s196_s30 = sshll.u32 %s8338_s29, 4  ;;  %s197_s30 = int_to_ptr.vmem [resolvable:$true] %s196_s30 }
  0x17   : > { %p8146_p13 = scmp.ne.s32.totalorder %s184_s27, %s8145_s5  ;;  %p8153_p5 = scmp.lt.s32.totalorder %s184_s27, %s184_s27 }
  0x18   : > { %p8136_p12 = pneg %p8434_p11  ;;  %p8154_p7 = scmp.lt.s32.totalorder %s8145_s5, %s8145_s5 }
  0x1a   : > { %p8148_p0 = pnand %p8146_p13, %p8136_p12  ;;  %p8155_p10 = por %p8154_p7, %p8153_p5 }
  0x1c   : > { %p8149_p3 = pneg %p8148_p0 }
  0x1e   : > { %p8156_p9 = pnand %p8155_p10, %p8149_p3 }
  0x20   : > { %8159 = shalt.err (!%p8156_p9)
}
  0x21   : > { %s8339_s6 = smov 512   ;;  %s8340_s7 = smov 32  }
  0x22   : > { %s10920_s2 = sld [smem:[#allocation116_spill]]  ;;  %s8171_s10 = scalar_lea.vmem %s197_s30, 4096 }
  0x23   : > { %p8172_p1 = scmp.ne.s32.totalorder %s197_s30, %s8171_s10  ;;  %p8179_p2 = scmp.lt.s32.totalorder %s197_s30, %s197_s30 }
  0x24   : > { %p8180_p6 = scmp.lt.s32.totalorder %s8171_s10, %s8171_s10 }
  0x25   : > { %p8174_p13 = pnand %p8172_p1, %p8136_p12 }
  0x26   : > { %p8181_p5 = por %p8180_p6, %p8179_p2 }
  0x27   : > { %p8175_p0 = pneg %p8174_p13 }
  0x28   : > { %7789 = dma.hbm_to_vmem [thread:$0]  (!%p8434_p11), %s10920_s2, 65536, %s184_s27, [#allocation6], %s8339_s6, %s8339_s6, %s8340_s7  }
  0x29   : > { %p8182_p10 = pnand %p8181_p5, %p8175_p0 }
  0x2b   : > { %8185 = shalt.err (!%p8182_p10)
}
  0x2c   : > { %s8341_s11 = smov 64   ;;  %s8342_s12 = smov 4  }
  0x2d   : > { %s10921_s3 = sld [smem:[#allocation117_spill]]  ;;  %s36_s22 = sadd.s32 1, %s8331_s19 }
  0x2e   : > { %s45_s26 = sadd.s32 1, %s8323_s17  ;;  %p38_p1 = scmp.ge.s32.totalorder %s36_s22, 2 }
  0x2f   : > { %p52_p2 = scmp.ne.s32.totalorder %s8323_s17, %s8319_s16  ;;  %p53_p6 = scmp.eq.s32.totalorder %s8335_s20, 0 }
  0x30   : > { %p7806_p12 = scmp.lt.s32.totalorder %s8335_s20, 2  ;;  %s11276_s22 = smov (%p38_p1, %s36_s22), 0 }
  0x31   : > { %10922 = sst [smem:[#allocation17_spill]] %s11276_s22  ;;  %p54_p3 = por %p53_p6, %p52_p2 }
  0x32   : > { %p10923_p7 = scmp.eq.s32.totalorder %s8406_s21, 1  ;;  %s40_s28 = ssub.s32 %s8331_s19, %s11276_s22 }
  0x33   : > { %7792 = dma.hbm_to_vmem [thread:$0]  (!%p8434_p11), %s10921_s3, 4096, %s197_s30, [#allocation9], %s8341_s11, %s8341_s11, %s8342_s12  }
  0x34   : > { %p8466_p9 = por %p10923_p7, %p52_p2  ;;  %s8473_s29 = sand.u32 1, %s8323_s17  }
  0x35   : > { %p43_p11 = scmp.eq.s32.totalorder %s40_s28, 0  ;;  %s7051_s30 = sshll.u32 %s8473_s29, 7 }
  0x36   : > { %s10807_s5 = smul.u32 2176, %s8331_s19  ;;  %s10926_s0 = sld [smem:[#allocation115_spill]] }
  0x37   : > { %s8478_s6 = scalar_select %p43_p11, %s8323_s17, %s45_s26  }
  0x38   : > { %s214_s10 = scalar_lea.vmem [#allocation2], %s7051_s30  ;;  %p8487_p13 = pnand %p7806_p12, %p54_p3 }
  0x39   : > { %10925 = sst [smem:[#allocation18_spill]] %s8478_s6  ;;  %s231_s11 = sshll.u32 %s214_s10, 4  ;;  %s232_s11 = int_to_ptr.vmem [resolvable:$true] %s231_s11 }
  0x3a   : > { %s211_s13 = scalar_lea.sflag [#allocation3], %s8473_s29  ;;  %p8188_p0 = pneg %p8487_p13 }
  0x3b   : > { %s8199_s14 = scalar_lea.vmem %s232_s11, 2048  ;;  %s8343_s26 = smov [#allocation2]  }
  0x3c   : > { %s229_s9 = scalar_lea.hbm %s10926_s0, %s10807_s5  ;;  %p8200_p5 = scmp.ne.s32.totalorder %s232_s11, %s8199_s14 }
  0x3d   : > { %s8204_s28 = sshll.u32 %s8343_s26, 4  ;;  %s8205_s28 = int_to_ptr.vmem [resolvable:$false] %s8204_s28 }
  0x3e   : > { %p8202_p10 = pnand %p8200_p5, %p8188_p0  ;;  %s8206_s30 = scalar_lea.vmem %s8205_s28, 4096 }
  0x3f   : > { %p8207_p2 = scmp.lt.s32.totalorder %s232_s11, %s8205_s28  ;;  %p8208_p6 = scmp.lt.s32.totalorder %s8206_s30, %s8199_s14 }
  0x40   : > { %p8203_p1 = pneg %p8202_p10 }
  0x41   : > { %p8209_p12 = por %p8208_p6, %p8207_p2 }
  0x43   : > { %p8210_p3 = pnand %p8209_p12, %p8203_p1 }
  0x45   : > { %8213 = shalt.err (!%p8210_p3)
}
  0x46   : > { %s8344_s7 = smov 128   ;;  %s8345_s8 = smov 8  }
  0x47   : > { %7796 = dma.hbm_to_vmem [thread:$0]  (!%p8487_p13), %s229_s9, 2048, %s232_s11, %s211_s13, %s8344_s7, %s8344_s7, %s8345_s8  }
  0x48   : > { %s241_s10 = sand.u32 1, %s8335_s20   ;;  %s7053_s5 = sshll.u32 %s8473_s29, 3 }
  0x49   : > { %s10928_s0 = smul.u32 2176, %s8331_s19  ;;  %s245_s14 = scalar_lea.vmem [#allocation5], %s7053_s5 }
  0x4a   : > { %s257_s30 = sshll.u32 %s245_s14, 4  ;;  %s242_s22 = scalar_lea.sflag [#allocation6], %s241_s10  ;;  %s258_s30 = int_to_ptr.vmem [resolvable:$true] %s257_s30 }
  0x4b   : > { %s6959_s28 = scalar_lea.hbm %s10802_s1, %s10928_s0  ;;  %s8227_s6 = scalar_lea.vmem %s258_s30, 128 }
  0x4c   : > { %s6960_s3 = scalar_lea.hbm %s6959_s28, 2048  ;;  %p8228_p7 = scmp.ne.s32.totalorder %s258_s30, %s8227_s6 }
  0x4d   : > { %s8346_s17 = smov [#allocation5]  }
  0x4e   : > { %p8230_p11 = pnand %p8228_p7, %p8188_p0  ;;  %s8232_s9 = sshll.u32 %s8346_s17, 4  ;;  %s8233_s9 = int_to_ptr.vmem [resolvable:$false] %s8232_s9 }
  0x4f   : > { %s8234_s29 = scalar_lea.vmem %s8233_s9, 256  ;;  %p8235_p10 = scmp.lt.s32.totalorder %s258_s30, %s8233_s9 }
  0x50   : > { %p8231_p5 = pneg %p8230_p11  ;;  %p8236_p1 = scmp.lt.s32.totalorder %s8234_s29, %s8227_s6 }
  0x52   : > { %p8237_p2 = por %p8236_p1, %p8235_p10 }
  0x54   : > { %p8238_p6 = pnand %p8237_p2, %p8231_p5 }
  0x56   : > { %8241 = shalt.err (!%p8238_p6)
}
  0x57   : > { %7799 = dma.hbm_to_vmem [thread:$0]  (!%p8487_p13), %s6960_s3, 128, %s258_s30, %s242_s22  }
  0x58   : > { %266 = sbr.rel (%p8425_p8) target bundleno = 1272 (0x4f8), region = 36 }
  0x5d   : > { %s8514_s0 = sand.u32 1, %s8319_s16  }
  0x5e   : > { %s7056_s2 = sshll.u32 %s8514_s0, 7  ;;  %s269_s17 = scalar_lea.sflag [#allocation3], %s8514_s0 }
  0x5f   : > { %s8518_s5 = scalar_lea.vmem [#allocation2], %s7056_s2 }
  0x60   : > { %8294 = dma.done.wait (%p8415_p4), %s269_s17, 2048  }
  0x61   : > { %8296 = vsyncadd (%p8415_p4), %s269_s17, 4294965248  ;;  %s277_s3 = sand.u32 1, %s8406_s21   ;;  %s7057_s25 = sshll.u32 %s8514_s0, 3 }
  0x62   : > { %s278_s22 = scalar_lea.sflag [#allocation6], %s277_s3  ;;  %s8526_s6 = scalar_lea.vmem [#allocation5], %s7057_s25 }
  0x63   : > { %8298 = dma.done.wait (%p8415_p4), %s278_s22, 128  }
  0x64   : > { %8300 = vsyncadd (%p8415_p4), %s278_s22, 4294967168  ;;  %p10929_p8 = scmp.eq.s32.totalorder %s8406_s21, 0 }
  0x66   : > { %8302 = dma.done.wait (%p10929_p8), [#allocation6], 65536   ;;  %p10930_p13 = pmov %p10929_p8 }
  0x67   : > { %p10931_p0 = pmov %p10929_p8 }
  0x68   : > { %8304 = vsyncadd (%p10930_p13), [#allocation6], 4294901760 }
  0x69   : > { %8306 = dma.done.wait (%p10931_p0), [#allocation9], 4096   ;;  %p10932_p12 = pmov %p10931_p0 }
  0x6a   : > { %v846_v0 = vld [vmem:[#allocation7 + $0x1c0] sm:$0xff]  ;;  %v8541_v56 = vld [vmem:[%s8518_s5 + $0x4] ss:$8 sps:$4 sm:$0xff]   ;;  %vm477_vm0 = vsmask.f32 7424  ;;  %vm648_vm2 = vcmask 1046528  }
  0x6b   : > { %8308 = vsyncadd (%p10932_p12), [#allocation9], 4294963200  ;;  %v850_v1 = vld [vmem:[#allocation7 + $0x1e0] sm:$0xff]  ;;  %3894 = vmatprep.mubr.bf16.mxu0 %v8541_v56  ;;  %v491_v61 = vshrl.u32 %v8541_v56, 16  ;;  %v493_v62 = vshll.u32 %v8541_v56, 16  ;;  %s7770_s21 = smul.u32 80, %s8514_s0 }
  0x6c   : > { %v974_v2 = vld [vmem:[#allocation7 + $0x5c0] sm:$0xff]  ;;  %v7151_v3 = vcombine.high %v846_v0, %v850_v1  ;;  %v7150_v5 = vcombine.low %v846_v0, %v850_v1  ;;  %vm699_vm1 = vsmask.f32 6400  ;;  %s7771_s12 = smul.u32 1280, %s8327_s18  ;;  %s6899_s10 = scalar_lea.sflag [#allocation4], %s8514_s0 }
  0x6d   : > { %v978_v4 = vld [vmem:[#allocation7 + $0x5e0] sm:$0xff]  ;;  %s318_s23 = scalar_lea.vmem [#allocation10], %s7770_s21  ;;  %s8347_s18 = smov [#allocation10]  }
  0x6e   : > { %v838_v6 = vld [vmem:[#allocation7 + $0x180] sm:$0xff]  ;;  %v7279_v8 = vcombine.high %v974_v2, %v978_v4  ;;  %v7278_v9 = vcombine.low %v974_v2, %v978_v4  ;;  %3862 = vmatprep.subr.bf16.mxu0 %v7151_v3  ;;  %s6913_s11 = sshll.u32 %s318_s23, 4  ;;  %s10753_s8 = scalar_lea.hbm %s10805_s4, %s7771_s12  ;;  %s10748_s11 = int_to_ptr.vmem [resolvable:$true] %s6913_s11 }
  0x6f   : > { %v842_v7 = vld [vmem:[#allocation7 + $0x1a0] sm:$0xff]  ;;  %3863 = vmatpush1.bf16.msra.mxu0 %v7150_v5  ;;  %s8243_s26 = scalar_lea.vmem %s10748_s11, 1280  ;;  %s8247_s28 = sshll.u32 %s8347_s18, 4  ;;  %s8248_s28 = int_to_ptr.vmem [resolvable:$false] %s8247_s28 }
  0x70   : > { %v7143_v10 = vcombine.high %v838_v6, %v842_v7  ;;  %v966_v11 = vld [vmem:[#allocation7 + $0x580] sm:$0xff]  ;;  %3975 = vmatprep.subr.bf16.mxu1 %v7279_v8  ;;  %v7142_v18 = vcombine.low %v838_v6, %v842_v7  ;;  %v495_v6 = vrot.slane %v493_v62, 1  ;;  %p8244_p4 = scmp.ne.s32.totalorder %s10748_s11, %s8243_s26  ;;  %s8249_s14 = scalar_lea.vmem %s8248_s28, 2560 }
  0x71   : > { %v970_v12 = vld [vmem:[#allocation7 + $0x5a0] sm:$0xff]  ;;  %3976 = vmatpush1.bf16.msra.mxu1 %v7278_v9  ;;  %p8250_p11 = scmp.lt.s32.totalorder %s10748_s11, %s8248_s28  ;;  %p8251_p5 = scmp.lt.s32.totalorder %s8249_s14, %s8243_s26 }
  0x72   : > { %v830_v13 = vld [vmem:[#allocation7 + $0x140] sm:$0xff]  ;;  %v7271_v14 = vcombine.high %v966_v11, %v970_v12  ;;  %3864 = vmatprep.subr.bf16.mxu0 %v7143_v10  ;;  %v7270_v19 = vcombine.low %v966_v11, %v970_v12  ;;  %v496_v10 = vor.u32 %v495_v6, %v491_v61  ;;  %p8245_p3 = pnand %p8244_p4, %p8466_p9 }
  0x73   : > { %v834_v15 = vld [vmem:[#allocation7 + $0x160] sm:$0xff]  ;;  %3865 = vmatpush1.bf16.msra.mxu0 %v7142_v18  ;;  %p8252_p10 = por %p8251_p5, %p8250_p11 }
  0x74   : > { %v958_v16 = vld [vmem:[#allocation7 + $0x540] sm:$0xff]  ;;  %v7135_v20 = vcombine.high %v830_v13, %v834_v15  ;;  %3977 = vmatprep.subr.bf16.mxu1 %v7271_v14  ;;  %v7134_v26 = vcombine.low %v830_v13, %v834_v15  ;;  %p8246_p7 = pneg %p8245_p3 }
  0x75   : > { %v962_v17 = vld [vmem:[#allocation7 + $0x560] sm:$0xff]  ;;  %3978 = vmatpush1.bf16.msra.mxu1 %v7270_v19 }
  0x76   : > { %v7263_v21 = vcombine.high %v958_v16, %v962_v17  ;;  %v822_v22 = vld [vmem:[#allocation7 + $0x100] sm:$0xff]  ;;  %3866 = vmatprep.subr.bf16.mxu0 %v7135_v20  ;;  %v7262_v27 = vcombine.low %v958_v16, %v962_v17  ;;  %p8253_p1 = pnand %p8252_p10, %p8246_p7 }
  0x77   : > { %v826_v23 = vld [vmem:[#allocation7 + $0x120] sm:$0xff]  ;;  %3867 = vmatpush1.bf16.msra.mxu0 %v7134_v26 }
  0x78   : > { %v950_v24 = vld [vmem:[#allocation7 + $0x500] sm:$0xff]  ;;  %v7127_v28 = vcombine.high %v822_v22, %v826_v23  ;;  %3979 = vmatprep.subr.bf16.mxu1 %v7263_v21  ;;  %v7126_v34 = vcombine.low %v822_v22, %v826_v23 }
  0x79   : > { %v954_v25 = vld [vmem:[#allocation7 + $0x520] sm:$0xff]  ;;  %3980 = vmatpush1.bf16.msra.mxu1 %v7262_v27 }
  0x7a   : > { %v7255_v29 = vcombine.high %v950_v24, %v954_v25  ;;  %v814_v30 = vld [vmem:[#allocation7 + $0xc0] sm:$0xff]  ;;  %3868 = vmatprep.subr.bf16.mxu0 %v7127_v28  ;;  %v7254_v35 = vcombine.low %v950_v24, %v954_v25 }
  0x7b   : > { %v818_v31 = vld [vmem:[#allocation7 + $0xe0] sm:$0xff]  ;;  %3869 = vmatpush1.bf16.msra.mxu0 %v7126_v34 }
  0x7c   : > { %v942_v32 = vld [vmem:[#allocation7 + $0x4c0] sm:$0xff]  ;;  %v7119_v36 = vcombine.high %v814_v30, %v818_v31  ;;  %3981 = vmatprep.subr.bf16.mxu1 %v7255_v29  ;;  %v7118_v42 = vcombine.low %v814_v30, %v818_v31 }
  0x7d   : > { %v946_v33 = vld [vmem:[#allocation7 + $0x4e0] sm:$0xff]  ;;  %3982 = vmatpush1.bf16.msra.mxu1 %v7254_v35 }
  0x7e   : > { %v7247_v37 = vcombine.high %v942_v32, %v946_v33  ;;  %v806_v38 = vld [vmem:[#allocation7 + $0x80] sm:$0xff]  ;;  %3870 = vmatprep.subr.bf16.mxu0 %v7119_v36  ;;  %v7246_v43 = vcombine.low %v942_v32, %v946_v33 }
  0x7f   : > { %v810_v39 = vld [vmem:[#allocation7 + $0xa0] sm:$0xff]  ;;  %3871 = vmatpush1.bf16.msra.mxu0 %v7118_v42 }
  0x80   : > { %v934_v40 = vld [vmem:[#allocation7 + $0x480] sm:$0xff]  ;;  %v7111_v44 = vcombine.high %v806_v38, %v810_v39  ;;  %3983 = vmatprep.subr.bf16.mxu1 %v7247_v37  ;;  %v7110_v50 = vcombine.low %v806_v38, %v810_v39 }
  0x81   : > { %v938_v41 = vld [vmem:[#allocation7 + $0x4a0] sm:$0xff]  ;;  %3984 = vmatpush1.bf16.msra.mxu1 %v7246_v43 }
  0x82   : > { %v7239_v45 = vcombine.high %v934_v40, %v938_v41  ;;  %v798_v46 = vld [vmem:[#allocation7 + $0x40] sm:$0xff]  ;;  %3872 = vmatprep.subr.bf16.mxu0 %v7111_v44  ;;  %v7238_v52 = vcombine.low %v934_v40, %v938_v41 }
  0x83   : > { %v802_v47 = vld [vmem:[#allocation7 + $0x60] sm:$0xff]  ;;  %3873 = vmatpush1.bf16.msra.mxu0 %v7110_v50 }
  0x84   : > { %v926_v48 = vld [vmem:[#allocation7 + $0x440] sm:$0xff]  ;;  %v7103_v53 = vcombine.high %v798_v46, %v802_v47  ;;  %3985 = vmatprep.subr.bf16.mxu1 %v7239_v45  ;;  %v7102_v60 = vcombine.low %v798_v46, %v802_v47 }
  0x85   : > { %v930_v49 = vld [vmem:[#allocation7 + $0x460] sm:$0xff]  ;;  %3986 = vmatpush1.bf16.msra.mxu1 %v7238_v52 }
  0x86   : > { %v790_v51 = vld [vmem:[#allocation7] sm:$0xff]  ;;  %v7231_v55 = vcombine.high %v926_v48, %v930_v49  ;;  %3874 = vmatprep.subr.bf16.mxu0 %v7103_v53  ;;  %v7230_v63 = vcombine.low %v926_v48, %v930_v49 }
  0x87   : > { %v794_v54 = vld [vmem:[#allocation7 + $0x20] sm:$0xff]  ;;  %3875 = vmatpush1.bf16.msra.mxu0 %v7102_v60 }
  0x88   : > { %v918_v57 = vld [vmem:[#allocation7 + $0x400] sm:$0xff]  ;;  %v7095_v0 = vcombine.high %v790_v51, %v794_v54  ;;  %3987 = vmatprep.subr.bf16.mxu1 %v7231_v55  ;;  %v7094_v9 = vcombine.low %v790_v51, %v794_v54  ;;  %v8564_v54 = vld [vmem:[%s8518_s5] ss:$8 sps:$4 sm:$0xff]  }
  0x89   : > { %v922_v58 = vld [vmem:[#allocation7 + $0x420] sm:$0xff]  ;;  %3988 = vmatpush1.bf16.msra.mxu1 %v7230_v63 }
  0x8a   : > { %v8544_v59 = vld [vmem:[%s8518_s5 + $0x14] ss:$8 sps:$4 sm:$0xff]   ;;  %v7223_v2 = vcombine.high %v918_v57, %v922_v58  ;;  %3876 = vmatprep.subr.bf16.mxu0 %v7095_v0  ;;  %v7222_v11 = vcombine.low %v918_v57, %v922_v58 }
  0x8b   : > { %v498_v1 = vshll.u32 %v8544_v59, 16  ;;  %v910_v3 = vld [vmem:[#allocation7 + $0x3c0] sm:$0xff]  ;;  %3877 = vmatpush1.bf16.msra.mxu0 %v7094_v9 }
  0x8c   : > { %v914_v4 = vld [vmem:[#allocation7 + $0x3e0] sm:$0xff]  ;;  %3989 = vmatprep.subr.bf16.mxu1 %v7223_v2 }
  0x8d   : > { %v1038_v5 = vld [vmem:[#allocation7 + $0x7c0] sm:$0xff]  ;;  %v8554_v8 = vrot.slane %v498_v1, 1  ;;  %v7215_v12 = vcombine.high %v910_v3, %v914_v4  ;;  %v7214_v19 = vcombine.low %v910_v3, %v914_v4  ;;  %3990 = vmatpush1.bf16.msra.mxu1 %v7222_v11 }
  0x8e   : > { %v1042_v7 = vld [vmem:[#allocation7 + $0x7e0] sm:$0xff] }
  0x8f   : > { %v7343_v13 = vcombine.high %v1038_v5, %v1042_v7  ;;  %v902_v14 = vld [vmem:[#allocation7 + $0x380] sm:$0xff]  ;;  %v8560_v17 = vsel %vm477_vm0, %v496_v10, %v8554_v8  ;;  %3878 = vmatprep.subr.bf16.mxu0 %v7215_v12  ;;  %v7342_v20 = vcombine.low %v1038_v5, %v1042_v7  ;;  %v10830_v5 = vshll.u32 %v8564_v54, 16 }
  0x90   : > { %v906_v15 = vld [vmem:[#allocation7 + $0x3a0] sm:$0xff]  ;;  %10933 = vst [vmem:[#allocation19_spill] sm:$0xff] %v8560_v17  ;;  %4007 = vmatprep.mubr.bf16.mxu1 %v8560_v17  ;;  %3879 = vmatpush2.bf16.msra.mxu0 %v7214_v19 }
  0x91   : > { %v1030_v16 = vld [vmem:[#allocation7 + $0x780] sm:$0xff]  ;;  %v7207_v21 = vcombine.high %v902_v14, %v906_v15  ;;  %3991 = vmatprep.subr.bf16.mxu1 %v7343_v13  ;;  %v7206_v27 = vcombine.low %v902_v14, %v906_v15  ;;  %v8571_v14 = vld [vmem:[%s8518_s5 + $0x24] ss:$8 sps:$4 sm:$0xff]  }
  0x92   : > { %v1034_v18 = vld [vmem:[#allocation7 + $0x7a0] sm:$0xff]  ;;  %3992 = vmatpush2.bf16.msra.mxu1 %v7342_v20 }
  0x93   : > { %v7335_v22 = vcombine.high %v1030_v16, %v1034_v18  ;;  %v894_v23 = vld [vmem:[#allocation7 + $0x340] sm:$0xff]  ;;  %3880 = vmatprep.subr.bf16.mxu0 %v7207_v21  ;;  %v7334_v28 = vcombine.low %v1030_v16, %v1034_v18  ;;  %v479_v16 = vshrl.u32 %v8564_v54, 16  ;;  %v483_v18 = vrot.slane %v10830_v5, 1 }
  0x94   : > { %v898_v24 = vld [vmem:[#allocation7 + $0x360] sm:$0xff]  ;;  %3881 = vmatpush2.bf16.msra.mxu0 %v7206_v27  ;;  %v10827_v27 = vshll.u32 %v8571_v14, 16 }
  0x95   : > { %v1022_v25 = vld [vmem:[#allocation7 + $0x740] sm:$0xff]  ;;  %v7199_v29 = vcombine.high %v894_v23, %v898_v24  ;;  %3993 = vmatprep.subr.bf16.mxu1 %v7335_v22  ;;  %v7198_v35 = vcombine.low %v894_v23, %v898_v24 }
  0x96   : > { %v1026_v26 = vld [vmem:[#allocation7 + $0x760] sm:$0xff]  ;;  %3994 = vmatpush2.bf16.msra.mxu1 %v7334_v28 }
  0x97   : > { %v7327_v30 = vcombine.high %v1022_v25, %v1026_v26  ;;  %v886_v31 = vld [vmem:[#allocation7 + $0x300] sm:$0xff]  ;;  %3882 = vmatprep.subr.bf16.mxu0 %v7199_v29  ;;  %v7326_v36 = vcombine.low %v1022_v25, %v1026_v26  ;;  %v510_v26 = vshrl.u32 %v8544_v59, 16  ;;  %v484_v29 = vor.u32 %v483_v18, %v479_v16 }
  0x98   : > { %v890_v32 = vld [vmem:[#allocation7 + $0x320] sm:$0xff]  ;;  %3883 = vmatpush2.bf16.msra.mxu0 %v7198_v35 }
  0x99   : > { %v1014_v33 = vld [vmem:[#allocation7 + $0x700] sm:$0xff]  ;;  %v7191_v37 = vcombine.high %v886_v31, %v890_v32  ;;  %3995 = vmatprep.subr.bf16.mxu1 %v7327_v30  ;;  %v7190_v43 = vcombine.low %v886_v31, %v890_v32 }
  0x9a   : > { %v1018_v34 = vld [vmem:[#allocation7 + $0x720] sm:$0xff]  ;;  %3996 = vmatpush2.bf16.msra.mxu1 %v7326_v36  ;;  %v707_v36 = vrot.slane %v491_v61, 1 }
  0x9b   : > { %v7319_v38 = vcombine.high %v1014_v33, %v1018_v34  ;;  %v878_v39 = vld [vmem:[#allocation7 + $0x2c0] sm:$0xff]  ;;  %3884 = vmatprep.subr.bf16.mxu0 %v7191_v37  ;;  %v7318_v44 = vcombine.low %v1014_v33, %v1018_v34  ;;  %v8584_v34 = vld [vmem:[%s8518_s5 + $0x20] ss:$8 sps:$4 sm:$0xff]   ;;  %v708_v37 = vrot.slane %v493_v62, 2 }
  0x9c   : > { %v882_v40 = vld [vmem:[#allocation7 + $0x2e0] sm:$0xff]  ;;  %3885 = vmatpush2.bf16.msra.mxu0 %v7190_v43  ;;  %v711_v43 = vrot.slane %v498_v1, 2 }
  0x9d   : > { %v1006_v41 = vld [vmem:[#allocation7 + $0x6c0] sm:$0xff]  ;;  %v7183_v45 = vcombine.high %v878_v39, %v882_v40  ;;  %3997 = vmatprep.subr.bf16.mxu1 %v7319_v38  ;;  %v7182_v51 = vcombine.low %v878_v39, %v882_v40  ;;  %v709_v61 = vor.u32 %v708_v37, %v707_v36 }
  0x9e   : > { %v1010_v42 = vld [vmem:[#allocation7 + $0x6e0] sm:$0xff]  ;;  %3998 = vmatpush2.bf16.msra.mxu1 %v7318_v44 }
  0x9f   : > { %v7311_v46 = vcombine.high %v1006_v41, %v1010_v42  ;;  %v870_v47 = vld [vmem:[#allocation7 + $0x280] sm:$0xff]  ;;  %3886 = vmatprep.subr.bf16.mxu0 %v7183_v45  ;;  %v7310_v52 = vcombine.low %v1006_v41, %v1010_v42  ;;  %v710_v42 = vrot.slane %v510_v26, 1  ;;  %v512_v45 = vor.u32 %v510_v26, %v8554_v8 }
  0xa0   : > { %v874_v48 = vld [vmem:[#allocation7 + $0x2a0] sm:$0xff]  ;;  %3887 = vmatpush2.bf16.msra.mxu0 %v7182_v51 }
  0xa1   : > { %v998_v49 = vld [vmem:[#allocation7 + $0x680] sm:$0xff]  ;;  %v7175_v53 = vcombine.high %v870_v47, %v874_v48  ;;  %3999 = vmatprep.subr.bf16.mxu1 %v7311_v46  ;;  %v7174_v0 = vcombine.low %v870_v47, %v874_v48  ;;  %v516_v46 = vrot.slane %v10827_v27, 1  ;;  %v8603_v1 = vor.u32 %v711_v43, %v710_v42  ;;  %v8649_v42 = vld [vmem:[%s8518_s5 + $0x40] ss:$8 sps:$4 sm:$0xff]  }
  0xa2   : > { %v1002_v50 = vld [vmem:[#allocation7 + $0x6a0] sm:$0xff]  ;;  %4000 = vmatpush2.bf16.msra.mxu1 %v7310_v52 }
  0xa3   : > { %v7303_v55 = vcombine.high %v998_v49, %v1002_v50  ;;  %v862_v57 = vld [vmem:[#allocation7 + $0x240] sm:$0xff]  ;;  %3888 = vmatprep.subr.bf16.mxu0 %v7175_v53  ;;  %v7302_v2 = vcombine.low %v998_v49, %v1002_v50  ;;  %v10825_v49 = vshll.u32 %v8584_v34, 16 }
  0xa4   : > { %v866_v58 = vld [vmem:[#allocation7 + $0x260] sm:$0xff]  ;;  %3889 = vmatpush2.bf16.msra.mxu0 %v7174_v0 }
  0xa5   : > { %v990_v60 = vld [vmem:[#allocation7 + $0x640] sm:$0xff]  ;;  %v7167_v3 = vcombine.high %v862_v57, %v866_v58  ;;  %4001 = vmatprep.subr.bf16.mxu1 %v7303_v55  ;;  %v7166_v12 = vcombine.low %v862_v57, %v866_v58  ;;  %v8608_v55 = vsel %vm699_vm1, %v709_v61, %v8603_v1  ;;  %v8612_v58 = vsel %vm477_vm0, %v512_v45, %v516_v46 }
  0xa6   : > { %v994_v63 = vld [vmem:[#allocation7 + $0x660] sm:$0xff]  ;;  %4002 = vmatpush2.bf16.msra.mxu1 %v7302_v2  ;;  %10934 = vst [vmem:[#allocation20_spill] sm:$0xff] %v8608_v55 }
  0xa7   : > { %v8567_v4 = vld [vmem:[%s8518_s5 + $0x10] ss:$8 sps:$4 sm:$0xff]   ;;  %v7295_v6 = vcombine.high %v990_v60, %v994_v63  ;;  %v7294_v13 = vcombine.low %v990_v60, %v994_v63  ;;  %3890 = vmatprep.subr.bf16.mxu0 %v7167_v3  ;;  %v8596_v47 = vld [vmem:[%s8518_s5 + $0x34] ss:$8 sps:$4 sm:$0xff]   ;;  %v10829_v60 = vshrl.u32 %v8571_v14, 16  ;;  %v508_v3 = vrot.slane %v10825_v49, 1 }
  0xa8   : > { %v854_v7 = vld [vmem:[#allocation7 + $0x200] sm:$0xff]  ;;  %v486_v19 = vshll.u32 %v8567_v4, 16  ;;  %3891 = vmatpush2.bf16.msra.mxu0 %v7166_v12  ;;  %v502_v48 = vshrl.u32 %v8567_v4, 16  ;;  %v10820_v63 = vshll.u32 %v8596_v47, 16  ;;  %v10821_v36 = vshrl.u32 %v8596_v47, 16 }
  0xa9   : > { %v858_v9 = vld [vmem:[#allocation7 + $0x220] sm:$0xff]  ;;  %4003 = vmatprep.subr.bf16.mxu1 %v7295_v6 }
  0xaa   : > { %v982_v10 = vld [vmem:[#allocation7 + $0x600] sm:$0xff]  ;;  %v7159_v15 = vcombine.high %v854_v7, %v858_v9  ;;  %v7158_v25 = vcombine.low %v854_v7, %v858_v9  ;;  %4004 = vmatpush2.bf16.msra.mxu1 %v7294_v13  ;;  %v488_v30 = vrot.slane %v486_v19, 1 }
  0xab   : > { %v986_v11 = vld [vmem:[#allocation7 + $0x620] sm:$0xff] }
  0xac   : > { %v7287_v20 = vcombine.high %v982_v10, %v986_v11  ;;  %v1102_v21 = vld [vmem:[#allocation7 + $0x9c0] sm:$0xff]  ;;  %3892 = vmatprep.subr.bf16.mxu0 %v7159_v15  ;;  %v7286_v28 = vcombine.low %v982_v10, %v986_v11  ;;  %v8599_v62 = vsel %vm477_vm0, %v484_v29, %v488_v30  ;;  %v504_v2 = vor.u32 %v502_v48, %v488_v30 }
  0xad   : > { %v1106_v22 = vld [vmem:[#allocation7 + $0x9e0] sm:$0xff]  ;;  %3893 = vmatpush2.bf16.msra.mxu0 %v7158_v25  ;;  %v10826_v25 = vshrl.u32 %v8584_v34, 16 }
  0xae   : > { %v1230_v23 = vld [vmem:[#allocation7 + $0xdc0] sm:$0xff]  ;;  %v7407_v31 = vcombine.high %v1102_v21, %v1106_v22  ;;  %4005 = vmatprep.subr.bf16.mxu1 %v7287_v20  ;;  %v7406_v38 = vcombine.low %v1102_v21, %v1106_v22  ;;  %v528_v20 = vor.u32 %v10829_v60, %v516_v46  ;;  %v532_v21 = vrot.slane %v10820_v63, 1  ;;  %v8630_v22 = vld [vmem:[%s8518_s5 + $0x44] ss:$8 sps:$4 sm:$0xff]  }
  0xaf   : > { %v1234_v24 = vld [vmem:[#allocation7 + $0xde0] sm:$0xff]  ;;  %4006 = vmatpush2.bf16.msra.mxu1 %v7286_v28  ;;  %v10814_v37 = vshll.u32 %v8630_v22, 16 }
  0xb0   : > { %v1094_v32 = vld [vmem:[#allocation7 + $0x980] sm:$0xff]  ;;  %v7535_v35 = vcombine.high %v1230_v23, %v1234_v24  ;;  %v7534_v39 = vcombine.low %v1230_v23, %v1234_v24  ;;  %4088 = vmatprep.subr.bf16.mxu0 %v7407_v31  ;;  %3895 = vmatmul.mubr.bf16.vlgmr.msra.gmra.mxu0 %v8564_v54  ;;  %v8633_v23 = vsel %vm477_vm0, %v504_v2, %v508_v3 }
  0xb1   : > { %v1098_v33 = vld [vmem:[#allocation7 + $0x9a0] sm:$0xff]  ;;  %4089 = vmatpush1.bf16.msra.mxu0 %v7406_v38  ;;  %3904 = vmatprep.mubr.bf16.mxu0 %v8544_v59 }
  0xb2   : > { %v1222_v40 = vld [vmem:[#allocation7 + $0xd80] sm:$0xff]  ;;  %v7399_v44 = vcombine.high %v1094_v32, %v1098_v33  ;;  %4201 = vmatprep.subr.bf16.mxu1 %v7535_v35  ;;  %4008 = vmatmul.mubr.bf16.vlgmr.msra.gmra.mxu1 %v8599_v62  ;;  %v7398_v57 = vcombine.low %v1094_v32, %v1098_v33  ;;  %v8640_v35 = vsel %vm477_vm0, %v528_v20, %v532_v21 }
  0xb3   : > { %v1226_v41 = vld [vmem:[#allocation7 + $0xda0] sm:$0xff]  ;;  %4202 = vmatpush1.bf16.msra.mxu1 %v7534_v39  ;;  %4017 = vmatprep.mubr.bf16.mxu1 %v8612_v58  ;;  %v520_v39 = vor.u32 %v10826_v25, %v508_v3  ;;  %v10811_v3 = vshll.u32 %v8649_v42, 16 }
  0xb4   : > { %v7527_v50 = vcombine.high %v1222_v40, %v1226_v41  ;;  %v1086_v8 = vld [vmem:[#allocation7 + $0x940] sm:$0xff]  ;;  %4090 = vmatprep.subr.bf16.mxu0 %v7399_v44  ;;  %v7526_v0 = vcombine.low %v1222_v40, %v1226_v41 }
  0xb5   : > { %v1090_v51 = vld [vmem:[#allocation7 + $0x960] sm:$0xff]  ;;  %4091 = vmatpush1.bf16.msra.mxu0 %v7398_v57 }
  0xb6   : > { %v1214_v52 = vld [vmem:[#allocation7 + $0xd40] sm:$0xff]  ;;  %v7391_v6 = vcombine.high %v1086_v8, %v1090_v51  ;;  %4203 = vmatprep.subr.bf16.mxu1 %v7527_v50  ;;  %v7390_v15 = vcombine.low %v1086_v8, %v1090_v51 }
  0xb7   : > { %v1218_v53 = vld [vmem:[#allocation7 + $0xd60] sm:$0xff]  ;;  %4204 = vmatpush1.bf16.msra.mxu1 %v7526_v0 }
  0xb8   : > { %v8621_v7 = vld [vmem:[%s8518_s5 + $0x30] ss:$8 sps:$4 sm:$0xff]   ;;  %v7519_v9 = vcombine.high %v1214_v52, %v1218_v53  ;;  %v7518_v18 = vcombine.low %v1214_v52, %v1218_v53  ;;  %4092 = vmatprep.subr.bf16.mxu0 %v7391_v6  ;;  %3905 = vmatmul.mubr.bf16.gmra.mxu0 %v8567_v4  ;;  %v8653_v46 = vld [vmem:[%s8518_s5 + $0x54] ss:$8 sps:$4 sm:$0xff]   ;;  %v544_v52 = vor.u32 %v10821_v36, %v532_v21  ;;  %v548_v53 = vrot.slane %v10814_v37, 1 }
  0xb9   : > { %v1078_v10 = vld [vmem:[#allocation7 + $0x900] sm:$0xff]  ;;  %v10816_v26 = vshll.u32 %v8621_v7, 16  ;;  %4093 = vmatpush1.bf16.msra.mxu0 %v7390_v15  ;;  %3914 = vmatprep.mubr.bf16.mxu0 %v8571_v14  ;;  %v10819_v2 = vshrl.u32 %v8621_v7, 16 }
  0xba   : > { %v1082_v11 = vld [vmem:[#allocation7 + $0x920] sm:$0xff]  ;;  %4205 = vmatprep.subr.bf16.mxu1 %v7519_v9  ;;  %4018 = vmatmul.mubr.bf16.gmra.mxu1 %v8633_v23 }
  0xbb   : > { %v1206_v12 = vld [vmem:[#allocation7 + $0xd00] sm:$0xff]  ;;  %v7383_v24 = vcombine.high %v1078_v10, %v1082_v11  ;;  %v7382_v33 = vcombine.low %v1078_v10, %v1082_v11  ;;  %4206 = vmatpush1.bf16.msra.mxu1 %v7518_v18  ;;  %v524_v40 = vrot.slane %v10816_v26, 1  ;;  %4027 = vmatprep.mubr.bf16.mxu1 %v8640_v35  ;;  %v8669_v18 = vsel %vm477_vm0, %v544_v52, %v548_v53 }
  0xbc   : > { %v1210_v13 = vld [vmem:[#allocation7 + $0xd20] sm:$0xff] }
  0xbd   : > { %v7511_v28 = vcombine.high %v1206_v12, %v1210_v13  ;;  %v1070_v29 = vld [vmem:[#allocation7 + $0x8c0] sm:$0xff]  ;;  %4094 = vmatprep.subr.bf16.mxu0 %v7383_v24  ;;  %v7510_v38 = vcombine.low %v1206_v12, %v1210_v13  ;;  %v8661_v57 = vsel %vm477_vm0, %v520_v39, %v524_v40  ;;  %v10810_v12 = vshll.u32 %v8653_v46, 16 }
  0xbe   : > { %v1074_v30 = vld [vmem:[#allocation7 + $0x8e0] sm:$0xff]  ;;  %4095 = vmatpush1.bf16.msra.mxu0 %v7382_v33  ;;  %v10815_v24 = vshrl.u32 %v8630_v22, 16 }
  0xbf   : > { %v1198_v31 = vld [vmem:[#allocation7 + $0xcc0] sm:$0xff]  ;;  %v7375_v41 = vcombine.high %v1070_v29, %v1074_v30  ;;  %4207 = vmatprep.subr.bf16.mxu1 %v7511_v28  ;;  %v7374_v8 = vcombine.low %v1070_v29, %v1074_v30  ;;  %v536_v29 = vor.u32 %v10819_v2, %v524_v40  ;;  %v540_v30 = vrot.slane %v10811_v3, 1 }
  0xc0   : > { %v1202_v32 = vld [vmem:[#allocation7 + $0xce0] sm:$0xff]  ;;  %4208 = vmatpush1.bf16.msra.mxu1 %v7510_v38  ;;  %3915 = vmatmul.mubr.bf16.gmra.mxu0 %v8584_v34  ;;  %v8680_v38 = vld [vmem:[%s8518_s5 + $0x64] ss:$8 sps:$4 sm:$0xff]  }
  0xc1   : > { %v7503_v43 = vcombine.high %v1198_v31, %v1202_v32  ;;  %v1062_v44 = vld [vmem:[#allocation7 + $0x880] sm:$0xff]  ;;  %v7502_v51 = vcombine.low %v1198_v31, %v1202_v32  ;;  %4096 = vmatprep.subr.bf16.mxu0 %v7375_v41  ;;  %3924 = vmatprep.mubr.bf16.mxu0 %v8596_v47 }
  0xc2   : > { %v1066_v45 = vld [vmem:[#allocation7 + $0x8a0] sm:$0xff]  ;;  %4028 = vmatmul.mubr.bf16.gmra.mxu1 %v8661_v57  ;;  %4097 = vmatpush1.bf16.msra.mxu0 %v7374_v8  ;;  %v10813_v8 = vshrl.u32 %v8649_v42, 16 }
  0xc3   : > { %v1190_v61 = vld [vmem:[#allocation7 + $0xc80] sm:$0xff]  ;;  %v7367_v0 = vcombine.high %v1062_v44, %v1066_v45  ;;  %4209 = vmatprep.subr.bf16.mxu1 %v7503_v43  ;;  %v7366_v15 = vcombine.low %v1062_v44, %v1066_v45  ;;  %v564_v43 = vrot.slane %v10810_v12, 1  ;;  %4037 = vmatprep.mubr.bf16.mxu1 %v8669_v18  ;;  %v560_v45 = vor.u32 %v10815_v24, %v548_v53 }
  0xc4   : > { %v1194_v50 = vld [vmem:[#allocation7 + $0xca0] sm:$0xff]  ;;  %4210 = vmatpush1.bf16.msra.mxu1 %v7502_v51 }
  0xc5   : > { %v7495_v6 = vcombine.high %v1190_v61, %v1194_v50  ;;  %v1054_v9 = vld [vmem:[#allocation7 + $0x840] sm:$0xff]  ;;  %4098 = vmatprep.subr.bf16.mxu0 %v7367_v0  ;;  %v7494_v28 = vcombine.low %v1190_v61, %v1194_v50  ;;  %v8689_v61 = vsel %vm477_vm0, %v536_v29, %v540_v30  ;;  %v552_v29 = vor.u32 %v10813_v8, %v540_v30 }
  0xc6   : > { %v1058_v10 = vld [vmem:[#allocation7 + $0x860] sm:$0xff]  ;;  %4099 = vmatpush1.bf16.msra.mxu0 %v7366_v15 }
  0xc7   : > { %v1182_v11 = vld [vmem:[#allocation7 + $0xc40] sm:$0xff]  ;;  %v7359_v31 = vcombine.high %v1054_v9, %v1058_v10  ;;  %4211 = vmatprep.subr.bf16.mxu1 %v7495_v6  ;;  %v7358_v40 = vcombine.low %v1054_v9, %v1058_v10  ;;  %v10817_v10 = vshll.u32 %v8680_v38, 16 }
  0xc8   : > { %v1186_v13 = vld [vmem:[#allocation7 + $0xc60] sm:$0xff]  ;;  %4212 = vmatpush1.bf16.msra.mxu1 %v7494_v28  ;;  %3925 = vmatmul.mubr.bf16.gmra.mxu0 %v8621_v7 }
  0xc9   : > { %v1046_v20 = vld [vmem:[#allocation7 + $0x800] sm:$0xff]  ;;  %v7487_v39 = vcombine.high %v1182_v11, %v1186_v13  ;;  %v7486_v44 = vcombine.low %v1182_v11, %v1186_v13  ;;  %4100 = vmatprep.subr.bf16.mxu0 %v7359_v31  ;;  %v8697_v11 = vsel %vm477_vm0, %v560_v45, %v564_v43  ;;  %v10818_v13 = vshrl.u32 %v8653_v46, 16  ;;  %3934 = vmatprep.mubr.bf16.mxu0 %v8630_v22 }
  0xca   : > { %v1050_v21 = vld [vmem:[#allocation7 + $0x820] sm:$0xff]  ;;  %4038 = vmatmul.mubr.bf16.gmra.mxu1 %v8689_v61  ;;  %4101 = vmatpush1.bf16.msra.mxu0 %v7358_v40  ;;  %v8705_v40 = vld [vmem:[%s8518_s5 + $0x60] ss:$8 sps:$4 sm:$0xff]   ;;  %v580_v30 = vrot.slane %v10817_v10, 1 }
  0xcb   : > { %v1174_v32 = vld [vmem:[#allocation7 + $0xc00] sm:$0xff]  ;;  %v7351_v50 = vcombine.high %v1046_v20, %v1050_v21  ;;  %4213 = vmatprep.subr.bf16.mxu1 %v7487_v39  ;;  %v7350_v53 = vcombine.low %v1046_v20, %v1050_v21  ;;  %4047 = vmatprep.mubr.bf16.mxu1 %v8697_v11  ;;  %v10822_v37 = vshll.u32 %v8705_v40, 16 }
  0xcc   : > { %v8677_v33 = vld [vmem:[%s8518_s5 + $0x50] ss:$8 sps:$4 sm:$0xff]   ;;  %4214 = vmatpush1.bf16.msra.mxu1 %v7486_v44  ;;  %v8709_v45 = vld [vmem:[%s8518_s5 + $0x74] ss:$8 sps:$4 sm:$0xff]  }
  0xcd   : > { %v1178_v41 = vld [vmem:[#allocation7 + $0xc20] sm:$0xff]  ;;  %v10812_v51 = vshll.u32 %v8677_v33, 16  ;;  %4102 = vmatprep.subr.bf16.mxu0 %v7351_v50  ;;  %v576_v50 = vor.u32 %v10818_v13, %v564_v43  ;;  %v10823_v8 = vshrl.u32 %v8677_v33, 16  ;;  %v344_v43 = vld [vmem:[%s8526_s6] sm:$0xff]  ;;  %v572_v13 = vrot.slane %v10822_v37, 1 }
  0xce   : > { %v1166_v52 = vld [vmem:[#allocation7 + $0xbc0] sm:$0xff]  ;;  %v7479_v6 = vcombine.high %v1174_v32, %v1178_v41  ;;  %v7478_v28 = vcombine.low %v1174_v32, %v1178_v41  ;;  %4103 = vmatpush1.bf16.msra.mxu0 %v7350_v53  ;;  %v8760_v5 = vcombine.low %v344_v43, %v344_v43 }
  0xcf   : > { %v1170_v0 = vld [vmem:[#allocation7 + $0xbe0] sm:$0xff]  ;;  %v556_v31 = vrot.slane %v10812_v51, 1  ;;  %v8726_v53 = vsel %vm477_vm0, %v576_v50, %v580_v30 }
  0xd0   : > { %v1294_v15 = vld [vmem:[#allocation7 + $0xfc0] sm:$0xff]  ;;  %v7471_v39 = vcombine.high %v1166_v52, %v1170_v0  ;;  %4215 = vmatprep.subr.bf16.mxu1 %v7479_v6  ;;  %v7470_v41 = vcombine.low %v1166_v52, %v1170_v0  ;;  %3935 = vmatmul.mubr.bf16.gmra.mxu0 %v8649_v42 }
  0xd1   : > { %v1298_v9 = vld [vmem:[#allocation7 + $0xfe0] sm:$0xff]  ;;  %4216 = vmatpush1.bf16.msra.mxu1 %v7478_v28  ;;  %v8717_v6 = vsel %vm477_vm0, %v552_v29, %v556_v31  ;;  %v10828_v29 = vshrl.u32 %v8680_v38, 16  ;;  %3944 = vmatprep.mubr.bf16.mxu0 %v8653_v46 }
  0xd2   : > { %v1158_v12 = vld [vmem:[#allocation7 + $0xb80] sm:$0xff]  ;;  %v7599_v20 = vcombine.high %v1294_v15, %v1298_v9  ;;  %v7598_v44 = vcombine.low %v1294_v15, %v1298_v9  ;;  %4104 = vmatprep.subr.bf16.mxu0 %v7471_v39  ;;  %v10824_v15 = vshll.u32 %v8709_v45, 16  ;;  %4048 = vmatmul.mubr.bf16.gmra.mxu1 %v8717_v6 }
  0xd3   : > { %v1162_v3 = vld [vmem:[#allocation7 + $0xba0] sm:$0xff]  ;;  %4105 = vmatpush2.bf16.msra.mxu0 %v7470_v41  ;;  %4057 = vmatprep.mubr.bf16.mxu1 %v8726_v53 }
  0xd4   : > { %v1286_v21 = vld [vmem:[#allocation7 + $0xf80] sm:$0xff]  ;;  %v7463_v51 = vcombine.high %v1158_v12, %v1162_v3  ;;  %4217 = vmatprep.subr.bf16.mxu1 %v7599_v20  ;;  %v7462_v9 = vcombine.low %v1158_v12, %v1162_v3  ;;  %v568_v20 = vor.u32 %v10823_v8, %v556_v31  ;;  %v10836_v8 = vshrl.u32 %v8705_v40, 16 }
  0xd5   : > { %v1290_v32 = vld [vmem:[#allocation7 + $0xfa0] sm:$0xff]  ;;  %4218 = vmatpush2.bf16.msra.mxu1 %v7598_v44  ;;  %v592_v44 = vor.u32 %v10828_v29, %v580_v30 }
  0xd6   : > { %v1150_v24 = vld [vmem:[#allocation7 + $0xb40] sm:$0xff]  ;;  %v7591_v52 = vcombine.high %v1286_v21, %v1290_v32  ;;  %4106 = vmatprep.subr.bf16.mxu0 %v7463_v51  ;;  %v7590_v39 = vcombine.low %v1286_v21, %v1290_v32  ;;  %v596_v51 = vrot.slane %v10824_v15, 1  ;;  %v8739_v21 = vcombine.high %v344_v43, %v344_v43 }
  0xd7   : > { %v1154_v26 = vld [vmem:[#allocation7 + $0xb60] sm:$0xff]  ;;  %4107 = vmatpush2.bf16.msra.mxu0 %v7462_v9  ;;  %v584_v9 = vor.u32 %v10836_v8, %v572_v13  ;;  %v10955_v8 = vshll.u32 %v8621_v7, 16 }
  0xd8   : > { %v1278_v10 = vld [vmem:[#allocation7 + $0xf40] sm:$0xff]  ;;  %v7455_v2 = vcombine.high %v1150_v24, %v1154_v26  ;;  %4219 = vmatprep.subr.bf16.mxu1 %v7591_v52  ;;  %v7454_v31 = vcombine.low %v1150_v24, %v1154_v26  ;;  %v8745_v52 = vsel %vm477_vm0, %v568_v20, %v572_v13  ;;  %v10835_v24 = vshrl.u32 %v8709_v45, 16  ;;  %3945 = vmatmul.mubr.bf16.gmra.mxu0 %v8677_v33 }
  0xd9   : > { %v1282_v0 = vld [vmem:[#allocation7 + $0xf60] sm:$0xff]  ;;  %4220 = vmatpush2.bf16.msra.mxu1 %v7590_v39  ;;  %10935 = vst [vmem:[#allocation21_spill] sm:$0xff] %v8745_v52  ;;  %3954 = vmatprep.mubr.bf16.mxu0 %v8680_v38 }
  0xda   : > { %v1142_v28 = vld [vmem:[#allocation7 + $0xb00] sm:$0xff]  ;;  %v7583_v3 = vcombine.high %v1278_v10, %v1282_v0  ;;  %v7582_v32 = vcombine.low %v1278_v10, %v1282_v0  ;;  %4108 = vmatprep.subr.bf16.mxu0 %v7455_v2  ;;  %v10831_v10 = vshll.u32 %v8739_v21, 16  ;;  %4058 = vmatmul.mubr.bf16.gmra.mxu1 %v8745_v52  ;;  %v8754_v0 = vsel %vm477_vm0, %v592_v44, %v596_v51 }
  0xdb   : > { %v1146_v63 = vld [vmem:[#allocation7 + $0xb20] sm:$0xff]  ;;  %4109 = vmatpush2.bf16.msra.mxu0 %v7454_v31  ;;  %10936 = vst [vmem:[#allocation22_spill] sm:$0xff] %v8754_v0  ;;  %4067 = vmatprep.mubr.bf16.mxu1 %v8754_v0  ;;  %v10833_v44 = vshll.u32 %v8760_v5, 16 }
  0xdc   : > { %v1270_v36 = vld [vmem:[#allocation7 + $0xf00] sm:$0xff]  ;;  %v7447_v37 = vcombine.high %v1142_v28, %v1146_v63  ;;  %4221 = vmatprep.subr.bf16.mxu1 %v7583_v3  ;;  %v7446_v2 = vcombine.low %v1142_v28, %v1146_v63 }
  0xdd   : > { %v8734_v41 = vld [vmem:[%s8518_s5 + $0x70] ss:$8 sps:$4 sm:$0xff]   ;;  %4222 = vmatpush2.bf16.msra.mxu1 %v7582_v32 }
  0xde   : > { %v1274_v12 = vld [vmem:[#allocation7 + $0xf20] sm:$0xff]  ;;  %v10832_v15 = vshll.u32 %v8734_v41, 16  ;;  %4110 = vmatprep.subr.bf16.mxu0 %v7447_v37  ;;  %v612_v37 = vrot.slane %v10831_v10, 1  ;;  %v10834_v32 = vshrl.u32 %v8734_v41, 16 }
  0xdf   : > { %v1134_v50 = vld [vmem:[#allocation7 + $0xac0] sm:$0xff]  ;;  %v7575_v26 = vcombine.high %v1270_v36, %v1274_v12  ;;  %v7574_v30 = vcombine.low %v1270_v36, %v1274_v12  ;;  %4111 = vmatpush2.bf16.msra.mxu0 %v7446_v2  ;;  %v608_v12 = vor.u32 %v10835_v24, %v596_v51  ;;  %v851_v24 = vld [vmem:[#allocation7 + $0x1e8] sm:$0xff] }
  0xe0   : > { %v1138_v49 = vld [vmem:[#allocation7 + $0xae0] sm:$0xff]  ;;  %v588_v39 = vrot.slane %v10832_v15, 1  ;;  %3955 = vmatmul.mubr.bf16.gmra.mxu0 %v8705_v40 }
  0xe1   : > { %v1262_v25 = vld [vmem:[#allocation7 + $0xec0] sm:$0xff]  ;;  %v7439_v20 = vcombine.high %v1134_v50, %v1138_v49  ;;  %4223 = vmatprep.subr.bf16.mxu1 %v7575_v26  ;;  %v7438_v13 = vcombine.low %v1134_v50, %v1138_v49  ;;  %3964 = vmatprep.mubr.bf16.mxu0 %v8709_v45 }
  0xe2   : > { %v1266_v27 = vld [vmem:[#allocation7 + $0xee0] sm:$0xff]  ;;  %4224 = vmatpush2.bf16.msra.mxu1 %v7574_v30  ;;  %v8769_v43 = vsel %vm477_vm0, %v584_v9, %v588_v39  ;;  %v600_v50 = vor.u32 %v10834_v32, %v588_v39  ;;  %v604_v30 = vrot.slane %v10833_v44, 1  ;;  %v700_v39 = vrot.slane %v479_v16, 1  ;;  %v847_v32 = vld [vmem:[#allocation7 + $0x1c8] sm:$0xff] }
  0xe3   : > { %v1126_v3 = vld [vmem:[#allocation7 + $0xa80] sm:$0xff]  ;;  %v7567_v63 = vcombine.high %v1262_v25, %v1266_v27  ;;  %v7566_v28 = vcombine.low %v1262_v25, %v1266_v27  ;;  %10937 = vst [vmem:[#allocation23_spill] sm:$0xff] %v8769_v43  ;;  %4112 = vmatprep.subr.bf16.mxu0 %v7439_v20  ;;  %4068 = vmatmul.mubr.bf16.gmra.mxu1 %v8769_v43 }
  0xe4   : > { %v1130_v29 = vld [vmem:[#allocation7 + $0xaa0] sm:$0xff]  ;;  %4113 = vmatpush2.bf16.msra.mxu0 %v7438_v13  ;;  %v8776_v25 = vsel %vm477_vm0, %v608_v12, %v612_v37 }
  0xe5   : > { %v1254_v60 = vld [vmem:[#allocation7 + $0xe80] sm:$0xff]  ;;  %v7431_v31 = vcombine.high %v1126_v3, %v1130_v29  ;;  %4225 = vmatprep.subr.bf16.mxu1 %v7567_v63  ;;  %v7430_v27 = vcombine.low %v1126_v3, %v1130_v29  ;;  %10938 = vst [vmem:[#allocation24_spill] sm:$0xff] %v8776_v25  ;;  %v652_v3 = vrot.slane %v8541_v56, 1  ;;  %4077 = vmatprep.mubr.bf16.mxu1 %v8776_v25 }
  0xe6   : > { %v1258_v36 = vld [vmem:[#allocation7 + $0xea0] sm:$0xff]  ;;  %4226 = vmatpush2.bf16.msra.mxu1 %v7566_v28  ;;  %v703_v28 = vrot.slane %v502_v48, 1 }
  0xe7   : > { %v1118_v26 = vld [vmem:[#allocation7 + $0xa40] sm:$0xff]  ;;  %v7559_v2 = vcombine.high %v1254_v60, %v1258_v36  ;;  %4114 = vmatprep.subr.bf16.mxu0 %v7431_v31  ;;  %v7558_v51 = vcombine.low %v1254_v60, %v1258_v36  ;;  %v653_v60 = vrot.slane %v8544_v59, 1  ;;  %v704_v36 = vrot.slane %v486_v19, 2 }
  0xe8   : > { %v1122_v10 = vld [vmem:[#allocation7 + $0xa60] sm:$0xff]  ;;  %4115 = vmatpush2.bf16.msra.mxu0 %v7430_v27  ;;  %v8793_v31 = vsel %vm477_vm0, %v600_v50, %v604_v30  ;;  %v10940_v59 = vshll.u32 %v8564_v54, 16  ;;  %v979_v27 = vld [vmem:[#allocation7 + $0x5e8] sm:$0xff]  ;;  %v10943_v30 = vshll.u32 %v8571_v14, 16 }
  0xe9   : > { %v1246_v15 = vld [vmem:[#allocation7 + $0xe40] sm:$0xff]  ;;  %v7423_v9 = vcombine.high %v1118_v26, %v1122_v10  ;;  %4227 = vmatprep.subr.bf16.mxu1 %v7559_v2  ;;  %v7422_v12 = vcombine.low %v1118_v26, %v1122_v10  ;;  %10939 = vst [vmem:[#allocation25_spill] sm:$0xff] %v8793_v31  ;;  %3965 = vmatmul.mubr.bf16.gmra.mxu0 %v8734_v41  ;;  %v975_v26 = vld [vmem:[#allocation7 + $0x5c8] sm:$0xff] }
  0xea   : > { %v1250_v49 = vld [vmem:[#allocation7 + $0xe60] sm:$0xff]  ;;  %4228 = vmatpush2.bf16.msra.mxu1 %v7558_v51  ;;  %v701_v44 = vrot.slane %v10940_v59, 2  ;;  %v8799_v10 = vsel %vm648_vm2, %v652_v3, %v653_v60  ;;  %v10942_v51 = vshrl.u32 %v8571_v14, 16  ;;  %v839_v3 = vld [vmem:[#allocation7 + $0x188] sm:$0xff] }
  0xeb   : > { %v1110_v20 = vld [vmem:[#allocation7 + $0xa00] sm:$0xff]  ;;  %v7551_v13 = vcombine.high %v1246_v15, %v1250_v49  ;;  %4116 = vmatprep.subr.bf16.mxu0 %v7423_v9  ;;  %v7550_v56 = vcombine.low %v1246_v15, %v1250_v49  ;;  %10941 = vst [vmem:[#allocation26_spill] sm:$0xff] %v8799_v10  ;;  %4078 = vmatmul.mubr.bf16.gmra.mxu1 %v8793_v31  ;;  %v649_v15 = vrot.slane %v8564_v54, 1  ;;  %v650_v49 = vrot.slane %v8567_v4, 1  ;;  %v967_v54 = vld [vmem:[#allocation7 + $0x588] sm:$0xff] }
  0xec   : > { %v1114_v63 = vld [vmem:[#allocation7 + $0xa20] sm:$0xff]  ;;  %4117 = vmatpush2.bf16.msra.mxu0 %v7422_v12  ;;  %v718_v50 = vrot.slane %v10942_v51, 1  ;;  %v719_v9 = vrot.slane %v10943_v30, 2  ;;  %4120 = vmatprep.mubr.bf16.mxu0 %v8799_v10  ;;  %v971_v4 = vld [vmem:[#allocation7 + $0x5a8] sm:$0xff]  ;;  %v657_v12 = vrot.slane %v8571_v14, 1  ;;  %v10947_v51 = vshll.u32 %v8584_v34, 16 }
  0xed   : > { %v1238_v29 = vld [vmem:[#allocation7 + $0xe00] sm:$0xff]  ;;  %v7415_v2 = vcombine.high %v1110_v20, %v1114_v63  ;;  %4229 = vmatprep.subr.bf16.mxu1 %v7551_v13  ;;  %v7414_v19 = vcombine.low %v1110_v20, %v1114_v63  ;;  %v702_v20 = vor.u32 %v701_v44, %v700_v39  ;;  %v705_v63 = vor.u32 %v704_v36, %v703_v28 }
  0xee   : > { %v1242_v37 = vld [vmem:[#allocation7 + $0xe20] sm:$0xff]  ;;  %4230 = vmatpush2.bf16.msra.mxu1 %v7550_v56  ;;  %v7153_v13 = vcombine.high %v847_v32, %v851_v24  ;;  %4233 = vmatprep.mubr.bf16.mxu1 %v8608_v55  ;;  %v8812_v59 = vsel %vm648_vm2, %v649_v15, %v650_v49  ;;  %v7152_v56 = vcombine.low %v847_v32, %v851_v24  ;;  %v715_v30 = vrot.slane %v10947_v51, 2  ;;  %v835_v15 = vld [vmem:[#allocation7 + $0x168] sm:$0xff] }
  0xef   : > { %v7543_v16 = vcombine.high %v1238_v29, %v1242_v37  ;;  %v7542_v48 = vcombine.low %v1238_v29, %v1242_v37  ;;  %4118 = vmatprep.subr.bf16.mxu0 %v7415_v2  ;;  %v7281_v29 = vcombine.high %v975_v26, %v979_v27  ;;  %v843_v37 = vld [vmem:[#allocation7 + $0x1a8] sm:$0xff]  ;;  %10944 = vst [vmem:[#allocation27_spill] sm:$0xff] %v8812_v59  ;;  %v10946_v2 = vshrl.u32 %v8584_v34, 16 }
  0xf0   : > { %4119 = vmatpush2.bf16.msra.mxu0 %v7414_v19  ;;  %v7280_v44 = vcombine.low %v975_v26, %v979_v27  ;;  %v720_v39 = vor.u32 %v719_v9, %v718_v50  ;;  %v8815_v36 = vsel %vm699_vm1, %v702_v20, %v705_v63  ;;  %v7145_v28 = vcombine.high %v839_v3, %v843_v37  ;;  %v831_v19 = vld [vmem:[#allocation7 + $0x148] sm:$0xff] }
  0xf1   : > { %4231 = vmatprep.subr.bf16.mxu1 %v7543_v16  ;;  %10945 = vst [vmem:[#allocation28_spill] sm:$0xff] %v8815_v36  ;;  %4314 = vmatprep.subr.bf16.mxu0 %v7153_v13  ;;  %v714_v16 = vrot.slane %v10946_v2, 1  ;;  %v7273_v14 = vcombine.high %v967_v54, %v971_v4  ;;  %v7144_v24 = vcombine.low %v839_v3, %v843_v37  ;;  %v963_v26 = vld [vmem:[#allocation7 + $0x568] sm:$0xff]  ;;  %v655_v50 = vrot.slane %v8584_v34, 1 }
  0xf2   : > { %4232 = vmatpush2.bf16.msra.mxu1 %v7542_v48  ;;  %v8823_v32 = vsel %vm648_vm2, %v653_v60, %v657_v12  ;;  %v959_v48 = vld [vmem:[#allocation7 + $0x548] sm:$0xff]  ;;  %v8828_v27 = vsel %vm699_vm1, %v8603_v1, %v720_v39  ;;  %v10950_v9 = vshrl.u32 %v8596_v47, 16  ;;  %v10951_v13 = vshll.u32 %v8596_v47, 16 }
  0xf3   : > { %4427 = vmatprep.subr.bf16.mxu1 %v7281_v29  ;;  %4121 = vmatmul.mubr.bf16.vlgmr.msra.gmra.mxu0 %v8812_v59  ;;  %10948 = vst [vmem:[#allocation29_spill] sm:$0xff] %v8823_v32  ;;  %10949 = vst [vmem:[#allocation30_spill] sm:$0xff] %v8828_v27  ;;  %v7272_v60 = vcombine.low %v967_v54, %v971_v4  ;;  %v716_v3 = vor.u32 %v715_v30, %v714_v16  ;;  %v823_v2 = vld [vmem:[#allocation7 + $0x108] sm:$0xff]  ;;  %v10954_v30 = vshrl.u32 %v8621_v7, 16 }
  0xf4   : > { %4315 = vmatpush1.bf16.msra.mxu0 %v7152_v56  ;;  %v726_v20 = vrot.slane %v10950_v9, 1  ;;  %v727_v29 = vrot.slane %v10951_v13, 2  ;;  %v7137_v37 = vcombine.high %v831_v19, %v835_v15  ;;  %4130 = vmatprep.mubr.bf16.mxu0 %v8823_v32  ;;  %v7265_v56 = vcombine.high %v959_v48, %v963_v26  ;;  %v827_v1 = vld [vmem:[#allocation7 + $0x128] sm:$0xff] }
  0xf5   : > { %4234 = vmatmul.mubr.bf16.vlgmr.msra.gmra.mxu1 %v8815_v36  ;;  %4316 = vmatprep.subr.bf16.mxu0 %v7145_v28  ;;  %v951_v34 = vld [vmem:[#allocation7 + $0x508] sm:$0xff]  ;;  %v661_v9 = vrot.slane %v8596_v47, 1  ;;  %v8839_v13 = vsel %vm648_vm2, %v650_v49, %v655_v50  ;;  %v7264_v54 = vcombine.low %v959_v48, %v963_v26  ;;  %v8842_v28 = vsel %vm699_vm1, %v705_v63, %v716_v3 }
  0xf6   : > { %4428 = vmatpush1.bf16.msra.mxu1 %v7280_v44  ;;  %4243 = vmatprep.mubr.bf16.mxu1 %v8828_v27  ;;  %v955_v51 = vld [vmem:[#allocation7 + $0x528] sm:$0xff]  ;;  %10952 = vst [vmem:[#allocation31_spill] sm:$0xff] %v8839_v13  ;;  %v7136_v44 = vcombine.low %v831_v19, %v835_v15  ;;  %v728_v4 = vor.u32 %v727_v29, %v726_v20  ;;  %10953 = vst [vmem:[#allocation32_spill] sm:$0xff] %v8842_v28  ;;  %v723_v27 = vrot.slane %v10955_v8, 2 }
  0xf7   : > { %4429 = vmatprep.subr.bf16.mxu1 %v7273_v14  ;;  %v7129_v16 = vcombine.high %v823_v2, %v827_v1  ;;  %v722_v14 = vrot.slane %v10954_v30, 1  ;;  %v7257_v47 = vcombine.high %v951_v34, %v955_v51  ;;  %v819_v49 = vld [vmem:[#allocation7 + $0xe8] sm:$0xff]  ;;  %v7128_v19 = vcombine.low %v823_v2, %v827_v1 }
  0xf8   : > { %4317 = vmatpush1.bf16.msra.mxu0 %v7144_v24  ;;  %v815_v24 = vld [vmem:[#allocation7 + $0xc8] sm:$0xff]  ;;  %v8850_v15 = vsel %vm648_vm2, %v657_v12, %v661_v9  ;;  %v8854_v26 = vsel %vm699_vm1, %v720_v39, %v728_v4  ;;  %v659_v8 = vrot.slane %v8621_v7, 1  ;;  %v10958_v20 = vshrl.u32 %v8630_v22, 16 }
  0xf9   : > { %4318 = vmatprep.subr.bf16.mxu0 %v7137_v37  ;;  %10956 = vst [vmem:[#allocation33_spill] sm:$0xff] %v8850_v15  ;;  %v943_v63 = vld [vmem:[#allocation7 + $0x4c8] sm:$0xff]  ;;  %10957 = vst [vmem:[#allocation34_spill] sm:$0xff] %v8854_v26  ;;  %v7256_v12 = vcombine.low %v951_v34, %v955_v51  ;;  %v7121_v2 = vcombine.high %v815_v24, %v819_v49 }
  0xfa   : > { %4430 = vmatpush1.bf16.msra.mxu1 %v7272_v60  ;;  %v947_v48 = vld [vmem:[#allocation7 + $0x4e8] sm:$0xff]  ;;  %v734_v29 = vrot.slane %v10958_v20, 1  ;;  %v10959_v60 = vshll.u32 %v8630_v22, 16  ;;  %v665_v20 = vrot.slane %v8630_v22, 1 }
  0xfb   : > { %4431 = vmatprep.subr.bf16.mxu1 %v7265_v56  ;;  %4131 = vmatmul.mubr.bf16.gmra.mxu0 %v8839_v13  ;;  %v724_v56 = vor.u32 %v723_v27, %v722_v14  ;;  %v7249_v1 = vcombine.high %v943_v63, %v947_v48  ;;  %v811_v39 = vld [vmem:[#allocation7 + $0xa8] sm:$0xff]  ;;  %v7248_v34 = vcombine.low %v943_v63, %v947_v48  ;;  %v10962_v14 = vshrl.u32 %v8649_v42, 16 }
  0xfc   : > { %4319 = vmatpush1.bf16.msra.mxu0 %v7136_v44  ;;  %v735_v37 = vrot.slane %v10959_v60, 2  ;;  %4140 = vmatprep.mubr.bf16.mxu0 %v8850_v15  ;;  %v807_v44 = vld [vmem:[#allocation7 + $0x88] sm:$0xff]  ;;  %v8865_v60 = vsel %vm648_vm2, %v655_v50, %v659_v8 }
  0xfd   : > { %4244 = vmatmul.mubr.bf16.gmra.mxu1 %v8842_v28  ;;  %4320 = vmatprep.subr.bf16.mxu0 %v7129_v16  ;;  %v935_v7 = vld [vmem:[#allocation7 + $0x488] sm:$0xff]  ;;  %10960 = vst [vmem:[#allocation35_spill] sm:$0xff] %v8865_v60  ;;  %v8868_v51 = vsel %vm699_vm1, %v716_v3, %v724_v56  ;;  %v7113_v16 = vcombine.high %v807_v44, %v811_v39 }
  0xfe   : > { %4432 = vmatpush1.bf16.msra.mxu1 %v7264_v54  ;;  %4253 = vmatprep.mubr.bf16.mxu1 %v8854_v26  ;;  %v939_v30 = vld [vmem:[#allocation7 + $0x4a8] sm:$0xff]  ;;  %v7120_v54 = vcombine.low %v815_v24, %v819_v49  ;;  %v736_v27 = vor.u32 %v735_v37, %v734_v29  ;;  %10961 = vst [vmem:[#allocation36_spill] sm:$0xff] %v8868_v51  ;;  %v10963_v26 = vshll.u32 %v8649_v42, 16  ;;  %v10966_v29 = vshrl.u32 %v8653_v46, 16 }
  0xff   : > { %4433 = vmatprep.subr.bf16.mxu1 %v7257_v47  ;;  %v730_v47 = vrot.slane %v10962_v14, 1  ;;  %v7241_v22 = vcombine.high %v935_v7, %v939_v30  ;;  %v803_v50 = vld [vmem:[#allocation7 + $0x68] sm:$0xff]  ;;  %v7112_v24 = vcombine.low %v807_v44, %v811_v39  ;;  %v8876_v49 = vsel %vm648_vm2, %v661_v9, %v665_v20 }
 0x100   : > { %4321 = vmatpush1.bf16.msra.mxu0 %v7128_v19  ;;  %v731_v15 = vrot.slane %v10963_v26, 2  ;;  %v799_v19 = vld [vmem:[#allocation7 + $0x48] sm:$0xff]  ;;  %10964 = vst [vmem:[#allocation37_spill] sm:$0xff] %v8876_v49  ;;  %v8880_v48 = vsel %vm699_vm1, %v728_v4, %v736_v27  ;;  %v663_v26 = vrot.slane %v8649_v42, 1  ;;  %v742_v37 = vrot.slane %v10966_v29, 1 }
 0x101   : > { %4322 = vmatprep.subr.bf16.mxu0 %v7121_v2  ;;  %v927_v3 = vld [vmem:[#allocation7 + $0x448] sm:$0xff]  ;;  %10965 = vst [vmem:[#allocation38_spill] sm:$0xff] %v8880_v48  ;;  %v7240_v9 = vcombine.low %v935_v7, %v939_v30  ;;  %v7105_v44 = vcombine.high %v799_v19, %v803_v50  ;;  %v669_v29 = vrot.slane %v8653_v46, 1 }
 0x102   : > { %4434 = vmatpush1.bf16.msra.mxu1 %v7256_v12  ;;  %v931_v63 = vld [vmem:[#allocation7 + $0x468] sm:$0xff]  ;;  %v10967_v12 = vshll.u32 %v8653_v46, 16 }
 0x103   : > { %4435 = vmatprep.subr.bf16.mxu1 %v7249_v1  ;;  %4141 = vmatmul.mubr.bf16.gmra.mxu0 %v8865_v60  ;;  %v732_v1 = vor.u32 %v731_v15, %v730_v47  ;;  %v7233_v39 = vcombine.high %v927_v3, %v931_v63  ;;  %v795_v4 = vld [vmem:[#allocation7 + $0x28] sm:$0xff]  ;;  %v7232_v7 = vcombine.low %v927_v3, %v931_v63  ;;  %v10970_v47 = vshrl.u32 %v8677_v33, 16 }
 0x104   : > { %4323 = vmatpush1.bf16.msra.mxu0 %v7120_v54  ;;  %v743_v2 = vrot.slane %v10967_v12, 2  ;;  %4150 = vmatprep.mubr.bf16.mxu0 %v8876_v49  ;;  %v791_v54 = vld [vmem:[#allocation7 + $0x8] sm:$0xff]  ;;  %v8891_v12 = vsel %vm648_vm2, %v659_v8, %v663_v26 }
 0x105   : > { %4254 = vmatmul.mubr.bf16.gmra.mxu1 %v8868_v51  ;;  %4324 = vmatprep.subr.bf16.mxu0 %v7113_v16  ;;  %v919_v42 = vld [vmem:[#allocation7 + $0x408] sm:$0xff]  ;;  %10968 = vst [vmem:[#allocation39_spill] sm:$0xff] %v8891_v12  ;;  %v8894_v30 = vsel %vm699_vm1, %v724_v56, %v732_v1  ;;  %v7097_v16 = vcombine.high %v791_v54, %v795_v4 }
 0x106   : > { %4436 = vmatpush1.bf16.msra.mxu1 %v7248_v34  ;;  %4263 = vmatprep.mubr.bf16.mxu1 %v8880_v48  ;;  %v923_v14 = vld [vmem:[#allocation7 + $0x428] sm:$0xff]  ;;  %v7104_v34 = vcombine.low %v799_v19, %v803_v50  ;;  %v744_v15 = vor.u32 %v743_v2, %v742_v37  ;;  %10969 = vst [vmem:[#allocation40_spill] sm:$0xff] %v8894_v30  ;;  %v10971_v48 = vshll.u32 %v8677_v33, 16  ;;  %v10974_v37 = vshrl.u32 %v8680_v38, 16 }
 0x107   : > { %4437 = vmatprep.subr.bf16.mxu1 %v7241_v22  ;;  %v738_v22 = vrot.slane %v10970_v47, 1  ;;  %v7225_v46 = vcombine.high %v919_v42, %v923_v14  ;;  %v915_v8 = vld [vmem:[#allocation7 + $0x3e8] sm:$0xff]  ;;  %v7096_v19 = vcombine.low %v791_v54, %v795_v4  ;;  %v8902_v50 = vsel %vm648_vm2, %v665_v20, %v669_v29 }
 0x108   : > { %4325 = vmatpush1.bf16.msra.mxu0 %v7112_v24  ;;  %v739_v49 = vrot.slane %v10971_v48, 2  ;;  %v911_v24 = vld [vmem:[#allocation7 + $0x3c8] sm:$0xff]  ;;  %10972 = vst [vmem:[#allocation41_spill] sm:$0xff] %v8902_v50  ;;  %v8906_v63 = vsel %vm699_vm1, %v736_v27, %v744_v15  ;;  %v667_v48 = vrot.slane %v8677_v33, 1  ;;  %v750_v2 = vrot.slane %v10974_v37, 1 }
 0x109   : > { %4326 = vmatprep.subr.bf16.mxu0 %v7105_v44  ;;  %v1039_v56 = vld [vmem:[#allocation7 + $0x7c8] sm:$0xff]  ;;  %10973 = vst [vmem:[#allocation42_spill] sm:$0xff] %v8906_v63  ;;  %v7224_v20 = vcombine.low %v919_v42, %v923_v14  ;;  %v7217_v54 = vcombine.high %v911_v24, %v915_v8  ;;  %v673_v37 = vrot.slane %v8680_v38, 1 }
 0x10a   : > { %4438 = vmatpush1.bf16.msra.mxu1 %v7240_v9  ;;  %v1043_v3 = vld [vmem:[#allocation7 + $0x7e8] sm:$0xff]  ;;  %v10975_v9 = vshll.u32 %v8680_v38, 16 }
 0x10b   : > { %4439 = vmatprep.subr.bf16.mxu1 %v7233_v39  ;;  %4151 = vmatmul.mubr.bf16.gmra.mxu0 %v8891_v12  ;;  %v740_v39 = vor.u32 %v739_v49, %v738_v22  ;;  %v7345_v4 = vcombine.high %v1039_v56, %v1043_v3  ;;  %v907_v27 = vld [vmem:[#allocation7 + $0x3a8] sm:$0xff]  ;;  %v7344_v42 = vcombine.low %v1039_v56, %v1043_v3  ;;  %v10978_v22 = vshrl.u32 %v8705_v40, 16 }
 0x10c   : > { %4327 = vmatpush1.bf16.msra.mxu0 %v7104_v34  ;;  %v751_v44 = vrot.slane %v10975_v9, 2  ;;  %4160 = vmatprep.mubr.bf16.mxu0 %v8902_v50  ;;  %v903_v34 = vld [vmem:[#allocation7 + $0x388] sm:$0xff]  ;;  %v8917_v9 = vsel %vm648_vm2, %v663_v26, %v667_v48 }
 0x10d   : > { %4264 = vmatmul.mubr.bf16.gmra.mxu1 %v8894_v30  ;;  %4328 = vmatprep.subr.bf16.mxu0 %v7097_v16  ;;  %v1031_v33 = vld [vmem:[#allocation7 + $0x788] sm:$0xff]  ;;  %10976 = vst [vmem:[#allocation43_spill] sm:$0xff] %v8917_v9  ;;  %v8920_v14 = vsel %vm699_vm1, %v732_v1, %v740_v39  ;;  %v7209_v16 = vcombine.high %v903_v34, %v907_v27 }
 0x10e   : > { %4440 = vmatpush1.bf16.msra.mxu1 %v7232_v7  ;;  %4273 = vmatprep.mubr.bf16.mxu1 %v8906_v63  ;;  %v1035_v47 = vld [vmem:[#allocation7 + $0x7a8] sm:$0xff]  ;;  %v7216_v7 = vcombine.low %v911_v24, %v915_v8  ;;  %v752_v49 = vor.u32 %v751_v44, %v750_v2  ;;  %10977 = vst [vmem:[#allocation44_spill] sm:$0xff] %v8920_v14  ;;  %v10979_v63 = vshll.u32 %v8705_v40, 16  ;;  %v10982_v2 = vshrl.u32 %v8709_v45, 16 }
 0x10f   : > { %4441 = vmatprep.subr.bf16.mxu1 %v7225_v46  ;;  %v746_v46 = vrot.slane %v10978_v22, 1  ;;  %v7337_v38 = vcombine.high %v1031_v33, %v1035_v47  ;;  %v899_v26 = vld [vmem:[#allocation7 + $0x368] sm:$0xff]  ;;  %v7208_v24 = vcombine.low %v903_v34, %v907_v27  ;;  %v8928_v8 = vsel %vm648_vm2, %v669_v29, %v673_v37 }
 0x110   : > { %4329 = vmatpush1.bf16.msra.mxu0 %v7096_v19  ;;  %v747_v50 = vrot.slane %v10979_v63, 2  ;;  %v895_v19 = vld [vmem:[#allocation7 + $0x348] sm:$0xff]  ;;  %10980 = vst [vmem:[#allocation45_spill] sm:$0xff] %v8928_v8  ;;  %v8932_v3 = vsel %vm699_vm1, %v744_v15, %v752_v49  ;;  %v671_v63 = vrot.slane %v8705_v40, 1  ;;  %v758_v44 = vrot.slane %v10982_v2, 1 }
 0x111   : > { %4330 = vmatprep.subr.bf16.mxu0 %v7217_v54  ;;  %v1023_v1 = vld [vmem:[#allocation7 + $0x748] sm:$0xff]  ;;  %10981 = vst [vmem:[#allocation46_spill] sm:$0xff] %v8932_v3  ;;  %v7336_v29 = vcombine.low %v1031_v33, %v1035_v47  ;;  %v7201_v34 = vcombine.high %v895_v19, %v899_v26  ;;  %v7200_v40 = vcombine.low %v895_v19, %v899_v26  ;;  %v677_v2 = vrot.slane %v8709_v45, 1 }
 0x112   : > { %4442 = vmatpush1.bf16.msra.mxu1 %v7224_v20  ;;  %v1027_v56 = vld [vmem:[#allocation7 + $0x768] sm:$0xff]  ;;  %v10983_v20 = vshll.u32 %v8709_v45, 16  ;;  %v768_v47 = vshrl.u32 %v8739_v21, 16  ;;  %v10987_v26 = vshll.u32 %v8734_v41, 16 }
 0x113   : > { %4443 = vmatprep.subr.bf16.mxu1 %v7345_v4  ;;  %4161 = vmatmul.mubr.bf16.gmra.mxu0 %v8917_v9  ;;  %v748_v4 = vor.u32 %v747_v50, %v746_v46  ;;  %v7329_v27 = vcombine.high %v1023_v1, %v1027_v56  ;;  %v891_v15 = vld [vmem:[#allocation7 + $0x328] sm:$0xff]  ;;  %v7328_v33 = vcombine.low %v1023_v1, %v1027_v56 }
 0x114   : > { %4331 = vmatpush2.bf16.msra.mxu0 %v7216_v7  ;;  %v759_v54 = vrot.slane %v10983_v20, 2  ;;  %4170 = vmatprep.mubr.bf16.mxu0 %v8928_v8  ;;  %v887_v7 = vld [vmem:[#allocation7 + $0x308] sm:$0xff]  ;;  %v755_v45 = vrot.slane %v10987_v26, 2  ;;  %v8955_v56 = vsel %vm648_vm2, %v673_v37, %v677_v2  ;;  %v762_v26 = vshrl.u32 %v8760_v5, 16 }
 0x115   : > { %4274 = vmatmul.mubr.bf16.gmra.mxu1 %v8920_v14  ;;  %4332 = vmatprep.subr.bf16.mxu0 %v7209_v16  ;;  %v1015_v22 = vld [vmem:[#allocation7 + $0x708] sm:$0xff]  ;;  %v8947_v16 = vsel %vm699_vm1, %v740_v39, %v748_v4  ;;  %v7193_v46 = vcombine.high %v887_v7, %v891_v15  ;;  %v7192_v1 = vcombine.low %v887_v7, %v891_v15 }
 0x116   : > { %4444 = vmatpush2.bf16.msra.mxu1 %v7344_v42  ;;  %4283 = vmatprep.mubr.bf16.mxu1 %v8932_v3  ;;  %v1019_v14 = vld [vmem:[#allocation7 + $0x728] sm:$0xff]  ;;  %v8943_v42 = vsel %vm648_vm2, %v667_v48, %v671_v63  ;;  %v760_v50 = vor.u32 %v759_v54, %v758_v44  ;;  %10985 = vst [vmem:[#allocation48_spill] sm:$0xff] %v8947_v16  ;;  %10988 = vst [vmem:[#allocation49_spill] sm:$0xff] %v8955_v56 }
 0x117   : > { %4445 = vmatprep.subr.bf16.mxu1 %v7337_v38  ;;  %10984 = vst [vmem:[#allocation47_spill] sm:$0xff] %v8943_v42  ;;  %v10986_v38 = vshrl.u32 %v8734_v41, 16  ;;  %v879_v48 = vld [vmem:[#allocation7 + $0x2c8] sm:$0xff]  ;;  %v7320_v7 = vcombine.low %v1015_v22, %v1019_v14 }
 0x118   : > { %4333 = vmatpush2.bf16.msra.mxu0 %v7208_v24  ;;  %v7321_v24 = vcombine.high %v1015_v22, %v1019_v14  ;;  %v883_v20 = vld [vmem:[#allocation7 + $0x2e8] sm:$0xff]  ;;  %v8959_v54 = vsel %vm699_vm1, %v752_v49, %v760_v50 }
 0x119   : > { %4334 = vmatprep.subr.bf16.mxu0 %v7201_v34  ;;  %v754_v19 = vrot.slane %v10986_v38, 1  ;;  %v1007_v39 = vld [vmem:[#allocation7 + $0x6c8] sm:$0xff]  ;;  %10989 = vst [vmem:[#allocation50_spill] sm:$0xff] %v8959_v54  ;;  %v770_v34 = vrot.slane %v768_v47, 1  ;;  %v7185_v37 = vcombine.high %v879_v48, %v883_v20  ;;  %v7184_v14 = vcombine.low %v879_v48, %v883_v20 }
 0x11a   : > { %4446 = vmatpush2.bf16.msra.mxu1 %v7336_v29  ;;  %v1011_v44 = vld [vmem:[#allocation7 + $0x6e8] sm:$0xff]  ;;  %v675_v29 = vrot.slane %v8734_v41, 1 }
 0x11b   : > { %4447 = vmatprep.subr.bf16.mxu1 %v7329_v27  ;;  %4171 = vmatmul.mubr.bf16.gmra.mxu0 %v8943_v42  ;;  %v10990_v27 = vshll.u32 %v8739_v21, 16  ;;  %v756_v15 = vor.u32 %v755_v45, %v754_v19  ;;  %v875_v49 = vld [vmem:[#allocation7 + $0x2a8] sm:$0xff]  ;;  %v681_v42 = vrot.slane %v8739_v21, 1  ;;  %v7312_v22 = vcombine.low %v1007_v39, %v1011_v44 }
 0x11c   : > { %4335 = vmatpush2.bf16.msra.mxu0 %v7200_v40  ;;  %4180 = vmatprep.mubr.bf16.mxu0 %v8955_v56  ;;  %v7313_v40 = vcombine.high %v1007_v39, %v1011_v44  ;;  %v999_v41 = vld [vmem:[#allocation7 + $0x688] sm:$0xff]  ;;  %v679_v44 = vrot.slane %v8760_v5, 1 }
 0x11d   : > { %4284 = vmatmul.mubr.bf16.gmra.mxu1 %v8947_v16  ;;  %v771_v38 = vrot.slane %v10990_v27, 2  ;;  %4336 = vmatprep.subr.bf16.mxu0 %v7193_v46  ;;  %v871_v16 = vld [vmem:[#allocation7 + $0x288] sm:$0xff]  ;;  %v8972_v19 = vsel %vm699_vm1, %v748_v4, %v756_v15  ;;  %v10993_v27 = vshll.u32 %v8760_v5, 16 }
 0x11e   : > { %4448 = vmatpush2.bf16.msra.mxu1 %v7328_v33  ;;  %4293 = vmatprep.mubr.bf16.mxu1 %v8959_v54  ;;  %v1003_v47 = vld [vmem:[#allocation7 + $0x6a8] sm:$0xff]  ;;  %v8969_v33 = vsel %vm648_vm2, %v671_v63, %v675_v29  ;;  %10992 = vst [vmem:[#allocation52_spill] sm:$0xff] %v8972_v19  ;;  %v7177_v45 = vcombine.high %v871_v16, %v875_v49 }
 0x11f   : > { %4449 = vmatprep.subr.bf16.mxu1 %v7321_v24  ;;  %10991 = vst [vmem:[#allocation51_spill] sm:$0xff] %v8969_v33  ;;  %v772_v46 = vor.u32 %v771_v38, %v770_v34  ;;  %v764_v24 = vrot.slane %v762_v26, 1  ;;  %v765_v54 = vrot.slane %v10993_v27, 2  ;;  %v7305_v56 = vcombine.high %v999_v41, %v1003_v47  ;;  %v863_v21 = vld [vmem:[#allocation7 + $0x248] sm:$0xff] }
 0x120   : > { %4337 = vmatpush2.bf16.msra.mxu0 %v7192_v1  ;;  %v867_v1 = vld [vmem:[#allocation7 + $0x268] sm:$0xff]  ;;  %v8978_v63 = vsel %vm648_vm2, %v677_v2, %v681_v42  ;;  %v7176_v4 = vcombine.low %v871_v16, %v875_v49  ;;  %v7304_v34 = vcombine.low %v999_v41, %v1003_v47 }
 0x121   : > { %4338 = vmatprep.subr.bf16.mxu0 %v7185_v37  ;;  %10994 = vst [vmem:[#allocation53_spill] sm:$0xff] %v8978_v63  ;;  %v991_v48 = vld [vmem:[#allocation7 + $0x648] sm:$0xff]  ;;  %v8982_v39 = vsel %vm699_vm1, %v760_v50, %v772_v46  ;;  %v766_v38 = vor.u32 %v765_v54, %v764_v24  ;;  %v8988_v50 = vsel %vm648_vm2, %v675_v29, %v679_v44 }
 0x122   : > { %4450 = vmatpush2.bf16.msra.mxu1 %v7320_v7  ;;  %v995_v20 = vld [vmem:[#allocation7 + $0x668] sm:$0xff]  ;;  %10995 = vst [vmem:[#allocation54_spill] sm:$0xff] %v8982_v39  ;;  %v7169_v7 = vcombine.high %v863_v21, %v867_v1  ;;  %10996 = vst [vmem:[#allocation55_spill] sm:$0xff] %v8988_v50  ;;  %v7168_v5 = vcombine.low %v863_v21, %v867_v1 }
 0x123   : > { %4451 = vmatprep.subr.bf16.mxu1 %v7313_v40  ;;  %4181 = vmatmul.mubr.bf16.gmra.mxu0 %v8969_v33  ;;  %v7297_v2 = vcombine.high %v991_v48, %v995_v20  ;;  %v855_v42 = vld [vmem:[#allocation7 + $0x208] sm:$0xff]  ;;  %v8991_v40 = vsel %vm699_vm1, %v756_v15, %v766_v38 }
 0x124   : > { %4339 = vmatpush2.bf16.msra.mxu0 %v7184_v14  ;;  %4190 = vmatprep.mubr.bf16.mxu0 %v8978_v63  ;;  %v859_v37 = vld [vmem:[#allocation7 + $0x228] sm:$0xff]  ;;  %10997 = vst [vmem:[#allocation56_spill] sm:$0xff] %v8991_v40 }
 0x125   : > { %4294 = vmatmul.mubr.bf16.gmra.mxu1 %v8972_v19  ;;  %4340 = vmatprep.subr.bf16.mxu0 %v7177_v45  ;;  %v983_v26 = vld [vmem:[#allocation7 + $0x608] sm:$0xff]  ;;  %v7161_v54 = vcombine.high %v855_v42, %v859_v37  ;;  %v7160_v29 = vcombine.low %v855_v42, %v859_v37  ;;  %v8086_v45 = vld [vmem:[%s8518_s5 + $0x4] ss:$8 sps:$4 sm:$0xff]  }
 0x126   : > { %4452 = vmatpush2.bf16.msra.mxu1 %v7312_v22  ;;  %4303 = vmatprep.mubr.bf16.mxu1 %v8982_v39  ;;  %v987_v16 = vld [vmem:[#allocation7 + $0x628] sm:$0xff] }
 0x127   : > { %4453 = vmatprep.subr.bf16.mxu1 %v7305_v56  ;;  %v7296_v56 = vcombine.low %v991_v48, %v995_v20  ;;  %v7289_v49 = vcombine.high %v983_v26, %v987_v16  ;;  %v1103_v41 = vld [vmem:[#allocation7 + $0x9c8] sm:$0xff]  ;;  %v7288_v15 = vcombine.low %v983_v26, %v987_v16 }
 0x128   : > { %4341 = vmatpush2.bf16.msra.mxu0 %v7176_v4  ;;  %v1107_v47 = vld [vmem:[#allocation7 + $0x9e8] sm:$0xff] }
 0x129   : > { %4342 = vmatprep.subr.bf16.mxu0 %v7169_v7  ;;  %v1231_v14 = vld [vmem:[#allocation7 + $0xdc8] sm:$0xff]  ;;  %v7409_v46 = vcombine.high %v1103_v41, %v1107_v47  ;;  %v7408_v20 = vcombine.low %v1103_v41, %v1107_v47 }
 0x12a   : > { %4454 = vmatpush2.bf16.msra.mxu1 %v7304_v34  ;;  %v1235_v22 = vld [vmem:[#allocation7 + $0xde8] sm:$0xff] }
 0x12b   : > { %4455 = vmatprep.subr.bf16.mxu1 %v7297_v2  ;;  %4191 = vmatmul.mubr.bf16.gmra.mxu0 %v8988_v50  ;;  %v7537_v24 = vcombine.high %v1231_v14, %v1235_v22  ;;  %v1095_v27 = vld [vmem:[#allocation7 + $0x988] sm:$0xff]  ;;  %v7536_v4 = vcombine.low %v1231_v14, %v1235_v22  ;;  %v8087_v2 = vld [vmem:[%s8518_s5] ss:$8 sps:$4 sm:$0xff]  }
 0x12c   : > { %4343 = vmatpush2.bf16.msra.mxu0 %v7168_v5  ;;  %4346 = vmatprep.mubr.bf16.mxu0 %v8086_v45  ;;  %v1099_v21 = vld [vmem:[#allocation7 + $0x9a8] sm:$0xff] }
 0x12d   : > { %4304 = vmatmul.mubr.bf16.gmra.mxu1 %v8991_v40  ;;  %4344 = vmatprep.subr.bf16.mxu0 %v7161_v54  ;;  %v1223_v1 = vld [vmem:[#allocation7 + $0xd88] sm:$0xff]  ;;  %v7401_v44 = vcombine.high %v1095_v27, %v1099_v21  ;;  %v7400_v26 = vcombine.low %v1095_v27, %v1099_v21 }
 0x12e   : > { %4456 = vmatpush2.bf16.msra.mxu1 %v7296_v56  ;;  %4459 = vmatprep.mubr.bf16.mxu1 %v8560_v17  ;;  %v1227_v48 = vld [vmem:[#allocation7 + $0xda8] sm:$0xff] }
 0x12f   : > { %4457 = vmatprep.subr.bf16.mxu1 %v7289_v49  ;;  %v7529_v34 = vcombine.high %v1223_v1, %v1227_v48  ;;  %v1087_v38 = vld [vmem:[#allocation7 + $0x948] sm:$0xff]  ;;  %v7528_v16 = vcombine.low %v1223_v1, %v1227_v48 }
 0x130   : > { %4345 = vmatpush2.bf16.msra.mxu0 %v7160_v29  ;;  %v1091_v7 = vld [vmem:[#allocation7 + $0x968] sm:$0xff] }
 0x131   : > { %4540 = vmatprep.subr.bf16.mxu0 %v7409_v46  ;;  %v1215_v42 = vld [vmem:[#allocation7 + $0xd48] sm:$0xff]  ;;  %v7393_v5 = vcombine.high %v1087_v38, %v1091_v7  ;;  %v7392_v22 = vcombine.low %v1087_v38, %v1091_v7 }
 0x132   : > { %4458 = vmatpush2.bf16.msra.mxu1 %v7288_v15  ;;  %v1219_v37 = vld [vmem:[#allocation7 + $0xd68] sm:$0xff] }
 0x133   : > { %4653 = vmatprep.subr.bf16.mxu1 %v7537_v24  ;;  %4347 = vmatmul.mubr.bf16.vlgmr.msra.gmra.mxu0 %v8087_v2  ;;  %v8088_v56 = vld [vmem:[%s8518_s5 + $0x14] ss:$8 sps:$4 sm:$0xff]   ;;  %v7521_v54 = vcombine.high %v1215_v42, %v1219_v37  ;;  %v7520_v29 = vcombine.low %v1215_v42, %v1219_v37  ;;  %v8089_v27 = vld [vmem:[%s8518_s5 + $0x10] ss:$8 sps:$4 sm:$0xff]  }
 0x134   : > { %4541 = vmatpush1.bf16.msra.mxu0 %v7408_v20  ;;  %4356 = vmatprep.mubr.bf16.mxu0 %v8088_v56  ;;  %v1079_v49 = vld [vmem:[#allocation7 + $0x908] sm:$0xff] }
 0x135   : > { %4460 = vmatmul.mubr.bf16.vlgmr.msra.gmra.mxu1 %v8599_v62  ;;  %4542 = vmatprep.subr.bf16.mxu0 %v7401_v44  ;;  %v1083_v41 = vld [vmem:[#allocation7 + $0x928] sm:$0xff]  ;;  %v8090_v44 = vld [vmem:[%s8518_s5 + $0x24] ss:$8 sps:$4 sm:$0xff]  }
 0x136   : > { %4654 = vmatpush1.bf16.msra.mxu1 %v7536_v4  ;;  %4469 = vmatprep.mubr.bf16.mxu1 %v8612_v58  ;;  %v1207_v47 = vld [vmem:[#allocation7 + $0xd08] sm:$0xff]  ;;  %v7385_v15 = vcombine.high %v1079_v49, %v1083_v41  ;;  %v7384_v48 = vcombine.low %v1079_v49, %v1083_v41  ;;  %v8091_v49 = vld [vmem:[%s8518_s5 + $0x20] ss:$8 sps:$4 sm:$0xff]  }
 0x137   : > { %4655 = vmatprep.subr.bf16.mxu1 %v7529_v34  ;;  %v1211_v14 = vld [vmem:[#allocation7 + $0xd28] sm:$0xff] }
 0x138   : > { %4543 = vmatpush1.bf16.msra.mxu0 %v7400_v26  ;;  %v7513_v46 = vcombine.high %v1207_v47, %v1211_v14  ;;  %v1071_v45 = vld [vmem:[#allocation7 + $0x8c8] sm:$0xff]  ;;  %v7512_v20 = vcombine.low %v1207_v47, %v1211_v14 }
 0x139   : > { %4544 = vmatprep.subr.bf16.mxu0 %v7393_v5  ;;  %v1075_v24 = vld [vmem:[#allocation7 + $0x8e8] sm:$0xff] }
 0x13a   : > { %4656 = vmatpush1.bf16.msra.mxu1 %v7528_v16  ;;  %v1199_v21 = vld [vmem:[#allocation7 + $0xcc8] sm:$0xff]  ;;  %v7377_v4 = vcombine.high %v1071_v45, %v1075_v24  ;;  %v7376_v37 = vcombine.low %v1071_v45, %v1075_v24 }
 0x13b   : > { %4657 = vmatprep.subr.bf16.mxu1 %v7521_v54  ;;  %4357 = vmatmul.mubr.bf16.gmra.mxu0 %v8089_v27  ;;  %v1203_v1 = vld [vmem:[#allocation7 + $0xce8] sm:$0xff] }
 0x13c   : > { %4545 = vmatpush1.bf16.msra.mxu0 %v7392_v22  ;;  %4366 = vmatprep.mubr.bf16.mxu0 %v8090_v44  ;;  %v7505_v34 = vcombine.high %v1199_v21, %v1203_v1  ;;  %v1063_v38 = vld [vmem:[#allocation7 + $0x888] sm:$0xff]  ;;  %v7504_v26 = vcombine.low %v1199_v21, %v1203_v1 }
 0x13d   : > { %4470 = vmatmul.mubr.bf16.gmra.mxu1 %v8633_v23  ;;  %4546 = vmatprep.subr.bf16.mxu0 %v7385_v15  ;;  %v1067_v7 = vld [vmem:[#allocation7 + $0x8a8] sm:$0xff] }
 0x13e   : > { %4658 = vmatpush1.bf16.msra.mxu1 %v7520_v29  ;;  %4479 = vmatprep.mubr.bf16.mxu1 %v8640_v35  ;;  %v1191_v2 = vld [vmem:[#allocation7 + $0xc88] sm:$0xff]  ;;  %v7369_v16 = vcombine.high %v1063_v38, %v1067_v7  ;;  %v7368_v14 = vcombine.low %v1063_v38, %v1067_v7 }
 0x13f   : > { %4659 = vmatprep.subr.bf16.mxu1 %v7513_v46  ;;  %v1195_v42 = vld [vmem:[#allocation7 + $0xca8] sm:$0xff] }
 0x140   : > { %4547 = vmatpush1.bf16.msra.mxu0 %v7384_v48  ;;  %v7497_v5 = vcombine.high %v1191_v2, %v1195_v42  ;;  %v1055_v56 = vld [vmem:[#allocation7 + $0x848] sm:$0xff]  ;;  %v7496_v22 = vcombine.low %v1191_v2, %v1195_v42 }
 0x141   : > { %4548 = vmatprep.subr.bf16.mxu0 %v7377_v4  ;;  %v1059_v54 = vld [vmem:[#allocation7 + $0x868] sm:$0xff] }
 0x142   : > { %4660 = vmatpush1.bf16.msra.mxu1 %v7512_v20  ;;  %v1183_v41 = vld [vmem:[#allocation7 + $0xc48] sm:$0xff]  ;;  %v7361_v29 = vcombine.high %v1055_v56, %v1059_v54  ;;  %v7360_v1 = vcombine.low %v1055_v56, %v1059_v54 }
 0x143   : > { %4661 = vmatprep.subr.bf16.mxu1 %v7505_v34  ;;  %4367 = vmatmul.mubr.bf16.gmra.mxu0 %v8091_v49  ;;  %v1187_v47 = vld [vmem:[#allocation7 + $0xc68] sm:$0xff] }
 0x144   : > { %4549 = vmatpush1.bf16.msra.mxu0 %v7376_v37  ;;  %v8092_v15 = vld [vmem:[%s8518_s5 + $0x34] ss:$8 sps:$4 sm:$0xff]   ;;  %v7489_v46 = vcombine.high %v1183_v41, %v1187_v47  ;;  %v7488_v48 = vcombine.low %v1183_v41, %v1187_v47  ;;  %v8093_v38 = vld [vmem:[%s8518_s5 + $0x30] ss:$8 sps:$4 sm:$0xff]  }
 0x145   : > { %4480 = vmatmul.mubr.bf16.gmra.mxu1 %v8661_v57  ;;  %4550 = vmatprep.subr.bf16.mxu0 %v7369_v16  ;;  %v1047_v45 = vld [vmem:[#allocation7 + $0x808] sm:$0xff]  ;;  %v8094_v16 = vld [vmem:[%s8518_s5 + $0x44] ss:$8 sps:$4 sm:$0xff]  }
 0x146   : > { %4662 = vmatpush1.bf16.msra.mxu1 %v7504_v26  ;;  %4376 = vmatprep.mubr.bf16.mxu0 %v8092_v15  ;;  %v1051_v24 = vld [vmem:[#allocation7 + $0x828] sm:$0xff] }
 0x147   : > { %4663 = vmatprep.subr.bf16.mxu1 %v7497_v5  ;;  %4489 = vmatprep.mubr.bf16.mxu1 %v8669_v18  ;;  %v1175_v27 = vld [vmem:[#allocation7 + $0xc08] sm:$0xff]  ;;  %v7353_v20 = vcombine.high %v1047_v45, %v1051_v24  ;;  %v7352_v42 = vcombine.low %v1047_v45, %v1051_v24  ;;  %v8095_v45 = vld [vmem:[%s8518_s5 + $0x40] ss:$8 sps:$4 sm:$0xff]  }
 0x148   : > { %v1179_v21 = vld [vmem:[#allocation7 + $0xc28] sm:$0xff]  ;;  %4551 = vmatpush1.bf16.msra.mxu0 %v7368_v14 }
 0x149   : > { %4552 = vmatprep.subr.bf16.mxu0 %v7361_v29  ;;  %v7481_v4 = vcombine.high %v1175_v27, %v1179_v21  ;;  %v1167_v44 = vld [vmem:[#allocation7 + $0xbc8] sm:$0xff]  ;;  %v7480_v37 = vcombine.low %v1175_v27, %v1179_v21 }
 0x14a   : > { %4664 = vmatpush1.bf16.msra.mxu1 %v7496_v22  ;;  %v1171_v34 = vld [vmem:[#allocation7 + $0xbe8] sm:$0xff] }
 0x14b   : > { %4665 = vmatprep.subr.bf16.mxu1 %v7489_v46  ;;  %4377 = vmatmul.mubr.bf16.gmra.mxu0 %v8093_v38  ;;  %v1295_v7 = vld [vmem:[#allocation7 + $0xfc8] sm:$0xff]  ;;  %v7473_v26 = vcombine.high %v1167_v44, %v1171_v34  ;;  %v7472_v47 = vcombine.low %v1167_v44, %v1171_v34 }
 0x14c   : > { %v1299_v2 = vld [vmem:[#allocation7 + $0xfe8] sm:$0xff]  ;;  %4553 = vmatpush1.bf16.msra.mxu0 %v7360_v1  ;;  %4386 = vmatprep.mubr.bf16.mxu0 %v8094_v16 }
 0x14d   : > { %4490 = vmatmul.mubr.bf16.gmra.mxu1 %v8689_v61  ;;  %4554 = vmatprep.subr.bf16.mxu0 %v7353_v20  ;;  %v7601_v5 = vcombine.high %v1295_v7, %v1299_v2  ;;  %v1159_v56 = vld [vmem:[#allocation7 + $0xb88] sm:$0xff]  ;;  %v7600_v14 = vcombine.low %v1295_v7, %v1299_v2 }
 0x14e   : > { %4666 = vmatpush1.bf16.msra.mxu1 %v7488_v48  ;;  %v1163_v54 = vld [vmem:[#allocation7 + $0xba8] sm:$0xff]  ;;  %4499 = vmatprep.mubr.bf16.mxu1 %v8697_v11 }
 0x14f   : > { %4667 = vmatprep.subr.bf16.mxu1 %v7481_v4  ;;  %v1287_v49 = vld [vmem:[#allocation7 + $0xf88] sm:$0xff]  ;;  %v7465_v22 = vcombine.high %v1159_v56, %v1163_v54  ;;  %v7464_v21 = vcombine.low %v1159_v56, %v1163_v54 }
 0x150   : > { %v1291_v41 = vld [vmem:[#allocation7 + $0xfa8] sm:$0xff]  ;;  %4555 = vmatpush1.bf16.msra.mxu0 %v7352_v42 }
 0x151   : > { %4556 = vmatprep.subr.bf16.mxu0 %v7473_v26  ;;  %v7593_v29 = vcombine.high %v1287_v49, %v1291_v41  ;;  %v1151_v15 = vld [vmem:[#allocation7 + $0xb48] sm:$0xff]  ;;  %v7592_v1 = vcombine.low %v1287_v49, %v1291_v41 }
 0x152   : > { %4668 = vmatpush1.bf16.msra.mxu1 %v7480_v37  ;;  %v1155_v46 = vld [vmem:[#allocation7 + $0xb68] sm:$0xff] }
 0x153   : > { %4669 = vmatprep.subr.bf16.mxu1 %v7601_v5  ;;  %4387 = vmatmul.mubr.bf16.gmra.mxu0 %v8095_v45  ;;  %v1279_v24 = vld [vmem:[#allocation7 + $0xf48] sm:$0xff]  ;;  %v7457_v48 = vcombine.high %v1151_v15, %v1155_v46  ;;  %v7456_v2 = vcombine.low %v1151_v15, %v1155_v46 }
 0x154   : > { %v1283_v27 = vld [vmem:[#allocation7 + $0xf68] sm:$0xff]  ;;  %4557 = vmatpush2.bf16.msra.mxu0 %v7472_v47 }
 0x155   : > { %4500 = vmatmul.mubr.bf16.gmra.mxu1 %v8717_v6  ;;  %4558 = vmatprep.subr.bf16.mxu0 %v7465_v22  ;;  %v8096_v20 = vld [vmem:[%s8518_s5 + $0x54] ss:$8 sps:$4 sm:$0xff]   ;;  %v7585_v4 = vcombine.high %v1279_v24, %v1283_v27  ;;  %v7584_v42 = vcombine.low %v1279_v24, %v1283_v27  ;;  %v8097_v56 = vld [vmem:[%s8518_s5 + $0x50] ss:$8 sps:$4 sm:$0xff]   ;;  %v8098_v22 = vld [vmem:[%s8518_s5 + $0x64] ss:$8 sps:$4 sm:$0xff]  }
 0x156   : > { %4670 = vmatpush2.bf16.msra.mxu1 %v7600_v14  ;;  %4396 = vmatprep.mubr.bf16.mxu0 %v8096_v20  ;;  %v1143_v44 = vld [vmem:[#allocation7 + $0xb08] sm:$0xff] }
 0x157   : > { %4671 = vmatprep.subr.bf16.mxu1 %v7593_v29  ;;  %v1147_v34 = vld [vmem:[#allocation7 + $0xb28] sm:$0xff]  ;;  %4509 = vmatprep.mubr.bf16.mxu1 %v8726_v53 }
 0x158   : > { %v1271_v38 = vld [vmem:[#allocation7 + $0xf08] sm:$0xff]  ;;  %4559 = vmatpush2.bf16.msra.mxu0 %v7464_v21  ;;  %v7449_v37 = vcombine.high %v1143_v44, %v1147_v34  ;;  %v7448_v41 = vcombine.low %v1143_v44, %v1147_v34  ;;  %v8099_v44 = vld [vmem:[%s8518_s5 + $0x60] ss:$8 sps:$4 sm:$0xff]  }
 0x159   : > { %v1275_v7 = vld [vmem:[#allocation7 + $0xf28] sm:$0xff]  ;;  %4560 = vmatprep.subr.bf16.mxu0 %v7457_v48 }
 0x15a   : > { %4672 = vmatpush2.bf16.msra.mxu1 %v7592_v1  ;;  %v7577_v26 = vcombine.high %v1271_v38, %v1275_v7  ;;  %v1135_v16 = vld [vmem:[#allocation7 + $0xac8] sm:$0xff]  ;;  %v7576_v47 = vcombine.low %v1271_v38, %v1275_v7 }
 0x15b   : > { %4673 = vmatprep.subr.bf16.mxu1 %v7585_v4  ;;  %v1139_v5 = vld [vmem:[#allocation7 + $0xae8] sm:$0xff]  ;;  %4397 = vmatmul.mubr.bf16.gmra.mxu0 %v8097_v56 }
 0x15c   : > { %v1263_v54 = vld [vmem:[#allocation7 + $0xec8] sm:$0xff]  ;;  %4561 = vmatpush2.bf16.msra.mxu0 %v7456_v2  ;;  %v7441_v14 = vcombine.high %v1135_v16, %v1139_v5  ;;  %4406 = vmatprep.mubr.bf16.mxu0 %v8098_v22  ;;  %v7440_v27 = vcombine.low %v1135_v16, %v1139_v5  ;;  %v848_v22 = vld [vmem:[#allocation7 + $0x1d0] sm:$0xff] }
 0x15d   : > { %v1267_v49 = vld [vmem:[#allocation7 + $0xee8] sm:$0xff]  ;;  %4510 = vmatmul.mubr.bf16.gmra.mxu1 %v8745_v52  ;;  %4562 = vmatprep.subr.bf16.mxu0 %v7449_v37 }
 0x15e   : > { %4674 = vmatpush2.bf16.msra.mxu1 %v7584_v42  ;;  %v7569_v29 = vcombine.high %v1263_v54, %v1267_v49  ;;  %v1127_v15 = vld [vmem:[#allocation7 + $0xa88] sm:$0xff]  ;;  %4519 = vmatprep.mubr.bf16.mxu1 %v8754_v0  ;;  %v7568_v21 = vcombine.low %v1263_v54, %v1267_v49 }
 0x15f   : > { %4675 = vmatprep.subr.bf16.mxu1 %v7577_v26  ;;  %v1131_v46 = vld [vmem:[#allocation7 + $0xaa8] sm:$0xff] }
 0x160   : > { %v1255_v45 = vld [vmem:[#allocation7 + $0xe88] sm:$0xff]  ;;  %4563 = vmatpush2.bf16.msra.mxu0 %v7448_v41  ;;  %v7433_v1 = vcombine.high %v1127_v15, %v1131_v46  ;;  %v7432_v7 = vcombine.low %v1127_v15, %v1131_v46  ;;  %v976_v46 = vld [vmem:[#allocation7 + $0x5d0] sm:$0xff] }
 0x161   : > { %v1259_v24 = vld [vmem:[#allocation7 + $0xea8] sm:$0xff]  ;;  %4564 = vmatprep.subr.bf16.mxu0 %v7441_v14 }
 0x162   : > { %4676 = vmatpush2.bf16.msra.mxu1 %v7576_v47  ;;  %v7561_v48 = vcombine.high %v1255_v45, %v1259_v24  ;;  %v1119_v20 = vld [vmem:[#allocation7 + $0xa48] sm:$0xff]  ;;  %v7560_v2 = vcombine.low %v1255_v45, %v1259_v24  ;;  %v980_v45 = vld [vmem:[#allocation7 + $0x5f0] sm:$0xff] }
 0x163   : > { %4677 = vmatprep.subr.bf16.mxu1 %v7569_v29  ;;  %v1123_v4 = vld [vmem:[#allocation7 + $0xa68] sm:$0xff]  ;;  %4407 = vmatmul.mubr.bf16.gmra.mxu0 %v8099_v44  ;;  %v852_v29 = vld [vmem:[#allocation7 + $0x1f0] sm:$0xff] }
 0x164   : > { %v1247_v34 = vld [vmem:[#allocation7 + $0xe48] sm:$0xff]  ;;  %4565 = vmatpush2.bf16.msra.mxu0 %v7440_v27  ;;  %v7425_v42 = vcombine.high %v1119_v20, %v1123_v4  ;;  %v7424_v49 = vcombine.low %v1119_v20, %v1123_v4  ;;  %v844_v20 = vld [vmem:[#allocation7 + $0x1b0] sm:$0xff] }
 0x165   : > { %v1251_v38 = vld [vmem:[#allocation7 + $0xe68] sm:$0xff]  ;;  %4520 = vmatmul.mubr.bf16.gmra.mxu1 %v8769_v43  ;;  %4566 = vmatprep.subr.bf16.mxu0 %v7433_v1  ;;  %v7283_v1 = vcombine.high %v976_v46, %v980_v45  ;;  %v968_v4 = vld [vmem:[#allocation7 + $0x590] sm:$0xff] }
 0x166   : > { %4678 = vmatpush2.bf16.msra.mxu1 %v7568_v21  ;;  %v8100_v37 = vld [vmem:[%s8518_s5 + $0x74] ss:$8 sps:$4 sm:$0xff]   ;;  %v7553_v26 = vcombine.high %v1247_v34, %v1251_v38  ;;  %4529 = vmatprep.mubr.bf16.mxu1 %v8776_v25  ;;  %v7552_v41 = vcombine.low %v1247_v34, %v1251_v38  ;;  %v8101_v15 = vld [vmem:[%s8518_s5 + $0x70] ss:$8 sps:$4 sm:$0xff]   ;;  %v7155_v21 = vcombine.high %v848_v22, %v852_v29  ;;  %v972_v44 = vld [vmem:[#allocation7 + $0x5b0] sm:$0xff] }
 0x167   : > { %4679 = vmatprep.subr.bf16.mxu1 %v7561_v48  ;;  %4416 = vmatprep.mubr.bf16.mxu0 %v8100_v37  ;;  %v1111_v16 = vld [vmem:[#allocation7 + $0xa08] sm:$0xff]  ;;  %v840_v48 = vld [vmem:[#allocation7 + $0x190] sm:$0xff]  ;;  %v7154_v34 = vcombine.low %v848_v22, %v852_v29  ;;  %v7282_v38 = vcombine.low %v976_v46, %v980_v45 }
 0x168   : > { %v1115_v5 = vld [vmem:[#allocation7 + $0xa28] sm:$0xff]  ;;  %4567 = vmatpush2.bf16.msra.mxu0 %v7432_v7  ;;  %v7147_v7 = vcombine.high %v840_v48, %v844_v20  ;;  %v836_v37 = vld [vmem:[#allocation7 + $0x170] sm:$0xff] }
 0x169   : > { %v1239_v56 = vld [vmem:[#allocation7 + $0xe08] sm:$0xff]  ;;  %4568 = vmatprep.subr.bf16.mxu0 %v7425_v42  ;;  %v7417_v47 = vcombine.high %v1111_v16, %v1115_v5  ;;  %v7416_v24 = vcombine.low %v1111_v16, %v1115_v5  ;;  %v832_v42 = vld [vmem:[#allocation7 + $0x150] sm:$0xff] }
 0x16a   : > { %v1243_v54 = vld [vmem:[#allocation7 + $0xe28] sm:$0xff]  ;;  %4680 = vmatpush2.bf16.msra.mxu1 %v7560_v2  ;;  %v7275_v2 = vcombine.high %v968_v4, %v972_v44  ;;  %v960_v16 = vld [vmem:[#allocation7 + $0x550] sm:$0xff] }
 0x16b   : > { %4681 = vmatprep.subr.bf16.mxu1 %v7553_v26  ;;  %v7545_v14 = vcombine.high %v1239_v56, %v1243_v54  ;;  %4417 = vmatmul.mubr.bf16.gmra.mxu0 %v8101_v15  ;;  %v7544_v27 = vcombine.low %v1239_v56, %v1243_v54  ;;  %v964_v5 = vld [vmem:[#allocation7 + $0x570] sm:$0xff]  ;;  %v7146_v54 = vcombine.low %v840_v48, %v844_v20 }
 0x16c   : > { %4569 = vmatpush2.bf16.msra.mxu0 %v7424_v49  ;;  %4572 = vmatprep.mubr.bf16.mxu0 %v8799_v10  ;;  %v7267_v29 = vcombine.high %v960_v16, %v964_v5  ;;  %v824_v15 = vld [vmem:[#allocation7 + $0x110] sm:$0xff]  ;;  %v7138_v20 = vcombine.low %v832_v42, %v836_v37 }
 0x16d   : > { %4530 = vmatmul.mubr.bf16.gmra.mxu1 %v8793_v31  ;;  %4570 = vmatprep.subr.bf16.mxu0 %v7417_v47  ;;  %v7274_v47 = vcombine.low %v968_v4, %v972_v44  ;;  %v828_v46 = vld [vmem:[#allocation7 + $0x130] sm:$0xff]  ;;  %v7266_v44 = vcombine.low %v960_v16, %v964_v5 }
 0x16e   : > { %4682 = vmatpush2.bf16.msra.mxu1 %v7552_v41  ;;  %4685 = vmatprep.mubr.bf16.mxu1 %v8608_v55  ;;  %v1040_v55 = vld [vmem:[#allocation7 + $0x7d0] sm:$0xff] }
 0x16f   : > { %4683 = vmatprep.subr.bf16.mxu1 %v7545_v14  ;;  %v7139_v14 = vcombine.high %v832_v42, %v836_v37  ;;  %v7130_v37 = vcombine.low %v824_v15, %v828_v46  ;;  %v1024_v31 = vld [vmem:[#allocation7 + $0x750] sm:$0xff] }
 0x170   : > { %4571 = vmatpush2.bf16.msra.mxu0 %v7416_v24  ;;  %v3896_v26 = vpop.f32.mrf.mxu0  ;;  %v1008_v43 = vld [vmem:[#allocation7 + $0x6d0] sm:$0xff] }
 0x171   : > { %4766 = vmatprep.subr.bf16.mxu0 %v7155_v21  ;;  %v952_v21 = vld [vmem:[#allocation7 + $0x510] sm:$0xff] }
 0x172   : > { %4684 = vmatpush2.bf16.msra.mxu1 %v7544_v27  ;;  %v4009_v56 = vpop.f32.mrf.mxu1  ;;  %v3898_v41 = vpop.f32.mrf.mxu0  ;;  %v10998_v27 = vld [vmem:[#allocation30_spill] sm:$0xff] }
 0x173   : > { %4879 = vmatprep.subr.bf16.mxu1 %v7283_v1  ;;  %4573 = vmatmul.mubr.bf16.vlgmr.msra.gmra.mxu0 %v8812_v59  ;;  %v9031_v49 = vadd.f32 %v4009_v56, %v3896_v26  ;;  %v956_v1 = vld [vmem:[#allocation7 + $0x530] sm:$0xff] }
 0x174   : > { %4767 = vmatpush1.bf16.msra.mxu0 %v7154_v34  ;;  %v4011_v22 = vpop.f32.mrf.mxu1  ;;  %4582 = vmatprep.mubr.bf16.mxu0 %v8823_v32  ;;  %v3900_v24 = vpop.f32.mrf.mxu0  ;;  %v816_v26 = vld [vmem:[#allocation7 + $0xd0] sm:$0xff]  ;;  %v7258_v5 = vcombine.low %v952_v21, %v956_v1 }
 0x175   : > { %4686 = vmatmul.mubr.bf16.vlgmr.msra.gmra.mxu1 %v8815_v36  ;;  %4768 = vmatprep.subr.bf16.mxu0 %v7147_v7  ;;  %v9034_v45 = vadd.f32 %v4011_v22, %v3898_v41  ;;  %v820_v56 = vld [vmem:[#allocation7 + $0xf0] sm:$0xff] }
 0x176   : > { %4880 = vmatpush1.bf16.msra.mxu1 %v7282_v38  ;;  %4695 = vmatprep.mubr.bf16.mxu1 %v10998_v27  ;;  %v4013_v48 = vpop.f32.mrf.mxu1  ;;  %v3902_v4 = vpop.f32.mrf.mxu0  ;;  %v7131_v38 = vcombine.high %v824_v15, %v828_v46  ;;  %v944_v27 = vld [vmem:[#allocation7 + $0x4d0] sm:$0xff] }
 0x177   : > { %4881 = vmatprep.subr.bf16.mxu1 %v7275_v2  ;;  %v9037_v34 = vadd.f32 %v4013_v48, %v3900_v24  ;;  %v7259_v2 = vcombine.high %v952_v21, %v956_v1  ;;  %v10999_v24 = vld [vmem:[#allocation33_spill] sm:$0xff] }
 0x178   : > { %4769 = vmatpush1.bf16.msra.mxu0 %v7146_v54  ;;  %v4015_v7 = vpop.f32.mrf.mxu1  ;;  %v3906_v22 = vpop.f32.mrf.mxu0  ;;  %v948_v54 = vld [vmem:[#allocation7 + $0x4f0] sm:$0xff] }
 0x179   : > { %4770 = vmatprep.subr.bf16.mxu0 %v7139_v14  ;;  %v9039_v41 = vadd.f32 %v4015_v7, %v3902_v4  ;;  %v7123_v14 = vcombine.high %v816_v26, %v820_v56  ;;  %v7251_v48 = vcombine.high %v944_v27, %v948_v54  ;;  %v808_v4 = vld [vmem:[#allocation7 + $0x90] sm:$0xff]  ;;  %v7250_v1 = vcombine.low %v944_v27, %v948_v54 }
 0x17a   : > { %4882 = vmatpush1.bf16.msra.mxu1 %v7274_v47  ;;  %v4019_v42 = vpop.f32.mrf.mxu1  ;;  %v3908_v16 = vpop.f32.mrf.mxu0  ;;  %v812_v7 = vld [vmem:[#allocation7 + $0xb0] sm:$0xff] }
 0x17b   : > { %4883 = vmatprep.subr.bf16.mxu1 %v7267_v29  ;;  %4583 = vmatmul.mubr.bf16.gmra.mxu0 %v8839_v13  ;;  %v9043_v47 = vadd.f32 %v4019_v42, %v3906_v22  ;;  %v936_v15 = vld [vmem:[#allocation7 + $0x490] sm:$0xff] }
 0x17c   : > { %4771 = vmatpush1.bf16.msra.mxu0 %v7138_v20  ;;  %v4021_v29 = vpop.f32.mrf.mxu1  ;;  %4592 = vmatprep.mubr.bf16.mxu0 %v10999_v24  ;;  %v3910_v32 = vpop.f32.mrf.mxu0  ;;  %v940_v46 = vld [vmem:[#allocation7 + $0x4b0] sm:$0xff] }
 0x17d   : > { %4696 = vmatmul.mubr.bf16.gmra.mxu1 %v8842_v28  ;;  %4772 = vmatprep.subr.bf16.mxu0 %v7131_v38  ;;  %v9046_v13 = vadd.f32 %v4021_v29, %v3908_v16  ;;  %v11000_v28 = vld [vmem:[#allocation34_spill] sm:$0xff]  ;;  %v7243_v42 = vcombine.high %v936_v15, %v940_v46  ;;  %v800_v16 = vld [vmem:[#allocation7 + $0x50] sm:$0xff]  ;;  %v7242_v54 = vcombine.low %v936_v15, %v940_v46 }
 0x17e   : > { %4884 = vmatpush1.bf16.msra.mxu1 %v7266_v44  ;;  %4705 = vmatprep.mubr.bf16.mxu1 %v11000_v28  ;;  %v4023_v20 = vpop.f32.mrf.mxu1  ;;  %v7122_v44 = vcombine.low %v816_v26, %v820_v56  ;;  %v3912_v21 = vpop.f32.mrf.mxu0  ;;  %v804_v29 = vld [vmem:[#allocation7 + $0x70] sm:$0xff] }
 0x17f   : > { %4885 = vmatprep.subr.bf16.mxu1 %v7259_v2  ;;  %v9049_v38 = vadd.f32 %v4023_v20, %v3910_v32  ;;  %v7115_v2 = vcombine.high %v808_v4, %v812_v7  ;;  %v928_v36 = vld [vmem:[#allocation7 + $0x450] sm:$0xff]  ;;  %v7114_v32 = vcombine.low %v808_v4, %v812_v7 }
 0x180   : > { %4773 = vmatpush1.bf16.msra.mxu0 %v7130_v37  ;;  %v4025_v22 = vpop.f32.mrf.mxu1  ;;  %v3916_v28 = vpop.f32.mrf.mxu0  ;;  %v932_v37 = vld [vmem:[#allocation7 + $0x470] sm:$0xff] }
 0x181   : > { %4774 = vmatprep.subr.bf16.mxu0 %v7123_v14  ;;  %v9051_v24 = vadd.f32 %v4025_v22, %v3912_v21  ;;  %v7235_v20 = vcombine.high %v928_v36, %v932_v37  ;;  %v792_v21 = vld [vmem:[#allocation7 + $0x10] sm:$0xff]  ;;  %v7234_v46 = vcombine.low %v928_v36, %v932_v37 }
 0x182   : > { %4886 = vmatpush1.bf16.msra.mxu1 %v7258_v5  ;;  %v4029_v26 = vpop.f32.mrf.mxu1  ;;  %v3918_v27 = vpop.f32.mrf.mxu0  ;;  %v7107_v5 = vcombine.high %v800_v16, %v804_v29  ;;  %v796_v22 = vld [vmem:[#allocation7 + $0x30] sm:$0xff] }
 0x183   : > { %4887 = vmatprep.subr.bf16.mxu1 %v7251_v48  ;;  %4593 = vmatmul.mubr.bf16.gmra.mxu0 %v8865_v60  ;;  %v9055_v56 = vadd.f32 %v4029_v26, %v3916_v28  ;;  %v11001_v48 = vld [vmem:[#allocation37_spill] sm:$0xff] }
 0x184   : > { %4775 = vmatpush1.bf16.msra.mxu0 %v7122_v44  ;;  %v4031_v14 = vpop.f32.mrf.mxu1  ;;  %4602 = vmatprep.mubr.bf16.mxu0 %v11001_v48  ;;  %v3920_v59 = vpop.f32.mrf.mxu0  ;;  %v920_v4 = vld [vmem:[#allocation7 + $0x410] sm:$0xff]  ;;  %v7106_v44 = vcombine.low %v800_v16, %v804_v29 }
 0x185   : > { %4706 = vmatmul.mubr.bf16.gmra.mxu1 %v8868_v51  ;;  %4776 = vmatprep.subr.bf16.mxu0 %v7115_v2  ;;  %v9058_v60 = vadd.f32 %v4031_v14, %v3918_v27  ;;  %v11002_v51 = vld [vmem:[#allocation38_spill] sm:$0xff]  ;;  %v924_v28 = vld [vmem:[#allocation7 + $0x430] sm:$0xff]  ;;  %v7099_v2 = vcombine.high %v792_v21, %v796_v22 }
 0x186   : > { %4888 = vmatpush1.bf16.msra.mxu1 %v7250_v1  ;;  %4715 = vmatprep.mubr.bf16.mxu1 %v11002_v51  ;;  %v4033_v7 = vpop.f32.mrf.mxu1  ;;  %v3922_v15 = vpop.f32.mrf.mxu0  ;;  %v7227_v26 = vcombine.high %v920_v4, %v924_v28  ;;  %v912_v27 = vld [vmem:[#allocation7 + $0x3d0] sm:$0xff]  ;;  %v7226_v37 = vcombine.low %v920_v4, %v924_v28 }
 0x187   : > { %4889 = vmatprep.subr.bf16.mxu1 %v7243_v42  ;;  %v9061_v1 = vadd.f32 %v4033_v7, %v3920_v59  ;;  %v916_v14 = vld [vmem:[#allocation7 + $0x3f0] sm:$0xff]  ;;  %v7098_v59 = vcombine.low %v792_v21, %v796_v22 }
 0x188   : > { %4777 = vmatpush1.bf16.msra.mxu0 %v7114_v32  ;;  %v4035_v42 = vpop.f32.mrf.mxu1  ;;  %v3926_v51 = vpop.f32.mrf.mxu0  ;;  %v1044_v32 = vld [vmem:[#allocation7 + $0x7f0] sm:$0xff] }
 0x189   : > { %4778 = vmatprep.subr.bf16.mxu0 %v7107_v5  ;;  %v9063_v48 = vadd.f32 %v4035_v42, %v3922_v15  ;;  %v7347_v7 = vcombine.high %v1040_v55, %v1044_v32  ;;  %v904_v15 = vld [vmem:[#allocation7 + $0x390] sm:$0xff]  ;;  %v7346_v28 = vcombine.low %v1040_v55, %v1044_v32 }
 0x18a   : > { %4890 = vmatpush1.bf16.msra.mxu1 %v7242_v54  ;;  %v4039_v16 = vpop.f32.mrf.mxu1  ;;  %v3928_v36 = vpop.f32.mrf.mxu0  ;;  %v7219_v54 = vcombine.high %v912_v27, %v916_v14  ;;  %v908_v42 = vld [vmem:[#allocation7 + $0x3b0] sm:$0xff] }
 0x18b   : > { %4891 = vmatprep.subr.bf16.mxu1 %v7235_v20  ;;  %4603 = vmatmul.mubr.bf16.gmra.mxu0 %v8891_v12  ;;  %v9067_v29 = vadd.f32 %v4039_v16, %v3926_v51  ;;  %v11003_v20 = vld [vmem:[#allocation41_spill] sm:$0xff] }
 0x18c   : > { %4779 = vmatpush1.bf16.msra.mxu0 %v7106_v44  ;;  %v4041_v5 = vpop.f32.mrf.mxu1  ;;  %4612 = vmatprep.mubr.bf16.mxu0 %v11003_v20  ;;  %v3930_v10 = vpop.f32.mrf.mxu0  ;;  %v1032_v21 = vld [vmem:[#allocation7 + $0x790] sm:$0xff]  ;;  %v7218_v44 = vcombine.low %v912_v27, %v916_v14  ;;  %v7210_v14 = vcombine.low %v904_v15, %v908_v42 }
 0x18d   : > { %4716 = vmatmul.mubr.bf16.gmra.mxu1 %v8894_v30  ;;  %4780 = vmatprep.subr.bf16.mxu0 %v7099_v2  ;;  %v9070_v12 = vadd.f32 %v4041_v5, %v3928_v36  ;;  %v11004_v30 = vld [vmem:[#allocation42_spill] sm:$0xff]  ;;  %v1036_v51 = vld [vmem:[#allocation7 + $0x7b0] sm:$0xff]  ;;  %v7211_v2 = vcombine.high %v904_v15, %v908_v42 }
 0x18e   : > { %4892 = vmatpush1.bf16.msra.mxu1 %v7234_v46  ;;  %4725 = vmatprep.mubr.bf16.mxu1 %v11004_v30  ;;  %v4043_v22 = vpop.f32.mrf.mxu1  ;;  %v3932_v4 = vpop.f32.mrf.mxu0  ;;  %v7339_v16 = vcombine.high %v1032_v21, %v1036_v51  ;;  %v896_v36 = vld [vmem:[#allocation7 + $0x350] sm:$0xff]  ;;  %v7338_v32 = vcombine.low %v1032_v21, %v1036_v51 }
 0x18f   : > { %4893 = vmatprep.subr.bf16.mxu1 %v7227_v26  ;;  %v9073_v46 = vadd.f32 %v4043_v22, %v3930_v10  ;;  %v900_v5 = vld [vmem:[#allocation7 + $0x370] sm:$0xff]  ;;  %v11005_v10 = vld [vmem:[#allocation44_spill] sm:$0xff] }
 0x190   : > { %4781 = vmatpush1.bf16.msra.mxu0 %v7098_v59  ;;  %v4045_v26 = vpop.f32.mrf.mxu1  ;;  %v3936_v30 = vpop.f32.mrf.mxu0  ;;  %v1028_v59 = vld [vmem:[#allocation7 + $0x770] sm:$0xff] }
 0x191   : > { %4782 = vmatprep.subr.bf16.mxu0 %v7219_v54  ;;  %v9075_v20 = vadd.f32 %v4045_v26, %v3932_v4  ;;  %v7203_v54 = vcombine.high %v896_v36, %v900_v5  ;;  %v7331_v22 = vcombine.high %v1024_v31, %v1028_v59  ;;  %v888_v4 = vld [vmem:[#allocation7 + $0x310] sm:$0xff]  ;;  %v7330_v51 = vcombine.low %v1024_v31, %v1028_v59 }
 0x192   : > { %4894 = vmatpush1.bf16.msra.mxu1 %v7226_v37  ;;  %v4049_v27 = vpop.f32.mrf.mxu1  ;;  %v3938_v55 = vpop.f32.mrf.mxu0  ;;  %v892_v26 = vld [vmem:[#allocation7 + $0x330] sm:$0xff] }
 0x193   : > { %4895 = vmatprep.subr.bf16.mxu1 %v7347_v7  ;;  %4613 = vmatmul.mubr.bf16.gmra.mxu0 %v8917_v9  ;;  %v9079_v37 = vadd.f32 %v4049_v27, %v3936_v30  ;;  %v1016_v15 = vld [vmem:[#allocation7 + $0x710] sm:$0xff] }
 0x194   : > { %4783 = vmatpush2.bf16.msra.mxu0 %v7218_v44  ;;  %v4051_v7 = vpop.f32.mrf.mxu1  ;;  %4622 = vmatprep.mubr.bf16.mxu0 %v8928_v8  ;;  %v3940_v25 = vpop.f32.mrf.mxu0  ;;  %v1020_v30 = vld [vmem:[#allocation7 + $0x730] sm:$0xff]  ;;  %v7202_v44 = vcombine.low %v896_v36, %v900_v5  ;;  %v7194_v5 = vcombine.low %v888_v4, %v892_v26 }
 0x195   : > { %4726 = vmatmul.mubr.bf16.gmra.mxu1 %v11005_v10  ;;  %4784 = vmatprep.subr.bf16.mxu0 %v7211_v2  ;;  %v9082_v9 = vadd.f32 %v4051_v7, %v3938_v55  ;;  %v7195_v2 = vcombine.high %v888_v4, %v892_v26  ;;  %v7323_v27 = vcombine.high %v1016_v15, %v1020_v30  ;;  %v880_v55 = vld [vmem:[#allocation7 + $0x2d0] sm:$0xff]  ;;  %v11006_v10 = vld [vmem:[#allocation47_spill] sm:$0xff] }
 0x196   : > { %4896 = vmatpush2.bf16.msra.mxu1 %v7346_v28  ;;  %4735 = vmatprep.mubr.bf16.mxu1 %v8932_v3  ;;  %v4053_v42 = vpop.f32.mrf.mxu1  ;;  %v3942_v21 = vpop.f32.mrf.mxu0  ;;  %v884_v7 = vld [vmem:[#allocation7 + $0x2f0] sm:$0xff]  ;;  %v7322_v59 = vcombine.low %v1016_v15, %v1020_v30 }
 0x197   : > { %4897 = vmatprep.subr.bf16.mxu1 %v7339_v16  ;;  %v9085_v28 = vadd.f32 %v4053_v42, %v3940_v25  ;;  %v11007_v25 = vld [vmem:[#allocation48_spill] sm:$0xff]  ;;  %v11008_v42 = vld [vmem:[#allocation49_spill] sm:$0xff] }
 0x198   : > { %4785 = vmatpush2.bf16.msra.mxu0 %v7210_v14  ;;  %v4055_v16 = vpop.f32.mrf.mxu1  ;;  %v3946_v3 = vpop.f32.mrf.mxu0  ;;  %v1012_v14 = vld [vmem:[#allocation7 + $0x6f0] sm:$0xff] }
 0x199   : > { %4786 = vmatprep.subr.bf16.mxu0 %v7203_v54  ;;  %v9087_v8 = vadd.f32 %v4055_v16, %v3942_v21  ;;  %v7187_v54 = vcombine.high %v880_v55, %v884_v7  ;;  %v7315_v21 = vcombine.high %v1008_v43, %v1012_v14  ;;  %v872_v16 = vld [vmem:[#allocation7 + $0x290] sm:$0xff]  ;;  %v7314_v30 = vcombine.low %v1008_v43, %v1012_v14 }
 0x19a   : > { %4898 = vmatpush2.bf16.msra.mxu1 %v7338_v32  ;;  %v4059_v36 = vpop.f32.mrf.mxu1  ;;  %v3948_v31 = vpop.f32.mrf.mxu0  ;;  %v1000_v4 = vld [vmem:[#allocation7 + $0x690] sm:$0xff] }
 0x19b   : > { %4899 = vmatprep.subr.bf16.mxu1 %v7331_v22  ;;  %4623 = vmatmul.mubr.bf16.gmra.mxu0 %v11006_v10  ;;  %v9091_v32 = vadd.f32 %v4059_v36, %v3946_v3  ;;  %v876_v10 = vld [vmem:[#allocation7 + $0x2b0] sm:$0xff] }
 0x19c   : > { %4787 = vmatpush2.bf16.msra.mxu0 %v7202_v44  ;;  %v4061_v22 = vpop.f32.mrf.mxu1  ;;  %4632 = vmatprep.mubr.bf16.mxu0 %v11008_v42  ;;  %v3950_v52 = vpop.f32.mrf.mxu0  ;;  %v1004_v3 = vld [vmem:[#allocation7 + $0x6b0] sm:$0xff]  ;;  %v7186_v44 = vcombine.low %v880_v55, %v884_v7 }
 0x19d   : > { %4736 = vmatmul.mubr.bf16.gmra.mxu1 %v11007_v25  ;;  %4788 = vmatprep.subr.bf16.mxu0 %v7195_v2  ;;  %v9094_v0 = vadd.f32 %v4061_v22, %v3948_v31  ;;  %v11010_v25 = vld [vmem:[#allocation50_spill] sm:$0xff]  ;;  %v7179_v2 = vcombine.high %v872_v16, %v876_v10  ;;  %v7307_v36 = vcombine.high %v1000_v4, %v1004_v3  ;;  %v864_v31 = vld [vmem:[#allocation7 + $0x250] sm:$0xff] }
 0x19e   : > { %4900 = vmatpush2.bf16.msra.mxu1 %v7330_v51  ;;  %4745 = vmatprep.mubr.bf16.mxu1 %v11010_v25  ;;  %v4063_v26 = vpop.f32.mrf.mxu1  ;;  %v3952_v15 = vpop.f32.mrf.mxu0  ;;  %v868_v22 = vld [vmem:[#allocation7 + $0x270] sm:$0xff]  ;;  %v7306_v14 = vcombine.low %v1000_v4, %v1004_v3 }
 0x19f   : > { %4901 = vmatprep.subr.bf16.mxu1 %v7323_v27  ;;  %11009 = vst [vmem:[#allocation57_spill] sm:$0xff] %v9094_v0  ;;  %v9097_v51 = vadd.f32 %v4063_v26, %v3950_v52  ;;  %v992_v0 = vld [vmem:[#allocation7 + $0x650] sm:$0xff]  ;;  %v7178_v52 = vcombine.low %v872_v16, %v876_v10 }
 0x1a0   : > { %4789 = vmatpush2.bf16.msra.mxu0 %v7194_v5  ;;  %v4065_v27 = vpop.f32.mrf.mxu1  ;;  %v3956_v25 = vpop.f32.mrf.mxu0  ;;  %v996_v5 = vld [vmem:[#allocation7 + $0x670] sm:$0xff] }
 0x1a1   : > { %4790 = vmatprep.subr.bf16.mxu0 %v7187_v54  ;;  %v9099_v42 = vadd.f32 %v4065_v27, %v3952_v15  ;;  %v856_v26 = vld [vmem:[#allocation7 + $0x210] sm:$0xff]  ;;  %v7298_v3 = vcombine.low %v992_v0, %v996_v5 }
 0x1a2   : > { %4902 = vmatpush2.bf16.msra.mxu1 %v7322_v59  ;;  %v3958_v43 = vpop.f32.mrf.mxu0  ;;  %v7171_v59 = vcombine.high %v864_v31, %v868_v22  ;;  %v860_v15 = vld [vmem:[#allocation7 + $0x230] sm:$0xff] }
 0x1a3   : > { %4903 = vmatprep.subr.bf16.mxu1 %v7315_v21  ;;  %4633 = vmatmul.mubr.bf16.gmra.mxu0 %v8969_v33  ;;  %v4069_v55 = vpop.f32.mrf.mxu1  ;;  %v7299_v21 = vcombine.high %v992_v0, %v996_v5  ;;  %v984_v10 = vld [vmem:[#allocation7 + $0x610] sm:$0xff] }
 0x1a4   : > { %4791 = vmatpush2.bf16.msra.mxu0 %v7186_v44  ;;  %v9103_v7 = vadd.f32 %v4069_v55, %v3956_v25  ;;  %4642 = vmatprep.mubr.bf16.mxu0 %v8978_v63  ;;  %v3960_v33 = vpop.f32.mrf.mxu0  ;;  %v988_v25 = vld [vmem:[#allocation7 + $0x630] sm:$0xff]  ;;  %v7170_v44 = vcombine.low %v864_v31, %v868_v22  ;;  %v7162_v22 = vcombine.low %v856_v26, %v860_v15 }
 0x1a5   : > { %4746 = vmatmul.mubr.bf16.gmra.mxu1 %v8972_v19  ;;  %4792 = vmatprep.subr.bf16.mxu0 %v7179_v2  ;;  %v4071_v54 = vpop.f32.mrf.mxu1  ;;  %v7163_v2 = vcombine.high %v856_v26, %v860_v15  ;;  %v7291_v55 = vcombine.high %v984_v10, %v988_v25  ;;  %v1236_v31 = vld [vmem:[#allocation7 + $0xdf0] sm:$0xff] }
 0x1a6   : > { %4904 = vmatpush2.bf16.msra.mxu1 %v7314_v30  ;;  %v9106_v27 = vadd.f32 %v4071_v54, %v3958_v43  ;;  %4755 = vmatprep.mubr.bf16.mxu1 %v8982_v39  ;;  %v3962_v4 = vpop.f32.mrf.mxu0  ;;  %v1104_v43 = vld [vmem:[#allocation7 + $0x9d0] sm:$0xff] }
 0x1a7   : > { %4905 = vmatprep.subr.bf16.mxu1 %v7307_v36  ;;  %v4073_v16 = vpop.f32.mrf.mxu1  ;;  %v1108_v54 = vld [vmem:[#allocation7 + $0x9f0] sm:$0xff] }
 0x1a8   : > { %4793 = vmatpush2.bf16.msra.mxu0 %v7178_v52  ;;  %v9109_v30 = vadd.f32 %v4073_v16, %v3960_v33  ;;  %v1232_v52 = vld [vmem:[#allocation7 + $0xdd0] sm:$0xff] }
 0x1a9   : > { %4794 = vmatprep.subr.bf16.mxu0 %v7171_v59  ;;  %v4075_v36 = vpop.f32.mrf.mxu1  ;;  %v3966_v39 = vpop.f32.mrf.mxu0  ;;  %v7411_v59 = vcombine.high %v1104_v43, %v1108_v54  ;;  %v8102_v16 = vld [vmem:[%s8518_s5 + $0x4] ss:$8 sps:$4 sm:$0xff]  }
 0x1aa   : > { %4906 = vmatpush2.bf16.msra.mxu1 %v7306_v14  ;;  %v9111_v63 = vadd.f32 %v4075_v36, %v3962_v4  ;;  %v7290_v14 = vcombine.low %v984_v10, %v988_v25  ;;  %v7539_v4 = vcombine.high %v1232_v52, %v1236_v31  ;;  %v1096_v36 = vld [vmem:[#allocation7 + $0x990] sm:$0xff] }
 0x1ab   : > { %4907 = vmatprep.subr.bf16.mxu1 %v7299_v21  ;;  %4643 = vmatmul.mubr.bf16.gmra.mxu0 %v8988_v50  ;;  %v4079_v33 = vpop.f32.mrf.mxu1  ;;  %v3968_v5 = vpop.f32.mrf.mxu0  ;;  %v1100_v50 = vld [vmem:[#allocation7 + $0x9b0] sm:$0xff] }
 0x1ac   : > { %11011 = vst [vmem:[#allocation58_spill] sm:$0xff] %v9111_v63  ;;  %4795 = vmatpush2.bf16.msra.mxu0 %v7170_v44  ;;  %v9115_v0 = vadd.f32 %v4079_v33, %v3966_v39  ;;  %4798 = vmatprep.mubr.bf16.mxu0 %v8102_v16  ;;  %v1224_v26 = vld [vmem:[#allocation7 + $0xd90] sm:$0xff]  ;;  %v7410_v44 = vcombine.low %v1104_v43, %v1108_v54 }
 0x1ad   : > { %4756 = vmatmul.mubr.bf16.gmra.mxu1 %v8991_v40  ;;  %4796 = vmatprep.subr.bf16.mxu0 %v7163_v2  ;;  %v4081_v21 = vpop.f32.mrf.mxu1  ;;  %v3970_v63 = vpop.f32.mrf.mxu0  ;;  %v1228_v39 = vld [vmem:[#allocation7 + $0xdb0] sm:$0xff]  ;;  %v7403_v2 = vcombine.high %v1096_v36, %v1100_v50 }
 0x1ae   : > { %4908 = vmatpush2.bf16.msra.mxu1 %v7298_v3  ;;  %v9118_v19 = vadd.f32 %v4081_v21, %v3968_v5  ;;  %4911 = vmatprep.mubr.bf16.mxu1 %v8560_v17  ;;  %v7538_v3 = vcombine.low %v1232_v52, %v1236_v31  ;;  %v7531_v33 = vcombine.high %v1224_v26, %v1228_v39  ;;  %v1088_v5 = vld [vmem:[#allocation7 + $0x950] sm:$0xff] }
 0x1af   : > { %4909 = vmatprep.subr.bf16.mxu1 %v7291_v55  ;;  %v4083_v15 = vpop.f32.mrf.mxu1  ;;  %v3972_v25 = vpop.f32.mrf.mxu0  ;;  %v1092_v21 = vld [vmem:[#allocation7 + $0x970] sm:$0xff]  ;;  %v7402_v52 = vcombine.low %v1096_v36, %v1100_v50 }
 0x1b0   : > { %11012 = vst [vmem:[#allocation59_spill] sm:$0xff] %v9118_v19  ;;  %4797 = vmatpush2.bf16.msra.mxu0 %v7162_v22  ;;  %v9121_v10 = vadd.f32 %v4083_v15, %v3970_v63  ;;  %v8103_v40 = vld [vmem:[%s8518_s5] ss:$8 sps:$4 sm:$0xff]   ;;  %v7530_v22 = vcombine.low %v1224_v26, %v1228_v39  ;;  %v8104_v15 = vld [vmem:[%s8518_s5 + $0x14] ss:$8 sps:$4 sm:$0xff]  }
 0x1b1   : > { %4992 = vmatprep.subr.bf16.mxu0 %v7411_v59  ;;  %v4085_v55 = vpop.f32.mrf.mxu1  ;;  %v1216_v19 = vld [vmem:[#allocation7 + $0xd50] sm:$0xff] }
 0x1b2   : > { %4910 = vmatpush2.bf16.msra.mxu1 %v7290_v14  ;;  %v9123_v16 = vadd.f32 %v4085_v55, %v3972_v25  ;;  %v1220_v43 = vld [vmem:[#allocation7 + $0xd70] sm:$0xff]  ;;  %v7395_v14 = vcombine.high %v1088_v5, %v1092_v21 }
 0x1b3   : > { %5105 = vmatprep.subr.bf16.mxu1 %v7539_v4  ;;  %v4122_v17 = vpop.f32.mrf.mxu0  ;;  %4799 = vmatmul.mubr.bf16.vlgmr.msra.gmra.mxu0 %v8103_v40  ;;  %v7523_v25 = vcombine.high %v1216_v19, %v1220_v43  ;;  %v1208_v50 = vld [vmem:[#allocation7 + $0xd10] sm:$0xff] }
 0x1b4   : > { %v4123_v63 = vadd.f32 %v4122_v17, %v9031_v49  ;;  %4993 = vmatpush1.bf16.msra.mxu0 %v7410_v44  ;;  %4808 = vmatprep.mubr.bf16.mxu0 %v8104_v15  ;;  %v1080_v17 = vld [vmem:[#allocation7 + $0x910] sm:$0xff] }
 0x1b5   : > { %v4235_v54 = vpop.f32.mrf.mxu1  ;;  %4912 = vmatmul.mubr.bf16.vlgmr.msra.gmra.mxu1 %v8599_v62  ;;  %v4124_v31 = vpop.f32.mrf.mxu0  ;;  %4994 = vmatprep.subr.bf16.mxu0 %v7403_v2  ;;  %v1084_v49 = vld [vmem:[#allocation7 + $0x930] sm:$0xff]  ;;  %v7522_v2 = vcombine.low %v1216_v19, %v1220_v43 }
 0x1b6   : > { %5106 = vmatpush1.bf16.msra.mxu1 %v7538_v3  ;;  %v9128_v59 = vadd.f32 %v4235_v54, %v4123_v63  ;;  %v4125_v4 = vadd.f32 %v4124_v31, %v9034_v45  ;;  %4921 = vmatprep.mubr.bf16.mxu1 %v8612_v58  ;;  %v1212_v36 = vld [vmem:[#allocation7 + $0xd30] sm:$0xff]  ;;  %v7394_v45 = vcombine.low %v1088_v5, %v1092_v21 }
 0x1b7   : > { %v4237_v40 = vpop.f32.mrf.mxu1  ;;  %5107 = vmatprep.subr.bf16.mxu1 %v7531_v33  ;;  %v4126_v55 = vpop.f32.mrf.mxu0  ;;  %v7387_v33 = vcombine.high %v1080_v17, %v1084_v49  ;;  %v7515_v15 = vcombine.high %v1208_v50, %v1212_v36 }
 0x1b8   : > { %11013 = vst [vmem:[#allocation60_spill] sm:$0xff] %v9128_v59  ;;  %v9133_v44 = vadd.f32 %v4237_v40, %v4125_v4  ;;  %v4127_v26 = vadd.f32 %v4126_v55, %v9037_v34  ;;  %4995 = vmatpush1.bf16.msra.mxu0 %v7402_v52  ;;  %v1072_v4 = vld [vmem:[#allocation7 + $0x8d0] sm:$0xff]  ;;  %v8105_v34 = vld [vmem:[%s8518_s5 + $0x10] ss:$8 sps:$4 sm:$0xff]  }
 0x1b9   : > { %v4239_v39 = vpop.f32.mrf.mxu1  ;;  %v4128_v3 = vpop.f32.mrf.mxu0  ;;  %4996 = vmatprep.subr.bf16.mxu0 %v7395_v14  ;;  %v1076_v40 = vld [vmem:[#allocation7 + $0x8f0] sm:$0xff] }
 0x1ba   : > { %11014 = vst [vmem:[#allocation61_spill] sm:$0xff] %v9133_v44  ;;  %5108 = vmatpush1.bf16.msra.mxu1 %v7530_v22  ;;  %v9136_v63 = vadd.f32 %v4239_v39, %v4127_v26  ;;  %v4129_v54 = vadd.f32 %v4128_v3, %v9039_v41  ;;  %v1200_v55 = vld [vmem:[#allocation7 + $0xcd0] sm:$0xff]  ;;  %v7386_v41 = vcombine.low %v1080_v17, %v1084_v49 }
 0x1bb   : > { %v4241_v31 = vpop.f32.mrf.mxu1  ;;  %5109 = vmatprep.subr.bf16.mxu1 %v7523_v25  ;;  %v4132_v44 = vpop.f32.mrf.mxu0  ;;  %4809 = vmatmul.mubr.bf16.gmra.mxu0 %v8105_v34  ;;  %v1204_v52 = vld [vmem:[#allocation7 + $0xcf0] sm:$0xff]  ;;  %v7514_v22 = vcombine.low %v1208_v50, %v1212_v36  ;;  %v7379_v14 = vcombine.high %v1072_v4, %v1076_v40 }
 0x1bc   : > { %11015 = vst [vmem:[#allocation62_spill] sm:$0xff] %v9136_v63  ;;  %v9140_v5 = vadd.f32 %v4241_v31, %v4129_v54  ;;  %v4133_v19 = vadd.f32 %v4132_v44, %v9043_v47  ;;  %4997 = vmatpush1.bf16.msra.mxu0 %v7394_v45  ;;  %v8106_v3 = vld [vmem:[%s8518_s5 + $0x24] ss:$8 sps:$4 sm:$0xff]   ;;  %v7507_v54 = vcombine.high %v1200_v55, %v1204_v52 }
 0x1bd   : > { %v4245_v21 = vpop.f32.mrf.mxu1  ;;  %4922 = vmatmul.mubr.bf16.gmra.mxu1 %v8633_v23  ;;  %v4134_v43 = vpop.f32.mrf.mxu0  ;;  %4998 = vmatprep.subr.bf16.mxu0 %v7387_v33  ;;  %v1064_v47 = vld [vmem:[#allocation7 + $0x890] sm:$0xff]  ;;  %v7506_v33 = vcombine.low %v1200_v55, %v1204_v52 }
 0x1be   : > { %11016 = vst [vmem:[#allocation63_spill] sm:$0xff] %v9140_v5  ;;  %5110 = vmatpush1.bf16.msra.mxu1 %v7522_v2  ;;  %v9144_v25 = vadd.f32 %v4245_v21, %v4133_v19  ;;  %v4135_v26 = vadd.f32 %v4134_v43, %v9046_v13  ;;  %4818 = vmatprep.mubr.bf16.mxu0 %v8106_v3  ;;  %v1068_v44 = vld [vmem:[#allocation7 + $0x8b0] sm:$0xff]  ;;  %v11066_v5 = vld [vmem:[#allocation38_spill] sm:$0xff] }
 0x1bf   : > { %v4247_v39 = vpop.f32.mrf.mxu1  ;;  %5111 = vmatprep.subr.bf16.mxu1 %v7515_v15  ;;  %v4136_v31 = vpop.f32.mrf.mxu0  ;;  %4931 = vmatprep.mubr.bf16.mxu1 %v8640_v35  ;;  %v1192_v17 = vld [vmem:[#allocation7 + $0xc90] sm:$0xff]  ;;  %v7378_v13 = vcombine.low %v1072_v4, %v1076_v40  ;;  %v7371_v15 = vcombine.high %v1064_v47, %v1068_v44 }
 0x1c0   : > { %11017 = vst [vmem:[#allocation64_spill] sm:$0xff] %v9144_v25  ;;  %v1196_v49 = vld [vmem:[#allocation7 + $0xcb0] sm:$0xff]  ;;  %v9149_v45 = vadd.f32 %v4247_v39, %v4135_v26  ;;  %v4137_v50 = vadd.f32 %v4136_v31, %v9049_v38  ;;  %4999 = vmatpush1.bf16.msra.mxu0 %v7386_v41 }
 0x1c1   : > { %v4249_v36 = vpop.f32.mrf.mxu1  ;;  %v4138_v2 = vpop.f32.mrf.mxu0  ;;  %5000 = vmatprep.subr.bf16.mxu0 %v7379_v14  ;;  %v7499_v43 = vcombine.high %v1192_v17, %v1196_v49  ;;  %v1056_v26 = vld [vmem:[#allocation7 + $0x850] sm:$0xff] }
 0x1c2   : > { %11018 = vst [vmem:[#allocation65_spill] sm:$0xff] %v9149_v45  ;;  %5112 = vmatpush1.bf16.msra.mxu1 %v7514_v22  ;;  %v9152_v34 = vadd.f32 %v4249_v36, %v4137_v50  ;;  %v4139_v19 = vadd.f32 %v4138_v2, %v9051_v24  ;;  %v1060_v39 = vld [vmem:[#allocation7 + $0x870] sm:$0xff]  ;;  %v7370_v24 = vcombine.low %v1064_v47, %v1068_v44  ;;  %v8108_v2 = vld [vmem:[%s8518_s5 + $0x34] ss:$8 sps:$4 sm:$0xff]  }
 0x1c3   : > { %v4251_v21 = vpop.f32.mrf.mxu1  ;;  %5113 = vmatprep.subr.bf16.mxu1 %v7507_v54  ;;  %v4142_v3 = vpop.f32.mrf.mxu0  ;;  %v8107_v38 = vld [vmem:[%s8518_s5 + $0x20] ss:$8 sps:$4 sm:$0xff]   ;;  %v7498_v22 = vcombine.low %v1192_v17, %v1196_v49  ;;  %v7363_v14 = vcombine.high %v1056_v26, %v1060_v39 }
 0x1c4   : > { %11019 = vst [vmem:[#allocation66_spill] sm:$0xff] %v9152_v34  ;;  %4819 = vmatmul.mubr.bf16.gmra.mxu0 %v8107_v38  ;;  %v1184_v31 = vld [vmem:[#allocation7 + $0xc50] sm:$0xff]  ;;  %v9156_v4 = vadd.f32 %v4251_v21, %v4139_v19  ;;  %v4143_v40 = vadd.f32 %v4142_v3, %v9055_v56  ;;  %v797_v34 = vld [vmem:[#allocation7 + $0x38] sm:$0xff] }
 0x1c5   : > { %v1188_v41 = vld [vmem:[#allocation7 + $0xc70] sm:$0xff]  ;;  %v4255_v55 = vpop.f32.mrf.mxu1  ;;  %4932 = vmatmul.mubr.bf16.gmra.mxu1 %v8661_v57  ;;  %5001 = vmatpush1.bf16.msra.mxu0 %v7378_v13  ;;  %v4144_v52 = vpop.f32.mrf.mxu0 }
 0x1c6   : > { %11020 = vst [vmem:[#allocation67_spill] sm:$0xff] %v9156_v4  ;;  %5114 = vmatpush1.bf16.msra.mxu1 %v7506_v33  ;;  %5002 = vmatprep.subr.bf16.mxu0 %v7371_v15  ;;  %v9160_v54 = vadd.f32 %v4255_v55, %v4143_v40  ;;  %v4145_v50 = vadd.f32 %v4144_v52, %v9058_v60  ;;  %v1048_v56 = vld [vmem:[#allocation7 + $0x810] sm:$0xff]  ;;  %v929_v4 = vld [vmem:[#allocation7 + $0x458] sm:$0xff] }
 0x1c7   : > { %v4257_v36 = vpop.f32.mrf.mxu1  ;;  %5115 = vmatprep.subr.bf16.mxu1 %v7499_v43  ;;  %4828 = vmatprep.mubr.bf16.mxu0 %v8108_v2  ;;  %v7491_v19 = vcombine.high %v1184_v31, %v1188_v41  ;;  %v1052_v21 = vld [vmem:[#allocation7 + $0x830] sm:$0xff]  ;;  %v4146_v3 = vpop.f32.mrf.mxu0  ;;  %v7362_v60 = vcombine.low %v1056_v26, %v1060_v39  ;;  %v7490_v15 = vcombine.low %v1184_v31, %v1188_v41 }
 0x1c8   : > { %11021 = vst [vmem:[#allocation68_spill] sm:$0xff] %v9160_v54  ;;  %4941 = vmatprep.mubr.bf16.mxu1 %v8669_v18  ;;  %v1176_v47 = vld [vmem:[#allocation7 + $0xc10] sm:$0xff]  ;;  %v9165_v13 = vadd.f32 %v4257_v36, %v4145_v50  ;;  %v4147_v17 = vadd.f32 %v4146_v3, %v9061_v1  ;;  %v7355_v43 = vcombine.high %v1048_v56, %v1052_v21  ;;  %v8109_v1 = vld [vmem:[%s8518_s5 + $0x30] ss:$8 sps:$4 sm:$0xff]  }
 0x1c9   : > { %v1180_v44 = vld [vmem:[#allocation7 + $0xc30] sm:$0xff]  ;;  %v4259_v49 = vpop.f32.mrf.mxu1  ;;  %5003 = vmatpush1.bf16.msra.mxu0 %v7370_v24  ;;  %v4148_v33 = vpop.f32.mrf.mxu0  ;;  %v11063_v54 = vld [vmem:[#allocation35_spill] sm:$0xff] }
 0x1ca   : > { %11022 = vst [vmem:[#allocation69_spill] sm:$0xff] %v9165_v13  ;;  %5116 = vmatpush1.bf16.msra.mxu1 %v7498_v22  ;;  %5004 = vmatprep.subr.bf16.mxu0 %v7363_v14  ;;  %v9168_v38 = vadd.f32 %v4259_v49, %v4147_v17  ;;  %v4149_v40 = vadd.f32 %v4148_v33, %v9063_v48  ;;  %v1168_v50 = vld [vmem:[#allocation7 + $0xbd0] sm:$0xff] }
 0x1cb   : > { %v4261_v55 = vpop.f32.mrf.mxu1  ;;  %5117 = vmatprep.subr.bf16.mxu1 %v7491_v19  ;;  %v7483_v52 = vcombine.high %v1176_v47, %v1180_v44  ;;  %v1172_v36 = vld [vmem:[#allocation7 + $0xbf0] sm:$0xff]  ;;  %v4152_v2 = vpop.f32.mrf.mxu0  ;;  %v7354_v48 = vcombine.low %v1048_v56, %v1052_v21  ;;  %v7482_v22 = vcombine.low %v1176_v47, %v1180_v44 }
 0x1cc   : > { %11023 = vst [vmem:[#allocation70_spill] sm:$0xff] %v9168_v38  ;;  %4829 = vmatmul.mubr.bf16.gmra.mxu0 %v8109_v1  ;;  %v1296_v3 = vld [vmem:[#allocation7 + $0xfd0] sm:$0xff]  ;;  %v9172_v26 = vadd.f32 %v4261_v55, %v4149_v40  ;;  %v4153_v39 = vadd.f32 %v4152_v2, %v9067_v29  ;;  %v7475_v14 = vcombine.high %v1168_v50, %v1172_v36 }
 0x1cd   : > { %v1300_v24 = vld [vmem:[#allocation7 + $0xff0] sm:$0xff]  ;;  %v4265_v31 = vpop.f32.mrf.mxu1  ;;  %4942 = vmatmul.mubr.bf16.gmra.mxu1 %v8689_v61  ;;  %5005 = vmatpush1.bf16.msra.mxu0 %v7362_v60  ;;  %v4154_v41 = vpop.f32.mrf.mxu0 }
 0x1ce   : > { %11024 = vst [vmem:[#allocation71_spill] sm:$0xff] %v9172_v26  ;;  %5118 = vmatpush1.bf16.msra.mxu1 %v7490_v15  ;;  %5006 = vmatprep.subr.bf16.mxu0 %v7355_v43  ;;  %v9176_v19 = vadd.f32 %v4265_v31, %v4153_v39  ;;  %v4155_v17 = vadd.f32 %v4154_v41, %v9070_v12  ;;  %v8110_v33 = vld [vmem:[%s8518_s5 + $0x44] ss:$8 sps:$4 sm:$0xff]  }
 0x1cf   : > { %v4267_v49 = vpop.f32.mrf.mxu1  ;;  %5119 = vmatprep.subr.bf16.mxu1 %v7483_v52  ;;  %4838 = vmatprep.mubr.bf16.mxu0 %v8110_v33  ;;  %v7603_v40 = vcombine.high %v1296_v3, %v1300_v24  ;;  %v1160_v29 = vld [vmem:[#allocation7 + $0xb90] sm:$0xff]  ;;  %v4156_v2 = vpop.f32.mrf.mxu0  ;;  %v7474_v12 = vcombine.low %v1168_v50, %v1172_v36  ;;  %v7602_v43 = vcombine.low %v1296_v3, %v1300_v24  ;;  %v11062_v26 = vld [vmem:[#allocation34_spill] sm:$0xff] }
 0x1d0   : > { %11025 = vst [vmem:[#allocation72_spill] sm:$0xff] %v9176_v19  ;;  %v1164_v55 = vld [vmem:[#allocation7 + $0xbb0] sm:$0xff]  ;;  %4951 = vmatprep.mubr.bf16.mxu1 %v8697_v11  ;;  %v9181_v60 = vadd.f32 %v4267_v49, %v4155_v17  ;;  %v4157_v47 = vadd.f32 %v4156_v2, %v9073_v46 }
 0x1d1   : > { %v1288_v56 = vld [vmem:[#allocation7 + $0xf90] sm:$0xff]  ;;  %v4269_v44 = vpop.f32.mrf.mxu1  ;;  %5007 = vmatpush1.bf16.msra.mxu0 %v7354_v48  ;;  %v4158_v15 = vpop.f32.mrf.mxu0  ;;  %v7467_v52 = vcombine.high %v1160_v29, %v1164_v55 }
 0x1d2   : > { %v1292_v21 = vld [vmem:[#allocation7 + $0xfb0] sm:$0xff]  ;;  %11026 = vst [vmem:[#allocation73_spill] sm:$0xff] %v9181_v60  ;;  %5120 = vmatpush1.bf16.msra.mxu1 %v7482_v22  ;;  %5008 = vmatprep.subr.bf16.mxu0 %v7475_v14  ;;  %v9184_v1 = vadd.f32 %v4269_v44, %v4157_v47  ;;  %v4159_v39 = vadd.f32 %v4158_v15, %v9075_v20  ;;  %v8112_v15 = vld [vmem:[%s8518_s5 + $0x54] ss:$8 sps:$4 sm:$0xff]  }
 0x1d3   : > { %v4271_v31 = vpop.f32.mrf.mxu1  ;;  %5121 = vmatprep.subr.bf16.mxu1 %v7603_v40  ;;  %v7595_v41 = vcombine.high %v1288_v56, %v1292_v21  ;;  %v1152_v17 = vld [vmem:[#allocation7 + $0xb50] sm:$0xff]  ;;  %v4162_v33 = vpop.f32.mrf.mxu0  ;;  %v7466_v20 = vcombine.low %v1160_v29, %v1164_v55  ;;  %v7594_v22 = vcombine.low %v1288_v56, %v1292_v21 }
 0x1d4   : > { %11027 = vst [vmem:[#allocation74_spill] sm:$0xff] %v9184_v1  ;;  %v1156_v49 = vld [vmem:[#allocation7 + $0xb70] sm:$0xff]  ;;  %v9188_v50 = vadd.f32 %v4271_v31, %v4159_v39  ;;  %v4163_v36 = vadd.f32 %v4162_v33, %v9079_v37  ;;  %v813_v1 = vld [vmem:[#allocation7 + $0xb8] sm:$0xff] }
 0x1d5   : > { %v8111_v46 = vld [vmem:[%s8518_s5 + $0x40] ss:$8 sps:$4 sm:$0xff]   ;;  %v4275_v3 = vpop.f32.mrf.mxu1  ;;  %4952 = vmatmul.mubr.bf16.gmra.mxu1 %v8717_v6  ;;  %5009 = vmatpush2.bf16.msra.mxu0 %v7474_v12  ;;  %v4164_v24 = vpop.f32.mrf.mxu0  ;;  %v7459_v14 = vcombine.high %v1152_v17, %v1156_v49 }
 0x1d6   : > { %4839 = vmatmul.mubr.bf16.gmra.mxu0 %v8111_v46  ;;  %v1280_v2 = vld [vmem:[#allocation7 + $0xf50] sm:$0xff]  ;;  %11028 = vst [vmem:[#allocation75_spill] sm:$0xff] %v9188_v50  ;;  %5122 = vmatpush2.bf16.msra.mxu1 %v7602_v43  ;;  %v9192_v40 = vadd.f32 %v4275_v3, %v4163_v36  ;;  %v4165_v47 = vadd.f32 %v4164_v24, %v9082_v9  ;;  %v945_v50 = vld [vmem:[#allocation7 + $0x4d8] sm:$0xff] }
 0x1d7   : > { %v1284_v48 = vld [vmem:[#allocation7 + $0xf70] sm:$0xff]  ;;  %5010 = vmatprep.subr.bf16.mxu0 %v7467_v52  ;;  %v4277_v44 = vpop.f32.mrf.mxu1  ;;  %5123 = vmatprep.subr.bf16.mxu1 %v7595_v41  ;;  %v4166_v33 = vpop.f32.mrf.mxu0  ;;  %v7458_v9 = vcombine.low %v1152_v17, %v1156_v49 }
 0x1d8   : > { %11029 = vst [vmem:[#allocation76_spill] sm:$0xff] %v9192_v40  ;;  %4848 = vmatprep.mubr.bf16.mxu0 %v8112_v15  ;;  %v7587_v39 = vcombine.high %v1280_v2, %v1284_v48  ;;  %v1144_v37 = vld [vmem:[#allocation7 + $0xb10] sm:$0xff]  ;;  %4961 = vmatprep.mubr.bf16.mxu1 %v8726_v53  ;;  %v9197_v12 = vadd.f32 %v4277_v44, %v4165_v47  ;;  %v11059_v40 = vld [vmem:[#allocation31_spill] sm:$0xff] }
 0x1d9   : > { %v1148_v31 = vld [vmem:[#allocation7 + $0xb30] sm:$0xff]  ;;  %v4167_v56 = vadd.f32 %v4166_v33, %v9085_v28  ;;  %v4279_v21 = vpop.f32.mrf.mxu1  ;;  %5011 = vmatpush2.bf16.msra.mxu0 %v7466_v20  ;;  %v4168_v43 = vpop.f32.mrf.mxu0  ;;  %v7586_v52 = vcombine.low %v1280_v2, %v1284_v48  ;;  %v8113_v28 = vld [vmem:[%s8518_s5 + $0x50] ss:$8 sps:$4 sm:$0xff]  }
 0x1da   : > { %v1272_v29 = vld [vmem:[#allocation7 + $0xf10] sm:$0xff]  ;;  %11030 = vst [vmem:[#allocation77_spill] sm:$0xff] %v9197_v12  ;;  %5124 = vmatpush2.bf16.msra.mxu1 %v7594_v22  ;;  %5012 = vmatprep.subr.bf16.mxu0 %v7459_v14  ;;  %v7451_v41 = vcombine.high %v1144_v37, %v1148_v31  ;;  %v4169_v36 = vadd.f32 %v4168_v43, %v9087_v8 }
 0x1db   : > { %v1276_v55 = vld [vmem:[#allocation7 + $0xf30] sm:$0xff]  ;;  %v9200_v46 = vadd.f32 %v4279_v21, %v4167_v56  ;;  %v4281_v3 = vpop.f32.mrf.mxu1  ;;  %5125 = vmatprep.subr.bf16.mxu1 %v7587_v39  ;;  %v4172_v15 = vpop.f32.mrf.mxu0  ;;  %v7450_v8 = vcombine.low %v1144_v37, %v1148_v31 }
 0x1dc   : > { %v7579_v24 = vcombine.high %v1272_v29, %v1276_v55  ;;  %v1136_v47 = vld [vmem:[#allocation7 + $0xad0] sm:$0xff]  ;;  %v9204_v17 = vadd.f32 %v4281_v3, %v4169_v36  ;;  %v4173_v49 = vadd.f32 %v4172_v15, %v9091_v32  ;;  %v7578_v14 = vcombine.low %v1272_v29, %v1276_v55 }
 0x1dd   : > { %11031 = vst [vmem:[#allocation78_spill] sm:$0xff] %v9200_v46  ;;  %v1140_v44 = vld [vmem:[#allocation7 + $0xaf0] sm:$0xff]  ;;  %v4285_v2 = vpop.f32.mrf.mxu1  ;;  %5013 = vmatpush2.bf16.msra.mxu0 %v7458_v9  ;;  %v4174_v22 = vpop.f32.mrf.mxu0  ;;  %v11036_v46 = vld [vmem:[#allocation22_spill] sm:$0xff] }
 0x1de   : > { %4849 = vmatmul.mubr.bf16.gmra.mxu0 %v8113_v28  ;;  %v1264_v33 = vld [vmem:[#allocation7 + $0xed0] sm:$0xff]  ;;  %11032 = vst [vmem:[#allocation79_spill] sm:$0xff] %v9204_v17  ;;  %5126 = vmatpush2.bf16.msra.mxu1 %v7586_v52  ;;  %v7443_v39 = vcombine.high %v1136_v47, %v1140_v44  ;;  %v9208_v56 = vadd.f32 %v4285_v2, %v4173_v49 }
 0x1df   : > { %v1268_v20 = vld [vmem:[#allocation7 + $0xef0] sm:$0xff]  ;;  %5014 = vmatprep.subr.bf16.mxu0 %v7451_v41  ;;  %v4287_v28 = vpop.f32.mrf.mxu1  ;;  %5127 = vmatprep.subr.bf16.mxu1 %v7579_v24  ;;  %v4176_v17 = vpop.f32.mrf.mxu0  ;;  %v7442_v52 = vcombine.low %v1136_v47, %v1140_v44 }
 0x1e0   : > { %v11033_v48 = vld [vmem:[#allocation21_spill] sm:$0xff]  ;;  %v7571_v3 = vcombine.high %v1264_v33, %v1268_v20  ;;  %v4177_v29 = vadd.f32 %v4176_v17, %v9097_v51  ;;  %v7570_v24 = vcombine.low %v1264_v33, %v1268_v20  ;;  %v11040_v20 = vld [vmem:[#allocation23_spill] sm:$0xff] }
 0x1e1   : > { %4962 = vmatmul.mubr.bf16.gmra.mxu1 %v11033_v48  ;;  %11034 = vst [vmem:[#allocation21_spill] sm:$0xff] %v9208_v56  ;;  %v11035_v21 = vld [vmem:[#allocation57_spill] sm:$0xff]  ;;  %v4289_v55 = vpop.f32.mrf.mxu1  ;;  %5015 = vmatpush2.bf16.msra.mxu0 %v7450_v8  ;;  %v4178_v41 = vpop.f32.mrf.mxu0 }
 0x1e2   : > { %v4175_v43 = vadd.f32 %v4174_v22, %v11035_v21  ;;  %v8114_v36 = vld [vmem:[%s8518_s5 + $0x64] ss:$8 sps:$4 sm:$0xff]   ;;  %4971 = vmatprep.mubr.bf16.mxu1 %v11036_v46  ;;  %5128 = vmatpush2.bf16.msra.mxu1 %v7578_v14  ;;  %v9216_v2 = vadd.f32 %v4289_v55, %v4177_v29  ;;  %v4179_v22 = vadd.f32 %v4178_v41, %v9099_v42  ;;  %v8115_v51 = vld [vmem:[%s8518_s5 + $0x60] ss:$8 sps:$4 sm:$0xff]  }
 0x1e3   : > { %4858 = vmatprep.mubr.bf16.mxu0 %v8114_v36  ;;  %v1128_v32 = vld [vmem:[#allocation7 + $0xa90] sm:$0xff]  ;;  %5016 = vmatprep.subr.bf16.mxu0 %v7443_v39  ;;  %v4291_v21 = vpop.f32.mrf.mxu1 }
 0x1e4   : > { %v1132_v15 = vld [vmem:[#allocation7 + $0xab0] sm:$0xff]  ;;  %v9213_v9 = vadd.f32 %v4287_v28, %v4175_v43  ;;  %11038 = vst [vmem:[#allocation22_spill] sm:$0xff] %v9216_v2  ;;  %5129 = vmatprep.subr.bf16.mxu1 %v7571_v3  ;;  %v9220_v47 = vadd.f32 %v4291_v21, %v4179_v22  ;;  %v8116_v22 = vld [vmem:[%s8518_s5 + $0x74] ss:$8 sps:$4 sm:$0xff]   ;;  %v833_v2 = vld [vmem:[#allocation7 + $0x158] sm:$0xff] }
 0x1e5   : > { %v1256_v37 = vld [vmem:[#allocation7 + $0xe90] sm:$0xff]  ;;  %v7435_v49 = vcombine.high %v1128_v32, %v1132_v15  ;;  %v4295_v33 = vpop.f32.mrf.mxu1  ;;  %5017 = vmatpush2.bf16.msra.mxu0 %v7442_v52  ;;  %v7434_v42 = vcombine.low %v1128_v32, %v1132_v15 }
 0x1e6   : > { %v1260_v31 = vld [vmem:[#allocation7 + $0xeb0] sm:$0xff]  ;;  %11037 = vst [vmem:[#allocation57_spill] sm:$0xff] %v9213_v9  ;;  %v4182_v9 = vpop.f32.mrf.mxu0  ;;  %4859 = vmatmul.mubr.bf16.gmra.mxu0 %v8115_v51  ;;  %11039 = vst [vmem:[#allocation80_spill] sm:$0xff] %v9220_v47  ;;  %5130 = vmatpush2.bf16.msra.mxu1 %v7570_v24  ;;  %v11042_v47 = vld [vmem:[#allocation24_spill] sm:$0xff] }
 0x1e7   : > { %v7563_v36 = vcombine.high %v1256_v37, %v1260_v31  ;;  %v1120_v43 = vld [vmem:[#allocation7 + $0xa50] sm:$0xff]  ;;  %v4183_v44 = vadd.f32 %v4182_v9, %v9103_v7  ;;  %5018 = vmatprep.subr.bf16.mxu0 %v7435_v49  ;;  %v7562_v39 = vcombine.low %v1256_v37, %v1260_v31  ;;  %v4297_v41 = vpop.f32.mrf.mxu1  ;;  %4868 = vmatprep.mubr.bf16.mxu0 %v8116_v22 }
 0x1e8   : > { %v1124_v28 = vld [vmem:[#allocation7 + $0xa70] sm:$0xff]  ;;  %v4184_v14 = vpop.f32.mrf.mxu0 }
 0x1e9   : > { %v1248_v17 = vld [vmem:[#allocation7 + $0xe50] sm:$0xff]  ;;  %4972 = vmatmul.mubr.bf16.gmra.mxu1 %v11040_v20  ;;  %v7427_v3 = vcombine.high %v1120_v43, %v1124_v28  ;;  %v9224_v29 = vadd.f32 %v4295_v33, %v4183_v44  ;;  %v4185_v55 = vadd.f32 %v4184_v14, %v9106_v27  ;;  %5131 = vmatprep.subr.bf16.mxu1 %v7563_v36  ;;  %v4299_v31 = vpop.f32.mrf.mxu1  ;;  %v11045_v33 = vld [vmem:[#allocation58_spill] sm:$0xff] }
 0x1ea   : > { %v1252_v8 = vld [vmem:[#allocation7 + $0xe70] sm:$0xff]  ;;  %v4186_v51 = vpop.f32.mrf.mxu0  ;;  %4981 = vmatprep.mubr.bf16.mxu1 %v11042_v47  ;;  %5019 = vmatpush2.bf16.msra.mxu0 %v7434_v42  ;;  %v7426_v27 = vcombine.low %v1120_v43, %v1124_v28  ;;  %v981_v42 = vld [vmem:[#allocation7 + $0x5f8] sm:$0xff] }
 0x1eb   : > { %11041 = vst [vmem:[#allocation81_spill] sm:$0xff] %v9224_v29  ;;  %v7555_v21 = vcombine.high %v1248_v17, %v1252_v8  ;;  %v1112_v7 = vld [vmem:[#allocation7 + $0xa10] sm:$0xff]  ;;  %v9229_v52 = vadd.f32 %v4297_v41, %v4185_v55  ;;  %v4187_v37 = vadd.f32 %v4186_v51, %v9109_v30  ;;  %5132 = vmatpush2.bf16.msra.mxu1 %v7562_v39  ;;  %v4301_v22 = vpop.f32.mrf.mxu1  ;;  %v849_v55 = vld [vmem:[#allocation7 + $0x1d8] sm:$0xff]  ;;  %v8117_v30 = vld [vmem:[%s8518_s5 + $0x70] ss:$8 sps:$4 sm:$0xff]  }
 0x1ec   : > { %v1116_v9 = vld [vmem:[#allocation7 + $0xa30] sm:$0xff]  ;;  %v4188_v24 = vpop.f32.mrf.mxu0  ;;  %5020 = vmatprep.subr.bf16.mxu0 %v7427_v3  ;;  %v7554_v49 = vcombine.low %v1248_v17, %v1252_v8  ;;  %v853_v41 = vld [vmem:[#allocation7 + $0x1f8] sm:$0xff] }
 0x1ed   : > { %v1240_v32 = vld [vmem:[#allocation7 + $0xe10] sm:$0xff]  ;;  %11043 = vst [vmem:[#allocation82_spill] sm:$0xff] %v9229_v52  ;;  %v7419_v36 = vcombine.high %v1112_v7, %v1116_v9  ;;  %v9232_v44 = vadd.f32 %v4299_v31, %v4187_v37  ;;  %v4189_v14 = vadd.f32 %v4188_v24, %v11045_v33  ;;  %5133 = vmatprep.subr.bf16.mxu1 %v7555_v21  ;;  %v977_v51 = vld [vmem:[#allocation7 + $0x5d8] sm:$0xff]  ;;  %v4305_v17 = vpop.f32.mrf.mxu1  ;;  %v11049_v24 = vld [vmem:[#allocation59_spill] sm:$0xff] }
 0x1ee   : > { %v1244_v15 = vld [vmem:[#allocation7 + $0xe30] sm:$0xff]  ;;  %v4192_v52 = vpop.f32.mrf.mxu0  ;;  %4869 = vmatmul.mubr.bf16.gmra.mxu0 %v8117_v30  ;;  %v7418_v39 = vcombine.low %v1112_v7, %v1116_v9  ;;  %v7157_v37 = vcombine.high %v849_v55, %v853_v41  ;;  %v969_v7 = vld [vmem:[#allocation7 + $0x598] sm:$0xff] }
 0x1ef   : > { %11044 = vst [vmem:[#allocation83_spill] sm:$0xff] %v9232_v44  ;;  %v7547_v29 = vcombine.high %v1240_v32, %v1244_v15  ;;  %v9236_v43 = vadd.f32 %v4301_v22, %v4189_v14  ;;  %v4193_v28 = vadd.f32 %v4192_v52, %v9115_v0  ;;  %v11047_v8 = vld [vmem:[#allocation25_spill] sm:$0xff]  ;;  %5021 = vmatpush2.bf16.msra.mxu0 %v7426_v27  ;;  %v4307_v30 = vpop.f32.mrf.mxu1  ;;  %v11050_v14 = vld [vmem:[#allocation26_spill] sm:$0xff]  ;;  %v11051_v44 = vld [vmem:[#allocation20_spill] sm:$0xff] }
 0x1f0   : > { %5134 = vmatpush2.bf16.msra.mxu1 %v7554_v49  ;;  %v4194_v3 = vpop.f32.mrf.mxu0  ;;  %5022 = vmatprep.subr.bf16.mxu0 %v7419_v36  ;;  %v7546_v21 = vcombine.low %v1240_v32, %v1244_v15  ;;  %v7285_v22 = vcombine.high %v977_v51, %v981_v42  ;;  %v841_v0 = vld [vmem:[#allocation7 + $0x198] sm:$0xff]  ;;  %v7156_v49 = vcombine.low %v849_v55, %v853_v41 }
 0x1f1   : > { %11046 = vst [vmem:[#allocation58_spill] sm:$0xff] %v9236_v43  ;;  %4982 = vmatmul.mubr.bf16.gmra.mxu1 %v11047_v8  ;;  %v9240_v31 = vadd.f32 %v4305_v17, %v4193_v28  ;;  %v4195_v33 = vadd.f32 %v4194_v3, %v11049_v24  ;;  %5135 = vmatprep.subr.bf16.mxu1 %v7547_v29  ;;  %v845_v52 = vld [vmem:[#allocation7 + $0x1b8] sm:$0xff]  ;;  %v4309_v15 = vpop.f32.mrf.mxu1 }
 0x1f2   : > { %5024 = vmatprep.mubr.bf16.mxu0 %v11050_v14  ;;  %v4196_v43 = vpop.f32.mrf.mxu0  ;;  %5137 = vmatprep.mubr.bf16.mxu1 %v11051_v44  ;;  %v973_v9 = vld [vmem:[#allocation7 + $0x5b8] sm:$0xff]  ;;  %v7284_v29 = vcombine.low %v977_v51, %v981_v42  ;;  %v7149_v28 = vcombine.high %v841_v0, %v845_v52  ;;  %v7148_v51 = vcombine.low %v841_v0, %v845_v52  ;;  %v11079_v44 = vld [vmem:[#allocation51_spill] sm:$0xff] }
 0x1f3   : > { %11048 = vst [vmem:[#allocation84_spill] sm:$0xff] %v9240_v31  ;;  %v9245_v27 = vadd.f32 %v4307_v30, %v4195_v33  ;;  %v4197_v32 = vadd.f32 %v4196_v43, %v9121_v10  ;;  %5023 = vmatpush2.bf16.msra.mxu0 %v7418_v39  ;;  %v4311_v24 = vpop.f32.mrf.mxu1  ;;  %v7277_v31 = vcombine.high %v969_v7, %v973_v9  ;;  %v837_v33 = vld [vmem:[#allocation7 + $0x178] sm:$0xff]  ;;  %v11056_v39 = vld [vmem:[#allocation28_spill] sm:$0xff] }
 0x1f4   : > { %5136 = vmatpush2.bf16.msra.mxu1 %v7546_v21  ;;  %v4198_v36 = vpop.f32.mrf.mxu0  ;;  %5218 = vmatprep.subr.bf16.mxu0 %v7157_v37  ;;  %v961_v10 = vld [vmem:[#allocation7 + $0x558] sm:$0xff]  ;;  %v7276_v21 = vcombine.low %v969_v7, %v973_v9  ;;  %v7141_v37 = vcombine.high %v833_v2, %v837_v33 }
 0x1f5   : > { %11052 = vst [vmem:[#allocation59_spill] sm:$0xff] %v9245_v27  ;;  %v9248_v17 = vadd.f32 %v4309_v15, %v4197_v32  ;;  %v4199_v3 = vadd.f32 %v4198_v36, %v9123_v16  ;;  %5331 = vmatprep.subr.bf16.mxu1 %v7285_v22  ;;  %v11054_v27 = vld [vmem:[#allocation27_spill] sm:$0xff]  ;;  %v965_v43 = vld [vmem:[#allocation7 + $0x578] sm:$0xff]  ;;  %v4461_v41 = vpop.f32.mrf.mxu1  ;;  %v11057_v32 = vld [vmem:[#allocation29_spill] sm:$0xff] }
 0x1f6   : > { %v4348_v30 = vpop.f32.mrf.mxu0  ;;  %5025 = vmatmul.mubr.bf16.vlgmr.msra.gmra.mxu0 %v11054_v27  ;;  %v7269_v15 = vcombine.high %v961_v10, %v965_v43  ;;  %v825_v36 = vld [vmem:[#allocation7 + $0x118] sm:$0xff] }
 0x1f7   : > { %11053 = vst [vmem:[#allocation85_spill] sm:$0xff] %v9248_v17  ;;  %v9252_v55 = vadd.f32 %v4311_v24, %v4199_v3  ;;  %5219 = vmatpush1.bf16.msra.mxu0 %v7156_v49  ;;  %v9255_v42 = vadd.f32 %v4461_v41, %v4348_v30  ;;  %v4463_v22 = vpop.f32.mrf.mxu1  ;;  %5034 = vmatprep.mubr.bf16.mxu0 %v11057_v32  ;;  %v829_v3 = vld [vmem:[#allocation7 + $0x138] sm:$0xff] }
 0x1f8   : > { %v4350_v16 = vpop.f32.mrf.mxu0  ;;  %5220 = vmatprep.subr.bf16.mxu0 %v7149_v28  ;;  %v11058_v17 = vld [vmem:[#allocation30_spill] sm:$0xff]  ;;  %v7133_v9 = vcombine.high %v825_v36, %v829_v3 }
 0x1f9   : > { %11055 = vst [vmem:[#allocation86_spill] sm:$0xff] %v9252_v55  ;;  %5138 = vmatmul.mubr.bf16.vlgmr.msra.gmra.mxu1 %v11056_v39  ;;  %v9258_v24 = vadd.f32 %v4463_v22, %v4350_v16  ;;  %v953_v0 = vld [vmem:[#allocation7 + $0x518] sm:$0xff]  ;;  %v4465_v49 = vpop.f32.mrf.mxu1 }
 0x1fa   : > { %5332 = vmatpush1.bf16.msra.mxu1 %v7284_v29  ;;  %v4352_v55 = vpop.f32.mrf.mxu0  ;;  %5147 = vmatprep.mubr.bf16.mxu1 %v11058_v17  ;;  %v957_v52 = vld [vmem:[#allocation7 + $0x538] sm:$0xff]  ;;  %v7140_v29 = vcombine.low %v833_v2, %v837_v33  ;;  %v11060_v33 = vld [vmem:[#allocation32_spill] sm:$0xff]  ;;  %v11075_v17 = vld [vmem:[#allocation47_spill] sm:$0xff] }
 0x1fb   : > { %5333 = vmatprep.subr.bf16.mxu1 %v7277_v31  ;;  %5221 = vmatpush1.bf16.msra.mxu0 %v7148_v51  ;;  %v9261_v28 = vadd.f32 %v4465_v49, %v4352_v55  ;;  %v7268_v31 = vcombine.low %v961_v10, %v965_v43  ;;  %v4467_v30 = vpop.f32.mrf.mxu1  ;;  %v7261_v41 = vcombine.high %v953_v0, %v957_v52  ;;  %v817_v16 = vld [vmem:[#allocation7 + $0xd8] sm:$0xff]  ;;  %v11061_v49 = vld [vmem:[#allocation33_spill] sm:$0xff] }
 0x1fc   : > { %v4354_v7 = vpop.f32.mrf.mxu0  ;;  %5222 = vmatprep.subr.bf16.mxu0 %v7141_v37  ;;  %v821_v22 = vld [vmem:[#allocation7 + $0xf8] sm:$0xff]  ;;  %v7132_v55 = vcombine.low %v825_v36, %v829_v3  ;;  %v7260_v43 = vcombine.low %v953_v0, %v957_v52 }
 0x1fd   : > { %v9263_v56 = vadd.f32 %v4467_v30, %v4354_v7  ;;  %v949_v51 = vld [vmem:[#allocation7 + $0x4f8] sm:$0xff]  ;;  %v4471_v2 = vpop.f32.mrf.mxu1  ;;  %v7125_v37 = vcombine.high %v817_v16, %v821_v22 }
 0x1fe   : > { %5334 = vmatpush1.bf16.msra.mxu1 %v7276_v21  ;;  %v4358_v12 = vpop.f32.mrf.mxu0  ;;  %5035 = vmatmul.mubr.bf16.gmra.mxu0 %v11059_v40  ;;  %v7253_v7 = vcombine.high %v945_v50, %v949_v51  ;;  %v809_v30 = vld [vmem:[#allocation7 + $0x98] sm:$0xff]  ;;  %v7252_v52 = vcombine.low %v945_v50, %v949_v51 }
 0x1ff   : > { %5335 = vmatprep.subr.bf16.mxu1 %v7269_v15  ;;  %5223 = vmatpush1.bf16.msra.mxu0 %v7140_v29  ;;  %v9267_v21 = vadd.f32 %v4471_v2, %v4358_v12  ;;  %v4473_v15 = vpop.f32.mrf.mxu1  ;;  %v937_v36 = vld [vmem:[#allocation7 + $0x498] sm:$0xff]  ;;  %v7124_v29 = vcombine.low %v817_v16, %v821_v22  ;;  %v7116_v22 = vcombine.low %v809_v30, %v813_v1 }
 0x200   : > { %v4360_v10 = vpop.f32.mrf.mxu0  ;;  %5224 = vmatprep.subr.bf16.mxu0 %v7133_v9  ;;  %5044 = vmatprep.mubr.bf16.mxu0 %v11061_v49  ;;  %v941_v12 = vld [vmem:[#allocation7 + $0x4b8] sm:$0xff]  ;;  %v7117_v9 = vcombine.high %v809_v30, %v813_v1 }
 0x201   : > { %5148 = vmatmul.mubr.bf16.gmra.mxu1 %v11060_v33  ;;  %v9270_v60 = vadd.f32 %v4473_v15, %v4360_v10  ;;  %v4475_v3 = vpop.f32.mrf.mxu1  ;;  %v7245_v2 = vcombine.high %v937_v36, %v941_v12  ;;  %v801_v10 = vld [vmem:[#allocation7 + $0x58] sm:$0xff]  ;;  %v7244_v51 = vcombine.low %v937_v36, %v941_v12 }
 0x202   : > { %5336 = vmatpush1.bf16.msra.mxu1 %v7268_v31  ;;  %v4362_v19 = vpop.f32.mrf.mxu0  ;;  %5157 = vmatprep.mubr.bf16.mxu1 %v11062_v26  ;;  %v805_v15 = vld [vmem:[#allocation7 + $0x78] sm:$0xff]  ;;  %v11071_v26 = vld [vmem:[#allocation43_spill] sm:$0xff] }
 0x203   : > { %5337 = vmatprep.subr.bf16.mxu1 %v7261_v41  ;;  %5225 = vmatpush1.bf16.msra.mxu0 %v7132_v55  ;;  %v9273_v31 = vadd.f32 %v4475_v3, %v4362_v19  ;;  %v4477_v41 = vpop.f32.mrf.mxu1  ;;  %v933_v55 = vld [vmem:[#allocation7 + $0x478] sm:$0xff]  ;;  %v11064_v19 = vld [vmem:[#allocation36_spill] sm:$0xff]  ;;  %v11065_v3 = vld [vmem:[#allocation37_spill] sm:$0xff] }
 0x204   : > { %v4364_v0 = vpop.f32.mrf.mxu0  ;;  %5226 = vmatprep.subr.bf16.mxu0 %v7125_v37  ;;  %v7109_v37 = vcombine.high %v801_v10, %v805_v15  ;;  %v921_v1 = vld [vmem:[#allocation7 + $0x418] sm:$0xff]  ;;  %v7236_v12 = vcombine.low %v929_v4, %v933_v55 }
 0x205   : > { %v9275_v38 = vadd.f32 %v4477_v41, %v4364_v0  ;;  %v4481_v16 = vpop.f32.mrf.mxu1  ;;  %v7237_v0 = vcombine.high %v929_v4, %v933_v55  ;;  %v793_v41 = vld [vmem:[#allocation7 + $0x18] sm:$0xff] }
 0x206   : > { %5338 = vmatpush1.bf16.msra.mxu1 %v7260_v43  ;;  %v4368_v13 = vpop.f32.mrf.mxu0  ;;  %5045 = vmatmul.mubr.bf16.gmra.mxu0 %v11063_v54  ;;  %v1025_v49 = vld [vmem:[#allocation7 + $0x758] sm:$0xff] }
 0x207   : > { %5339 = vmatprep.subr.bf16.mxu1 %v7253_v7  ;;  %5227 = vmatpush1.bf16.msra.mxu0 %v7124_v29  ;;  %v9279_v43 = vadd.f32 %v4481_v16, %v4368_v13  ;;  %v4483_v7 = vpop.f32.mrf.mxu1  ;;  %v925_v13 = vld [vmem:[#allocation7 + $0x438] sm:$0xff]  ;;  %v7108_v29 = vcombine.low %v801_v10, %v805_v15  ;;  %v7100_v15 = vcombine.low %v793_v41, %v797_v34 }
 0x208   : > { %v4370_v50 = vpop.f32.mrf.mxu0  ;;  %5228 = vmatprep.subr.bf16.mxu0 %v7117_v9  ;;  %5054 = vmatprep.mubr.bf16.mxu0 %v11065_v3  ;;  %v7101_v9 = vcombine.high %v793_v41, %v797_v34  ;;  %v7229_v16 = vcombine.high %v921_v1, %v925_v13  ;;  %v1041_v3 = vld [vmem:[#allocation7 + $0x7d8] sm:$0xff]  ;;  %v7228_v55 = vcombine.low %v921_v1, %v925_v13 }
 0x209   : > { %5158 = vmatmul.mubr.bf16.gmra.mxu1 %v11064_v19  ;;  %v9282_v45 = vadd.f32 %v4483_v7, %v4370_v50  ;;  %v4485_v30 = vpop.f32.mrf.mxu1  ;;  %v913_v50 = vld [vmem:[#allocation7 + $0x3d8] sm:$0xff] }
 0x20a   : > { %5340 = vmatpush1.bf16.msra.mxu1 %v7252_v52  ;;  %v4372_v25 = vpop.f32.mrf.mxu0  ;;  %5167 = vmatprep.mubr.bf16.mxu1 %v11066_v5  ;;  %v917_v7 = vld [vmem:[#allocation7 + $0x3f8] sm:$0xff]  ;;  %v11067_v5 = vld [vmem:[#allocation39_spill] sm:$0xff] }
 0x20b   : > { %5341 = vmatprep.subr.bf16.mxu1 %v7245_v2  ;;  %5229 = vmatpush1.bf16.msra.mxu0 %v7116_v22  ;;  %v9285_v52 = vadd.f32 %v4485_v30, %v4372_v25  ;;  %v4487_v2 = vpop.f32.mrf.mxu1  ;;  %v1045_v22 = vld [vmem:[#allocation7 + $0x7f8] sm:$0xff]  ;;  %v11068_v25 = vld [vmem:[#allocation40_spill] sm:$0xff]  ;;  %v11069_v30 = vld [vmem:[#allocation41_spill] sm:$0xff] }
 0x20c   : > { %v4374_v36 = vpop.f32.mrf.mxu0  ;;  %5230 = vmatprep.subr.bf16.mxu0 %v7109_v37  ;;  %v7221_v37 = vcombine.high %v913_v50, %v917_v7  ;;  %v1033_v34 = vld [vmem:[#allocation7 + $0x798] sm:$0xff]  ;;  %v7348_v13 = vcombine.low %v1041_v3, %v1045_v22 }
 0x20d   : > { %v9287_v63 = vadd.f32 %v4487_v2, %v4374_v36  ;;  %v4491_v10 = vpop.f32.mrf.mxu1  ;;  %v7349_v36 = vcombine.high %v1041_v3, %v1045_v22  ;;  %v905_v2 = vld [vmem:[#allocation7 + $0x398] sm:$0xff] }
 0x20e   : > { %5342 = vmatpush1.bf16.msra.mxu1 %v7244_v51  ;;  %v4378_v59 = vpop.f32.mrf.mxu0  ;;  %5055 = vmatmul.mubr.bf16.gmra.mxu0 %v11067_v5  ;;  %v909_v5 = vld [vmem:[#allocation7 + $0x3b8] sm:$0xff] }
 0x20f   : > { %5343 = vmatprep.subr.bf16.mxu1 %v7237_v0  ;;  %5231 = vmatpush1.bf16.msra.mxu0 %v7108_v29  ;;  %v9291_v51 = vadd.f32 %v4491_v10, %v4378_v59  ;;  %v4493_v0 = vpop.f32.mrf.mxu1  ;;  %v1037_v59 = vld [vmem:[#allocation7 + $0x7b8] sm:$0xff]  ;;  %v7220_v29 = vcombine.low %v913_v50, %v917_v7  ;;  %v7212_v7 = vcombine.low %v905_v2, %v909_v5 }
 0x210   : > { %v4380_v4 = vpop.f32.mrf.mxu0  ;;  %5232 = vmatprep.subr.bf16.mxu0 %v7101_v9  ;;  %5064 = vmatprep.mubr.bf16.mxu0 %v11069_v30  ;;  %v7213_v9 = vcombine.high %v905_v2, %v909_v5  ;;  %v7341_v10 = vcombine.high %v1033_v34, %v1037_v59  ;;  %v7340_v22 = vcombine.low %v1033_v34, %v1037_v59  ;;  %v1017_v5 = vld [vmem:[#allocation7 + $0x718] sm:$0xff] }
 0x211   : > { %5168 = vmatmul.mubr.bf16.gmra.mxu1 %v11068_v25  ;;  %v9294_v19 = vadd.f32 %v4493_v0, %v4380_v4  ;;  %v11070_v25 = vld [vmem:[#allocation42_spill] sm:$0xff]  ;;  %v4495_v41 = vpop.f32.mrf.mxu1 }
 0x212   : > { %5344 = vmatpush1.bf16.msra.mxu1 %v7236_v12  ;;  %v4382_v54 = vpop.f32.mrf.mxu0  ;;  %5177 = vmatprep.mubr.bf16.mxu1 %v11070_v25  ;;  %v897_v4 = vld [vmem:[#allocation7 + $0x358] sm:$0xff] }
 0x213   : > { %5345 = vmatprep.subr.bf16.mxu1 %v7229_v16  ;;  %5233 = vmatpush1.bf16.msra.mxu0 %v7100_v15  ;;  %v9297_v12 = vadd.f32 %v4495_v41, %v4382_v54  ;;  %v4497_v16 = vpop.f32.mrf.mxu1  ;;  %v901_v0 = vld [vmem:[#allocation7 + $0x378] sm:$0xff]  ;;  %v11072_v54 = vld [vmem:[#allocation44_spill] sm:$0xff]  ;;  %v11073_v41 = vld [vmem:[#allocation45_spill] sm:$0xff] }
 0x214   : > { %v4384_v1 = vpop.f32.mrf.mxu0  ;;  %5234 = vmatprep.subr.bf16.mxu0 %v7221_v37  ;;  %v1029_v15 = vld [vmem:[#allocation7 + $0x778] sm:$0xff]  ;;  %v7205_v37 = vcombine.high %v897_v4, %v901_v0 }
 0x215   : > { %v9299_v30 = vadd.f32 %v4497_v16, %v4384_v1  ;;  %v4501_v50 = vpop.f32.mrf.mxu1  ;;  %v7333_v1 = vcombine.high %v1025_v49, %v1029_v15  ;;  %v889_v16 = vld [vmem:[#allocation7 + $0x318] sm:$0xff]  ;;  %v7332_v59 = vcombine.low %v1025_v49, %v1029_v15 }
 0x216   : > { %5346 = vmatpush1.bf16.msra.mxu1 %v7228_v55  ;;  %v4388_v25 = vpop.f32.mrf.mxu0  ;;  %5065 = vmatmul.mubr.bf16.gmra.mxu0 %v11071_v26  ;;  %v893_v26 = vld [vmem:[#allocation7 + $0x338] sm:$0xff] }
 0x217   : > { %5347 = vmatprep.subr.bf16.mxu1 %v7349_v36  ;;  %5235 = vmatpush2.bf16.msra.mxu0 %v7220_v29  ;;  %v9303_v55 = vadd.f32 %v4501_v50, %v4388_v25  ;;  %v4503_v36 = vpop.f32.mrf.mxu1  ;;  %v1021_v25 = vld [vmem:[#allocation7 + $0x738] sm:$0xff]  ;;  %v7204_v29 = vcombine.low %v897_v4, %v901_v0  ;;  %v7196_v0 = vcombine.low %v889_v16, %v893_v26 }
 0x218   : > { %v4390_v3 = vpop.f32.mrf.mxu0  ;;  %5236 = vmatprep.subr.bf16.mxu0 %v7213_v9  ;;  %5074 = vmatprep.mubr.bf16.mxu0 %v11073_v41  ;;  %v7197_v9 = vcombine.high %v889_v16, %v893_v26  ;;  %v7325_v50 = vcombine.high %v1017_v5, %v1021_v25  ;;  %v1009_v32 = vld [vmem:[#allocation7 + $0x6d8] sm:$0xff]  ;;  %v7324_v15 = vcombine.low %v1017_v5, %v1021_v25 }
 0x219   : > { %5178 = vmatmul.mubr.bf16.gmra.mxu1 %v11072_v54  ;;  %v9306_v33 = vadd.f32 %v4503_v36, %v4390_v3  ;;  %v11074_v54 = vld [vmem:[#allocation46_spill] sm:$0xff]  ;;  %v4505_v2 = vpop.f32.mrf.mxu1 }
 0x21a   : > { %5348 = vmatpush2.bf16.msra.mxu1 %v7348_v13  ;;  %v4392_v40 = vpop.f32.mrf.mxu0  ;;  %5187 = vmatprep.mubr.bf16.mxu1 %v11074_v54  ;;  %v881_v3 = vld [vmem:[#allocation7 + $0x2d8] sm:$0xff] }
 0x21b   : > { %5349 = vmatprep.subr.bf16.mxu1 %v7341_v10  ;;  %5237 = vmatpush2.bf16.msra.mxu0 %v7212_v7  ;;  %v9309_v13 = vadd.f32 %v4505_v2, %v4392_v40  ;;  %v4507_v10 = vpop.f32.mrf.mxu1  ;;  %v885_v36 = vld [vmem:[#allocation7 + $0x2f8] sm:$0xff]  ;;  %v11076_v40 = vld [vmem:[#allocation48_spill] sm:$0xff]  ;;  %v11077_v2 = vld [vmem:[#allocation49_spill] sm:$0xff] }
 0x21c   : > { %v4394_v34 = vpop.f32.mrf.mxu0  ;;  %5238 = vmatprep.subr.bf16.mxu0 %v7205_v37  ;;  %v1013_v7 = vld [vmem:[#allocation7 + $0x6f8] sm:$0xff]  ;;  %v7189_v37 = vcombine.high %v881_v3, %v885_v36 }
 0x21d   : > { %v9311_v41 = vadd.f32 %v4507_v10, %v4394_v34  ;;  %v4511_v4 = vpop.f32.mrf.mxu1  ;;  %v7317_v34 = vcombine.high %v1009_v32, %v1013_v7  ;;  %v873_v10 = vld [vmem:[#allocation7 + $0x298] sm:$0xff]  ;;  %v7316_v25 = vcombine.low %v1009_v32, %v1013_v7 }
 0x21e   : > { %5350 = vmatpush2.bf16.msra.mxu1 %v7340_v22  ;;  %v4398_v54 = vpop.f32.mrf.mxu0  ;;  %5075 = vmatmul.mubr.bf16.gmra.mxu0 %v11075_v17  ;;  %v877_v17 = vld [vmem:[#allocation7 + $0x2b8] sm:$0xff] }
 0x21f   : > { %5351 = vmatprep.subr.bf16.mxu1 %v7333_v1  ;;  %5239 = vmatpush2.bf16.msra.mxu0 %v7204_v29  ;;  %v9315_v22 = vadd.f32 %v4511_v4, %v4398_v54  ;;  %v4513_v1 = vpop.f32.mrf.mxu1  ;;  %v1001_v26 = vld [vmem:[#allocation7 + $0x698] sm:$0xff]  ;;  %v7188_v29 = vcombine.low %v881_v3, %v885_v36  ;;  %v7180_v36 = vcombine.low %v873_v10, %v877_v17 }
 0x220   : > { %v4400_v49 = vpop.f32.mrf.mxu0  ;;  %5240 = vmatprep.subr.bf16.mxu0 %v7197_v9  ;;  %5084 = vmatprep.mubr.bf16.mxu0 %v11077_v2  ;;  %v1005_v54 = vld [vmem:[#allocation7 + $0x6b8] sm:$0xff]  ;;  %v7181_v9 = vcombine.high %v873_v10, %v877_v17 }
 0x221   : > { %5188 = vmatmul.mubr.bf16.gmra.mxu1 %v11076_v40  ;;  %v9318_v39 = vadd.f32 %v4513_v1, %v4400_v49  ;;  %v11078_v40 = vld [vmem:[#allocation50_spill] sm:$0xff]  ;;  %v4515_v16 = vpop.f32.mrf.mxu1  ;;  %v7309_v4 = vcombine.high %v1001_v26, %v1005_v54  ;;  %v7308_v7 = vcombine.low %v1001_v26, %v1005_v54 }
 0x222   : > { %5352 = vmatpush2.bf16.msra.mxu1 %v7332_v59  ;;  %v4402_v27 = vpop.f32.mrf.mxu0  ;;  %5197 = vmatprep.mubr.bf16.mxu1 %v11078_v40  ;;  %v865_v49 = vld [vmem:[#allocation7 + $0x258] sm:$0xff] }
 0x223   : > { %5353 = vmatprep.subr.bf16.mxu1 %v7325_v50  ;;  %5241 = vmatpush2.bf16.msra.mxu0 %v7196_v0  ;;  %v9321_v59 = vadd.f32 %v4515_v16, %v4402_v27  ;;  %v4517_v50 = vpop.f32.mrf.mxu1  ;;  %v869_v1 = vld [vmem:[#allocation7 + $0x278] sm:$0xff]  ;;  %v11080_v27 = vld [vmem:[#allocation52_spill] sm:$0xff]  ;;  %v11081_v16 = vld [vmem:[#allocation53_spill] sm:$0xff] }
 0x224   : > { %v4404_v5 = vpop.f32.mrf.mxu0  ;;  %5242 = vmatprep.subr.bf16.mxu0 %v7189_v37  ;;  %v993_v14 = vld [vmem:[#allocation7 + $0x658] sm:$0xff]  ;;  %v7173_v37 = vcombine.high %v865_v49, %v869_v1 }
 0x225   : > { %v9323_v2 = vadd.f32 %v4517_v50, %v4404_v5  ;;  %v997_v0 = vld [vmem:[#allocation7 + $0x678] sm:$0xff]  ;;  %v4521_v3 = vpop.f32.mrf.mxu1 }
 0x226   : > { %5354 = vmatpush2.bf16.msra.mxu1 %v7324_v15  ;;  %v4408_v40 = vpop.f32.mrf.mxu0  ;;  %5085 = vmatmul.mubr.bf16.gmra.mxu0 %v11079_v44  ;;  %v7301_v5 = vcombine.high %v993_v14, %v997_v0  ;;  %v857_v50 = vld [vmem:[#allocation7 + $0x218] sm:$0xff]  ;;  %v7300_v54 = vcombine.low %v993_v14, %v997_v0 }
 0x227   : > { %5355 = vmatprep.subr.bf16.mxu1 %v7317_v34  ;;  %5243 = vmatpush2.bf16.msra.mxu0 %v7188_v29  ;;  %v9327_v15 = vadd.f32 %v4521_v3, %v4408_v40  ;;  %v4523_v34 = vpop.f32.mrf.mxu1  ;;  %v861_v44 = vld [vmem:[#allocation7 + $0x238] sm:$0xff]  ;;  %v7172_v29 = vcombine.low %v865_v49, %v869_v1  ;;  %v11087_v1 = vld [vmem:[#allocation56_spill] sm:$0xff] }
 0x228   : > { %v4410_v32 = vpop.f32.mrf.mxu0  ;;  %5244 = vmatprep.subr.bf16.mxu0 %v7181_v9  ;;  %5094 = vmatprep.mubr.bf16.mxu0 %v11081_v16  ;;  %v985_v17 = vld [vmem:[#allocation7 + $0x618] sm:$0xff]  ;;  %v7165_v9 = vcombine.high %v857_v50, %v861_v44 }
 0x229   : > { %5198 = vmatmul.mubr.bf16.gmra.mxu1 %v11080_v27  ;;  %v9330_v8 = vadd.f32 %v4523_v34, %v4410_v32  ;;  %v11083_v27 = vld [vmem:[#allocation54_spill] sm:$0xff]  ;;  %v4525_v10 = vpop.f32.mrf.mxu1 }
 0x22a   : > { %5356 = vmatpush2.bf16.msra.mxu1 %v7316_v25  ;;  %v4412_v47 = vpop.f32.mrf.mxu0  ;;  %5207 = vmatprep.mubr.bf16.mxu1 %v11083_v27  ;;  %v989_v40 = vld [vmem:[#allocation7 + $0x638] sm:$0xff] }
 0x22b   : > { %5357 = vmatprep.subr.bf16.mxu1 %v7309_v4  ;;  %11082 = vst [vmem:[#allocation87_spill] sm:$0xff] %v9330_v8  ;;  %5245 = vmatpush2.bf16.msra.mxu0 %v7180_v36  ;;  %v9333_v25 = vadd.f32 %v4525_v10, %v4412_v47  ;;  %v4527_v4 = vpop.f32.mrf.mxu1  ;;  %v7293_v3 = vcombine.high %v985_v17, %v989_v40  ;;  %v1105_v32 = vld [vmem:[#allocation7 + $0x9d8] sm:$0xff]  ;;  %v11086_v8 = vld [vmem:[#allocation55_spill] sm:$0xff] }
 0x22c   : > { %v4414_v26 = vpop.f32.mrf.mxu0  ;;  %5246 = vmatprep.subr.bf16.mxu0 %v7173_v37  ;;  %v1109_v34 = vld [vmem:[#allocation7 + $0x9f8] sm:$0xff]  ;;  %v7292_v37 = vcombine.low %v985_v17, %v989_v40 }
 0x22d   : > { %11084 = vst [vmem:[#allocation88_spill] sm:$0xff] %v9333_v25  ;;  %v9335_v16 = vadd.f32 %v4527_v4, %v4414_v26  ;;  %v1233_v36 = vld [vmem:[#allocation7 + $0xdd8] sm:$0xff]  ;;  %v4531_v47 = vpop.f32.mrf.mxu1 }
 0x22e   : > { %5358 = vmatpush2.bf16.msra.mxu1 %v7308_v7  ;;  %v4418_v27 = vpop.f32.mrf.mxu0  ;;  %5095 = vmatmul.mubr.bf16.gmra.mxu0 %v11086_v8  ;;  %v1237_v49 = vld [vmem:[#allocation7 + $0xdf8] sm:$0xff]  ;;  %v7164_v7 = vcombine.low %v857_v50, %v861_v44 }
 0x22f   : > { %5359 = vmatprep.subr.bf16.mxu1 %v7301_v5  ;;  %11085 = vst [vmem:[#allocation89_spill] sm:$0xff] %v9335_v16  ;;  %5247 = vmatpush2.bf16.msra.mxu0 %v7172_v29  ;;  %v9339_v14 = vadd.f32 %v4531_v47, %v4418_v27  ;;  %v7413_v5 = vcombine.high %v1105_v32, %v1109_v34  ;;  %v4533_v10 = vpop.f32.mrf.mxu1  ;;  %v8118_v26 = vld [vmem:[%s8518_s5 + $0x4] ss:$8 sps:$4 sm:$0xff]  }
 0x230   : > { %v4420_v0 = vpop.f32.mrf.mxu0  ;;  %5248 = vmatprep.subr.bf16.mxu0 %v7165_v9  ;;  %5250 = vmatprep.mubr.bf16.mxu0 %v8118_v26  ;;  %v7541_v4 = vcombine.high %v1233_v36, %v1237_v49  ;;  %v1097_v8 = vld [vmem:[#allocation7 + $0x998] sm:$0xff]  ;;  %v7412_v29 = vcombine.low %v1105_v32, %v1109_v34 }
 0x231   : > { %5208 = vmatmul.mubr.bf16.gmra.mxu1 %v11087_v1  ;;  %11088 = vst [vmem:[#allocation90_spill] sm:$0xff] %v9339_v14  ;;  %v1101_v16 = vld [vmem:[#allocation7 + $0x9b8] sm:$0xff]  ;;  %v9342_v25 = vadd.f32 %v4533_v10, %v4420_v0  ;;  %v11090_v1 = vld [vmem:[#allocation19_spill] sm:$0xff]  ;;  %v4535_v50 = vpop.f32.mrf.mxu1 }
 0x232   : > { %5360 = vmatpush2.bf16.msra.mxu1 %v7300_v54  ;;  %v4422_v20 = vpop.f32.mrf.mxu0  ;;  %5363 = vmatprep.mubr.bf16.mxu1 %v11090_v1  ;;  %v1225_v44 = vld [vmem:[#allocation7 + $0xd98] sm:$0xff]  ;;  %v7540_v54 = vcombine.low %v1233_v36, %v1237_v49  ;;  %v7405_v9 = vcombine.high %v1097_v8, %v1101_v16  ;;  %v7404_v36 = vcombine.low %v1097_v8, %v1101_v16 }
 0x233   : > { %5361 = vmatprep.subr.bf16.mxu1 %v7293_v3  ;;  %11089 = vst [vmem:[#allocation91_spill] sm:$0xff] %v9342_v25  ;;  %v1229_v27 = vld [vmem:[#allocation7 + $0xdb8] sm:$0xff]  ;;  %5249 = vmatpush2.bf16.msra.mxu0 %v7164_v7  ;;  %v9345_v17 = vadd.f32 %v4535_v50, %v4422_v20  ;;  %v4537_v3 = vpop.f32.mrf.mxu1  ;;  %v8120_v50 = vld [vmem:[%s8518_s5 + $0x14] ss:$8 sps:$4 sm:$0xff]  }
 0x234   : > { %v4424_v40 = vpop.f32.mrf.mxu0  ;;  %5444 = vmatprep.subr.bf16.mxu0 %v7413_v5  ;;  %v7533_v47 = vcombine.high %v1225_v44, %v1229_v27  ;;  %v1089_v0 = vld [vmem:[#allocation7 + $0x958] sm:$0xff]  ;;  %v7532_v7 = vcombine.low %v1225_v44, %v1229_v27 }
 0x235   : > { %v1093_v10 = vld [vmem:[#allocation7 + $0x978] sm:$0xff]  ;;  %v9347_v26 = vadd.f32 %v4537_v3, %v4424_v40  ;;  %v4687_v34 = vpop.f32.mrf.mxu1 }
 0x236   : > { %5362 = vmatpush2.bf16.msra.mxu1 %v7292_v37  ;;  %v4574_v1 = vpop.f32.mrf.mxu0  ;;  %v8119_v25 = vld [vmem:[%s8518_s5] ss:$8 sps:$4 sm:$0xff]   ;;  %v7397_v37 = vcombine.high %v1089_v0, %v1093_v10 }
 0x237   : > { %5557 = vmatprep.subr.bf16.mxu1 %v7541_v4  ;;  %5251 = vmatmul.mubr.bf16.vlgmr.msra.gmra.mxu0 %v8119_v25  ;;  %v1217_v14 = vld [vmem:[#allocation7 + $0xd58] sm:$0xff]  ;;  %v4575_v20 = vadd.f32 %v4574_v1, %v9255_v42  ;;  %v4689_v25 = vpop.f32.mrf.mxu1 }
 0x238   : > { %v1221_v32 = vld [vmem:[#allocation7 + $0xd78] sm:$0xff]  ;;  %5445 = vmatpush1.bf16.msra.mxu0 %v7412_v29  ;;  %v4576_v49 = vpop.f32.mrf.mxu0  ;;  %5260 = vmatprep.mubr.bf16.mxu0 %v8120_v50 }
 0x239   : > { %5364 = vmatmul.mubr.bf16.vlgmr.msra.gmra.mxu1 %v8599_v62  ;;  %5446 = vmatprep.subr.bf16.mxu0 %v7405_v9  ;;  %v9352_v5 = vadd.f32 %v4687_v34, %v4575_v20  ;;  %v4577_v4 = vadd.f32 %v4576_v49, %v9258_v24  ;;  %v7525_v40 = vcombine.high %v1217_v14, %v1221_v32  ;;  %v1081_v42 = vld [vmem:[#allocation7 + $0x918] sm:$0xff]  ;;  %v4691_v27 = vpop.f32.mrf.mxu1 }
 0x23a   : > { %5558 = vmatpush1.bf16.msra.mxu1 %v7540_v54  ;;  %v1085_v3 = vld [vmem:[#allocation7 + $0x938] sm:$0xff]  ;;  %v4578_v1 = vpop.f32.mrf.mxu0  ;;  %5373 = vmatprep.mubr.bf16.mxu1 %v8612_v58  ;;  %v7396_v24 = vcombine.low %v1089_v0, %v1093_v10  ;;  %v7524_v54 = vcombine.low %v1217_v14, %v1221_v32 }
 0x23b   : > { %11091 = vst [vmem:[#allocation19_spill] sm:$0xff] %v9352_v5  ;;  %5559 = vmatprep.subr.bf16.mxu1 %v7533_v47  ;;  %v1209_v62 = vld [vmem:[#allocation7 + $0xd18] sm:$0xff]  ;;  %v9357_v16 = vadd.f32 %v4689_v25, %v4577_v4  ;;  %v4579_v44 = vadd.f32 %v4578_v1, %v9261_v28  ;;  %v7389_v9 = vcombine.high %v1081_v42, %v1085_v3  ;;  %v4693_v58 = vpop.f32.mrf.mxu1  ;;  %v8121_v28 = vld [vmem:[%s8518_s5 + $0x10] ss:$8 sps:$4 sm:$0xff]  }
 0x23c   : > { %v1213_v8 = vld [vmem:[#allocation7 + $0xd38] sm:$0xff]  ;;  %5447 = vmatpush1.bf16.msra.mxu0 %v7404_v36  ;;  %v4580_v29 = vpop.f32.mrf.mxu0 }
 0x23d   : > { %11092 = vst [vmem:[#allocation92_spill] sm:$0xff] %v9357_v16  ;;  %5448 = vmatprep.subr.bf16.mxu0 %v7397_v37  ;;  %v9360_v47 = vadd.f32 %v4691_v27, %v4579_v44  ;;  %v4581_v20 = vadd.f32 %v4580_v29, %v9263_v56  ;;  %v7517_v34 = vcombine.high %v1209_v62, %v1213_v8  ;;  %v1073_v49 = vld [vmem:[#allocation7 + $0x8d8] sm:$0xff]  ;;  %v4697_v10 = vpop.f32.mrf.mxu1 }
 0x23e   : > { %5560 = vmatpush1.bf16.msra.mxu1 %v7532_v7  ;;  %v1077_v4 = vld [vmem:[#allocation7 + $0x8f8] sm:$0xff]  ;;  %v4584_v25 = vpop.f32.mrf.mxu0  ;;  %v7388_v56 = vcombine.low %v1081_v42, %v1085_v3  ;;  %v7516_v7 = vcombine.low %v1209_v62, %v1213_v8 }
 0x23f   : > { %11093 = vst [vmem:[#allocation93_spill] sm:$0xff] %v9360_v47  ;;  %5561 = vmatprep.subr.bf16.mxu1 %v7525_v40  ;;  %5261 = vmatmul.mubr.bf16.gmra.mxu0 %v8121_v28  ;;  %v1201_v50 = vld [vmem:[#allocation7 + $0xcd8] sm:$0xff]  ;;  %v9364_v0 = vadd.f32 %v4693_v58, %v4581_v20  ;;  %v4585_v14 = vadd.f32 %v4584_v25, %v9267_v21  ;;  %v4699_v44 = vpop.f32.mrf.mxu1  ;;  %v11183_v47 = vld [vmem:[#allocation73_spill] sm:$0xff] }
 0x240   : > { %v1205_v36 = vld [vmem:[#allocation7 + $0xcf8] sm:$0xff]  ;;  %5449 = vmatpush1.bf16.msra.mxu0 %v7396_v24  ;;  %v4586_v32 = vpop.f32.mrf.mxu0  ;;  %v7381_v37 = vcombine.high %v1073_v49, %v1077_v4 }
 0x241   : > { %11094 = vst [vmem:[#allocation94_spill] sm:$0xff] %v9364_v0  ;;  %5374 = vmatmul.mubr.bf16.gmra.mxu1 %v8633_v23  ;;  %5450 = vmatprep.subr.bf16.mxu0 %v7389_v9  ;;  %v9368_v40 = vadd.f32 %v4697_v10, %v4585_v14  ;;  %v4587_v1 = vadd.f32 %v4586_v32, %v9270_v60  ;;  %v8122_v27 = vld [vmem:[%s8518_s5 + $0x24] ss:$8 sps:$4 sm:$0xff]   ;;  %v4701_v8 = vpop.f32.mrf.mxu1  ;;  %v11182_v0 = vld [vmem:[#allocation72_spill] sm:$0xff] }
 0x242   : > { %5562 = vmatpush1.bf16.msra.mxu1 %v7524_v54  ;;  %5270 = vmatprep.mubr.bf16.mxu0 %v8122_v27  ;;  %v7509_v29 = vcombine.high %v1201_v50, %v1205_v36  ;;  %v1065_v21 = vld [vmem:[#allocation7 + $0x898] sm:$0xff]  ;;  %v4588_v58 = vpop.f32.mrf.mxu0  ;;  %v7380_v60 = vcombine.low %v1073_v49, %v1077_v4  ;;  %v7508_v54 = vcombine.low %v1201_v50, %v1205_v36 }
 0x243   : > { %11095 = vst [vmem:[#allocation95_spill] sm:$0xff] %v9368_v40  ;;  %5563 = vmatprep.subr.bf16.mxu1 %v7517_v34  ;;  %v1069_v20 = vld [vmem:[#allocation7 + $0x8b8] sm:$0xff]  ;;  %5383 = vmatprep.mubr.bf16.mxu1 %v8640_v35  ;;  %v9373_v3 = vadd.f32 %v4699_v44, %v4587_v1  ;;  %v4589_v62 = vadd.f32 %v4588_v58, %v9273_v31  ;;  %v4703_v35 = vpop.f32.mrf.mxu1  ;;  %v8124_v58 = vld [vmem:[%s8518_s5 + $0x34] ss:$8 sps:$4 sm:$0xff]  }
 0x244   : > { %v1193_v23 = vld [vmem:[#allocation7 + $0xc98] sm:$0xff]  ;;  %5451 = vmatpush1.bf16.msra.mxu0 %v7388_v56  ;;  %v4590_v24 = vpop.f32.mrf.mxu0  ;;  %v7373_v9 = vcombine.high %v1065_v21, %v1069_v20 }
 0x245   : > { %v1197_v42 = vld [vmem:[#allocation7 + $0xcb8] sm:$0xff]  ;;  %11096 = vst [vmem:[#allocation96_spill] sm:$0xff] %v9373_v3  ;;  %5452 = vmatprep.subr.bf16.mxu0 %v7381_v37  ;;  %v9376_v34 = vadd.f32 %v4701_v8, %v4589_v62  ;;  %v4591_v25 = vadd.f32 %v4590_v24, %v9275_v38  ;;  %v4707_v50 = vpop.f32.mrf.mxu1  ;;  %v7372_v38 = vcombine.low %v1065_v21, %v1069_v20 }
 0x246   : > { %5564 = vmatpush1.bf16.msra.mxu1 %v7516_v7  ;;  %v7501_v28 = vcombine.high %v1193_v23, %v1197_v42  ;;  %v1057_v14 = vld [vmem:[#allocation7 + $0x858] sm:$0xff]  ;;  %v4594_v32 = vpop.f32.mrf.mxu0  ;;  %v7500_v7 = vcombine.low %v1193_v23, %v1197_v42 }
 0x247   : > { %11097 = vst [vmem:[#allocation97_spill] sm:$0xff] %v9376_v34  ;;  %5565 = vmatprep.subr.bf16.mxu1 %v7509_v29  ;;  %v1061_v10 = vld [vmem:[#allocation7 + $0x878] sm:$0xff]  ;;  %v9380_v49 = vadd.f32 %v4703_v35, %v4591_v25  ;;  %v4595_v4 = vadd.f32 %v4594_v32, %v9279_v43  ;;  %v4709_v29 = vpop.f32.mrf.mxu1  ;;  %v11179_v34 = vld [vmem:[#allocation69_spill] sm:$0xff] }
 0x248   : > { %v8123_v31 = vld [vmem:[%s8518_s5 + $0x20] ss:$8 sps:$4 sm:$0xff]   ;;  %5453 = vmatpush1.bf16.msra.mxu0 %v7380_v60  ;;  %v4596_v36 = vpop.f32.mrf.mxu0  ;;  %v7365_v37 = vcombine.high %v1057_v14, %v1061_v10  ;;  %v9619_v3 = vmul.f32 %v11179_v34, %v11179_v34  ;;  %v9633_v34 = vmul.f32 %v11182_v0, %v11182_v0  ;;  %v11186_v0 = vld [vmem:[#allocation76_spill] sm:$0xff] }
 0x249   : > { %5271 = vmatmul.mubr.bf16.gmra.mxu0 %v8123_v31  ;;  %v1185_v1 = vld [vmem:[#allocation7 + $0xc58] sm:$0xff]  ;;  %11098 = vst [vmem:[#allocation98_spill] sm:$0xff] %v9380_v49  ;;  %5384 = vmatmul.mubr.bf16.gmra.mxu1 %v8661_v57  ;;  %v9384_v44 = vadd.f32 %v4707_v50, %v4595_v4  ;;  %v4597_v27 = vadd.f32 %v4596_v36, %v9282_v45  ;;  %v4711_v42 = vpop.f32.mrf.mxu1  ;;  %v11178_v49 = vld [vmem:[#allocation68_spill] sm:$0xff] }
 0x24a   : > { %v1189_v56 = vld [vmem:[#allocation7 + $0xc78] sm:$0xff]  ;;  %5566 = vmatpush1.bf16.msra.mxu1 %v7508_v54  ;;  %5454 = vmatprep.subr.bf16.mxu0 %v7373_v9  ;;  %v4598_v24 = vpop.f32.mrf.mxu0  ;;  %v7364_v45 = vcombine.low %v1057_v14, %v1061_v10 }
 0x24b   : > { %11099 = vst [vmem:[#allocation99_spill] sm:$0xff] %v9384_v44  ;;  %5567 = vmatprep.subr.bf16.mxu1 %v7501_v28  ;;  %5280 = vmatprep.mubr.bf16.mxu0 %v8124_v58  ;;  %v7493_v62 = vcombine.high %v1185_v1, %v1189_v56  ;;  %v1049_v43 = vld [vmem:[#allocation7 + $0x818] sm:$0xff]  ;;  %v9389_v20 = vadd.f32 %v4709_v29, %v4597_v27  ;;  %v11177_v44 = vld [vmem:[#allocation67_spill] sm:$0xff] }
 0x24c   : > { %v1053_v8 = vld [vmem:[#allocation7 + $0x838] sm:$0xff]  ;;  %5393 = vmatprep.mubr.bf16.mxu1 %v8669_v18  ;;  %v4599_v23 = vadd.f32 %v4598_v24, %v9285_v52  ;;  %5455 = vmatpush1.bf16.msra.mxu0 %v7372_v38  ;;  %v4600_v60 = vpop.f32.mrf.mxu0  ;;  %v7492_v54 = vcombine.low %v1185_v1, %v1189_v56  ;;  %v4713_v18 = vpop.f32.mrf.mxu1  ;;  %v8125_v52 = vld [vmem:[%s8518_s5 + $0x30] ss:$8 sps:$4 sm:$0xff]  }
 0x24d   : > { %v1177_v57 = vld [vmem:[#allocation7 + $0xc18] sm:$0xff]  ;;  %11100 = vst [vmem:[#allocation100_spill] sm:$0xff] %v9389_v20  ;;  %5456 = vmatprep.subr.bf16.mxu0 %v7365_v37  ;;  %v7357_v9 = vcombine.high %v1049_v43, %v1053_v8  ;;  %v4601_v35 = vadd.f32 %v4600_v60, %v9287_v63  ;;  %v7356_v63 = vcombine.low %v1049_v43, %v1053_v8 }
 0x24e   : > { %v1181_v21 = vld [vmem:[#allocation7 + $0xc38] sm:$0xff]  ;;  %5568 = vmatpush1.bf16.msra.mxu1 %v7500_v7  ;;  %v9392_v25 = vadd.f32 %v4711_v42, %v4599_v23  ;;  %v4604_v4 = vpop.f32.mrf.mxu0  ;;  %v4717_v1 = vpop.f32.mrf.mxu1 }
 0x24f   : > { %5569 = vmatprep.subr.bf16.mxu1 %v7493_v62  ;;  %v7485_v28 = vcombine.high %v1177_v57, %v1181_v21  ;;  %v1169_v32 = vld [vmem:[#allocation7 + $0xbd8] sm:$0xff]  ;;  %v9396_v14 = vadd.f32 %v4713_v18, %v4601_v35  ;;  %v4605_v10 = vadd.f32 %v4604_v4, %v9291_v51  ;;  %v7484_v36 = vcombine.low %v1177_v57, %v1181_v21 }
 0x250   : > { %11101 = vst [vmem:[#allocation101_spill] sm:$0xff] %v9392_v25  ;;  %v1173_v31 = vld [vmem:[#allocation7 + $0xbf8] sm:$0xff]  ;;  %5457 = vmatpush1.bf16.msra.mxu0 %v7364_v45  ;;  %v4606_v56 = vpop.f32.mrf.mxu0  ;;  %v4719_v29 = vpop.f32.mrf.mxu1 }
 0x251   : > { %5281 = vmatmul.mubr.bf16.gmra.mxu0 %v8125_v52  ;;  %v1297_v50 = vld [vmem:[#allocation7 + $0xfd8] sm:$0xff]  ;;  %11102 = vst [vmem:[#allocation102_spill] sm:$0xff] %v9396_v14  ;;  %5394 = vmatmul.mubr.bf16.gmra.mxu1 %v8689_v61  ;;  %v7477_v7 = vcombine.high %v1169_v32, %v1173_v31  ;;  %v9400_v37 = vadd.f32 %v4717_v1, %v4605_v10  ;;  %v11174_v14 = vld [vmem:[#allocation64_spill] sm:$0xff] }
 0x252   : > { %v1301_v38 = vld [vmem:[#allocation7 + $0xff8] sm:$0xff]  ;;  %5570 = vmatpush1.bf16.msra.mxu1 %v7492_v54  ;;  %5458 = vmatprep.subr.bf16.mxu0 %v7357_v9  ;;  %v4607_v27 = vadd.f32 %v4606_v56, %v9294_v19  ;;  %v4608_v23 = vpop.f32.mrf.mxu0  ;;  %v4721_v21 = vpop.f32.mrf.mxu1  ;;  %v7476_v19 = vcombine.low %v1169_v32, %v1173_v31  ;;  %v9596_v25 = vmul.f32 %v11174_v14, %v11174_v14 }
 0x253   : > { %11103 = vst [vmem:[#allocation103_spill] sm:$0xff] %v9400_v37  ;;  %5571 = vmatprep.subr.bf16.mxu1 %v7485_v28  ;;  %v8126_v58 = vld [vmem:[%s8518_s5 + $0x44] ss:$8 sps:$4 sm:$0xff]   ;;  %v7605_v62 = vcombine.high %v1297_v50, %v1301_v38  ;;  %5403 = vmatprep.mubr.bf16.mxu1 %v8697_v11  ;;  %v4609_v57 = vadd.f32 %v4608_v23, %v9297_v12  ;;  %v8127_v12 = vld [vmem:[%s8518_s5 + $0x40] ss:$8 sps:$4 sm:$0xff]  }
 0x254   : > { %5290 = vmatprep.mubr.bf16.mxu0 %v8126_v58  ;;  %v1161_v51 = vld [vmem:[#allocation7 + $0xb98] sm:$0xff]  ;;  %v9405_v8 = vadd.f32 %v4719_v29, %v4607_v27  ;;  %5459 = vmatpush1.bf16.msra.mxu0 %v7356_v63  ;;  %v4610_v42 = vpop.f32.mrf.mxu0  ;;  %v7604_v45 = vcombine.low %v1297_v50, %v1301_v38  ;;  %v4723_v11 = vpop.f32.mrf.mxu1  ;;  %v8128_v27 = vld [vmem:[%s8518_s5 + $0x54] ss:$8 sps:$4 sm:$0xff]   ;;  %v9611_v14 = vmul.f32 %v11177_v44, %v11177_v44 }
 0x255   : > { %v1165_v24 = vld [vmem:[#allocation7 + $0xbb8] sm:$0xff]  ;;  %5460 = vmatprep.subr.bf16.mxu0 %v7477_v7  ;;  %v9408_v54 = vadd.f32 %v4721_v21, %v4609_v57  ;;  %v4611_v9 = vadd.f32 %v4610_v42, %v9299_v30 }
 0x256   : > { %v1289_v61 = vld [vmem:[#allocation7 + $0xf98] sm:$0xff]  ;;  %11104 = vst [vmem:[#allocation104_spill] sm:$0xff] %v9405_v8  ;;  %5572 = vmatpush1.bf16.msra.mxu1 %v7484_v36  ;;  %v7469_v60 = vcombine.high %v1161_v51, %v1165_v24  ;;  %v4614_v4 = vpop.f32.mrf.mxu0  ;;  %v4727_v50 = vpop.f32.mrf.mxu1  ;;  %v7468_v30 = vcombine.low %v1161_v51, %v1165_v24  ;;  %v11173_v8 = vld [vmem:[#allocation63_spill] sm:$0xff] }
 0x257   : > { %v1293_v43 = vld [vmem:[#allocation7 + $0xfb8] sm:$0xff]  ;;  %11105 = vst [vmem:[#allocation105_spill] sm:$0xff] %v9408_v54  ;;  %5573 = vmatprep.subr.bf16.mxu1 %v7605_v62  ;;  %v9412_v32 = vadd.f32 %v4723_v11, %v4611_v9  ;;  %v4615_v31 = vadd.f32 %v4614_v4, %v9303_v55  ;;  %v7917_v54 = vld [vmem:[#allocation8 + $0xa0] sm:$0xff]   ;;  %v5675_v37 = vmul.f32 %v11173_v8, %v11173_v8 }
 0x258   : > { %v7597_v35 = vcombine.high %v1289_v61, %v1293_v43  ;;  %v1153_v18 = vld [vmem:[#allocation7 + $0xb58] sm:$0xff]  ;;  %5461 = vmatpush2.bf16.msra.mxu0 %v7476_v19  ;;  %v4616_v38 = vpop.f32.mrf.mxu0  ;;  %v7596_v1 = vcombine.low %v1289_v61, %v1293_v43  ;;  %v4729_v7 = vpop.f32.mrf.mxu1 }
 0x259   : > { %v1157_v28 = vld [vmem:[#allocation7 + $0xb78] sm:$0xff]  ;;  %5291 = vmatmul.mubr.bf16.gmra.mxu0 %v8127_v12  ;;  %11106 = vst [vmem:[#allocation106_spill] sm:$0xff] %v9412_v32  ;;  %5404 = vmatmul.mubr.bf16.gmra.mxu1 %v8717_v6  ;;  %v9416_v56 = vadd.f32 %v4727_v50, %v4615_v31  ;;  %v4617_v36 = vadd.f32 %v4616_v38, %v9306_v33  ;;  %v7916_v32 = vld [vmem:[#allocation8 + $0xe0] sm:$0xff]  }
 0x25a   : > { %v1281_v52 = vld [vmem:[#allocation7 + $0xf58] sm:$0xff]  ;;  %5574 = vmatpush2.bf16.msra.mxu1 %v7604_v45  ;;  %5462 = vmatprep.subr.bf16.mxu0 %v7469_v60  ;;  %v7461_v63 = vcombine.high %v1153_v18, %v1157_v28  ;;  %v4618_v62 = vpop.f32.mrf.mxu0  ;;  %v4731_v61 = vpop.f32.mrf.mxu1  ;;  %v7460_v33 = vcombine.low %v1153_v18, %v1157_v28 }
 0x25b   : > { %v1285_v10 = vld [vmem:[#allocation7 + $0xf78] sm:$0xff]  ;;  %11107 = vst [vmem:[#allocation107_spill] sm:$0xff] %v9416_v56  ;;  %5575 = vmatprep.subr.bf16.mxu1 %v7597_v35  ;;  %5300 = vmatprep.mubr.bf16.mxu0 %v8128_v27  ;;  %v9421_v24 = vadd.f32 %v4729_v7, %v4617_v36  ;;  %v4619_v23 = vadd.f32 %v4618_v62, %v9309_v13  ;;  %v8129_v13 = vld [vmem:[%s8518_s5 + $0x50] ss:$8 sps:$4 sm:$0xff]  }
 0x25c   : > { %v7589_v29 = vcombine.high %v1281_v52, %v1285_v10  ;;  %v1145_v55 = vld [vmem:[#allocation7 + $0xb18] sm:$0xff]  ;;  %5413 = vmatprep.mubr.bf16.mxu1 %v8726_v53  ;;  %5463 = vmatpush2.bf16.msra.mxu0 %v7468_v30  ;;  %v4620_v43 = vpop.f32.mrf.mxu0  ;;  %v7588_v57 = vcombine.low %v1281_v52, %v1285_v10  ;;  %v4733_v53 = vpop.f32.mrf.mxu1 }
 0x25d   : > { %v1149_v58 = vld [vmem:[#allocation7 + $0xb38] sm:$0xff]  ;;  %11108 = vst [vmem:[#allocation108_spill] sm:$0xff] %v9421_v24  ;;  %5464 = vmatprep.subr.bf16.mxu0 %v7461_v63  ;;  %v9424_v19 = vadd.f32 %v4731_v61, %v4619_v23  ;;  %v4621_v42 = vadd.f32 %v4620_v43, %v9311_v41 }
 0x25e   : > { %v1273_v6 = vld [vmem:[#allocation7 + $0xf18] sm:$0xff]  ;;  %5576 = vmatpush2.bf16.msra.mxu1 %v7596_v1  ;;  %v7453_v21 = vcombine.high %v1145_v55, %v1149_v58  ;;  %v4624_v11 = vpop.f32.mrf.mxu0  ;;  %v4737_v12 = vpop.f32.mrf.mxu1  ;;  %v7452_v41 = vcombine.low %v1145_v55, %v1149_v58 }
 0x25f   : > { %v1277_v51 = vld [vmem:[#allocation7 + $0xf38] sm:$0xff]  ;;  %11109 = vst [vmem:[#allocation109_spill] sm:$0xff] %v9424_v19  ;;  %5577 = vmatprep.subr.bf16.mxu1 %v7589_v29  ;;  %v9428_v18 = vadd.f32 %v4733_v53, %v4621_v42  ;;  %v4625_v28 = vadd.f32 %v4624_v11, %v9315_v22  ;;  %v11115_v11 = vld [vmem:[#allocation23_spill] sm:$0xff] }
 0x260   : > { %v7581_v45 = vcombine.high %v1273_v6, %v1277_v51  ;;  %v1137_v60 = vld [vmem:[#allocation7 + $0xad8] sm:$0xff]  ;;  %5465 = vmatpush2.bf16.msra.mxu0 %v7460_v33  ;;  %v4626_v52 = vpop.f32.mrf.mxu0  ;;  %v7580_v10 = vcombine.low %v1273_v6, %v1277_v51  ;;  %v4739_v38 = vpop.f32.mrf.mxu1 }
 0x261   : > { %v1141_v9 = vld [vmem:[#allocation7 + $0xaf8] sm:$0xff]  ;;  %5301 = vmatmul.mubr.bf16.gmra.mxu0 %v8129_v13  ;;  %11110 = vst [vmem:[#allocation110_spill] sm:$0xff] %v9428_v18  ;;  %5414 = vmatmul.mubr.bf16.gmra.mxu1 %v11033_v48  ;;  %v9432_v50 = vadd.f32 %v4737_v12, %v4625_v28  ;;  %v4627_v30 = vadd.f32 %v4626_v52, %v9318_v39  ;;  %v11117_v12 = vld [vmem:[#allocation87_spill] sm:$0xff]  ;;  %v7915_v18 = vld [vmem:[#allocation8 + $0xa8] sm:$0xff]  }
 0x262   : > { %v1265_v35 = vld [vmem:[#allocation7 + $0xed8] sm:$0xff]  ;;  %5578 = vmatpush2.bf16.msra.mxu1 %v7588_v57  ;;  %5466 = vmatprep.subr.bf16.mxu0 %v7453_v21  ;;  %v7445_v31 = vcombine.high %v1137_v60, %v1141_v9  ;;  %v4628_v7 = vpop.f32.mrf.mxu0  ;;  %v4741_v58 = vpop.f32.mrf.mxu1  ;;  %v7444_v39 = vcombine.low %v1137_v60, %v1141_v9 }
 0x263   : > { %v1269_v4 = vld [vmem:[#allocation7 + $0xef8] sm:$0xff]  ;;  %11111 = vst [vmem:[#allocation111_spill] sm:$0xff] %v9432_v50  ;;  %5579 = vmatprep.subr.bf16.mxu1 %v7581_v45  ;;  %5423 = vmatprep.mubr.bf16.mxu1 %v11036_v46  ;;  %v9437_v29 = vadd.f32 %v4739_v38, %v4627_v30  ;;  %v4629_v55 = vadd.f32 %v4628_v7, %v9321_v59  ;;  %v11120_v7 = vld [vmem:[#allocation88_spill] sm:$0xff] }
 0x264   : > { %v8130_v1 = vld [vmem:[%s8518_s5 + $0x64] ss:$8 sps:$4 sm:$0xff]   ;;  %v7573_v63 = vcombine.high %v1265_v35, %v1269_v4  ;;  %5467 = vmatpush2.bf16.msra.mxu0 %v7452_v41  ;;  %v4630_v62 = vpop.f32.mrf.mxu0  ;;  %v7572_v6 = vcombine.low %v1265_v35, %v1269_v4  ;;  %v4743_v46 = vpop.f32.mrf.mxu1  ;;  %v8131_v59 = vld [vmem:[%s8518_s5 + $0x60] ss:$8 sps:$4 sm:$0xff]  }
 0x265   : > { %5310 = vmatprep.mubr.bf16.mxu0 %v8130_v1  ;;  %v1129_v22 = vld [vmem:[#allocation7 + $0xa98] sm:$0xff]  ;;  %11112 = vst [vmem:[#allocation112_spill] sm:$0xff] %v9437_v29  ;;  %5468 = vmatprep.subr.bf16.mxu0 %v7445_v31  ;;  %v9440_v23 = vadd.f32 %v4741_v58, %v4629_v55  ;;  %v4631_v61 = vadd.f32 %v4630_v62, %v9323_v2  ;;  %v11118_v1 = vld [vmem:[#allocation24_spill] sm:$0xff] }
 0x266   : > { %v1133_v36 = vld [vmem:[#allocation7 + $0xab8] sm:$0xff]  ;;  %5580 = vmatpush2.bf16.msra.mxu1 %v7580_v10  ;;  %v4634_v21 = vpop.f32.mrf.mxu0  ;;  %v4747_v9 = vpop.f32.mrf.mxu1  ;;  %v8132_v10 = vld [vmem:[%s8518_s5 + $0x74] ss:$8 sps:$4 sm:$0xff]  }
 0x267   : > { %v1257_v48 = vld [vmem:[#allocation7 + $0xe98] sm:$0xff]  ;;  %v7437_v51 = vcombine.high %v1129_v22, %v1133_v36  ;;  %11113 = vst [vmem:[#allocation113_spill] sm:$0xff] %v9440_v23  ;;  %5581 = vmatprep.subr.bf16.mxu1 %v7573_v63  ;;  %v9444_v45 = vadd.f32 %v4743_v46, %v4631_v61  ;;  %v4635_v60 = vadd.f32 %v4634_v21, %v9327_v15 }
 0x268   : > { %v1261_v27 = vld [vmem:[#allocation7 + $0xeb8] sm:$0xff]  ;;  %5469 = vmatpush2.bf16.msra.mxu0 %v7444_v39  ;;  %v7436_v2 = vcombine.low %v1129_v22, %v1133_v36  ;;  %v4636_v13 = vpop.f32.mrf.mxu0  ;;  %v4749_v52 = vpop.f32.mrf.mxu1 }
 0x269   : > { %v7565_v33 = vcombine.high %v1257_v48, %v1261_v27  ;;  %v1121_v43 = vld [vmem:[#allocation7 + $0xa58] sm:$0xff]  ;;  %5311 = vmatmul.mubr.bf16.gmra.mxu0 %v8131_v59  ;;  %11114 = vst [vmem:[#allocation114_spill] sm:$0xff] %v9444_v45  ;;  %5424 = vmatmul.mubr.bf16.gmra.mxu1 %v11115_v11  ;;  %v7564_v35 = vcombine.low %v1257_v48, %v1261_v27  ;;  %v8133_v59 = vld [vmem:[%s8518_s5 + $0x70] ss:$8 sps:$4 sm:$0xff]  }
 0x26a   : > { %v1125_v57 = vld [vmem:[#allocation7 + $0xa78] sm:$0xff]  ;;  %5582 = vmatpush2.bf16.msra.mxu1 %v7572_v6  ;;  %5470 = vmatprep.subr.bf16.mxu0 %v7437_v51  ;;  %v9448_v28 = vadd.f32 %v4747_v9, %v4635_v60  ;;  %v4637_v41 = vadd.f32 %v4636_v13, %v11117_v12  ;;  %v4638_v38 = vpop.f32.mrf.mxu0  ;;  %v4751_v27 = vpop.f32.mrf.mxu1  ;;  %v11122_v51 = vld [vmem:[#allocation89_spill] sm:$0xff] }
 0x26b   : > { %v1249_v42 = vld [vmem:[#allocation7 + $0xe58] sm:$0xff]  ;;  %v7429_v4 = vcombine.high %v1121_v43, %v1125_v57  ;;  %5583 = vmatprep.subr.bf16.mxu1 %v7565_v33  ;;  %5320 = vmatprep.mubr.bf16.mxu0 %v8132_v10  ;;  %v4639_v48 = vadd.f32 %v4638_v38, %v11120_v7  ;;  %v7428_v55 = vcombine.low %v1121_v43, %v1125_v57  ;;  %v11125_v57 = vld [vmem:[#allocation25_spill] sm:$0xff] }
 0x26c   : > { %v1253_v53 = vld [vmem:[#allocation7 + $0xe78] sm:$0xff]  ;;  %11116 = vst [vmem:[#allocation23_spill] sm:$0xff] %v9448_v28  ;;  %5433 = vmatprep.mubr.bf16.mxu1 %v11118_v1  ;;  %v9453_v36 = vadd.f32 %v4749_v52, %v4637_v41  ;;  %5471 = vmatpush2.bf16.msra.mxu0 %v7436_v2  ;;  %v4640_v58 = vpop.f32.mrf.mxu0  ;;  %v4753_v46 = vpop.f32.mrf.mxu1 }
 0x26d   : > { %v7557_v31 = vcombine.high %v1249_v42, %v1253_v53  ;;  %v1113_v15 = vld [vmem:[#allocation7 + $0xa18] sm:$0xff]  ;;  %5472 = vmatprep.subr.bf16.mxu0 %v7429_v4  ;;  %v7556_v39 = vcombine.low %v1249_v42, %v1253_v53  ;;  %v9456_v6 = vadd.f32 %v4751_v27, %v4639_v48  ;;  %v4641_v61 = vadd.f32 %v4640_v58, %v11122_v51  ;;  %v11127_v4 = vld [vmem:[#allocation91_spill] sm:$0xff]  ;;  %v7896_v27 = vld [vmem:[#allocation8 + $0x70] sm:$0xff]  }
 0x26e   : > { %v1117_v30 = vld [vmem:[#allocation7 + $0xa38] sm:$0xff]  ;;  %11119 = vst [vmem:[#allocation87_spill] sm:$0xff] %v9453_v36  ;;  %5584 = vmatpush2.bf16.msra.mxu1 %v7564_v35  ;;  %v4644_v21 = vpop.f32.mrf.mxu0  ;;  %v4757_v43 = vpop.f32.mrf.mxu1  ;;  %v11132_v58 = vld [vmem:[#allocation27_spill] sm:$0xff]  ;;  %v11134_v51 = vld [vmem:[#allocation28_spill] sm:$0xff] }
 0x26f   : > { %v1241_v63 = vld [vmem:[#allocation7 + $0xe18] sm:$0xff]  ;;  %v7421_v62 = vcombine.high %v1113_v15, %v1117_v30  ;;  %11121 = vst [vmem:[#allocation24_spill] sm:$0xff] %v9456_v6  ;;  %5585 = vmatprep.subr.bf16.mxu1 %v7557_v31  ;;  %v9460_v60 = vadd.f32 %v4753_v46, %v4641_v61  ;;  %v7420_v42 = vcombine.low %v1113_v15, %v1117_v30  ;;  %v11129_v31 = vld [vmem:[#allocation20_spill] sm:$0xff] }
 0x270   : > { %v1245_v22 = vld [vmem:[#allocation7 + $0xe38] sm:$0xff]  ;;  %5473 = vmatpush2.bf16.msra.mxu0 %v7428_v55  ;;  %v4646_v53 = vpop.f32.mrf.mxu0  ;;  %v4759_v41 = vpop.f32.mrf.mxu1 }
 0x271   : > { %v7549_v33 = vcombine.high %v1241_v63, %v1245_v22  ;;  %5321 = vmatmul.mubr.bf16.gmra.mxu0 %v8133_v59  ;;  %11123 = vst [vmem:[#allocation88_spill] sm:$0xff] %v9460_v60  ;;  %v11124_v9 = vld [vmem:[#allocation90_spill] sm:$0xff]  ;;  %5434 = vmatmul.mubr.bf16.gmra.mxu1 %v11125_v57  ;;  %v7548_v2 = vcombine.low %v1241_v63, %v1245_v22  ;;  %v7898_v59 = vld [vmem:[#allocation8 + $0x68] sm:$0xff]  }
 0x272   : > { %v4645_v11 = vadd.f32 %v4644_v21, %v11124_v9  ;;  %5586 = vmatpush2.bf16.msra.mxu1 %v7556_v39  ;;  %5474 = vmatprep.subr.bf16.mxu0 %v7421_v62  ;;  %v7894_v13 = vld [vmem:[#allocation8 + $0x78] sm:$0xff]   ;;  %v4647_v12 = vadd.f32 %v4646_v53, %v11127_v4  ;;  %v4648_v10 = vpop.f32.mrf.mxu0  ;;  %v4761_v30 = vpop.f32.mrf.mxu1  ;;  %v7897_v21 = vld [vmem:[#allocation8 + $0x30] sm:$0xff]   ;;  %v11137_v4 = vld [vmem:[#allocation31_spill] sm:$0xff] }
 0x273   : > { %5587 = vmatprep.subr.bf16.mxu1 %v7549_v33  ;;  %v11128_v52 = vld [vmem:[#allocation26_spill] sm:$0xff]  ;;  %5589 = vmatprep.mubr.bf16.mxu1 %v11129_v31  ;;  %v4649_v15 = vadd.f32 %v4648_v10, %v9345_v17  ;;  %v11135_v17 = vld [vmem:[#allocation29_spill] sm:$0xff] }
 0x274   : > { %v9464_v35 = vadd.f32 %v4757_v43, %v4645_v11  ;;  %5476 = vmatprep.mubr.bf16.mxu0 %v11128_v52  ;;  %v9469_v38 = vadd.f32 %v4759_v41, %v4647_v12  ;;  %5475 = vmatpush2.bf16.msra.mxu0 %v7420_v42  ;;  %v4650_v1 = vpop.f32.mrf.mxu0  ;;  %v7895_v63 = vld [vmem:[#allocation8 + $0x38] sm:$0xff]   ;;  %v4763_v48 = vpop.f32.mrf.mxu1  ;;  %v7899_v42 = vld [vmem:[#allocation8 + $0x28] sm:$0xff]   ;;  %v11139_v52 = vld [vmem:[#allocation33_spill] sm:$0xff] }
 0x275   : > { %7641 = vmatprep.subr.bf16.mxu0 %v7894_v13  ;;  %v9472_v22 = vadd.f32 %v4761_v30, %v4649_v15  ;;  %v4651_v7 = vadd.f32 %v4650_v1, %v9347_v26  ;;  %v11136_v33 = vld [vmem:[#allocation30_spill] sm:$0xff]  ;;  %v11138_v41 = vld [vmem:[#allocation32_spill] sm:$0xff]  ;;  %v7901_v30 = vld [vmem:[#allocation8 + $0x20] sm:$0xff]  }
 0x276   : > { %11126 = vst [vmem:[#allocation89_spill] sm:$0xff] %v9464_v35  ;;  %11130 = vst [vmem:[#allocation90_spill] sm:$0xff] %v9469_v38  ;;  %5588 = vmatpush2.bf16.msra.mxu1 %v7548_v2  ;;  %v4800_v55 = vpop.f32.mrf.mxu0  ;;  %v4913_v62 = vpop.f32.mrf.mxu1  ;;  %v7900_v2 = vld [vmem:[#allocation8 + $0x60] sm:$0xff]   ;;  %v11140_v15 = vld [vmem:[#allocation34_spill] sm:$0xff] }
 0x277   : > { %11131 = vst [vmem:[#allocation25_spill] sm:$0xff] %v9472_v22  ;;  %v9476_v39 = vadd.f32 %v4763_v48, %v4651_v7  ;;  %v9480_v61 = vadd.f32 %v4913_v62, %v4800_v55  ;;  %v7903_v62 = vld [vmem:[#allocation8 + $0x18] sm:$0xff]  }
 0x278   : > { %v4802_v46 = vpop.f32.mrf.mxu0  ;;  %v4915_v26 = vpop.f32.mrf.mxu1  ;;  %v7910_v35 = vld [vmem:[#allocation8 + $0xf8] sm:$0xff]  }
 0x279   : > { %5477 = vmatmul.mubr.bf16.vlgmr.msra.gmra.mxu0 %v11132_v58  ;;  %11133 = vst [vmem:[#allocation91_spill] sm:$0xff] %v9476_v39  ;;  %5590 = vmatmul.mubr.bf16.vlgmr.msra.gmra.mxu1 %v11134_v51  ;;  %v9483_v9 = vadd.f32 %v4915_v26, %v4802_v46  ;;  %v11142_v26 = vld [vmem:[#allocation36_spill] sm:$0xff]  ;;  %v7911_v60 = vld [vmem:[#allocation8 + $0xb8] sm:$0xff]  }
 0x27a   : > { %5486 = vmatprep.mubr.bf16.mxu0 %v11135_v17  ;;  %5599 = vmatprep.mubr.bf16.mxu1 %v11136_v33  ;;  %v9485_v11 = vpop.f32.mrf.mxu0  ;;  %v9487_v43 = vpop.f32.mrf.mxu1  ;;  %v7904_v17 = vld [vmem:[#allocation8 + $0x50] sm:$0xff]   ;;  %v11141_v33 = vld [vmem:[#allocation35_spill] sm:$0xff]  ;;  %v11184_v16 = vld [vmem:[#allocation74_spill] sm:$0xff] }
 0x27b   : > { %7642 = vmatpush3.bf16.msra.mxu0 %v7895_v63  ;;  %v7902_v63 = vld [vmem:[#allocation8 + $0x58] sm:$0xff]   ;;  %7705 = vmatprep.subr.bf16.mxu1 %v7910_v35  ;;  %v9641_v5 = vmul.f32 %v11184_v16, %v11184_v16 }
 0x27c   : > { %7643 = vmatprep.subr.bf16.mxu0 %v7896_v27  ;;  %v9489_v57 = vpop.f32.mrf.mxu0  ;;  %v9491_v53 = vpop.f32.mrf.mxu1  ;;  %7706 = vmatpush3.bf16.msra.mxu1 %v7911_v60  ;;  %v11188_v16 = vld [vmem:[#allocation78_spill] sm:$0xff] }
 0x27e   : > { %v4810_v13 = vpop.f32.mrf.mxu0  ;;  %v4923_v12 = vpop.f32.mrf.mxu1 }
 0x27f   : > { %7644 = vmatpush3.bf16.msra.mxu0 %v7897_v21  ;;  %v9496_v10 = vadd.f32 %v4923_v12, %v4810_v13  ;;  %v11144_v13 = vld [vmem:[#allocation38_spill] sm:$0xff] }
 0x280   : > { %7645 = vmatprep.subr.bf16.mxu0 %v7898_v59  ;;  %v4812_v31 = vpop.f32.mrf.mxu0  ;;  %v4925_v1 = vpop.f32.mrf.mxu1  ;;  %v11143_v59 = vld [vmem:[#allocation37_spill] sm:$0xff] }
 0x281   : > { %5487 = vmatmul.mubr.bf16.gmra.mxu0 %v11137_v4  ;;  %5600 = vmatmul.mubr.bf16.gmra.mxu1 %v11138_v41  ;;  %v9499_v7 = vadd.f32 %v4925_v1, %v4812_v31  ;;  %v7905_v4 = vld [vmem:[#allocation8 + $0x10] sm:$0xff]   ;;  %v7906_v41 = vld [vmem:[#allocation8 + $0x48] sm:$0xff]  }
 0x282   : > { %5496 = vmatprep.mubr.bf16.mxu0 %v11139_v52  ;;  %5609 = vmatprep.mubr.bf16.mxu1 %v11140_v15  ;;  %v4814_v48 = vpop.f32.mrf.mxu0  ;;  %v4927_v27 = vpop.f32.mrf.mxu1 }
 0x283   : > { %7646 = vmatpush3.bf16.msra.mxu0 %v7899_v42  ;;  %v9501_v55 = vadd.f32 %v4927_v27, %v4814_v48  ;;  %v7908_v27 = vld [vmem:[#allocation8 + $0x40] sm:$0xff]  }
 0x284   : > { %7647 = vmatprep.subr.bf16.mxu0 %v7900_v2  ;;  %v9503_v58 = vpop.f32.mrf.mxu0  ;;  %v9505_v51 = vpop.f32.mrf.mxu1 }
 0x286   : > { %v4820_v46 = vpop.f32.mrf.mxu0  ;;  %v4933_v21 = vpop.f32.mrf.mxu1 }
 0x287   : > { %7648 = vmatpush3.bf16.msra.mxu0 %v7901_v30  ;;  %v9510_v42 = vadd.f32 %v4933_v21, %v4820_v46 }
 0x288   : > { %7649 = vmatprep.subr.bf16.mxu0 %v7902_v63  ;;  %v4822_v2 = vpop.f32.mrf.mxu0  ;;  %v4935_v12 = vpop.f32.mrf.mxu1  ;;  %v7907_v63 = vld [vmem:[#allocation8 + $0x8] sm:$0xff]  }
 0x289   : > { %5497 = vmatmul.mubr.bf16.gmra.mxu0 %v11141_v33  ;;  %5610 = vmatmul.mubr.bf16.gmra.mxu1 %v11142_v26  ;;  %v9513_v52 = vadd.f32 %v4935_v12, %v4822_v2  ;;  %v11147_v26 = vld [vmem:[#allocation41_spill] sm:$0xff] }
 0x28a   : > { %5506 = vmatprep.mubr.bf16.mxu0 %v11143_v59  ;;  %5619 = vmatprep.mubr.bf16.mxu1 %v11144_v13  ;;  %v4824_v31 = vpop.f32.mrf.mxu0  ;;  %v4937_v15 = vpop.f32.mrf.mxu1  ;;  %v11148_v13 = vld [vmem:[#allocation42_spill] sm:$0xff] }
 0x28b   : > { %7650 = vmatpush3.bf16.msra.mxu0 %v7903_v62  ;;  %v9515_v30 = vadd.f32 %v4937_v15, %v4824_v31  ;;  %v11145_v62 = vld [vmem:[#allocation39_spill] sm:$0xff] }
 0x28c   : > { %7651 = vmatprep.subr.bf16.mxu0 %v7904_v17  ;;  %v4826_v1 = vpop.f32.mrf.mxu0  ;;  %v4939_v48 = vpop.f32.mrf.mxu1  ;;  %v11146_v17 = vld [vmem:[#allocation40_spill] sm:$0xff] }
 0x28d   : > { %v9517_v46 = vadd.f32 %v4939_v48, %v4826_v1 }
 0x28e   : > { %v4830_v33 = vpop.f32.mrf.mxu0  ;;  %v4943_v21 = vpop.f32.mrf.mxu1 }
 0x28f   : > { %7652 = vmatpush3.bf16.msra.mxu0 %v7905_v4  ;;  %v9522_v59 = vadd.f32 %v4943_v21, %v4830_v33  ;;  %v7909_v4 = vld [vmem:[#allocation8] sm:$0xff]  }
 0x290   : > { %7653 = vmatprep.subr.bf16.mxu0 %v7906_v41  ;;  %v4832_v2 = vpop.f32.mrf.mxu0  ;;  %v4945_v12 = vpop.f32.mrf.mxu1  ;;  %v11149_v21 = vld [vmem:[#allocation43_spill] sm:$0xff] }
 0x291   : > { %5507 = vmatmul.mubr.bf16.gmra.mxu0 %v11145_v62  ;;  %5620 = vmatmul.mubr.bf16.gmra.mxu1 %v11146_v17  ;;  %v9525_v41 = vadd.f32 %v4945_v12, %v4832_v2  ;;  %v11152_v12 = vld [vmem:[#allocation46_spill] sm:$0xff] }
 0x292   : > { %5516 = vmatprep.mubr.bf16.mxu0 %v11147_v26  ;;  %5629 = vmatprep.mubr.bf16.mxu1 %v11148_v13  ;;  %v4834_v31 = vpop.f32.mrf.mxu0  ;;  %v4947_v15 = vpop.f32.mrf.mxu1  ;;  %v11150_v13 = vld [vmem:[#allocation44_spill] sm:$0xff] }
 0x293   : > { %7654 = vmatpush3.bf16.msra.mxu0 %v7907_v63  ;;  %v9527_v1 = vadd.f32 %v4947_v15, %v4834_v31  ;;  %v11151_v63 = vld [vmem:[#allocation45_spill] sm:$0xff] }
 0x294   : > { %7655 = vmatprep.subr.bf16.mxu0 %v7908_v27  ;;  %v4836_v48 = vpop.f32.mrf.mxu0  ;;  %v4949_v62 = vpop.f32.mrf.mxu1 }
 0x295   : > { %v9529_v17 = vadd.f32 %v4949_v62, %v4836_v48 }
 0x296   : > { %v4840_v33 = vpop.f32.mrf.mxu0  ;;  %v4953_v26 = vpop.f32.mrf.mxu1 }
 0x297   : > { %7656 = vmatpush3.bf16.msra.mxu0 %v7909_v4  ;;  %v9534_v27 = vadd.f32 %v4953_v26, %v4840_v33  ;;  %v11154_v33 = vld [vmem:[#allocation48_spill] sm:$0xff]  ;;  %v11155_v26 = vld [vmem:[#allocation49_spill] sm:$0xff] }
 0x298   : > { %v4842_v2 = vpop.f32.mrf.mxu0  ;;  %v4955_v31 = vpop.f32.mrf.mxu1 }
 0x299   : > { %5517 = vmatmul.mubr.bf16.gmra.mxu0 %v11149_v21  ;;  %5630 = vmatmul.mubr.bf16.gmra.mxu1 %v11150_v13  ;;  %v9537_v15 = vadd.f32 %v4955_v31, %v4842_v2  ;;  %v11153_v13 = vld [vmem:[#allocation47_spill] sm:$0xff]  ;;  %v11156_v31 = vld [vmem:[#allocation50_spill] sm:$0xff] }
 0x29a   : > { %5526 = vmatprep.mubr.bf16.mxu0 %v11151_v63  ;;  %5639 = vmatprep.mubr.bf16.mxu1 %v11152_v12  ;;  %v4844_v4 = vpop.f32.mrf.mxu0  ;;  %v4957_v39 = vpop.f32.mrf.mxu1 }
 0x29b   : > { %v9539_v48 = vadd.f32 %v4957_v39, %v4844_v4 }
 0x29c   : > { %v9541_v62 = vpop.f32.mrf.mxu0  ;;  %v9543_v21 = vpop.f32.mrf.mxu1 }
 0x29e   : > { %v4850_v22 = vpop.f32.mrf.mxu0 }
 0x2a0   : > { %v4852_v2 = vpop.f32.mrf.mxu0 }
 0x2a1   : > { %5527 = vmatmul.mubr.bf16.gmra.mxu0 %v11153_v13  ;;  %v4963_v63 = vpop.f32.mrf.mxu1  ;;  %5640 = vmatmul.mubr.bf16.gmra.mxu1 %v11154_v33  ;;  %v7912_v33 = vld [vmem:[#allocation8 + $0xf0] sm:$0xff]  }
 0x2a2   : > { %5536 = vmatprep.mubr.bf16.mxu0 %v11155_v26  ;;  %v9548_v12 = vadd.f32 %v4963_v63, %v4850_v22  ;;  %5649 = vmatprep.mubr.bf16.mxu1 %v11156_v31  ;;  %v4854_v4 = vpop.f32.mrf.mxu0  ;;  %v7913_v22 = vld [vmem:[#allocation8 + $0xb0] sm:$0xff]   ;;  %v11157_v26 = vld [vmem:[#allocation51_spill] sm:$0xff] }
 0x2a3   : > { %v4965_v38 = vpop.f32.mrf.mxu1  ;;  %7707 = vmatprep.subr.bf16.mxu1 %v7912_v33  ;;  %v11159_v31 = vld [vmem:[#allocation53_spill] sm:$0xff]  ;;  %v7914_v33 = vld [vmem:[#allocation8 + $0xe8] sm:$0xff]  }
 0x2a4   : > { %v9551_v39 = vadd.f32 %v4965_v38, %v4852_v2  ;;  %v9555_v13 = vpop.f32.mrf.mxu0  ;;  %v11158_v2 = vld [vmem:[#allocation52_spill] sm:$0xff]  ;;  %7708 = vmatpush3.bf16.msra.mxu1 %v7913_v22 }
 0x2a5   : > { %v4967_v6 = vpop.f32.mrf.mxu1  ;;  %7709 = vmatprep.subr.bf16.mxu1 %v7914_v33 }
 0x2a6   : > { %v9553_v36 = vadd.f32 %v4967_v6, %v4854_v4  ;;  %v4860_v63 = vpop.f32.mrf.mxu0  ;;  %v11160_v4 = vld [vmem:[#allocation54_spill] sm:$0xff] }
 0x2a7   : > { %v9557_v28 = vpop.f32.mrf.mxu1 }
 0x2a8   : > { %v4862_v6 = vpop.f32.mrf.mxu0  ;;  %7710 = vmatpush3.bf16.msra.mxu1 %v7915_v18 }
 0x2a9   : > { %5537 = vmatmul.mubr.bf16.gmra.mxu0 %v11157_v26  ;;  %v4973_v38 = vpop.f32.mrf.mxu1  ;;  %5650 = vmatmul.mubr.bf16.gmra.mxu1 %v11158_v2 }
 0x2aa   : > { %5546 = vmatprep.mubr.bf16.mxu0 %v11159_v31  ;;  %v9562_v45 = vadd.f32 %v4973_v38, %v4860_v63  ;;  %5659 = vmatprep.mubr.bf16.mxu1 %v11160_v4  ;;  %v4864_v60 = vpop.f32.mrf.mxu0  ;;  %v11163_v63 = vld [vmem:[#allocation55_spill] sm:$0xff]  ;;  %v11164_v4 = vld [vmem:[#allocation56_spill] sm:$0xff] }
 0x2ab   : > { %v4975_v35 = vpop.f32.mrf.mxu1  ;;  %7711 = vmatprep.subr.bf16.mxu1 %v7916_v32  ;;  %v11175_v32 = vld [vmem:[#allocation65_spill] sm:$0xff] }
 0x2ac   : > { %v9565_v23 = vadd.f32 %v4975_v35, %v4862_v6  ;;  %v9569_v26 = vpop.f32.mrf.mxu0  ;;  %7712 = vmatpush3.bf16.msra.mxu1 %v7917_v54  ;;  %v4918_v54 = vadd.f32 %v9487_v43, %v9485_v11 }
 0x2ad   : > { %v4977_v29 = vpop.f32.mrf.mxu1 }
 0x2ae   : > { %11161 = vst [vmem:[#allocation26_spill] sm:$0xff] %v9565_v23  ;;  %v9567_v50 = vadd.f32 %v4977_v29, %v4864_v60  ;;  %v4870_v31 = vpop.f32.mrf.mxu0 }
 0x2af   : > { %v9571_v2 = vpop.f32.mrf.mxu1 }
 0x2b0   : > { %11162 = vst [vmem:[#allocation20_spill] sm:$0xff] %v9567_v50  ;;  %v4872_v6 = vpop.f32.mrf.mxu0 }
 0x2b1   : > { %5547 = vmatmul.mubr.bf16.gmra.mxu0 %v11163_v63  ;;  %v4983_v38 = vpop.f32.mrf.mxu1  ;;  %5660 = vmatmul.mubr.bf16.gmra.mxu1 %v11164_v4  ;;  %v11170_v4 = vld [vmem:[#allocation60_spill] sm:$0xff] }
 0x2b2   : > { %v9575_v22 = vadd.f32 %v4983_v38, %v4870_v31  ;;  %v4874_v60 = vpop.f32.mrf.mxu0  ;;  %v5670_v31 = vmul.f32 %v11170_v4, %v11170_v4  ;;  %v11171_v38 = vld [vmem:[#allocation61_spill] sm:$0xff]  ;;  %v9600_v4 = vmul.f32 %v11175_v32, %v11175_v32  ;;  %v9615_v32 = vmul.f32 %v11178_v49, %v11178_v49 }
 0x2b3   : > { %v4985_v35 = vpop.f32.mrf.mxu1  ;;  %v5671_v18 = vmul.f32 %v11171_v38, %v11171_v38  ;;  %v11176_v38 = vld [vmem:[#allocation66_spill] sm:$0xff] }
 0x2b4   : > { %11165 = vst [vmem:[#allocation27_spill] sm:$0xff] %v9575_v22  ;;  %v9577_v29 = vadd.f32 %v4985_v35, %v4872_v6  ;;  %v9581_v56 = vpop.f32.mrf.mxu0 }
 0x2b5   : > { %v4987_v19 = vpop.f32.mrf.mxu1  ;;  %11168 = vst [vmem:[#allocation30_spill] sm:$0xff] %v9581_v56 }
 0x2b6   : > { %11166 = vst [vmem:[#allocation28_spill] sm:$0xff] %v9577_v29  ;;  %v9579_v24 = vadd.f32 %v4987_v19, %v4874_v60  ;;  %v5026_v33 = vpop.f32.mrf.mxu0  ;;  %v11172_v19 = vld [vmem:[#allocation62_spill] sm:$0xff] }
 0x2b7   : > { %v9583_v63 = vpop.f32.mrf.mxu1  ;;  %v5027_v6 = vadd.f32 %v5026_v33, %v9480_v61  ;;  %v5674_v60 = vmul.f32 %v11172_v19, %v11172_v19  ;;  %v9604_v61 = vmul.f32 %v11176_v38, %v11176_v38  ;;  %v11180_v38 = vld [vmem:[#allocation70_spill] sm:$0xff] }
 0x2b8   : > { %11167 = vst [vmem:[#allocation29_spill] sm:$0xff] %v9579_v24  ;;  %11169 = vst [vmem:[#allocation31_spill] sm:$0xff] %v9583_v63  ;;  %v5028_v20 = vpop.f32.mrf.mxu0  ;;  %v9623_v40 = vmul.f32 %v11180_v38, %v11180_v38  ;;  %v9637_v38 = vmul.f32 %v11183_v47, %v11183_v47  ;;  %v9651_v24 = vmul.f32 %v11186_v0, %v11186_v0  ;;  %v11187_v47 = vld [vmem:[#allocation77_spill] sm:$0xff] }
 0x2b9   : > { %v5139_v35 = vpop.f32.mrf.mxu1  ;;  %v5029_v19 = vadd.f32 %v5028_v20, %v9483_v9  ;;  %v4920_v20 = vadd.f32 %v9491_v53, %v9489_v57  ;;  %v9655_v63 = vmul.f32 %v11187_v47, %v11187_v47  ;;  %v11191_v0 = vld [vmem:[#allocation57_spill] sm:$0xff] }
 0x2ba   : > { %v5140_v33 = vadd.f32 %v5139_v35, %v5027_v6  ;;  %v5030_v11 = vpop.f32.mrf.mxu0  ;;  %v11181_v35 = vld [vmem:[#allocation71_spill] sm:$0xff]  ;;  %v9674_v47 = vmul.f32 %v11191_v0, %v11191_v0  ;;  %v11197_v0 = vld [vmem:[#allocation81_spill] sm:$0xff] }
 0x2bb   : > { %v5141_v8 = vpop.f32.mrf.mxu1  ;;  %v5031_v44 = vadd.f32 %v5030_v11, %v4918_v54  ;;  %v9629_v49 = vmul.f32 %v11181_v35, %v11181_v35  ;;  %v11185_v11 = vld [vmem:[#allocation75_spill] sm:$0xff] }
 0x2bc   : > { %v5734_v9 = vmul.f32 %v5140_v33, %v5140_v33  ;;  %v5142_v43 = vadd.f32 %v5141_v8, %v5029_v19  ;;  %v5032_v57 = vpop.f32.mrf.mxu0  ;;  %v9647_v35 = vmul.f32 %v11185_v11, %v11185_v11  ;;  %11192 = vst [vmem:[#allocation32_spill] sm:$0xff] %v9674_v47  ;;  %v11199_v47 = vld [vmem:[#allocation83_spill] sm:$0xff] }
 0x2bd   : > { %v5143_v6 = vpop.f32.mrf.mxu1  ;;  %v5033_v19 = vadd.f32 %v5032_v57, %v4920_v20 }
 0x2be   : > { %v9643_v53 = vadd.f32 %v5734_v9, %v5670_v31  ;;  %v5735_v54 = vmul.f32 %v5142_v43, %v5142_v43  ;;  %v5144_v33 = vadd.f32 %v5143_v6, %v5031_v44  ;;  %v9659_v31 = vmul.f32 %v11188_v16, %v11188_v16  ;;  %v5036_v9 = vpop.f32.mrf.mxu0  ;;  %v11189_v43 = vld [vmem:[#allocation79_spill] sm:$0xff]  ;;  %v11190_v44 = vld [vmem:[#allocation21_spill] sm:$0xff] }
 0x2bf   : > { %v5145_v8 = vpop.f32.mrf.mxu1  ;;  %v9663_v20 = vmul.f32 %v11189_v43, %v11189_v43  ;;  %v9667_v6 = vmul.f32 %v11190_v44, %v11190_v44  ;;  %v5037_v29 = vadd.f32 %v5036_v9, %v9496_v10  ;;  %v11193_v43 = vld [vmem:[#allocation22_spill] sm:$0xff]  ;;  %v11195_v44 = vld [vmem:[#allocation80_spill] sm:$0xff] }
 0x2c0   : > { %7926 = vrsqrt.f32 %v9643_v53  ;;  %v9670_v57 = vadd.f32 %v5735_v54, %v5671_v18  ;;  %v5738_v16 = vmul.f32 %v5144_v33, %v5144_v33  ;;  %v5146_v56 = vadd.f32 %v5145_v8, %v5033_v19  ;;  %v5038_v22 = vpop.f32.mrf.mxu0 }
 0x2c1   : > { %v5149_v11 = vpop.f32.mrf.mxu1  ;;  %v9679_v50 = vmul.f32 %v11193_v43, %v11193_v43  ;;  %v9683_v23 = vmul.f32 %v11195_v44, %v11195_v44  ;;  %v5039_v18 = vadd.f32 %v5038_v22, %v9499_v7  ;;  %v9689_v33 = vmul.f32 %v11197_v0, %v11197_v0  ;;  %v11198_v43 = vld [vmem:[#allocation82_spill] sm:$0xff] }
 0x2c2   : > { %7928 = vrsqrt.f32 %v9670_v57  ;;  %v9691_v19 = vadd.f32 %v5738_v16, %v5674_v60  ;;  %v5739_v10 = vmul.f32 %v5146_v56, %v5146_v56  ;;  %v5150_v8 = vadd.f32 %v5149_v11, %v5037_v29  ;;  %v5040_v9 = vpop.f32.mrf.mxu0  ;;  %v11200_v60 = vld [vmem:[#allocation58_spill] sm:$0xff] }
 0x2c3   : > { %11194 = vst [vmem:[#allocation33_spill] sm:$0xff] %v9679_v50  ;;  %11196 = vst [vmem:[#allocation34_spill] sm:$0xff] %v9683_v23  ;;  %v5151_v54 = vpop.f32.mrf.mxu1  ;;  %v9695_v50 = vmul.f32 %v11198_v43, %v11198_v43  ;;  %v4930_v44 = vadd.f32 %v9505_v51, %v9503_v58  ;;  %v5041_v7 = vadd.f32 %v5040_v9, %v9501_v55  ;;  %v11202_v55 = vld [vmem:[#allocation84_spill] sm:$0xff]  ;;  %vm5864_vm3 = vcmp.eq.f32.partialorder %v9643_v53, inf }
 0x2c4   : > { %v5152_v23 = vadd.f32 %v5151_v54, %v5039_v18  ;;  %v9702_v0 = vmul.f32 %v11199_v47, %v11199_v47  ;;  %v9706_v56 = vmul.f32 %v11200_v60, %v11200_v60  ;;  %7930 = vrsqrt.f32 %v9691_v19  ;;  %v5042_v11 = vpop.f32.mrf.mxu0  ;;  %v11203_v47 = vld [vmem:[#allocation59_spill] sm:$0xff]  ;;  %v11204_v60 = vld [vmem:[#allocation85_spill] sm:$0xff] }
 0x2c5   : > { %v5153_v22 = vpop.f32.mrf.mxu1  ;;  %v9709_v29 = vadd.f32 %v5739_v10, %v5675_v37  ;;  %v5742_v16 = vmul.f32 %v5150_v8, %v5150_v8  ;;  %v5043_v51 = vadd.f32 %v5042_v11, %v4930_v44  ;;  %v9713_v54 = vmul.f32 %v11202_v55, %v11202_v55 }
 0x2c6   : > { %11201 = vst [vmem:[#allocation35_spill] sm:$0xff] %v9706_v56  ;;  %v5743_v43 = vmul.f32 %v5152_v23, %v5152_v23  ;;  %v5154_v58 = vadd.f32 %v5153_v22, %v5041_v7  ;;  %v9717_v9 = vmul.f32 %v11203_v47, %v11203_v47  ;;  %v9721_v56 = vmul.f32 %v11204_v60, %v11204_v60  ;;  %v5046_v37 = vpop.f32.mrf.mxu0 }
 0x2c7   : > { %v5155_v18 = vpop.f32.mrf.mxu1  ;;  %7932 = vrsqrt.f32 %v9709_v29  ;;  %v9725_v23 = vadd.f32 %v5742_v16, %v9596_v25  ;;  %v9732_v22 = vadd.f32 %v9543_v21, %v9541_v62  ;;  %v9736_v11 = vadd.f32 %v9557_v28, %v9555_v13 }
 0x2c8   : > { %v9728_v10 = vadd.f32 %v5743_v43, %v9600_v4  ;;  %v5746_v8 = vmul.f32 %v5154_v58, %v5154_v58  ;;  %v5156_v44 = vadd.f32 %v5155_v18, %v5043_v51  ;;  %v9740_v55 = vadd.f32 %v9571_v2, %v9569_v26  ;;  %v5048_v16 = vpop.f32.mrf.mxu0 }
 0x2c9   : > { %v5159_v7 = vpop.f32.mrf.mxu1  ;;  %v5047_v25 = vadd.f32 %v5046_v37, %v9510_v42  ;;  %7934 = vrsqrt.f32 %v9725_v23  ;;  %v5049_v62 = vadd.f32 %v5048_v16, %v9513_v52  ;;  %v5867_v28 = vand.u32 2147483648, %v9643_v53 }
 0x2ca   : > { %v9745_v4 = vadd.f32 %v5746_v8, %v9604_v61  ;;  %v5747_v43 = vmul.f32 %v5156_v44, %v5156_v44  ;;  %7936 = vrsqrt.f32 %v9728_v10  ;;  %v5050_v26 = vpop.f32.mrf.mxu0  ;;  %vm5871_vm4 = vcmp.eq.f32.partialorder %v9670_v57, inf }
 0x2cb   : > { %v5161_v21 = vpop.f32.mrf.mxu1  ;;  %v5160_v13 = vadd.f32 %v5159_v7, %v5047_v25  ;;  %v5051_v58 = vadd.f32 %v5050_v26, %v9515_v30  ;;  %vm5866_vm5 = vcmp.eq.f32.partialorder %v9643_v53, 0.0  ;;  %vm5892_vm6 = vcmp.eq.f32.partialorder %v9691_v19, inf }
 0x2cc   : > { %v9752_v42 = vadd.f32 %v5747_v43, %v9611_v14  ;;  %v5162_v2 = vadd.f32 %v5161_v21, %v5049_v62  ;;  %v5895_v51 = vand.u32 2147483648, %v9691_v19  ;;  %v5052_v47 = vpop.f32.mrf.mxu0  ;;  %v5874_v60 = vand.u32 2147483648, %v9670_v57 }
 0x2cd   : > { %v5163_v61 = vpop.f32.mrf.mxu1  ;;  %v7927_v52 = vpop.eup %7926  ;;  %v5750_v18 = vmul.f32 %v5160_v13, %v5160_v13  ;;  %vm5873_vm7 = vcmp.eq.f32.partialorder %v9670_v57, 0.0  ;;  %vm5899_vm8 = vcmp.eq.f32.partialorder %v9709_v29, inf  ;;  %v5053_v25 = vadd.f32 %v5052_v47, %v9517_v46 }
 0x2ce   : > { %v5863_v14 = vmul.f32 %v7927_v52, %v9643_v53  ;;  %7938 = vrsqrt.f32 %v9752_v42  ;;  %v5751_v37 = vmul.f32 %v5162_v2, %v5162_v2  ;;  %v5164_v30 = vadd.f32 %v5163_v61, %v5051_v58  ;;  %v5056_v16 = vpop.f32.mrf.mxu0 }
 0x2cf   : > { %v5165_v8 = vpop.f32.mrf.mxu1  ;;  %v7929_v44 = vpop.eup %7928  ;;  %7940 = vrsqrt.f32 %v9745_v4  ;;  %v9766_v7 = vadd.f32 %v5750_v18, %v9615_v32  ;;  %v5902_v43 = vand.u32 2147483648, %v9709_v29  ;;  %v5057_v13 = vadd.f32 %v5056_v16, %v9522_v59  ;;  %v7919_v16 = vld [vmem:[#allocation8 + $0x98] sm:$0xff]  }
 0x2d0   : > { %v9771_v62 = vadd.f32 %v5751_v37, %v9619_v3  ;;  %v5754_v21 = vmul.f32 %v5164_v30, %v5164_v30  ;;  %v5870_v2 = vmul.f32 %v7929_v44, %v9670_v57  ;;  %vm5901_vm9 = vcmp.eq.f32.partialorder %v9709_v29, 0.0  ;;  %v5058_v58 = vpop.f32.mrf.mxu0 }
 0x2d1   : > { %v5169_v26 = vpop.f32.mrf.mxu1  ;;  %7942 = vrsqrt.f32 %v9766_v7  ;;  %v5166_v32 = vadd.f32 %v5165_v8, %v5053_v25  ;;  %vm5894_vm10 = vcmp.eq.f32.partialorder %v9691_v19, 0.0  ;;  %v5930_v46 = vand.u32 2147483648, %v9728_v10  ;;  %v7931_v61 = vpop.eup %7930  ;;  %v7918_v25 = vld [vmem:[#allocation8 + $0xd8] sm:$0xff]  }
 0x2d2   : > { %v9780_v3 = vadd.f32 %v5754_v21, %v9623_v40  ;;  %v5170_v52 = vadd.f32 %v5169_v26, %v5057_v13  ;;  %v5059_v59 = vadd.f32 %v5058_v58, %v9525_v41  ;;  %v5865_v47 = vsel %vm5864_vm3, %v9643_v53, %v5863_v14  ;;  %v5060_v8 = vpop.f32.mrf.mxu0  ;;  %v7920_v40 = vld [vmem:[#allocation8 + $0xd0] sm:$0xff]   ;;  %7713 = vmatprep.subr.bf16.mxu1 %v7918_v25 }
 0x2d3   : > { %v5171_v18 = vpop.f32.mrf.mxu1  ;;  %v5891_v37 = vmul.f32 %v7931_v61, %v9691_v19  ;;  %7944 = vrsqrt.f32 %v9771_v62  ;;  %v5755_v30 = vmul.f32 %v5166_v32, %v5166_v32  ;;  %v5061_v41 = vadd.f32 %v5060_v8, %v9527_v1  ;;  %7714 = vmatpush3.bf16.msra.mxu1 %v7919_v16  ;;  %v7921_v8 = vld [vmem:[#allocation8 + $0x90] sm:$0xff]  }
 0x2d4   : > { %v7933_v21 = vpop.eup %7932  ;;  %v5758_v13 = vmul.f32 %v5170_v52, %v5170_v52  ;;  %v5172_v26 = vadd.f32 %v5171_v18, %v5059_v59  ;;  %v5872_v14 = vsel %vm5871_vm4, %v9670_v57, %v5870_v2  ;;  %vm5927_vm11 = vcmp.eq.f32.partialorder %v9728_v10, inf  ;;  %v5062_v61 = vpop.f32.mrf.mxu0  ;;  %7715 = vmatprep.subr.bf16.mxu1 %v7920_v40 }
 0x2d5   : > { %v5173_v58 = vpop.f32.mrf.mxu1  ;;  %vm5920_vm12 = vcmp.eq.f32.partialorder %v9725_v23, inf  ;;  %v9796_v32 = vadd.f32 %v5755_v30, %v9629_v49  ;;  %v5898_v44 = vmul.f32 %v7933_v21, %v9709_v29  ;;  %v9803_v1 = vsel %vm5866_vm5, %v5867_v28, %v5865_v47 }
 0x2d6   : > { %v5893_v2 = vsel %vm5892_vm6, %v9691_v19, %v5891_v37  ;;  %v9809_v52 = vadd.f32 %v5758_v13, %v9633_v34  ;;  %v5759_v59 = vmul.f32 %v5172_v26, %v5172_v26  ;;  %v5174_v49 = vadd.f32 %v5173_v58, %v5061_v41  ;;  %v7935_v53 = vpop.eup %7934  ;;  %v5066_v28 = vpop.f32.mrf.mxu0  ;;  %v7922_v37 = vld [vmem:[#allocation8 + $0xc8] sm:$0xff]  }
 0x2d7   : > { %v5063_v18 = vadd.f32 %v5062_v61, %v9529_v17  ;;  %v5175_v30 = vpop.f32.mrf.mxu1  ;;  %vm5955_vm13 = vcmp.eq.f32.partialorder %v9752_v42, inf  ;;  %7946 = vrsqrt.f32 %v9780_v3  ;;  %v5875_v47 = vsel %vm5873_vm7, %v5874_v60, %v5872_v14  ;;  %v7937_v25 = vpop.eup %7936  ;;  %7716 = vmatpush3.bf16.msra.mxu1 %v7921_v8 }
 0x2d8   : > { %v5900_v34 = vsel %vm5899_vm8, %v9709_v29, %v5898_v44  ;;  %v5896_v17 = vsel %vm5894_vm10, %v5895_v51, %v5893_v2  ;;  %7948 = vrsqrt.f32 %v9796_v32  ;;  %v9827_v16 = vadd.f32 %v5759_v59, %v9637_v38  ;;  %v5068_v51 = vpop.f32.mrf.mxu0  ;;  %7717 = vmatprep.subr.bf16.mxu1 %v7922_v37 }
 0x2d9   : > { %v5762_v21 = vmul.f32 %v5174_v49, %v5174_v49  ;;  %v5176_v57 = vadd.f32 %v5175_v30, %v5063_v18  ;;  %v5179_v60 = vpop.f32.mrf.mxu1  ;;  %vm5929_vm14 = vcmp.eq.f32.partialorder %v9728_v10, 0.0  ;;  %vm5957_vm15 = vcmp.eq.f32.partialorder %v9752_v42, 0.0  ;;  %v7924_v30 = vld [vmem:[#allocation8 + $0xc0] sm:$0xff]  }
 0x2da   : > { %vm5922_vm0 = vcmp.eq.f32.partialorder %v9725_v23, 0.0  ;;  %v5067_v19 = vadd.f32 %v5066_v28, %v9534_v27  ;;  %v5903_v44 = vsel %vm5901_vm9, %v5902_v43, %v5900_v34  ;;  %v6310_v38 = vpack.c.bf16 %v5896_v17, %v9803_v1  ;;  %v7923_v27 = vld [vmem:[#allocation8 + $0x88] sm:$0xff]   ;;  %v5070_v2 = vpop.f32.mrf.mxu0 }
 0x2db   : > { %v5926_v40 = vmul.f32 %v7937_v25, %v9728_v10  ;;  %v9840_v13 = vadd.f32 %v5762_v21, %v9641_v5  ;;  %v5763_v26 = vmul.f32 %v5176_v57, %v5176_v57  ;;  %v5069_v41 = vadd.f32 %v5068_v51, %v9537_v15  ;;  %v5181_v58 = vpop.f32.mrf.mxu1  ;;  %v7939_v61 = vpop.eup %7938  ;;  %7718 = vmatpush3.bf16.msra.mxu1 %v7923_v27  ;;  %v7925_v21 = vld [vmem:[#allocation8 + $0x80] sm:$0xff]  }
 0x2dc   : > { %v5923_v14 = vand.u32 2147483648, %v9725_v23  ;;  %7950 = vrsqrt.f32 %v9809_v52  ;;  %v5180_v29 = vadd.f32 %v5179_v60, %v5067_v19  ;;  %v6311_v43 = vpack.c.bf16 %v5903_v44, %v5875_v47  ;;  %v7941_v59 = vpop.eup %7940  ;;  %v5072_v28 = vpop.f32.mrf.mxu0  ;;  %7719 = vmatprep.subr.bf16.mxu1 %v7924_v30 }
 0x2dd   : > { %v5919_v1 = vmul.f32 %v7935_v53, %v9725_v23  ;;  %7952 = vrsqrt.f32 %v9827_v16  ;;  %v9848_v5 = vadd.f32 %v5763_v26, %v9647_v35  ;;  %v5182_v15 = vadd.f32 %v5181_v58, %v5069_v41  ;;  %v5183_v18 = vpop.f32.mrf.mxu1 }
 0x2de   : > { %v5071_v49 = vadd.f32 %v5070_v2, %v9539_v48  ;;  %v5766_v8 = vmul.f32 %v5180_v29, %v5180_v29  ;;  %6630 = vmatprep.mubr.bf16.mxu0 %v6311_v43  ;;  %v5928_v47 = vsel %vm5927_vm11, %v9728_v10, %v5926_v40  ;;  %v5954_v53 = vmul.f32 %v7939_v61, %v9752_v42  ;;  %v9858_v35 = vpop.eup %7942  ;;  %v5076_v60 = vpop.f32.mrf.mxu0 }
 0x2df   : > { %v5921_v34 = vsel %vm5920_vm12, %v9725_v23, %v5919_v1  ;;  %7954 = vrsqrt.f32 %v9840_v13  ;;  %v5767_v48 = vmul.f32 %v5182_v15, %v5182_v15  ;;  %6631 = vmatmul.mubr.bf16.vlgmr.msra.gmra.mxu0 %v6310_v38  ;;  %v5073_v37 = vadd.f32 %v5072_v28, %v9732_v22  ;;  %v5185_v25 = vpop.f32.mrf.mxu1  ;;  %7720 = vmatpush3.bf16.msra.mxu1 %v7925_v21 }
 0x2e0   : > { %v5184_v17 = vadd.f32 %v5183_v18, %v5071_v49  ;;  %7956 = vrsqrt.f32 %v9848_v5  ;;  %v9864_v57 = vadd.f32 %v5766_v8, %v9651_v24  ;;  %v5956_v19 = vsel %vm5955_vm13, %v9752_v42, %v5954_v53  ;;  %v7945_v44 = vpop.eup %7944  ;;  %v5078_v24 = vpop.f32.mrf.mxu0 }
 0x2e1   : > { %v5947_v51 = vmul.f32 %v7941_v59, %v9745_v4  ;;  %v9871_v38 = vadd.f32 %v5767_v48, %v9655_v63  ;;  %v5186_v40 = vadd.f32 %v5185_v25, %v5073_v37  ;;  %v5077_v26 = vadd.f32 %v5076_v60, %v9548_v12  ;;  %v5189_v41 = vpop.f32.mrf.mxu1 }
 0x2e2   : > { %v5770_v22 = vmul.f32 %v5184_v17, %v5184_v17  ;;  %7958 = vrsqrt.f32 %v9864_v57  ;;  %v5931_v58 = vsel %vm5929_vm14, %v5930_v46, %v5928_v47  ;;  %v11205_v27 = vand.u32 2147483648, %v9752_v42  ;;  %v5080_v1 = vpop.f32.mrf.mxu0 }
 0x2e3   : > { %v5924_v63 = vsel %vm5922_vm0, %v5923_v14, %v5921_v34  ;;  %v5771_v12 = vmul.f32 %v5186_v40, %v5186_v40  ;;  %v5190_v43 = vadd.f32 %v5189_v41, %v5077_v26  ;;  %v5191_v2 = vpop.f32.mrf.mxu1  ;;  %vm5948_vm1 = vcmp.eq.f32.partialorder %v9745_v4, inf  ;;  %v11207_v26 = vld [vmem:[#allocation33_spill] sm:$0xff] }
 0x2e4   : > { %v5959_v61 = vsel %vm5957_vm15, %v11205_v27, %v5956_v19  ;;  %v9886_v29 = vadd.f32 %v5770_v22, %v9659_v31  ;;  %v5079_v10 = vadd.f32 %v5078_v24, %v9551_v39  ;;  %v5949_v59 = vsel %vm5948_vm1, %v9745_v4, %v5947_v51  ;;  %v9892_v15 = vpop.eup %7946  ;;  %v5082_v8 = vpop.f32.mrf.mxu0  ;;  %v11206_v19 = vld [vmem:[#allocation32_spill] sm:$0xff]  ;;  %v11208_v24 = vld [vmem:[#allocation26_spill] sm:$0xff] }
 0x2e5   : > { %v6315_v46 = vpack.c.bf16 %v5959_v61, %v5931_v58  ;;  %v5951_v42 = vand.u32 2147483648, %v9745_v4  ;;  %v9895_v23 = vadd.f32 %v5771_v12, %v9663_v20  ;;  %v5774_v31 = vmul.f32 %v5190_v43, %v5190_v43  ;;  %v5193_v49 = vpop.f32.mrf.mxu1  ;;  %v7949_v18 = vpop.eup %7948 }
 0x2e6   : > { %v5081_v14 = vadd.f32 %v5080_v1, %v9553_v36  ;;  %vm5950_vm2 = vcmp.eq.f32.partialorder %v9745_v4, 0.0  ;;  %7960 = vrsqrt.f32 %v9871_v38  ;;  %v5192_v39 = vadd.f32 %v5191_v2, %v5079_v10  ;;  %v5086_v48 = vpop.f32.mrf.mxu0 }
 0x2e7   : > { %6638 = vmatprep.mubr.bf16.mxu0 %v6315_v46  ;;  %v5952_v30 = vsel %vm5950_vm2, %v5951_v42, %v5949_v59  ;;  %v5982_v28 = vmul.f32 %v7945_v44, %v9771_v62  ;;  %7962 = vrsqrt.f32 %v9886_v29  ;;  %v9903_v20 = vadd.f32 %v5774_v31, %v9667_v6  ;;  %v5195_v36 = vpop.f32.mrf.mxu1  ;;  %v11209_v42 = vld [vmem:[#allocation34_spill] sm:$0xff] }
 0x2e8   : > { %v5194_v47 = vadd.f32 %v5193_v49, %v5081_v14  ;;  %v6314_v53 = vpack.c.bf16 %v5952_v30, %v5924_v63  ;;  %7964 = vrsqrt.f32 %v9895_v23  ;;  %v5775_v4 = vmul.f32 %v5192_v39, %v5192_v39  ;;  %v5088_v44 = vpop.f32.mrf.mxu0  ;;  %v11210_v14 = vld [vmem:[#allocation20_spill] sm:$0xff] }
 0x2e9   : > { %v5083_v34 = vadd.f32 %v5082_v8, %v9736_v11  ;;  %vm5983_vm3 = vcmp.eq.f32.partialorder %v9771_v62, inf  ;;  %v9908_v17 = vpop.eup %7950  ;;  %v5087_v25 = vadd.f32 %v5086_v48, %v9562_v45  ;;  %v5199_v21 = vpop.f32.mrf.mxu1  ;;  %vm5985_vm4 = vcmp.eq.f32.partialorder %v9771_v62, 0.0 }
 0x2ea   : > { %v5778_v37 = vmul.f32 %v5194_v47, %v5194_v47  ;;  %6639 = vmatmul.mubr.bf16.gmra.mxu0 %v6314_v53  ;;  %v5984_v6 = vsel %vm5983_vm3, %v9771_v62, %v5982_v28  ;;  %v9913_v60 = vpop.eup %7952  ;;  %v9916_v51 = vadd.f32 %v5775_v4, %v11206_v19  ;;  %v5986_v22 = vand.u32 2147483648, %v9771_v62  ;;  %v5090_v62 = vpop.f32.mrf.mxu0 }
 0x2eb   : > { %v5196_v11 = vadd.f32 %v5195_v36, %v5083_v34  ;;  %v6010_v40 = vmul.f32 %v7949_v18, %v9796_v32  ;;  %v5200_v45 = vadd.f32 %v5199_v21, %v5087_v25  ;;  %v5089_v58 = vadd.f32 %v5088_v44, %v11208_v24  ;;  %v5201_v27 = vpop.f32.mrf.mxu1  ;;  %v11212_v24 = vld [vmem:[#allocation28_spill] sm:$0xff] }
 0x2ec   : > { %v9921_v41 = vadd.f32 %v5778_v37, %v11207_v26  ;;  %vm6011_vm5 = vcmp.eq.f32.partialorder %v9796_v32, inf  ;;  %v9925_v61 = vpop.eup %7954  ;;  %7966 = vrsqrt.f32 %v9903_v20  ;;  %v5987_v12 = vsel %vm5985_vm4, %v5986_v22, %v5984_v6  ;;  %v5092_v39 = vpop.f32.mrf.mxu0  ;;  %v11211_v26 = vld [vmem:[#allocation27_spill] sm:$0xff] }
 0x2ed   : > { %v5779_v63 = vmul.f32 %v5196_v11, %v5196_v11  ;;  %v6012_v43 = vsel %vm6011_vm5, %v9796_v32, %v6010_v40  ;;  %v7957_v2 = vpop.eup %7956  ;;  %7968 = vrsqrt.f32 %v9916_v51  ;;  %v5782_v10 = vmul.f32 %v5200_v45, %v5200_v45  ;;  %v5203_v59 = vpop.f32.mrf.mxu1 }
 0x2ee   : > { %v5202_v46 = vadd.f32 %v5201_v27, %v5089_v58  ;;  %v6014_v1 = vand.u32 2147483648, %v9796_v32  ;;  %vm6013_vm6 = vcmp.eq.f32.partialorder %v9796_v32, 0.0  ;;  %v5091_v49 = vadd.f32 %v5090_v62, %v11210_v14  ;;  %v5096_v34 = vpop.f32.mrf.mxu0  ;;  %v11213_v62 = vld [vmem:[#allocation30_spill] sm:$0xff] }
 0x2ef   : > { %v9932_v31 = vadd.f32 %v5779_v63, %v11209_v42  ;;  %v5975_v18 = vmul.f32 %v9858_v35, %v9766_v7  ;;  %v9938_v30 = vpop.eup %7958  ;;  %v9941_v8 = vadd.f32 %v5782_v10, %v9689_v33  ;;  %vm5976_vm7 = vcmp.eq.f32.partialorder %v9766_v7, inf  ;;  %v5205_v53 = vpop.f32.mrf.mxu1  ;;  %v11214_v10 = vld [vmem:[#allocation31_spill] sm:$0xff] }
 0x2f0   : > { %v5783_v28 = vmul.f32 %v5202_v46, %v5202_v46  ;;  %v6015_v47 = vsel %vm6013_vm6, %v6014_v1, %v6012_v43  ;;  %7970 = vrsqrt.f32 %v9921_v41  ;;  %v5204_v32 = vadd.f32 %v5203_v59, %v5091_v49  ;;  %v5098_v6 = vpop.f32.mrf.mxu0 }
 0x2f1   : > { %v6319_v36 = vpack.c.bf16 %v6015_v47, %v5987_v12  ;;  %v5977_v4 = vsel %vm5976_vm7, %v9766_v7, %v5975_v18  ;;  %vm5978_vm8 = vcmp.eq.f32.partialorder %v9766_v7, 0.0  ;;  %v5979_v33 = vand.u32 2147483648, %v9766_v7  ;;  %v5209_v37 = vpop.f32.mrf.mxu1 }
 0x2f2   : > { %v9947_v35 = vadd.f32 %v5783_v28, %v9695_v50  ;;  %v6003_v48 = vmul.f32 %v9892_v15, %v9780_v3  ;;  %7972 = vrsqrt.f32 %v9932_v31  ;;  %v5786_v25 = vmul.f32 %v5204_v32, %v5204_v32  ;;  %v5100_v27 = vpop.f32.mrf.mxu0 }
 0x2f3   : > { %6646 = vmatprep.mubr.bf16.mxu0 %v6319_v36  ;;  %vm6004_vm9 = vcmp.eq.f32.partialorder %v9780_v3, inf  ;;  %v6007_v21 = vand.u32 2147483648, %v9780_v3  ;;  %v9956_v19 = vpop.eup %7960  ;;  %v5980_v50 = vsel %vm5978_vm8, %v5979_v33, %v5977_v4  ;;  %vm6006_vm10 = vcmp.eq.f32.partialorder %v9780_v3, 0.0  ;;  %v5211_v15 = vpop.f32.mrf.mxu1 }
 0x2f4   : > { %v6005_v11 = vsel %vm6004_vm9, %v9780_v3, %v6003_v48  ;;  %v5093_v7 = vadd.f32 %v5092_v39, %v9740_v55  ;;  %v9961_v44 = vpop.eup %7962  ;;  %v9964_v22 = vadd.f32 %v5786_v25, %v9702_v0  ;;  %v5097_v45 = vadd.f32 %v5096_v34, %v11211_v26  ;;  %v5102_v59 = vpop.f32.mrf.mxu0  ;;  %v11215_v48 = vld [vmem:[#allocation29_spill] sm:$0xff] }
 0x2f5   : > { %v6008_v40 = vsel %vm6006_vm10, %v6007_v21, %v6005_v11  ;;  %v5099_v58 = vadd.f32 %v5098_v6, %v11212_v24  ;;  %v9968_v63 = vpop.eup %7964  ;;  %7974 = vrsqrt.f32 %v9941_v8  ;;  %v6038_v55 = vmul.f32 %v9913_v60, %v9827_v16  ;;  %v5213_v43 = vpop.f32.mrf.mxu1 }
 0x2f6   : > { %v6318_v12 = vpack.c.bf16 %v6008_v40, %v5980_v50  ;;  %v5206_v3 = vadd.f32 %v5205_v53, %v5093_v7  ;;  %v4990_v0 = vadd.f32 %v11214_v10, %v11213_v62  ;;  %7976 = vrsqrt.f32 %v9947_v35 }
 0x2f7   : > { %v5210_v46 = vadd.f32 %v5209_v37, %v5097_v45  ;;  %v5212_v1 = vadd.f32 %v5211_v15, %v5099_v58  ;;  %vm6039_vm11 = vcmp.eq.f32.partialorder %v9827_v16, inf  ;;  %vm6041_vm12 = vcmp.eq.f32.partialorder %v9827_v16, 0.0  ;;  %v5215_v49 = vpop.f32.mrf.mxu1  ;;  %v5252_v28 = vpop.f32.mrf.mxu0 }
 0x2f8   : > { %6647 = vmatmul.mubr.bf16.gmra.mxu0 %v6318_v12  ;;  %v5787_v42 = vmul.f32 %v5206_v3, %v5206_v3  ;;  %v6066_v14 = vmul.f32 %v7957_v2, %v9848_v5  ;;  %v6040_v39 = vsel %vm6039_vm11, %v9827_v16, %v6038_v55  ;;  %vm6067_vm13 = vcmp.eq.f32.partialorder %v9848_v5, inf }
 0x2f9   : > { %v5790_v18 = vmul.f32 %v5210_v46, %v5210_v46  ;;  %v5791_v60 = vmul.f32 %v5212_v1, %v5212_v1  ;;  %v9981_v47 = vpop.eup %7966  ;;  %v6042_v53 = vand.u32 2147483648, %v9827_v16  ;;  %vm6069_vm14 = vcmp.eq.f32.partialorder %v9848_v5, 0.0  ;;  %v5365_v4 = vpop.f32.mrf.mxu1 }
 0x2fa   : > { %v6068_v36 = vsel %vm6067_vm13, %v9848_v5, %v6066_v14  ;;  %v6070_v32 = vand.u32 2147483648, %v9848_v5  ;;  %v9987_v2 = vpop.eup %7968  ;;  %v5101_v37 = vadd.f32 %v5100_v27, %v11215_v48  ;;  %v6031_v25 = vmul.f32 %v9908_v17, %v9809_v52  ;;  %v5254_v21 = vpop.f32.mrf.mxu0 }
 0x2fb   : > { %v9990_v34 = vadd.f32 %v5790_v18, %v9713_v54  ;;  %v9993_v33 = vadd.f32 %v5791_v60, %v9717_v9  ;;  %7978 = vrsqrt.f32 %v9964_v22  ;;  %v6043_v5 = vsel %vm6041_vm12, %v6042_v53, %v6040_v39  ;;  %v5367_v50 = vpop.f32.mrf.mxu1  ;;  %v11216_v54 = vld [vmem:[#allocation35_spill] sm:$0xff] }
 0x2fc   : > { %v6071_v6 = vsel %vm6069_vm14, %v6070_v32, %v6068_v36  ;;  %vm6032_vm15 = vcmp.eq.f32.partialorder %v9809_v52, inf  ;;  %v10003_v11 = vadd.f32 %v5787_v42, %v11216_v54  ;;  %v5214_v7 = vadd.f32 %v5213_v43, %v5101_v37  ;;  %v10006_v40 = vpop.f32.mrf.mxu0  ;;  %v11217_v42 = vld [vmem:[#allocation86_spill] sm:$0xff] }
 0x2fd   : > { %v6323_v9 = vpack.c.bf16 %v6071_v6, %v6043_v5  ;;  %v6033_v15 = vsel %vm6032_vm15, %v9809_v52, %v6031_v25  ;;  %v10008_v17 = vpop.eup %7970  ;;  %vm6034_vm0 = vcmp.eq.f32.partialorder %v9809_v52, 0.0  ;;  %v6035_v16 = vand.u32 2147483648, %v9809_v52  ;;  %v10015_v45 = vpop.f32.mrf.mxu1 }
 0x2fe   : > { %v6059_v26 = vmul.f32 %v9925_v61, %v9840_v13  ;;  %vm6060_vm1 = vcmp.eq.f32.partialorder %v9840_v13, inf  ;;  %v5794_v24 = vmul.f32 %v5214_v7, %v5214_v7  ;;  %vm6062_vm2 = vcmp.eq.f32.partialorder %v9840_v13, 0.0  ;;  %v10019_v12 = vpop.f32.mrf.mxu0 }
 0x2ff   : > { %6654 = vmatprep.mubr.bf16.mxu0 %v6323_v9  ;;  %v6063_v58 = vand.u32 2147483648, %v9840_v13  ;;  %v5103_v27 = vadd.f32 %v5102_v59, %v4990_v0  ;;  %v10021_v3 = vpop.eup %7972  ;;  %v6036_v55 = vsel %vm6034_vm0, %v6035_v16, %v6033_v15  ;;  %v10024_v43 = vadd.f32 %v5365_v4, %v5252_v28  ;;  %v10028_v62 = vpop.f32.mrf.mxu1 }
 0x300   : > { %v6061_v52 = vsel %vm6060_vm1, %v9840_v13, %v6059_v26  ;;  %v10026_v61 = vadd.f32 %v5367_v50, %v5254_v21  ;;  %v10031_v10 = vadd.f32 %v5794_v24, %v9721_v56  ;;  %v6094_v0 = vmul.f32 %v9956_v19, %v9871_v38  ;;  %v5262_v59 = vpop.f32.mrf.mxu0 }
 0x301   : > { %v6064_v46 = vsel %vm6062_vm2, %v6063_v58, %v6061_v52  ;;  %v5216_v1 = vadd.f32 %v5215_v49, %v5103_v27  ;;  %v5731_v14 = vmul.f32 %v11217_v42, %v11217_v42  ;;  %7980 = vrsqrt.f32 %v10003_v11  ;;  %v5375_v18 = vpop.f32.mrf.mxu1 }
 0x302   : > { %v6322_v13 = vpack.c.bf16 %v6064_v46, %v6036_v55  ;;  %vm6095_vm3 = vcmp.eq.f32.partialorder %v9871_v38, inf  ;;  %v10039_v60 = vpop.eup %7974  ;;  %7982 = vrsqrt.f32 %v9990_v34  ;;  %v6122_v19 = vmul.f32 %v9968_v63, %v9895_v23  ;;  %v5264_v39 = vpop.f32.mrf.mxu0 }
 0x303   : > { %v5795_v56 = vmul.f32 %v5216_v1, %v5216_v1  ;;  %v6096_v49 = vsel %vm6095_vm3, %v9871_v38, %v6094_v0  ;;  %v10045_v28 = vpop.eup %7976  ;;  %7984 = vrsqrt.f32 %v9993_v33  ;;  %v6098_v53 = vand.u32 2147483648, %v9871_v38  ;;  %v5377_v32 = vpop.f32.mrf.mxu1 }
 0x304   : > { %6655 = vmatmul.mubr.bf16.gmra.mxu0 %v6322_v13  ;;  %vm6123_vm4 = vcmp.eq.f32.partialorder %v9895_v23, inf  ;;  %v6126_v36 = vand.u32 2147483648, %v9895_v23  ;;  %vm6097_vm5 = vcmp.eq.f32.partialorder %v9871_v38, 0.0  ;;  %vm6125_vm6 = vcmp.eq.f32.partialorder %v9895_v23, 0.0  ;;  %v5266_v48 = vpop.f32.mrf.mxu0 }
 0x305   : > { %v6124_v4 = vsel %vm6123_vm4, %v9895_v23, %v6122_v19  ;;  %v6087_v63 = vmul.f32 %v9938_v30, %v9864_v57  ;;  %v10056_v37 = vadd.f32 %v5795_v56, %v5731_v14  ;;  %v6099_v25 = vsel %vm6097_vm5, %v6098_v53, %v6096_v49  ;;  %v5379_v5 = vpop.f32.mrf.mxu1 }
 0x306   : > { %v6127_v21 = vsel %vm6125_vm6, %v6126_v36, %v6124_v4  ;;  %vm6088_vm7 = vcmp.eq.f32.partialorder %v9864_v57, inf  ;;  %7986 = vrsqrt.f32 %v10031_v10  ;;  %v6115_v50 = vmul.f32 %v9961_v44, %v9886_v29  ;;  %v10063_v23 = vpop.f32.mrf.mxu0 }
 0x307   : > { %v6327_v6 = vpack.c.bf16 %v6127_v21, %v6099_v25  ;;  %v6089_v38 = vsel %vm6088_vm7, %v9864_v57, %v6087_v63  ;;  %vm6090_vm8 = vcmp.eq.f32.partialorder %v9864_v57, 0.0  ;;  %v6091_v30 = vand.u32 2147483648, %v9864_v57  ;;  %v10069_v9 = vpop.f32.mrf.mxu1 }
 0x308   : > { %vm6116_vm9 = vcmp.eq.f32.partialorder %v9886_v29, inf  ;;  %v6119_v54 = vand.u32 2147483648, %v9886_v29  ;;  %v10071_v7 = vpop.eup %7978  ;;  %vm6118_vm10 = vcmp.eq.f32.partialorder %v9886_v29, 0.0  ;;  %v10075_v44 = vadd.f32 %v5375_v18, %v5262_v59 }
 0x309   : > { %6662 = vmatprep.mubr.bf16.mxu0 %v6327_v6  ;;  %v6117_v15 = vsel %vm6116_vm9, %v9886_v29, %v6115_v50  ;;  %v10077_v16 = vadd.f32 %v5377_v32, %v5264_v39  ;;  %v5272_v26 = vpop.f32.mrf.mxu0  ;;  %7988 = vrsqrt.f32 %v10056_v37  ;;  %v6092_v57 = vsel %vm6090_vm8, %v6091_v30, %v6089_v38  ;;  %v5385_v27 = vpop.f32.mrf.mxu1 }
 0x30a   : > { %v6120_v24 = vsel %vm6118_vm10, %v6119_v54, %v6117_v15  ;;  %v6150_v58 = vmul.f32 %v9987_v2, %v9916_v51  ;;  %vm6151_vm11 = vcmp.eq.f32.partialorder %v9916_v51, inf  ;;  %v6154_v52 = vand.u32 2147483648, %v9916_v51 }
 0x30b   : > { %v6326_v55 = vpack.c.bf16 %v6120_v24, %v6092_v57  ;;  %v6178_v29 = vmul.f32 %v10021_v3, %v9932_v31  ;;  %v5274_v46 = vpop.f32.mrf.mxu0  ;;  %vm6179_vm12 = vcmp.eq.f32.partialorder %v9932_v31, inf  ;;  %v6182_v0 = vand.u32 2147483648, %v9932_v31  ;;  %v5387_v42 = vpop.f32.mrf.mxu1 }
 0x30c   : > { %v6152_v1 = vsel %vm6151_vm11, %v9916_v51, %v6150_v58  ;;  %v10089_v59 = vadd.f32 %v5379_v5, %v5266_v48  ;;  %vm6153_vm13 = vcmp.eq.f32.partialorder %v9916_v51, 0.0  ;;  %vm6181_vm14 = vcmp.eq.f32.partialorder %v9932_v31, 0.0 }
 0x30d   : > { %6663 = vmatmul.mubr.bf16.gmra.mxu0 %v6326_v55  ;;  %v6180_v2 = vsel %vm6179_vm12, %v9932_v31, %v6178_v29  ;;  %v6143_v3 = vmul.f32 %v9981_v47, %v9903_v20  ;;  %v5276_v14 = vpop.f32.mrf.mxu0  ;;  %v6155_v13 = vsel %vm6153_vm13, %v6154_v52, %v6152_v1  ;;  %vm6144_vm15 = vcmp.eq.f32.partialorder %v9903_v20, inf  ;;  %v5389_v49 = vpop.f32.mrf.mxu1 }
 0x30e   : > { %v6183_v18 = vsel %vm6181_vm14, %v6182_v0, %v6180_v2  ;;  %v6171_v56 = vmul.f32 %v10008_v17, %v9921_v41  ;;  %v7981_v19 = vpop.eup %7980  ;;  %v6147_v53 = vand.u32 2147483648, %v9903_v20  ;;  %vm6172_vm0 = vcmp.eq.f32.partialorder %v9921_v41, inf }
 0x30f   : > { %v6331_v39 = vpack.c.bf16 %v6183_v18, %v6155_v13  ;;  %v6145_v51 = vsel %vm6144_vm15, %v9903_v20, %v6143_v3  ;;  %v5278_v31 = vpop.f32.mrf.mxu0  ;;  %v10102_v36 = vpop.eup %7982  ;;  %vm6146_vm1 = vcmp.eq.f32.partialorder %v9903_v20, 0.0  ;;  %vm6174_vm2 = vcmp.eq.f32.partialorder %v9921_v41, 0.0 }
 0x310   : > { %v6173_v47 = vsel %vm6172_vm0, %v9921_v41, %v6171_v56  ;;  %v6175_v17 = vand.u32 2147483648, %v9921_v41  ;;  %v5391_v32 = vpop.f32.mrf.mxu1  ;;  %v7985_v4 = vpop.eup %7984  ;;  %v6148_v63 = vsel %vm6146_vm1, %v6147_v53, %v6145_v51  ;;  %v10108_v48 = vadd.f32 %v5385_v27, %v5272_v26 }
 0x311   : > { %6670 = vmatprep.mubr.bf16.mxu0 %v6331_v39  ;;  %v10110_v25 = vadd.f32 %v5387_v42, %v5274_v46  ;;  %v6206_v21 = vmul.f32 %v10045_v28, %v9947_v35  ;;  %v5282_v5 = vpop.f32.mrf.mxu0  ;;  %vm6207_vm3 = vcmp.eq.f32.partialorder %v9947_v35, inf  ;;  %vm6209_vm4 = vcmp.eq.f32.partialorder %v9947_v35, 0.0 }
 0x312   : > { %v6176_v6 = vsel %vm6174_vm2, %v6175_v17, %v6173_v47  ;;  %v6234_v20 = vmul.f32 %v7981_v19, %v10003_v11  ;;  %v5395_v41 = vpop.f32.mrf.mxu1  ;;  %v6210_v30 = vand.u32 2147483648, %v9947_v35  ;;  %vm6235_vm5 = vcmp.eq.f32.partialorder %v10003_v11, inf }
 0x313   : > { %v6330_v38 = vpack.c.bf16 %v6176_v6, %v6148_v63  ;;  %v6208_v50 = vsel %vm6207_vm3, %v9947_v35, %v6206_v21  ;;  %v5284_v54 = vpop.f32.mrf.mxu0  ;;  %v7987_v15 = vpop.eup %7986  ;;  %vm6237_vm6 = vcmp.eq.f32.partialorder %v10003_v11, 0.0  ;;  %v6238_v26 = vand.u32 2147483648, %v10003_v11 }
 0x314   : > { %v6236_v28 = vsel %vm6235_vm5, %v10003_v11, %v6234_v20  ;;  %v10123_v57 = vadd.f32 %v5389_v49, %v5276_v14  ;;  %v5397_v24 = vpop.f32.mrf.mxu1  ;;  %v6211_v58 = vsel %vm6209_vm4, %v6210_v30, %v6208_v50  ;;  %v6199_v27 = vmul.f32 %v10039_v60, %v9941_v8 }
 0x315   : > { %6671 = vmatmul.mubr.bf16.gmra.mxu0 %v6330_v38  ;;  %vm6200_vm7 = vcmp.eq.f32.partialorder %v9941_v8, inf  ;;  %vm6202_vm8 = vcmp.eq.f32.partialorder %v9941_v8, 0.0  ;;  %v5286_v35 = vpop.f32.mrf.mxu0  ;;  %v6239_v55 = vsel %vm6237_vm6, %v6238_v26, %v6236_v28  ;;  %v6203_v52 = vand.u32 2147483648, %v9941_v8 }
 0x316   : > { %v6227_v29 = vmul.f32 %v10071_v7, %v9964_v22  ;;  %vm6228_vm9 = vcmp.eq.f32.partialorder %v9964_v22, inf  ;;  %v5399_v11 = vpop.f32.mrf.mxu1  ;;  %v7989_v46 = vpop.eup %7988  ;;  %v6335_v1 = vpack.c.bf16 %v6239_v55, %v6211_v58  ;;  %v6201_v0 = vsel %vm6200_vm7, %v9941_v8, %v6199_v27 }
 0x317   : > { %v6231_v60 = vand.u32 2147483648, %v9964_v22  ;;  %v10135_v42 = vadd.f32 %v5391_v32, %v5278_v31  ;;  %v5288_v2 = vpop.f32.mrf.mxu0  ;;  %vm6230_vm10 = vcmp.eq.f32.partialorder %v9964_v22, 0.0  ;;  %v10139_v14 = vadd.f32 %v5395_v41, %v5282_v5 }
 0x318   : > { %v6229_v3 = vsel %vm6228_vm9, %v9964_v22, %v6227_v29  ;;  %v10141_v13 = vadd.f32 %v5397_v24, %v5284_v54  ;;  %v5401_v7 = vpop.f32.mrf.mxu1  ;;  %6678 = vmatprep.mubr.bf16.mxu0 %v6335_v1  ;;  %v6204_v18 = vsel %vm6202_vm8, %v6203_v52, %v6201_v0  ;;  %v6262_v49 = vmul.f32 %v7985_v4, %v9993_v33 }
 0x319   : > { %v6232_v56 = vsel %vm6230_vm10, %v6231_v60, %v6229_v3  ;;  %v5292_v19 = vpop.f32.mrf.mxu0  ;;  %vm6263_vm11 = vcmp.eq.f32.partialorder %v9993_v33, inf  ;;  %v6266_v51 = vand.u32 2147483648, %v9993_v33  ;;  %v6290_v22 = vmul.f32 %v7989_v46, %v10056_v37 }
 0x31a   : > { %v6334_v39 = vpack.c.bf16 %v6232_v56, %v6204_v18  ;;  %v5405_v53 = vpop.f32.mrf.mxu1  ;;  %v6264_v31 = vsel %vm6263_vm11, %v9993_v33, %v6262_v49  ;;  %vm6291_vm12 = vcmp.eq.f32.partialorder %v10056_v37, inf  ;;  %v6294_v47 = vand.u32 2147483648, %v10056_v37 }
 0x31b   : > { %v10152_v8 = vadd.f32 %v5399_v11, %v5286_v35  ;;  %v5294_v17 = vpop.f32.mrf.mxu0  ;;  %vm6265_vm13 = vcmp.eq.f32.partialorder %v9993_v33, 0.0  ;;  %v6292_v32 = vsel %vm6291_vm12, %v10056_v37, %v6290_v22  ;;  %vm6293_vm14 = vcmp.eq.f32.partialorder %v10056_v37, 0.0 }
 0x31c   : > { %v6255_v4 = vmul.f32 %v10102_v36, %v9990_v34  ;;  %v5407_v63 = vpop.f32.mrf.mxu1  ;;  %v6267_v21 = vsel %vm6265_vm13, %v6266_v51, %v6264_v31  ;;  %v6295_v5 = vsel %vm6293_vm14, %v6294_v47, %v6292_v32  ;;  %vm6256_vm15 = vcmp.eq.f32.partialorder %v9990_v34, inf }
 0x31d   : > { %6679 = vmatmul.mubr.bf16.gmra.mxu0 %v6334_v39  ;;  %v6283_v6 = vmul.f32 %v7987_v15, %v10031_v10  ;;  %v5296_v20 = vpop.f32.mrf.mxu0  ;;  %v6339_v41 = vpack.c.bf16 %v6295_v5, %v6267_v21  ;;  %vm6258_vm0 = vcmp.eq.f32.partialorder %v9990_v34, 0.0  ;;  %vm6284_vm1 = vcmp.eq.f32.partialorder %v10031_v10, inf }
 0x31e   : > { %v6257_v38 = vsel %vm6256_vm15, %v9990_v34, %v6255_v4  ;;  %v5409_v33 = vpop.f32.mrf.mxu1  ;;  %v6259_v37 = vand.u32 2147483648, %v9990_v34  ;;  %v6287_v50 = vand.u32 2147483648, %v10031_v10  ;;  %v10167_v30 = vadd.f32 %v5401_v7, %v5288_v2 }
 0x31f   : > { %v6285_v36 = vsel %vm6284_vm1, %v10031_v10, %v6283_v6  ;;  %v5298_v54 = vpop.f32.mrf.mxu0  ;;  %6686 = vmatprep.mubr.bf16.mxu0 %v6339_v41  ;;  %vm6286_vm2 = vcmp.eq.f32.partialorder %v10031_v10, 0.0  ;;  %v10170_v15 = vadd.f32 %v5405_v53, %v5292_v19  ;;  %v10172_v28 = vadd.f32 %v5407_v63, %v5294_v17 }
 0x320   : > { %v10174_v26 = vadd.f32 %v5409_v33, %v5296_v20  ;;  %v5411_v24 = vpop.f32.mrf.mxu1  ;;  %v6260_v58 = vsel %vm6258_vm0, %v6259_v37, %v6257_v38  ;;  %v6288_v27 = vsel %vm6286_vm2, %v6287_v50, %v6285_v36 }
 0x321   : > { %v10176_v34 = vadd.f32 %v5411_v24, %v5298_v54  ;;  %v5302_v35 = vpop.f32.mrf.mxu0  ;;  %v6338_v55 = vpack.c.bf16 %v6288_v27, %v6260_v58  ;;  %v11224_v24 = vld [vmem:[#allocation19_spill] sm:$0xff]  ;;  %v11225_v27 = vld [vmem:[#allocation92_spill] sm:$0xff] }
 0x322   : > { %v5415_v52 = vpop.f32.mrf.mxu1  ;;  %v5672_v58 = vmul.f32 %v11224_v24, %v11224_v24 }
 0x323   : > { %v10178_v29 = vadd.f32 %v5415_v52, %v5302_v35  ;;  %v5304_v11 = vpop.f32.mrf.mxu0  ;;  %v5673_v35 = vmul.f32 %v11225_v27, %v11225_v27 }
 0x324   : > { %v5417_v46 = vpop.f32.mrf.mxu1 }
 0x325   : > { %6687 = vmatmul.mubr.bf16.gmra.mxu0 %v6338_v55  ;;  %v10180_v10 = vadd.f32 %v5417_v46, %v5304_v11  ;;  %v5306_v1 = vpop.f32.mrf.mxu0  ;;  %v11226_v11 = vld [vmem:[#allocation93_spill] sm:$0xff] }
 0x326   : > { %v5419_v0 = vpop.f32.mrf.mxu1  ;;  %v5676_v46 = vmul.f32 %v11226_v11, %v11226_v11  ;;  %v11236_v11 = vld [vmem:[#allocation103_spill] sm:$0xff] }
 0x327   : > { %v10182_v60 = vadd.f32 %v5419_v0, %v5306_v1  ;;  %v5308_v2 = vpop.f32.mrf.mxu0  ;;  %v11227_v1 = vld [vmem:[#allocation94_spill] sm:$0xff] }
 0x328   : > { %v5421_v3 = vpop.f32.mrf.mxu1  ;;  %v5677_v0 = vmul.f32 %v11227_v1, %v11227_v1  ;;  %v10250_v1 = vmul.f32 %v11236_v11, %v11236_v11  ;;  %v11242_v11 = vld [vmem:[#allocation109_spill] sm:$0xff] }
 0x329   : > { %v10184_v7 = vadd.f32 %v5421_v3, %v5308_v2  ;;  %v5312_v18 = vpop.f32.mrf.mxu0  ;;  %v11228_v2 = vld [vmem:[#allocation95_spill] sm:$0xff] }
 0x32a   : > { %v5425_v56 = vpop.f32.mrf.mxu1  ;;  %v10213_v3 = vmul.f32 %v11228_v2, %v11228_v2  ;;  %v11237_v2 = vld [vmem:[#allocation104_spill] sm:$0xff] }
 0x32b   : > { %v10186_v49 = vadd.f32 %v5425_v56, %v5312_v18  ;;  %v5314_v19 = vpop.f32.mrf.mxu0  ;;  %v11229_v18 = vld [vmem:[#allocation96_spill] sm:$0xff] }
 0x32c   : > { %v5427_v39 = vpop.f32.mrf.mxu1  ;;  %v10217_v56 = vmul.f32 %v11229_v18, %v11229_v18  ;;  %v10254_v18 = vmul.f32 %v11237_v2, %v11237_v2 }
 0x32d   : > { %v10188_v51 = vadd.f32 %v5427_v39, %v5314_v19  ;;  %v5316_v22 = vpop.f32.mrf.mxu0  ;;  %v11230_v39 = vld [vmem:[#allocation97_spill] sm:$0xff] }
 0x32e   : > { %v5429_v53 = vpop.f32.mrf.mxu1 }
 0x32f   : > { %v10190_v31 = vadd.f32 %v5429_v53, %v5316_v22  ;;  %v5318_v47 = vpop.f32.mrf.mxu0  ;;  %v10221_v22 = vmul.f32 %v11230_v39, %v11230_v39 }
 0x330   : > { %v5431_v17 = vpop.f32.mrf.mxu1 }
 0x331   : > { %11218 = vst [vmem:[#allocation36_spill] sm:$0xff] %v10190_v31  ;;  %v10192_v32 = vadd.f32 %v5431_v17, %v5318_v47  ;;  %v5322_v4 = vpop.f32.mrf.mxu0  ;;  %v11250_v31 = vld [vmem:[#allocation24_spill] sm:$0xff] }
 0x332   : > { %v5435_v63 = vpop.f32.mrf.mxu1 }
 0x333   : > { %11219 = vst [vmem:[#allocation37_spill] sm:$0xff] %v10192_v32  ;;  %v10194_v21 = vadd.f32 %v5435_v63, %v5322_v4  ;;  %v5324_v5 = vpop.f32.mrf.mxu0  ;;  %v11231_v4 = vld [vmem:[#allocation98_spill] sm:$0xff] }
 0x334   : > { %v5437_v6 = vpop.f32.mrf.mxu1  ;;  %v10228_v63 = vmul.f32 %v11231_v4, %v11231_v4  ;;  %v11239_v4 = vld [vmem:[#allocation106_spill] sm:$0xff] }
 0x335   : > { %11220 = vst [vmem:[#allocation38_spill] sm:$0xff] %v10194_v21  ;;  %v10196_v20 = vadd.f32 %v5437_v6, %v5324_v5  ;;  %v5326_v41 = vpop.f32.mrf.mxu0  ;;  %v11232_v5 = vld [vmem:[#allocation99_spill] sm:$0xff] }
 0x336   : > { %v5439_v38 = vpop.f32.mrf.mxu1  ;;  %v10232_v6 = vmul.f32 %v11232_v5, %v11232_v5  ;;  %v10264_v5 = vmul.f32 %v11239_v4, %v11239_v4 }
 0x337   : > { %11221 = vst [vmem:[#allocation39_spill] sm:$0xff] %v10196_v20  ;;  %v10198_v33 = vadd.f32 %v5439_v38, %v5326_v41  ;;  %v5328_v37 = vpop.f32.mrf.mxu0  ;;  %v11233_v41 = vld [vmem:[#allocation100_spill] sm:$0xff] }
 0x338   : > { %v5441_v36 = vpop.f32.mrf.mxu1  ;;  %v10236_v38 = vmul.f32 %v11233_v41, %v11233_v41  ;;  %v11240_v41 = vld [vmem:[#allocation107_spill] sm:$0xff] }
 0x339   : > { %11222 = vst [vmem:[#allocation40_spill] sm:$0xff] %v10198_v33  ;;  %v10200_v50 = vadd.f32 %v5441_v36, %v5328_v37  ;;  %v5478_v54 = vpop.f32.mrf.mxu0  ;;  %v11234_v37 = vld [vmem:[#allocation101_spill] sm:$0xff] }
 0x33a   : > { %v5479_v55 = vadd.f32 %v5478_v54, %v10024_v43  ;;  %v5591_v52 = vpop.f32.mrf.mxu1  ;;  %v5370_v43 = vadd.f32 %v10015_v45, %v10006_v40  ;;  %v10240_v36 = vmul.f32 %v11234_v37, %v11234_v37  ;;  %v5372_v45 = vadd.f32 %v10028_v62, %v10019_v12 }
 0x33b   : > { %11223 = vst [vmem:[#allocation41_spill] sm:$0xff] %v10200_v50  ;;  %v5480_v19 = vpop.f32.mrf.mxu0  ;;  %v10268_v37 = vmul.f32 %v11240_v41, %v11240_v41 }
 0x33c   : > { %v5592_v53 = vadd.f32 %v5591_v52, %v5479_v55  ;;  %v5481_v47 = vadd.f32 %v5480_v19, %v10026_v61  ;;  %v5593_v17 = vpop.f32.mrf.mxu1  ;;  %v11235_v55 = vld [vmem:[#allocation102_spill] sm:$0xff]  ;;  %v11238_v19 = vld [vmem:[#allocation105_spill] sm:$0xff] }
 0x33d   : > { %v5482_v40 = vpop.f32.mrf.mxu0  ;;  %v10246_v52 = vmul.f32 %v11235_v55, %v11235_v55  ;;  %v10258_v39 = vmul.f32 %v11238_v19, %v11238_v19 }
 0x33e   : > { %v5736_v61 = vmul.f32 %v5592_v53, %v5592_v53  ;;  %v5594_v54 = vadd.f32 %v5593_v17, %v5481_v47  ;;  %v5483_v24 = vadd.f32 %v5482_v40, %v5370_v43  ;;  %v5595_v27 = vpop.f32.mrf.mxu1  ;;  %v11241_v40 = vld [vmem:[#allocation108_spill] sm:$0xff] }
 0x33f   : > { %v5484_v12 = vpop.f32.mrf.mxu0  ;;  %v10272_v55 = vmul.f32 %v11241_v40, %v11241_v40 }
 0x340   : > { %v10260_v62 = vadd.f32 %v5736_v61, %v5672_v58  ;;  %v5737_v43 = vmul.f32 %v5594_v54, %v5594_v54  ;;  %v5596_v53 = vadd.f32 %v5595_v27, %v5483_v24  ;;  %v5485_v47 = vadd.f32 %v5484_v12, %v5372_v45  ;;  %v5597_v17 = vpop.f32.mrf.mxu1  ;;  %v11243_v54 = vld [vmem:[#allocation110_spill] sm:$0xff]  ;;  %v11244_v24 = vld [vmem:[#allocation111_spill] sm:$0xff]  ;;  %v11245_v12 = vld [vmem:[#allocation112_spill] sm:$0xff] }
 0x341   : > { %v10276_v58 = vmul.f32 %v11242_v11, %v11242_v11  ;;  %v5488_v61 = vpop.f32.mrf.mxu0  ;;  %v10280_v45 = vmul.f32 %v11243_v54, %v11243_v54  ;;  %v10284_v27 = vmul.f32 %v11244_v24, %v11244_v24  ;;  %v10291_v4 = vmul.f32 %v11245_v12, %v11245_v12  ;;  %v11246_v54 = vld [vmem:[#allocation113_spill] sm:$0xff]  ;;  %v11247_v24 = vld [vmem:[#allocation114_spill] sm:$0xff]  ;;  %v11248_v12 = vld [vmem:[#allocation23_spill] sm:$0xff] }
 0x342   : > { %7990 = vrsqrt.f32 %v10260_v62  ;;  %v10287_v2 = vadd.f32 %v5737_v43, %v5673_v35  ;;  %v5601_v19 = vpop.f32.mrf.mxu1  ;;  %v5740_v41 = vmul.f32 %v5596_v53, %v5596_v53  ;;  %v5598_v40 = vadd.f32 %v5597_v17, %v5485_v47 }
 0x343   : > { %v5489_v11 = vadd.f32 %v5488_v61, %v10075_v44  ;;  %v5490_v50 = vpop.f32.mrf.mxu0  ;;  %v10296_v33 = vmul.f32 %v11246_v54, %v11246_v54  ;;  %v10300_v20 = vmul.f32 %v11247_v24, %v11247_v24  ;;  %v10306_v53 = vmul.f32 %v11248_v12, %v11248_v12  ;;  %v11249_v54 = vld [vmem:[#allocation87_spill] sm:$0xff] }
 0x344   : > { %7992 = vrsqrt.f32 %v10287_v2  ;;  %v5491_v35 = vadd.f32 %v5490_v50, %v10077_v16  ;;  %v5603_v43 = vpop.f32.mrf.mxu1  ;;  %v10308_v47 = vadd.f32 %v5740_v41, %v5676_v46  ;;  %v5741_v44 = vmul.f32 %v5598_v40, %v5598_v40  ;;  %v11251_v46 = vld [vmem:[#allocation88_spill] sm:$0xff] }
 0x345   : > { %v5602_v17 = vadd.f32 %v5601_v19, %v5489_v11  ;;  %v5492_v61 = vpop.f32.mrf.mxu0  ;;  %v10312_v21 = vmul.f32 %v11249_v54, %v11249_v54  ;;  %v5382_v24 = vadd.f32 %v10069_v9, %v10063_v23  ;;  %v10319_v12 = vmul.f32 %v11250_v31, %v11250_v31  ;;  %v11254_v31 = vld [vmem:[#allocation90_spill] sm:$0xff] }
 0x346   : > { %v5604_v32 = vadd.f32 %v5603_v43, %v5491_v35  ;;  %v5493_v16 = vadd.f32 %v5492_v61, %v10089_v59  ;;  %v5605_v50 = vpop.f32.mrf.mxu1  ;;  %v10323_v41 = vmul.f32 %v11251_v46, %v11251_v46  ;;  %7994 = vrsqrt.f32 %v10308_v47  ;;  %v11253_v59 = vld [vmem:[#allocation89_spill] sm:$0xff] }
 0x347   : > { %v10326_v19 = vadd.f32 %v5741_v44, %v5677_v0  ;;  %v5494_v40 = vpop.f32.mrf.mxu0  ;;  %v5744_v11 = vmul.f32 %v5602_v17, %v5602_v17  ;;  %v10330_v43 = vmul.f32 %v11253_v59, %v11253_v59  ;;  %v10334_v61 = vmul.f32 %v11254_v31, %v11254_v31  ;;  %v11255_v46 = vld [vmem:[#allocation25_spill] sm:$0xff] }
 0x348   : > { %11252 = vst [vmem:[#allocation42_spill] sm:$0xff] %v10323_v41  ;;  %v5745_v54 = vmul.f32 %v5604_v32, %v5604_v32  ;;  %v5606_v23 = vadd.f32 %v5605_v50, %v5493_v16  ;;  %v5495_v9 = vadd.f32 %v5494_v40, %v5382_v24  ;;  %v5607_v35 = vpop.f32.mrf.mxu1  ;;  %v10338_v41 = vmul.f32 %v11255_v46, %v11255_v46  ;;  %v11256_v50 = vld [vmem:[#allocation91_spill] sm:$0xff] }
 0x349   : > { %7996 = vrsqrt.f32 %v10326_v19  ;;  %v5498_v0 = vpop.f32.mrf.mxu0  ;;  %v10342_v32 = vadd.f32 %v5744_v11, %v10213_v3  ;;  %v10349_v40 = vmul.f32 %v11256_v50, %v11256_v50  ;;  %vm5878_vm3 = vcmp.eq.f32.partialorder %v10260_v62, inf }
 0x34a   : > { %v10345_v44 = vadd.f32 %v5745_v54, %v10217_v56  ;;  %v5748_v17 = vmul.f32 %v5606_v23, %v5606_v23  ;;  %v5608_v24 = vadd.f32 %v5607_v35, %v5495_v9  ;;  %v5611_v16 = vpop.f32.mrf.mxu1  ;;  %v5881_v59 = vand.u32 2147483648, %v10260_v62 }
 0x34b   : > { %v5499_v31 = vadd.f32 %v5498_v0, %v10108_v48  ;;  %v5500_v46 = vpop.f32.mrf.mxu0  ;;  %7998 = vrsqrt.f32 %v10342_v32  ;;  %vm5885_vm4 = vcmp.eq.f32.partialorder %v10287_v2, inf  ;;  %vm5880_vm5 = vcmp.eq.f32.partialorder %v10260_v62, 0.0 }
 0x34c   : > { %v10356_v3 = vadd.f32 %v5748_v17, %v10221_v22  ;;  %v5749_v56 = vmul.f32 %v5608_v24, %v5608_v24  ;;  %v5501_v11 = vadd.f32 %v5500_v46, %v10110_v25  ;;  %v5613_v54 = vpop.f32.mrf.mxu1  ;;  %8000 = vrsqrt.f32 %v10345_v44 }
 0x34d   : > { %v5612_v23 = vadd.f32 %v5611_v16, %v5499_v31  ;;  %v5502_v9 = vpop.f32.mrf.mxu0  ;;  %v5888_v17 = vand.u32 2147483648, %v10287_v2  ;;  %vm5906_vm6 = vcmp.eq.f32.partialorder %v10308_v47, inf  ;;  %v5909_v25 = vand.u32 2147483648, %v10308_v47 }
 0x34e   : > { %v10363_v48 = vadd.f32 %v5749_v56, %v10228_v63  ;;  %v5614_v35 = vadd.f32 %v5613_v54, %v5501_v11  ;;  %v5503_v0 = vadd.f32 %v5502_v9, %v10123_v57  ;;  %v5615_v22 = vpop.f32.mrf.mxu1  ;;  %vm5887_vm7 = vcmp.eq.f32.partialorder %v10287_v2, 0.0 }
 0x34f   : > { %v7991_v24 = vpop.eup %7990  ;;  %v5752_v16 = vmul.f32 %v5612_v23, %v5612_v23  ;;  %v5504_v50 = vpop.f32.mrf.mxu0  ;;  %vm5913_vm8 = vcmp.eq.f32.partialorder %v10326_v19, inf  ;;  %vm5908_vm9 = vcmp.eq.f32.partialorder %v10308_v47, 0.0  ;;  %vm5915_vm10 = vcmp.eq.f32.partialorder %v10326_v19, 0.0 }
 0x350   : > { %v5877_v46 = vmul.f32 %v7991_v24, %v10260_v62  ;;  %8002 = vrsqrt.f32 %v10363_v48  ;;  %v5753_v63 = vmul.f32 %v5614_v35, %v5614_v35  ;;  %v5616_v56 = vadd.f32 %v5615_v22, %v5503_v0  ;;  %v5617_v11 = vpop.f32.mrf.mxu1 }
 0x351   : > { %v7993_v57 = vpop.eup %7992  ;;  %8004 = vrsqrt.f32 %v10356_v3  ;;  %v10376_v54 = vadd.f32 %v5752_v16, %v10232_v6  ;;  %v5505_v23 = vadd.f32 %v5504_v50, %v10135_v42  ;;  %v5508_v9 = vpop.f32.mrf.mxu0  ;;  %vm5941_vm11 = vcmp.eq.f32.partialorder %v10345_v44, inf }
 0x352   : > { %v10381_v24 = vadd.f32 %v5753_v63, %v10236_v38  ;;  %v5756_v35 = vmul.f32 %v5616_v56, %v5616_v56  ;;  %v5509_v0 = vadd.f32 %v5508_v9, %v10139_v14  ;;  %v5621_v22 = vpop.f32.mrf.mxu1  ;;  %v5884_v31 = vmul.f32 %v7993_v57, %v10287_v2 }
 0x353   : > { %8006 = vrsqrt.f32 %v10376_v54  ;;  %v5618_v6 = vadd.f32 %v5617_v11, %v5505_v23  ;;  %v5510_v16 = vpop.f32.mrf.mxu0  ;;  %v5879_v42 = vsel %vm5878_vm3, %v10260_v62, %v5877_v46  ;;  %v7995_v38 = vpop.eup %7994  ;;  %v5972_v9 = vand.u32 2147483648, %v10363_v48 }
 0x354   : > { %v10392_v63 = vadd.f32 %v5756_v35, %v10240_v36  ;;  %v5622_v14 = vadd.f32 %v5621_v22, %v5509_v0  ;;  %v5511_v56 = vadd.f32 %v5510_v16, %v10141_v13  ;;  %v5623_v57 = vpop.f32.mrf.mxu1  ;;  %v5905_v11 = vmul.f32 %v7995_v38, %v10308_v47 }
 0x355   : > { %8008 = vrsqrt.f32 %v10381_v24  ;;  %v5757_v23 = vmul.f32 %v5618_v6, %v5618_v6  ;;  %v5512_v46 = vpop.f32.mrf.mxu0  ;;  %v5886_v50 = vsel %vm5885_vm4, %v10287_v2, %v5884_v31  ;;  %v5882_v16 = vsel %vm5880_vm5, %v5881_v59, %v5879_v42 }
 0x356   : > { %v7997_v36 = vpop.eup %7996  ;;  %v5760_v35 = vmul.f32 %v5622_v14, %v5622_v14  ;;  %v5624_v0 = vadd.f32 %v5623_v57, %v5511_v56  ;;  %v5513_v13 = vadd.f32 %v5512_v46, %v10152_v8  ;;  %v5625_v22 = vpop.f32.mrf.mxu1  ;;  %vm5943_vm12 = vcmp.eq.f32.partialorder %v10345_v44, 0.0 }
 0x357   : > { %8010 = vrsqrt.f32 %v10392_v63  ;;  %v10410_v6 = vadd.f32 %v5757_v23, %v10246_v52  ;;  %v5514_v38 = vpop.f32.mrf.mxu0  ;;  %v5912_v31 = vmul.f32 %v7997_v36, %v10326_v19  ;;  %v5907_v8 = vsel %vm5906_vm6, %v10308_v47, %v5905_v11 }
 0x358   : > { %vm5934_vm13 = vcmp.eq.f32.partialorder %v10342_v32, inf  ;;  %v10418_v14 = vadd.f32 %v5760_v35, %v10250_v1  ;;  %v5761_v62 = vmul.f32 %v5624_v0, %v5624_v0  ;;  %v5626_v59 = vadd.f32 %v5625_v22, %v5513_v13  ;;  %v5627_v56 = vpop.f32.mrf.mxu1  ;;  %v7999_v52 = vpop.eup %7998 }
 0x359   : > { %v5515_v42 = vadd.f32 %v5514_v38, %v10167_v30  ;;  %vm5969_vm14 = vcmp.eq.f32.partialorder %v10363_v48, inf  ;;  %8012 = vrsqrt.f32 %v10410_v6  ;;  %v5518_v57 = vpop.f32.mrf.mxu0  ;;  %v5889_v11 = vsel %vm5887_vm7, %v5888_v17, %v5886_v50  ;;  %v8001_v23 = vpop.eup %8000 }
 0x35a   : > { %v5914_v1 = vsel %vm5913_vm8, %v10326_v19, %v5912_v31  ;;  %v5910_v30 = vsel %vm5908_vm9, %v5909_v25, %v5907_v8  ;;  %v10435_v46 = vadd.f32 %v5761_v62, %v10254_v18  ;;  %v5764_v36 = vmul.f32 %v5626_v59, %v5626_v59  ;;  %v5631_v0 = vpop.f32.mrf.mxu1 }
 0x35b   : > { %v5628_v35 = vadd.f32 %v5627_v56, %v5515_v42  ;;  %vm5971_vm15 = vcmp.eq.f32.partialorder %v10363_v48, 0.0  ;;  %vm5936_vm0 = vcmp.eq.f32.partialorder %v10342_v32, 0.0  ;;  %v5937_v2 = vand.u32 2147483648, %v10342_v32  ;;  %v5520_v50 = vpop.f32.mrf.mxu0 }
 0x35c   : > { %v5519_v17 = vadd.f32 %v5518_v57, %v10170_v15  ;;  %v11257_v13 = vand.u32 2147483648, %v10326_v19  ;;  %v6312_v25 = vpack.c.bf16 %v5910_v30, %v5882_v16  ;;  %v5940_v18 = vmul.f32 %v8001_v23, %v10345_v44  ;;  %v5633_v8 = vpop.f32.mrf.mxu1 }
 0x35d   : > { %8014 = vrsqrt.f32 %v10418_v14  ;;  %v10448_v22 = vadd.f32 %v5764_v36, %v10258_v39  ;;  %v5765_v38 = vmul.f32 %v5628_v35, %v5628_v35  ;;  %v5521_v31 = vadd.f32 %v5520_v50, %v10172_v28  ;;  %v8003_v62 = vpop.eup %8002  ;;  %v5522_v42 = vpop.f32.mrf.mxu0 }
 0x35e   : > { %v5917_v47 = vsel %vm5915_vm10, %v11257_v13, %v5914_v1  ;;  %v5632_v15 = vadd.f32 %v5631_v0, %v5519_v17  ;;  %v5942_v19 = vsel %vm5941_vm11, %v10345_v44, %v5940_v18  ;;  %v5933_v16 = vmul.f32 %v7999_v52, %v10342_v32  ;;  %v8005_v56 = vpop.eup %8004  ;;  %v5635_v1 = vpop.f32.mrf.mxu1 }
 0x35f   : > { %v6313_v59 = vpack.c.bf16 %v5917_v47, %v5889_v11  ;;  %8016 = vrsqrt.f32 %v10435_v46  ;;  %v10457_v39 = vadd.f32 %v5765_v38, %v10264_v5  ;;  %v5634_v57 = vadd.f32 %v5633_v8, %v5521_v31  ;;  %v5524_v30 = vpop.f32.mrf.mxu0 }
 0x360   : > { %v5523_v28 = vadd.f32 %v5522_v42, %v10174_v26  ;;  %8018 = vrsqrt.f32 %v10448_v22  ;;  %v5768_v11 = vmul.f32 %v5632_v15, %v5632_v15  ;;  %v11258_v23 = vand.u32 2147483648, %v10345_v44  ;;  %v10466_v35 = vpop.eup %8006  ;;  %v5637_v17 = vpop.f32.mrf.mxu1 }
 0x361   : > { %6727 = vmatprep.mubr.bf16.mxu1 %v6313_v59  ;;  %v5968_v36 = vmul.f32 %v8003_v62, %v10363_v48  ;;  %v5769_v5 = vmul.f32 %v5634_v57, %v5634_v57  ;;  %v5525_v26 = vadd.f32 %v5524_v30, %v10176_v34  ;;  %v5935_v50 = vsel %vm5934_vm13, %v10342_v32, %v5933_v16  ;;  %v5528_v44 = vpop.f32.mrf.mxu0 }
 0x362   : > { %v5945_v52 = vsel %vm5943_vm12, %v11258_v23, %v5942_v19  ;;  %v5636_v0 = vadd.f32 %v5635_v1, %v5523_v28  ;;  %6728 = vmatmul.mubr.bf16.vlgmr.msra.gmra.mxu1 %v6312_v25  ;;  %8020 = vrsqrt.f32 %v10457_v39  ;;  %v10474_v13 = vadd.f32 %v5768_v11, %v10268_v37  ;;  %v8009_v25 = vpop.eup %8008  ;;  %v5641_v62 = vpop.f32.mrf.mxu1 }
 0x363   : > { %v5970_v47 = vsel %vm5969_vm14, %v10363_v48, %v5968_v36  ;;  %v5961_v18 = vmul.f32 %v8005_v56, %v10356_v3  ;;  %v10481_v34 = vadd.f32 %v5769_v5, %v10272_v55  ;;  %v5638_v31 = vadd.f32 %v5637_v17, %v5525_v26  ;;  %v5530_v37 = vpop.f32.mrf.mxu0 }
 0x364   : > { %v5772_v38 = vmul.f32 %v5636_v0, %v5636_v0  ;;  %v5529_v8 = vadd.f32 %v5528_v44, %v10178_v29  ;;  %8022 = vrsqrt.f32 %v10474_v13  ;;  %v5973_v15 = vsel %vm5971_vm15, %v5972_v9, %v5970_v47  ;;  %v10492_v55 = vpop.eup %8010  ;;  %v5643_v16 = vpop.f32.mrf.mxu1 }
 0x365   : > { %v5938_v59 = vsel %vm5936_vm0, %v5937_v2, %v5935_v50  ;;  %vm5962_vm1 = vcmp.eq.f32.partialorder %v10356_v3, inf  ;;  %v5773_v29 = vmul.f32 %v5638_v31, %v5638_v31  ;;  %vm5964_vm2 = vcmp.eq.f32.partialorder %v10356_v3, 0.0  ;;  %v5532_v48 = vpop.f32.mrf.mxu0 }
 0x366   : > { %v10495_v42 = vadd.f32 %v5772_v38, %v10276_v58  ;;  %v5642_v19 = vadd.f32 %v5641_v62, %v5529_v8  ;;  %v5531_v56 = vadd.f32 %v5530_v37, %v10180_v10  ;;  %v6317_v57 = vpack.c.bf16 %v5973_v15, %v5945_v52  ;;  %v8013_v2 = vpop.eup %8012  ;;  %v5645_v11 = vpop.f32.mrf.mxu1 }
 0x367   : > { %v5963_v9 = vsel %vm5962_vm1, %v10356_v3, %v5961_v18  ;;  %v5965_v32 = vand.u32 2147483648, %v10356_v3  ;;  %8024 = vrsqrt.f32 %v10481_v34  ;;  %v10503_v28 = vadd.f32 %v5773_v29, %v10280_v45  ;;  %v5534_v23 = vpop.f32.mrf.mxu0 }
 0x368   : > { %v5776_v58 = vmul.f32 %v5642_v19, %v5642_v19  ;;  %v5533_v1 = vadd.f32 %v5532_v48, %v10182_v60  ;;  %8026 = vrsqrt.f32 %v10495_v42  ;;  %v5644_v30 = vadd.f32 %v5643_v16, %v5531_v56  ;;  %6735 = vmatprep.mubr.bf16.mxu1 %v6317_v57  ;;  %v5647_v0 = vpop.f32.mrf.mxu1 }
 0x369   : > { %v5966_v10 = vsel %vm5964_vm2, %v5965_v32, %v5963_v9  ;;  %v5996_v52 = vmul.f32 %v8009_v25, %v10381_v24  ;;  %vm5997_vm3 = vcmp.eq.f32.partialorder %v10381_v24, inf  ;;  %8028 = vrsqrt.f32 %v10503_v28  ;;  %v5538_v17 = vpop.f32.mrf.mxu0  ;;  %v11259_v9 = vld [vmem:[#allocation36_spill] sm:$0xff] }
 0x36a   : > { %v10509_v3 = vadd.f32 %v5776_v58, %v10284_v27  ;;  %v5646_v36 = vadd.f32 %v5645_v11, %v5533_v1  ;;  %v6316_v5 = vpack.c.bf16 %v5966_v10, %v5938_v59  ;;  %v10512_v45 = vpop.eup %8014  ;;  %v5777_v60 = vmul.f32 %v5644_v30, %v5644_v30  ;;  %v5651_v47 = vpop.f32.mrf.mxu1 }
 0x36b   : > { %v5535_v26 = vadd.f32 %v5534_v23, %v10184_v7  ;;  %v5998_v50 = vsel %vm5997_vm3, %v10381_v24, %v5996_v52  ;;  %v5539_v27 = vadd.f32 %v5538_v17, %v10186_v49  ;;  %vm5999_vm4 = vcmp.eq.f32.partialorder %v10381_v24, 0.0  ;;  %v5540_v31 = vpop.f32.mrf.mxu0 }
 0x36c   : > { %8030 = vrsqrt.f32 %v10509_v3  ;;  %v5780_v44 = vmul.f32 %v5646_v36, %v5646_v36  ;;  %6736 = vmatmul.mubr.bf16.gmra.mxu1 %v6316_v5  ;;  %v10520_v18 = vpop.eup %8016  ;;  %v10523_v25 = vadd.f32 %v5777_v60, %v10291_v4  ;;  %v6000_v7 = vand.u32 2147483648, %v10381_v24  ;;  %v5653_v59 = vpop.f32.mrf.mxu1 }
 0x36d   : > { %v5648_v38 = vadd.f32 %v5647_v0, %v5535_v26  ;;  %v6024_v8 = vmul.f32 %v8013_v2, %v10410_v6  ;;  %v10527_v62 = vpop.eup %8018  ;;  %v5652_v49 = vadd.f32 %v5651_v47, %v5539_v27  ;;  %v5541_v15 = vadd.f32 %v5540_v31, %v10188_v51  ;;  %v5542_v24 = vpop.f32.mrf.mxu0  ;;  %v11261_v31 = vld [vmem:[#allocation38_spill] sm:$0xff] }
 0x36e   : > { %v10530_v37 = vadd.f32 %v5780_v44, %v10296_v33  ;;  %vm6025_vm5 = vcmp.eq.f32.partialorder %v10410_v6, inf  ;;  %8032 = vrsqrt.f32 %v10523_v25  ;;  %v6001_v29 = vsel %vm5999_vm4, %v6000_v7, %v5998_v50  ;;  %v5655_v48 = vpop.f32.mrf.mxu1 }
 0x36f   : > { %v5781_v4 = vmul.f32 %v5648_v38, %v5648_v38  ;;  %v6026_v19 = vsel %vm6025_vm5, %v10410_v6, %v6024_v8  ;;  %v8021_v16 = vpop.eup %8020  ;;  %v5784_v56 = vmul.f32 %v5652_v49, %v5652_v49  ;;  %v5654_v57 = vadd.f32 %v5653_v59, %v5541_v15  ;;  %v5544_v58 = vpop.f32.mrf.mxu0  ;;  %v11262_v8 = vld [vmem:[#allocation39_spill] sm:$0xff] }
 0x370   : > { %vm6027_vm6 = vcmp.eq.f32.partialorder %v10410_v6, 0.0  ;;  %v6028_v33 = vand.u32 2147483648, %v10410_v6  ;;  %8034 = vrsqrt.f32 %v10530_v37  ;;  %v5543_v32 = vadd.f32 %v5542_v24, %v11259_v9  ;;  %v5657_v6 = vpop.f32.mrf.mxu1 }
 0x371   : > { %v10540_v51 = vadd.f32 %v5781_v4, %v10300_v20  ;;  %v5989_v2 = vmul.f32 %v10466_v35, %v10376_v54  ;;  %v10545_v1 = vpop.eup %8022  ;;  %v10548_v11 = vadd.f32 %v5784_v56, %v10306_v53  ;;  %v5785_v30 = vmul.f32 %v5654_v57, %v5654_v57  ;;  %v5548_v36 = vpop.f32.mrf.mxu0 }
 0x372   : > { %v6029_v10 = vsel %vm6027_vm6, %v6028_v33, %v6026_v19  ;;  %vm5990_vm7 = vcmp.eq.f32.partialorder %v10376_v54, inf  ;;  %v5656_v52 = vadd.f32 %v5655_v48, %v5543_v32  ;;  %vm5992_vm8 = vcmp.eq.f32.partialorder %v10376_v54, 0.0  ;;  %v5661_v0 = vpop.f32.mrf.mxu1 }
 0x373   : > { %v6321_v23 = vpack.c.bf16 %v6029_v10, %v6001_v29  ;;  %v5991_v20 = vsel %vm5990_vm7, %v10376_v54, %v5989_v2  ;;  %8036 = vrsqrt.f32 %v10540_v51  ;;  %v10555_v35 = vadd.f32 %v5785_v30, %v10312_v21  ;;  %v5550_v50 = vpop.f32.mrf.mxu0 }
 0x374   : > { %v5993_v53 = vand.u32 2147483648, %v10376_v54  ;;  %v6017_v5 = vmul.f32 %v10492_v55, %v10392_v63  ;;  %v10560_v60 = vpop.eup %8024  ;;  %8038 = vrsqrt.f32 %v10548_v11  ;;  %v5788_v26 = vmul.f32 %v5656_v52, %v5656_v52  ;;  %v11260_v55 = vld [vmem:[#allocation37_spill] sm:$0xff]  ;;  %v5663_v29 = vpop.f32.mrf.mxu1  ;;  %v11264_v52 = vld [vmem:[#allocation40_spill] sm:$0xff] }
 0x375   : > { %6743 = vmatprep.mubr.bf16.mxu1 %v6321_v23  ;;  %vm6018_vm9 = vcmp.eq.f32.partialorder %v10392_v63, inf  ;;  %v6021_v17 = vand.u32 2147483648, %v10392_v63  ;;  %v10565_v44 = vpop.eup %8026  ;;  %vm6020_vm10 = vcmp.eq.f32.partialorder %v10392_v63, 0.0  ;;  %v5545_v27 = vadd.f32 %v5544_v58, %v11260_v55  ;;  %v5552_v48 = vpop.f32.mrf.mxu0  ;;  %v11263_v58 = vld [vmem:[#allocation42_spill] sm:$0xff]  ;;  %v11265_v55 = vld [vmem:[#allocation41_spill] sm:$0xff] }
 0x376   : > { %v5994_v21 = vsel %vm5992_vm8, %v5993_v53, %v5991_v20  ;;  %v6019_v54 = vsel %vm6018_vm9, %v10392_v63, %v6017_v5  ;;  %v10571_v47 = vadd.f32 %v5788_v26, %v10319_v12  ;;  %v5549_v7 = vadd.f32 %v5548_v36, %v11261_v31  ;;  %v10575_v15 = vpop.eup %8028 }
 0x377   : > { %v6022_v38 = vsel %vm6020_vm10, %v6021_v17, %v6019_v54  ;;  %v5551_v49 = vadd.f32 %v5550_v50, %v11262_v8  ;;  %8040 = vrsqrt.f32 %v10555_v35  ;;  %v5658_v4 = vadd.f32 %v5657_v6, %v5545_v27 }
 0x378   : > { %v6320_v59 = vpack.c.bf16 %v6022_v38, %v5994_v21  ;;  %v6052_v63 = vmul.f32 %v10520_v18, %v10435_v46  ;;  %8042 = vrsqrt.f32 %v10571_v47  ;;  %v5662_v12 = vadd.f32 %v5661_v0, %v5549_v7 }
 0x379   : > { %v10580_v19 = vpop.eup %8030  ;;  %v5664_v24 = vadd.f32 %v5663_v29, %v5551_v49  ;;  %vm6053_vm11 = vcmp.eq.f32.partialorder %v10435_v46, inf  ;;  %v5789_v56 = vmul.f32 %v5658_v4, %v5658_v4  ;;  %vm6055_vm12 = vcmp.eq.f32.partialorder %v10435_v46, 0.0 }
 0x37a   : > { %6744 = vmatmul.mubr.bf16.gmra.mxu1 %v6320_v59  ;;  %v6054_v57 = vsel %vm6053_vm11, %v10435_v46, %v6052_v63  ;;  %v6080_v33 = vmul.f32 %v8021_v16, %v10457_v39  ;;  %v5792_v9 = vmul.f32 %v5662_v12, %v5662_v12  ;;  %v6056_v18 = vand.u32 2147483648, %v10435_v46 }
 0x37b   : > { %v5793_v32 = vmul.f32 %v5664_v24, %v5664_v24  ;;  %vm6081_vm13 = vcmp.eq.f32.partialorder %v10457_v39, inf  ;;  %v10589_v2 = vpop.eup %8032  ;;  %v10592_v30 = vadd.f32 %v5789_v56, %v11263_v58  ;;  %vm6083_vm14 = vcmp.eq.f32.partialorder %v10457_v39, 0.0 }
 0x37c   : > { %v6082_v10 = vsel %vm6081_vm13, %v10457_v39, %v6080_v33  ;;  %v6084_v6 = vand.u32 2147483648, %v10457_v39  ;;  %v10598_v16 = vadd.f32 %v5792_v9, %v10330_v43  ;;  %v5553_v20 = vadd.f32 %v5552_v48, %v11264_v52  ;;  %v5665_v39 = vpop.f32.mrf.mxu1  ;;  %v5554_v43 = vpop.f32.mrf.mxu0 }
 0x37d   : > { %v10601_v23 = vadd.f32 %v5793_v32, %v10334_v61  ;;  %v6045_v36 = vmul.f32 %v10512_v45, %v10418_v14  ;;  %v10606_v53 = vpop.eup %8034  ;;  %8044 = vrsqrt.f32 %v10592_v30  ;;  %v6057_v5 = vsel %vm6055_vm12, %v6056_v18, %v6054_v57 }
 0x37e   : > { %v6085_v0 = vsel %vm6083_vm14, %v6084_v6, %v6082_v10  ;;  %vm6046_vm15 = vcmp.eq.f32.partialorder %v10418_v14, inf  ;;  %8046 = vrsqrt.f32 %v10598_v16  ;;  %v5666_v26 = vadd.f32 %v5665_v39, %v5553_v20 }
 0x37f   : > { %v6325_v61 = vpack.c.bf16 %v6085_v0, %v6057_v5  ;;  %v6047_v17 = vsel %vm6046_vm15, %v10418_v14, %v6045_v36  ;;  %8048 = vrsqrt.f32 %v10601_v23  ;;  %vm6048_vm0 = vcmp.eq.f32.partialorder %v10418_v14, 0.0 }
 0x380   : > { %v6049_v45 = vand.u32 2147483648, %v10418_v14  ;;  %v6073_v46 = vmul.f32 %v10527_v62, %v10448_v22  ;;  %v8037_v50 = vpop.eup %8036  ;;  %v5796_v21 = vmul.f32 %v5666_v26, %v5666_v26  ;;  %vm6074_vm1 = vcmp.eq.f32.partialorder %v10448_v22, inf  ;;  %v5667_v14 = vpop.f32.mrf.mxu1 }
 0x381   : > { %6751 = vmatprep.mubr.bf16.mxu1 %v6325_v61  ;;  %v6077_v54 = vand.u32 2147483648, %v10448_v22  ;;  %v5555_v27 = vadd.f32 %v5554_v43, %v11265_v55  ;;  %v10622_v38 = vpop.eup %8038  ;;  %vm6076_vm2 = vcmp.eq.f32.partialorder %v10448_v22, 0.0  ;;  %v6108_v62 = vmul.f32 %v10560_v60, %v10481_v34 }
 0x382   : > { %v6050_v31 = vsel %vm6048_vm0, %v6049_v45, %v6047_v17  ;;  %v6075_v7 = vsel %vm6074_vm1, %v10448_v22, %v6073_v46  ;;  %v10629_v8 = vadd.f32 %v5796_v21, %v10338_v41  ;;  %vm6109_vm3 = vcmp.eq.f32.partialorder %v10481_v34, inf }
 0x383   : > { %v6078_v49 = vsel %vm6076_vm2, %v6077_v54, %v6075_v7  ;;  %v5668_v59 = vadd.f32 %v5667_v14, %v5555_v27  ;;  %v6110_v29 = vsel %vm6109_vm3, %v10481_v34, %v6108_v62  ;;  %vm6111_vm4 = vcmp.eq.f32.partialorder %v10481_v34, 0.0 }
 0x384   : > { %v6324_v4 = vpack.c.bf16 %v6078_v49, %v6050_v31  ;;  %v6136_v63 = vmul.f32 %v10575_v15, %v10503_v28  ;;  %v8041_v22 = vpop.eup %8040  ;;  %8050 = vrsqrt.f32 %v10629_v8  ;;  %v6112_v60 = vand.u32 2147483648, %v10481_v34 }
 0x385   : > { %v5797_v12 = vmul.f32 %v5668_v59, %v5668_v59  ;;  %vm6137_vm5 = vcmp.eq.f32.partialorder %v10503_v28, inf  ;;  %v10639_v41 = vpop.eup %8042  ;;  %vm6139_vm6 = vcmp.eq.f32.partialorder %v10503_v28, 0.0  ;;  %v6140_v56 = vand.u32 2147483648, %v10503_v28 }
 0x386   : > { %6752 = vmatmul.mubr.bf16.gmra.mxu1 %v6324_v4  ;;  %v6138_v24 = vsel %vm6137_vm5, %v10503_v28, %v6136_v63  ;;  %v6101_v15 = vmul.f32 %v10545_v1, %v10474_v13  ;;  %v6113_v33 = vsel %vm6111_vm4, %v6112_v60, %v6110_v29  ;;  %vm6102_vm7 = vcmp.eq.f32.partialorder %v10474_v13, inf }
 0x387   : > { %v10647_v57 = vadd.f32 %v5797_v12, %v10349_v40  ;;  %v6105_v34 = vand.u32 2147483648, %v10474_v13  ;;  %v6141_v48 = vsel %vm6139_vm6, %v6140_v56, %v6138_v24  ;;  %vm6104_vm8 = vcmp.eq.f32.partialorder %v10474_v13, 0.0 }
 0x388   : > { %v6103_v9 = vsel %vm6102_vm7, %v10474_v13, %v6101_v15  ;;  %v6129_v32 = vmul.f32 %v10565_v44, %v10495_v42  ;;  %v6329_v28 = vpack.c.bf16 %v6141_v48, %v6113_v33  ;;  %vm6130_vm9 = vcmp.eq.f32.partialorder %v10495_v42, inf }
 0x389   : > { %8052 = vrsqrt.f32 %v10647_v57  ;;  %v6106_v1 = vsel %vm6104_vm8, %v6105_v34, %v6103_v9  ;;  %vm6132_vm10 = vcmp.eq.f32.partialorder %v10495_v42, 0.0  ;;  %v6133_v18 = vand.u32 2147483648, %v10495_v42 }
 0x38a   : > { %v6131_v40 = vsel %vm6130_vm9, %v10495_v42, %v6129_v32  ;;  %v6164_v58 = vmul.f32 %v10589_v2, %v10523_v25  ;;  %v8045_v10 = vpop.eup %8044  ;;  %6759 = vmatprep.mubr.bf16.mxu1 %v6329_v28  ;;  %vm6165_vm11 = vcmp.eq.f32.partialorder %v10523_v25, inf  ;;  %vm6167_vm12 = vcmp.eq.f32.partialorder %v10523_v25, 0.0 }
 0x38b   : > { %v6168_v13 = vand.u32 2147483648, %v10523_v25  ;;  %v6192_v44 = vmul.f32 %v8037_v50, %v10540_v51  ;;  %v10666_v6 = vpop.eup %8046  ;;  %v6134_v52 = vsel %vm6132_vm10, %v6133_v18, %v6131_v40  ;;  %vm6193_vm13 = vcmp.eq.f32.partialorder %v10540_v51, inf }
 0x38c   : > { %v6166_v20 = vsel %vm6165_vm11, %v10523_v25, %v6164_v58  ;;  %v6196_v42 = vand.u32 2147483648, %v10540_v51  ;;  %v8049_v2 = vpop.eup %8048  ;;  %v6328_v36 = vpack.c.bf16 %v6134_v52, %v6106_v1  ;;  %vm6195_vm14 = vcmp.eq.f32.partialorder %v10540_v51, 0.0 }
 0x38d   : > { %v6194_v5 = vsel %vm6193_vm13, %v10540_v51, %v6192_v44  ;;  %v6157_v0 = vmul.f32 %v10580_v19, %v10509_v3  ;;  %v6169_v39 = vsel %vm6167_vm12, %v6168_v13, %v6166_v20  ;;  %vm6158_vm15 = vcmp.eq.f32.partialorder %v10509_v3, inf }
 0x38e   : > { %v6197_v43 = vsel %vm6195_vm14, %v6196_v42, %v6194_v5  ;;  %6760 = vmatmul.mubr.bf16.gmra.mxu1 %v6328_v36  ;;  %v6161_v26 = vand.u32 2147483648, %v10509_v3  ;;  %v6185_v17 = vmul.f32 %v10606_v53, %v10530_v37  ;;  %vm6160_vm0 = vcmp.eq.f32.partialorder %v10509_v3, 0.0 }
 0x38f   : > { %v6333_v61 = vpack.c.bf16 %v6197_v43, %v6169_v39  ;;  %v6159_v25 = vsel %vm6158_vm15, %v10509_v3, %v6157_v0  ;;  %vm6186_vm1 = vcmp.eq.f32.partialorder %v10530_v37, inf  ;;  %v6189_v51 = vand.u32 2147483648, %v10530_v37 }
 0x390   : > { %v6220_v19 = vmul.f32 %v8041_v22, %v10555_v35  ;;  %v6162_v45 = vsel %vm6160_vm0, %v6161_v26, %v6159_v25  ;;  %v6187_v46 = vsel %vm6186_vm1, %v10530_v37, %v6185_v17  ;;  %vm6188_vm2 = vcmp.eq.f32.partialorder %v10530_v37, 0.0 }
 0x391   : > { %6767 = vmatprep.mubr.bf16.mxu1 %v6333_v61  ;;  %vm6221_vm3 = vcmp.eq.f32.partialorder %v10555_v35, inf  ;;  %v8051_v50 = vpop.eup %8050  ;;  %v6190_v21 = vsel %vm6188_vm2, %v6189_v51, %v6187_v46  ;;  %v6224_v3 = vand.u32 2147483648, %v10555_v35  ;;  %v6248_v54 = vmul.f32 %v8045_v10, %v10592_v30 }
 0x392   : > { %v6222_v53 = vsel %vm6221_vm3, %v10555_v35, %v6220_v19  ;;  %v6332_v55 = vpack.c.bf16 %v6190_v21, %v6162_v45  ;;  %vm6223_vm4 = vcmp.eq.f32.partialorder %v10555_v35, 0.0  ;;  %vm6249_vm5 = vcmp.eq.f32.partialorder %v10592_v30, inf }
 0x393   : > { %v6252_v27 = vand.u32 2147483648, %v10592_v30  ;;  %v6225_v31 = vsel %vm6223_vm4, %v6224_v3, %v6222_v53  ;;  %v6250_v37 = vsel %vm6249_vm5, %v10592_v30, %v6248_v54  ;;  %vm6251_vm6 = vcmp.eq.f32.partialorder %v10592_v30, 0.0 }
 0x394   : > { %v6213_v7 = vmul.f32 %v10622_v38, %v10548_v11  ;;  %vm6214_vm7 = vcmp.eq.f32.partialorder %v10548_v11, inf  ;;  %v6217_v62 = vand.u32 2147483648, %v10548_v11  ;;  %v6241_v35 = vmul.f32 %v10639_v41, %v10571_v47 }
 0x395   : > { %v6253_v14 = vsel %vm6251_vm6, %v6252_v27, %v6250_v37  ;;  %vm6242_vm8 = vcmp.eq.f32.partialorder %v10571_v47, inf  ;;  %v6245_v29 = vand.u32 2147483648, %v10571_v47  ;;  %vm6216_vm9 = vcmp.eq.f32.partialorder %v10548_v11, 0.0 }
 0x396   : > { %v8053_v49 = vpop.eup %8052  ;;  %v6337_v59 = vpack.c.bf16 %v6253_v14, %v6225_v31  ;;  %v6215_v4 = vsel %vm6214_vm7, %v10548_v11, %v6213_v7  ;;  %6768 = vmatmul.mubr.bf16.gmra.mxu1 %v6332_v55  ;;  %v6243_v30 = vsel %vm6242_vm8, %v10571_v47, %v6241_v35  ;;  %vm6244_vm10 = vcmp.eq.f32.partialorder %v10571_v47, 0.0 }
 0x397   : > { %v6276_v38 = vmul.f32 %v8049_v2, %v10601_v23  ;;  %v6218_v63 = vsel %vm6216_vm9, %v6217_v62, %v6215_v4  ;;  %v6246_v22 = vsel %vm6244_vm10, %v6245_v29, %v6243_v30  ;;  %vm6277_vm11 = vcmp.eq.f32.partialorder %v10601_v23, inf }
 0x398   : > { %6775 = vmatprep.mubr.bf16.mxu1 %v6337_v59  ;;  %v6304_v12 = vmul.f32 %v8053_v49, %v10647_v57  ;;  %v6336_v60 = vpack.c.bf16 %v6246_v22, %v6218_v63  ;;  %vm6305_vm12 = vcmp.eq.f32.partialorder %v10647_v57, inf  ;;  %v6280_v11 = vand.u32 2147483648, %v10601_v23 }
 0x399   : > { %v6278_v41 = vsel %vm6277_vm11, %v10601_v23, %v6276_v38  ;;  %v6308_v47 = vand.u32 2147483648, %v10647_v57  ;;  %v6269_v56 = vmul.f32 %v10666_v6, %v10598_v16  ;;  %vm6279_vm13 = vcmp.eq.f32.partialorder %v10601_v23, 0.0 }
 0x39a   : > { %v6306_v24 = vsel %vm6305_vm12, %v10647_v57, %v6304_v12  ;;  %vm6307_vm14 = vcmp.eq.f32.partialorder %v10647_v57, 0.0  ;;  %vm6270_vm15 = vcmp.eq.f32.partialorder %v10598_v16, inf  ;;  %v6297_v15 = vmul.f32 %v8051_v50, %v10629_v8 }
 0x39b   : > { %v6281_v33 = vsel %vm6279_vm13, %v6280_v11, %v6278_v41  ;;  %v6309_v34 = vsel %vm6307_vm14, %v6308_v47, %v6306_v24  ;;  %v6271_v48 = vsel %vm6270_vm15, %v10598_v16, %v6269_v56  ;;  %vm6298_vm0 = vcmp.eq.f32.partialorder %v10629_v8, inf }
 0x39c   : > { %v6341_v9 = vpack.c.bf16 %v6309_v34, %v6281_v33  ;;  %v6273_v32 = vand.u32 2147483648, %v10598_v16  ;;  %v6299_v28 = vsel %vm6298_vm0, %v10629_v8, %v6297_v15  ;;  %v6301_v1 = vand.u32 2147483648, %v10629_v8 }
 0x39d   : > { %vm6272_vm1 = vcmp.eq.f32.partialorder %v10598_v16, 0.0  ;;  %vm6300_vm2 = vcmp.eq.f32.partialorder %v10629_v8, 0.0 }
 0x39e   : > { %6776 = vmatmul.mubr.bf16.gmra.mxu1 %v6336_v60  ;;  %v6274_v23 = vsel %vm6272_vm1, %v6273_v32, %v6271_v48  ;;  %v6302_v57 = vsel %vm6300_vm2, %v6301_v1, %v6299_v28 }
 0x39f   : > { %6783 = vmatprep.mubr.bf16.mxu1 %v6341_v9  ;;  %v6340_v40 = vpack.c.bf16 %v6302_v57, %v6274_v23  ;;  %v7657_v18 = vpop.f32.mrf.mxu0 }
 0x3a1   : > { %v7658_v58 = vpop.f32.mrf.mxu0 }
 0x3a2   : > { %v7659_v43 = vadd.f32 %v7658_v58, %v7657_v18 }
 0x3a3   : > { %v7660_v10 = vpop.f32.mrf.mxu0 }
 0x3a5   : > { %v7661_v13 = vpop.f32.mrf.mxu0 }
 0x3a6   : > { %6784 = vmatmul.mubr.bf16.gmra.mxu1 %v6340_v40  ;;  %v7662_v19 = vadd.f32 %v7661_v13, %v7660_v10 }
 0x3aa   : > { %v7663_v44 = vpop.f32.mrf.mxu0 }
 0x3ac   : > { %v7664_v6 = vpop.f32.mrf.mxu0 }
 0x3ad   : > { %v7665_v55 = vadd.f32 %v7664_v6, %v7663_v44 }
 0x3ae   : > { %v7666_v52 = vpop.f32.mrf.mxu0 }
 0x3b0   : > { %v7667_v20 = vpop.f32.mrf.mxu0 }
 0x3b1   : > { %v7668_v62 = vadd.f32 %v7667_v20, %v7666_v52 }
 0x3b8   : > { %v7669_v42 = vpop.f32.mrf.mxu0 }
 0x3ba   : > { %v7670_v2 = vpop.f32.mrf.mxu0 }
 0x3bb   : > { %v7671_v24 = vadd.f32 %v7670_v2, %v7669_v42 }
 0x3bc   : > { %v7672_v36 = vpop.f32.mrf.mxu0 }
 0x3be   : > { %v7673_v16 = vpop.f32.mrf.mxu0 }
 0x3bf   : > { %v7674_v32 = vadd.f32 %v7673_v16, %v7672_v36 }
 0x3c4   : > { %v10728_v5 = vpop.f32.mrf.mxu0 }
 0x3c6   : > { %v10730_v0 = vpop.f32.mrf.mxu0 }
 0x3c7   : > { %v7677_v42 = vadd.f32 %v10730_v0, %v10728_v5 }
 0x3c8   : > { %v10732_v26 = vpop.f32.mrf.mxu0 }
 0x3ca   : > { %v10734_v50 = vpop.f32.mrf.mxu0 }
 0x3cd   : > { %v10736_v27 = vpop.f32.mrf.mxu0 }
 0x3cf   : > { %v7682_v35 = vpop.f32.mrf.mxu0 }
 0x3d0   : > { %v7683_v0 = vadd.f32 %v7682_v35, %v10736_v27 }
 0x3d1   : > { %v10738_v29 = vpop.f32.mrf.mxu0 }
 0x3d3   : > { %v7685_v12 = vpop.f32.mrf.mxu0 }
 0x3d5   : > { %v7687_v33 = vpop.f32.mrf.mxu0 }
 0x3d7   : > { %v7688_v57 = vpop.f32.mrf.mxu0 }
 0x3d8   : > { %v7689_v35 = vadd.f32 %v7688_v57, %v7687_v33 }
 0x3d9   : > { %v7690_v6 = vpop.f32.mrf.mxu0 }
 0x422   : > { %v7721_v8 = vpop.f32.mrf.mxu1 }
 0x424   : > { %v7722_v39 = vpop.f32.mrf.mxu1 }
 0x425   : > { %v7723_v61 = vadd.f32 %v7722_v39, %v7721_v8  ;;  %v7691_v8 = vpop.f32.mrf.mxu0 }
 0x426   : > { %v7724_v25 = vpop.f32.mrf.mxu1 }
 0x427   : > { %v6730_v17 = vadd.f32 %v7723_v61, %v7659_v43  ;;  %v7680_v61 = vadd.f32 %v10734_v50, %v10732_v26 }
 0x428   : > { %v7725_v51 = vpop.f32.mrf.mxu1 }
 0x429   : > { %v6792_v45 = vmax.f32 %v6730_v17, 1e-05  ;;  %v7726_v46 = vadd.f32 %v7725_v51, %v7724_v25  ;;  %v7693_v51 = vpop.f32.mrf.mxu0 }
 0x42b   : > { %8054 = vlog2.f32 %v6792_v45  ;;  %v6733_v21 = vadd.f32 %v7726_v46, %v7662_v19 }
 0x42c   : > { %v7727_v53 = vpop.f32.mrf.mxu1 }
 0x42d   : > { %v6793_v3 = vmax.f32 %v6733_v21, 1e-05 }
 0x42e   : > { %v7728_v54 = vpop.f32.mrf.mxu1 }
 0x42f   : > { %8056 = vlog2.f32 %v6793_v3  ;;  %v7729_v31 = vadd.f32 %v7728_v54, %v7727_v53  ;;  %v7694_v54 = vpop.f32.mrf.mxu0 }
 0x430   : > { %v7730_v37 = vpop.f32.mrf.mxu1 }
 0x431   : > { %v6738_v7 = vadd.f32 %v7729_v31, %v7665_v55 }
 0x432   : > { %v7731_v14 = vpop.f32.mrf.mxu1 }
 0x433   : > { %v6794_v49 = vmax.f32 %v6738_v7, 1e-05  ;;  %v7732_v59 = vadd.f32 %v7731_v14, %v7730_v37  ;;  %v7686_v14 = vadd.f32 %v7685_v12, %v10738_v29  ;;  %v7692_v29 = vadd.f32 %v7691_v8, %v7690_v6 }
 0x435   : > { %8058 = vlog2.f32 %v6794_v49  ;;  %v6741_v4 = vadd.f32 %v7732_v59, %v7668_v62  ;;  %v7696_v59 = vpop.f32.mrf.mxu0 }
 0x437   : > { %v6795_v30 = vmax.f32 %v6741_v4, 1e-05 }
 0x438   : > { %v8055_v38 = vpop.eup %8054 }
 0x439   : > { %8060 = vlog2.f32 %v6795_v30  ;;  %v6809_v63 = vmul.f32 0.6931472, %v8055_v38 }
 0x43a   : > { %v7733_v22 = vpop.f32.mrf.mxu1 }
 0x43b   : > { %v6840_v60 = vmul.f32 0.4342945, %v6809_v63 }
 0x43c   : > { %v8057_v41 = vpop.eup %8056  ;;  %v7734_v11 = vpop.f32.mrf.mxu1 }
 0x43d   : > { %v7735_v47 = vadd.f32 %v7734_v11, %v7733_v22  ;;  %6856 = vxpose.xlu0.b32.start [1/16] (narrow) %v6840_v60, 80  ;;  %v6811_v56 = vmul.f32 0.6931472, %v8057_v41  ;;  %v7697_v60 = vpop.f32.mrf.mxu0 }
 0x43e   : > { %v7736_v15 = vpop.f32.mrf.mxu1 }
 0x43f   : > { %v6746_v34 = vadd.f32 %v7735_v47, %v7671_v24  ;;  %v6841_v48 = vmul.f32 0.4342945, %v6811_v56 }
 0x440   : > { %v7737_v9 = vpop.f32.mrf.mxu1 }
 0x441   : > { %v6796_v28 = vmax.f32 %v6746_v34, 1e-05  ;;  %v7738_v1 = vadd.f32 %v7737_v9, %v7736_v15  ;;  %6857 = vxpose.xlu0.b32.cont [2/16] (narrow) %v6841_v48, 80  ;;  %v7699_v34 = vpop.f32.mrf.mxu0 }
 0x442   : > { %v8059_v23 = vpop.eup %8058 }
 0x443   : > { %8062 = vlog2.f32 %v6796_v28  ;;  %v6749_v40 = vadd.f32 %v7738_v1, %v7674_v32  ;;  %v6813_v18 = vmul.f32 0.6931472, %v8059_v23  ;;  %v7695_v23 = vadd.f32 %v7694_v54, %v7693_v51 }
 0x445   : > { %v6797_v58 = vmax.f32 %v6749_v40, 1e-05  ;;  %v6842_v10 = vmul.f32 0.4342945, %v6813_v18  ;;  %v7700_v18 = vpop.f32.mrf.mxu0 }
 0x446   : > { %v8061_v13 = vpop.eup %8060  ;;  %v7739_v44 = vpop.f32.mrf.mxu1 }
 0x447   : > { %8064 = vlog2.f32 %v6797_v58  ;;  %6858 = vxpose.xlu0.b32.cont [3/16] (narrow) %v6842_v10, 80  ;;  %v6815_v52 = vmul.f32 0.6931472, %v8061_v13 }
 0x448   : > { %v7740_v20 = vpop.f32.mrf.mxu1 }
 0x449   : > { %v7741_v2 = vadd.f32 %v7740_v20, %v7739_v44  ;;  %v6843_v36 = vmul.f32 0.4342945, %v6815_v52  ;;  %v7698_v52 = vadd.f32 %v7697_v60, %v7696_v59 }
 0x44a   : > { %v7742_v16 = vpop.f32.mrf.mxu1 }
 0x44b   : > { %v6754_v39 = vadd.f32 %v7741_v2, %v7677_v42  ;;  %6859 = vxpose.xlu0.b32.cont [4/16] (narrow) %v6843_v36, 80  ;;  %v7702_v36 = vpop.f32.mrf.mxu0 }
 0x44c   : > { %v7743_v43 = vpop.f32.mrf.mxu1 }
 0x44d   : > { %v6798_v25 = vmax.f32 %v6754_v39, 1e-05  ;;  %v7744_v17 = vadd.f32 %v7743_v43, %v7742_v16 }
 0x44e   : > { %v7745_v45 = vpop.f32.mrf.mxu1 }
 0x44f   : > { %8066 = vlog2.f32 %v6798_v25  ;;  %v6757_v19 = vadd.f32 %v7744_v17, %v7680_v61  ;;  %v7701_v25 = vadd.f32 %v7700_v18, %v7699_v34 }
 0x450   : > { %v8063_v46 = vpop.eup %8062  ;;  %v7746_v53 = vpop.f32.mrf.mxu1 }
 0x451   : > { %v6799_v21 = vmax.f32 %v6757_v19, 1e-05  ;;  %v6817_v5 = vmul.f32 0.6931472, %v8063_v46  ;;  %v7747_v3 = vadd.f32 %v7746_v53, %v7745_v45  ;;  %v7703_v45 = vpop.f32.mrf.mxu0 }
 0x452   : > { %v7748_v55 = vpop.f32.mrf.mxu1 }
 0x453   : > { %8068 = vlog2.f32 %v6799_v21  ;;  %v6844_v31 = vmul.f32 0.4342945, %v6817_v5  ;;  %v6762_v7 = vadd.f32 %v7747_v3, %v7683_v0  ;;  %v7704_v3 = vadd.f32 %v7703_v45, %v7702_v36 }
 0x454   : > { %v8065_v37 = vpop.eup %8064  ;;  %v7749_v26 = vpop.f32.mrf.mxu1 }
 0x455   : > { %6860 = vxpose.xlu0.b32.cont [5/16] (narrow) %v6844_v31, 80  ;;  %v6819_v50 = vmul.f32 0.6931472, %v8065_v37  ;;  %v6800_v62 = vmax.f32 %v6762_v7, 1e-05  ;;  %v7750_v49 = vadd.f32 %v7749_v26, %v7748_v55 }
 0x456   : > { %v7751_v4 = vpop.f32.mrf.mxu1 }
 0x457   : > { %v6845_v30 = vmul.f32 0.4342945, %v6819_v50  ;;  %8070 = vlog2.f32 %v6800_v62  ;;  %v6765_v38 = vadd.f32 %v7750_v49, %v7686_v14 }
 0x458   : > { %v7752_v27 = vpop.f32.mrf.mxu1 }
 0x459   : > { %6861 = vxpose.xlu0.b32.cont [6/16] (narrow) %v6845_v30, 80  ;;  %v6801_v63 = vmax.f32 %v6765_v38, 1e-05  ;;  %v7753_v22 = vadd.f32 %v7752_v27, %v7751_v4 }
 0x45a   : > { %v7754_v41 = vpop.f32.mrf.mxu1 }
 0x45b   : > { %8072 = vlog2.f32 %v6801_v63  ;;  %v6770_v24 = vadd.f32 %v7753_v22, %v7689_v35 }
 0x45c   : > { %v8067_v11 = vpop.eup %8066  ;;  %v7755_v47 = vpop.f32.mrf.mxu1 }
 0x45d   : > { %v6821_v56 = vmul.f32 0.6931472, %v8067_v11  ;;  %v6802_v12 = vmax.f32 %v6770_v24, 1e-05  ;;  %v7756_v15 = vadd.f32 %v7755_v47, %v7754_v41 }
 0x45e   : > { %v7757_v48 = vpop.f32.mrf.mxu1 }
 0x45f   : > { %v6846_v9 = vmul.f32 0.4342945, %v6821_v56  ;;  %8074 = vlog2.f32 %v6802_v12  ;;  %v6773_v28 = vadd.f32 %v7756_v15, %v7692_v29 }
 0x460   : > { %v8069_v32 = vpop.eup %8068  ;;  %v7758_v1 = vpop.f32.mrf.mxu1 }
 0x461   : > { %6862 = vxpose.xlu0.b32.cont [7/16] (narrow) %v6846_v9, 80  ;;  %v6823_v33 = vmul.f32 0.6931472, %v8069_v32  ;;  %v6803_v57 = vmax.f32 %v6773_v28, 1e-05  ;;  %v7759_v40 = vadd.f32 %v7758_v1, %v7757_v48 }
 0x462   : > { %v7760_v58 = vpop.f32.mrf.mxu1 }
 0x463   : > { %v6847_v10 = vmul.f32 0.4342945, %v6823_v33  ;;  %8076 = vlog2.f32 %v6803_v57  ;;  %v6778_v13 = vadd.f32 %v7759_v40, %v7695_v23 }
 0x464   : > { %v8071_v44 = vpop.eup %8070  ;;  %v7761_v6 = vpop.f32.mrf.mxu1 }
 0x465   : > { %6863 = vxpose.xlu0.b32.cont [8/16] (narrow) %v6847_v10, 80  ;;  %v6804_v20 = vmax.f32 %v6778_v13, 1e-05  ;;  %v7762_v42 = vadd.f32 %v7761_v6, %v7760_v58  ;;  %v6825_v2 = vmul.f32 0.6931472, %v8071_v44 }
 0x466   : > { %v7763_v16 = vpop.f32.mrf.mxu1 }
 0x467   : > { %8078 = vlog2.f32 %v6804_v20  ;;  %v6781_v8 = vadd.f32 %v7762_v42, %v7698_v52  ;;  %v6848_v39 = vmul.f32 0.4342945, %v6825_v2 }
 0x468   : > { %v8073_v43 = vpop.eup %8072  ;;  %v7764_v61 = vpop.f32.mrf.mxu1 }
 0x469   : > { %v6805_v17 = vmax.f32 %v6781_v8, 1e-05  ;;  %v7765_v51 = vadd.f32 %v7764_v61, %v7763_v16  ;;  %6864 = vxpose.xlu0.b32.cont [9/16] (narrow) %v6848_v39, 80  ;;  %v6827_v19 = vmul.f32 0.6931472, %v8073_v43 }
 0x46a   : > { %v7766_v46 = vpop.f32.mrf.mxu1 }
 0x46b   : > { %8080 = vlog2.f32 %v6805_v17  ;;  %v6786_v21 = vadd.f32 %v7765_v51, %v7701_v25  ;;  %v6849_v53 = vmul.f32 0.4342945, %v6827_v19 }
 0x46c   : > { %v8075_v5 = vpop.eup %8074  ;;  %v7767_v0 = vpop.f32.mrf.mxu1 }
 0x46d   : > { %v6806_v54 = vmax.f32 %v6786_v21, 1e-05  ;;  %v7768_v55 = vadd.f32 %v7767_v0, %v7766_v46  ;;  %6865 = vxpose.xlu0.b32.cont [10/16] (narrow) %v6849_v53, 80  ;;  %v6829_v31 = vmul.f32 0.6931472, %v8075_v5 }
 0x46f   : > { %8082 = vlog2.f32 %v6806_v54  ;;  %v6789_v37 = vadd.f32 %v7768_v55, %v7704_v3  ;;  %v6850_v7 = vmul.f32 0.4342945, %v6829_v31 }
 0x470   : > { %v8077_v26 = vpop.eup %8076 }
 0x471   : > { %v6807_v50 = vmax.f32 %v6789_v37, 1e-05  ;;  %6866 = vxpose.xlu0.b32.cont [11/16] (narrow) %v6850_v7, 80  ;;  %v6831_v14 = vmul.f32 0.6931472, %v8077_v26 }
 0x473   : > { %8084 = vlog2.f32 %v6807_v50  ;;  %v6851_v62 = vmul.f32 0.4342945, %v6831_v14 }
 0x474   : > { %v8079_v49 = vpop.eup %8078 }
 0x475   : > { %6867 = vxpose.xlu0.b32.cont [12/16] (narrow) %v6851_v62, 80  ;;  %v6833_v59 = vmul.f32 0.6931472, %v8079_v49 }
 0x477   : > { %v6852_v4 = vmul.f32 0.4342945, %v6833_v59 }
 0x478   : > { %v8081_v30 = vpop.eup %8080 }
 0x479   : > { %6868 = vxpose.xlu0.b32.cont [13/16] (narrow) %v6852_v4, 80  ;;  %v6835_v38 = vmul.f32 0.6931472, %v8081_v30 }
 0x47b   : > { %v6853_v27 = vmul.f32 0.4342945, %v6835_v38 }
 0x47c   : > { %v8083_v35 = vpop.eup %8082 }
 0x47d   : > { %6869 = vxpose.xlu0.b32.cont [14/16] (narrow) %v6853_v27, 80  ;;  %v6837_v63 = vmul.f32 0.6931472, %v8083_v35 }
 0x47f   : > { %v6854_v22 = vmul.f32 0.4342945, %v6837_v63 }
 0x480   : > { %v8085_v60 = vpop.eup %8084 }
 0x481   : > { %6870 = vxpose.xlu0.b32.cont [15/16] (narrow) %v6854_v22, 80  ;;  %v6839_v41 = vmul.f32 0.6931472, %v8085_v60 }
 0x483   : > { %v6855_v11 = vmul.f32 0.4342945, %v6839_v41 }
 0x485   : > { %6871 = vxpose.xlu0.b32.end [16/16] (narrow) %v6855_v11, 80 }
 0x4c5   : > { %v6872_v24 = vpop.trf.xlu0 }
 0x4c6   : > { %6888 = vst [vmem:[%s318_s23] sm:$0xff] %v6872_v24 }
 0x4c9   : > { %v6873_v47 = vpop.trf.xlu0 }
 0x4ca   : > { %6889 = vst [vmem:[%s318_s23 + $0x8] sm:$0xff] %v6873_v47 }
 0x4cd   : > { %v6874_v56 = vpop.trf.xlu0 }
 0x4ce   : > { %6890 = vst [vmem:[%s318_s23 + $0x10] sm:$0xff] %v6874_v56 }
 0x4d1   : > { %v6875_v29 = vpop.trf.xlu0 }
 0x4d2   : > { %6891 = vst [vmem:[%s318_s23 + $0x18] sm:$0xff] %v6875_v29 }
 0x4d5   : > { %v6876_v12 = vpop.trf.xlu0 }
 0x4d6   : > { %6892 = vst [vmem:[%s318_s23 + $0x20] sm:$0xff] %v6876_v12 }
 0x4d9   : > { %v6877_v15 = vpop.trf.xlu0 }
 0x4da   : > { %6893 = vst [vmem:[%s318_s23 + $0x28] sm:$0xff] %v6877_v15 }
 0x4dd   : > { %v6878_v34 = vpop.trf.xlu0 }
 0x4de   : > { %6894 = vst [vmem:[%s318_s23 + $0x30] sm:$0xff] %v6878_v34 }
 0x4e1   : > { %v6879_v48 = vpop.trf.xlu0 }
 0x4e2   : > { %6895 = vst [vmem:[%s318_s23 + $0x38] sm:$0xff] %v6879_v48 }
 0x4e5   : > { %v6880_v9 = vpop.trf.xlu0 }
 0x4e6   : > { %6896 = vst [vmem:[%s318_s23 + $0x40] sm:$0xff] %v6880_v9 }
 0x4e9   : > { %v6881_v32 = vpop.trf.xlu0 }
 0x4ea   : > { %6897 = vst [vmem:[%s318_s23 + $0x48] sm:$0xff] %v6881_v32 }
 0x4eb   : > { %8256 = shalt.err (!%p8253_p1)
}
 0x4ec   : > { %s8257_s30 = scalar_lea.hbm %s10753_s8, 1280  ;;  %s8261_s2 = scalar_lea.hbm %s10805_s4, 2560 }
 0x4ed   : > { %p8258_p2 = scmp.ne.s32.totalorder %s10753_s8, %s8257_s30  ;;  %p8262_p13 = scmp.lt.s32.totalorder %s10753_s8, %s10805_s4 }
 0x4ee   : > { %p8263_p0 = scmp.lt.s32.totalorder %s8261_s2, %s8257_s30 }
 0x4ef   : > { %p8259_p6 = pnand %p8258_p2, %p8466_p9 }
 0x4f0   : > { %p8264_p12 = por %p8263_p0, %p8262_p13 }
 0x4f1   : > { %p8260_p8 = pneg %p8259_p6 }
 0x4f3   : > { %p8265_p4 = pnand %p8264_p12, %p8260_p8 }
 0x4f5   : > { %8268 = shalt.err (!%p8265_p4)
}
 0x4f6   : > { %s8348_s3 = smov 128   ;;  %s8349_s25 = smov 8  }
 0x4f7   : > { %7784 = dma.vmem_to_hbm [thread:$0]  (%p8466_p9), %s10748_s11, 1280, %s10753_s8, %s6899_s10, %s8348_s3, %s8348_s3, %s8349_s25  }
 0x4f8 PF: > { %s6928_s22 = sand.u32 1, %s8315_s15   ;;  %p11266_p3 = scmp.ne.s32.totalorder %s10917_s24, 0 }
 0x4f9   : > { %p11267_p7 = scmp.ge.s32.totalorder %s8335_s20, 2  ;;  %s6929_s6 = scalar_lea.sflag [#allocation4], %s6928_s22 }
 0x4fb   : > { %p7801_p11 = pnand %p11267_p7, %p11266_p3 }
 0x4fd   : > { %p7802_p5 = pneg %p7801_p11 }
 0x4ff   : > { %8310 = dma.done.wait (%p7802_p5), %s6929_s6, 1280  }
 0x500   : > { %8312 = vsyncadd (%p7802_p5), %s6929_s6, 4294966016  ;;  %s24_s20 = sadd.s32 1, %s8335_s20   ;;  %s11268_s21 = sld [smem:[#allocation16_spill]] }
 0x501   : > { %p21_p10 = scmp.ge.s32.totalorder %s24_s20, 4   ;;  %s11269_s17 = sld [smem:[#allocation18_spill]] }
 0x502   : > { %s11270_s27 = sld [smem:[#allocation17_spill]]  ;;  %s11271_s15 = smov %s8319_s16 }
 0x503   : > { %s11273_s18 = smov %s8331_s19 }
 0x504   :  { %23 = sbr.rel (!%p21_p10) target bundleno = 13 (0xd), region = 102 }
 0x506   : > { %s11272_s16 = smov %s11268_s21 }
 0x508   : > { %s11274_s19 = smov %s11270_s27 }
 0x509   :  { %6934 = vsyncpa [#allocation3], 1 }
 0x50a   :  { %6936 = vsyncpa [#allocation3 + $0x1], 1 }
 0x50b   :  { %6937 = vsyncpa [#allocation6], 1 }
 0x50c   :  { %6939 = vsyncpa [#allocation6 + $0x1], 1 }
 0x50d   :  { %6940 = vsyncpa [#allocation9], 1 }
 0x50e   :  { %6941 = vsyncpa [#allocation4], 1 }
 0x50f   :  { %6943 = vsyncpa [#allocation4 + $0x1], 1 }

</bundles_post_ra>
